<compile_context>
chip_gen: v6e
topology: v6e:2x2x1
jax: 0.10.0
libtpu: 0.0.40
codegen_flags: <defaults>
</compile_context>

<pallas_src>
import jax
import jax.numpy as jnp
from jax import lax
from jax.experimental import pallas as pl
from jax.experimental.pallas import tpu as pltpu

H_REAL = 100   # LSTM hidden size
IN_REAL = 25   # LSTM input size
IN_PAD = 32    # input features padded to 32 lanes (sublane-friendly, 4x < 128)
HID1 = 64      # first FC hidden
HID2 = 25      # second FC hidden (gf_out width)
PAD = 128      # lane-aligned padded width for hidden/FC tensors
NGATES = 4
NLAYERS = 3
TC_MAX = 32    # hoisted-projection window depth (caps xproj VMEM scratch)

# packed gate slot -> PyTorch gate index.  PyTorch order is [i, f, g, o];
# we pack as [i, f, o, g] so sigmoid covers one contiguous 3*PAD slice.
GATE_PERM = (0, 1, 3, 2)


# ----------------------------- Pallas kernel -------------------------------
def _regression1_kernel(x_ref, wih0_ref, wihr_ref, whh_ref, b_ref,
                        w1_ref, b1_ref, s1_ref, t1_ref,
                        w2_ref, b2_ref, s2_ref, t2_ref,
                        wr_ref, br_ref,
                        lstm_out_ref, gf_ref, rul_ref,
                        xproj_ref, hbuf_ref):
    T, TB, _ = lstm_out_ref.shape
    Hp = PAD
    G = NGATES * Hp
    Tc = xproj_ref.shape[0]
    n_windows = (T + Tc - 1) // Tc          # static

    h_last = jnp.zeros((TB, Hp), jnp.float32)
    for layer in range(NLAYERS):             # static, unrolled layer loop
        whh = whh_ref[layer]                 # (PAD, 4*PAD) hoisted out of the steps
        b = b_ref[layer]                     # (1, 4*PAD)

        carry = (jnp.zeros((TB, Hp), jnp.float32),
                 jnp.zeros((TB, Hp), jnp.float32))

        for w in range(n_windows):           # static window loop
            s0 = w * Tc
            tc = min(Tc, T - s0)

            # Hoisted (off the serial critical path) input projection for this
            # window.  Layer 0 contracts over the narrow 32-lane input; layers
            # 1..2 read the previous layer's hidden states from hbuf, which is
            # safe to overwrite below because the window is captured here.
            if layer == 0:
                x_win = x_ref[pl.ds(s0, tc)].reshape(tc * TB, IN_PAD)
                w_in = wih0_ref[...]
            else:
                x_win = hbuf_ref[pl.ds(s0, tc)].reshape(tc * TB, Hp)
                w_in = wihr_ref[layer - 1]
            xproj_ref[pl.ds(0, tc)] = (
                jnp.dot(x_win, w_in, preferred_element_type=jnp.float32) + b
            ).reshape(tc, TB, G)

            # TODO(synk): make this matmul weight-stationary (push W_hh into MXU
            # staging once per layer) once f32 multi-pass staging is expressible.
            def step(t, carry, _s0=s0, _whh=whh):
                h, c = carry
                gates = (jnp.dot(h, _whh, preferred_element_type=jnp.float32)
                         + xproj_ref[t])
                sig = jax.nn.sigmoid(gates[:, :3 * Hp])   # [i, f, o] in one launch
                i_g = sig[:, 0 * Hp:1 * Hp]
                f_g = sig[:, 1 * Hp:2 * Hp]
                o_g = sig[:, 2 * Hp:3 * Hp]
                g_g = jnp.tanh(gates[:, 3 * Hp:4 * Hp])
                c = f_g * c + i_g * g_g
                h = o_g * jnp.tanh(c)
                hbuf_ref[_s0 + t] = h                     # dense 128-lane store
                return (h, c)

            unroll = True if tc <= 16 else 8
            carry = lax.fori_loop(0, tc, step, carry, unroll=unroll)
        h_last = carry[0]

    # Top layer's hidden states -> output block (only the 100 real lanes).
    lstm_out_ref[...] = hbuf_ref[:, :, :H_REAL]

    # fcRelu2 head on h_T of the top layer (== lstm_out[:, -1, :])
    z1 = jnp.dot(h_last, w1_ref[...], preferred_element_type=jnp.float32) + b1_ref[...]
    z1 = jnp.maximum(z1 * s1_ref[...] + t1_ref[...], 0.0)    # BatchNorm1d(64) eval + ReLU
    z2 = jnp.dot(z1, w2_ref[...], preferred_element_type=jnp.float32) + b2_ref[...]
    z2 = jnp.maximum(z2 * s2_ref[...] + t2_ref[...], 0.0)    # BatchNorm1d(25) eval + ReLU
    gf_ref[...] = z2
    rul_ref[...] = jnp.dot(z2, wr_ref[...],
                           preferred_element_type=jnp.float32) + br_ref[...]


# ------------------------- parameter construction --------------------------
def init_raw_params(key):
    """Deterministic PyTorch-default-style init (uniform +-1/sqrt(fan))."""
    raw = {}
    keys = iter(jax.random.split(key, 32))
    k_lstm = 1.0 / (H_REAL ** 0.5)
    for l in range(NLAYERS):
        in_sz = IN_REAL if l == 0 else H_REAL
        raw[f"w_ih_{l}"] = jax.random.uniform(next(keys), (NGATES * H_REAL, in_sz),
                                              jnp.float32, -k_lstm, k_lstm)
        raw[f"w_hh_{l}"] = jax.random.uniform(next(keys), (NGATES * H_REAL, H_REAL),
                                              jnp.float32, -k_lstm, k_lstm)
        raw[f"b_ih_{l}"] = jax.random.uniform(next(keys), (NGATES * H_REAL,),
                                              jnp.float32, -k_lstm, k_lstm)
        raw[f"b_hh_{l}"] = jax.random.uniform(next(keys), (NGATES * H_REAL,),
                                              jnp.float32, -k_lstm, k_lstm)
    k1 = 1.0 / (H_REAL ** 0.5)
    raw["w1"] = jax.random.uniform(next(keys), (HID1, H_REAL), jnp.float32, -k1, k1)
    raw["b1"] = jax.random.uniform(next(keys), (HID1,), jnp.float32, -k1, k1)
    k2 = 1.0 / (HID1 ** 0.5)
    raw["w2"] = jax.random.uniform(next(keys), (HID2, HID1), jnp.float32, -k2, k2)
    raw["b2"] = jax.random.uniform(next(keys), (HID2,), jnp.float32, -k2, k2)
    kr = 1.0 / (HID2 ** 0.5)
    raw["wr"] = jax.random.uniform(next(keys), (1, HID2), jnp.float32, -kr, kr)
    raw["br"] = jax.random.uniform(next(keys), (1,), jnp.float32, -kr, kr)
    # BatchNorm (eval): running_mean=0, running_var=1, gamma=1, beta=0  -> fold.
    eps = 1e-5
    bn_scale = float(1.0 / jnp.sqrt(1.0 + eps))
    raw["bn1_scale"] = jnp.full((HID1,), bn_scale, jnp.float32)
    raw["bn1_shift"] = jnp.zeros((HID1,), jnp.float32)
    raw["bn2_scale"] = jnp.full((HID2,), bn_scale, jnp.float32)
    raw["bn2_shift"] = jnp.zeros((HID2,), jnp.float32)
    return raw


def _pad_gate_w(w, in_sz, rows):
    # torch (4*H, in) -> (rows, 4*PAD); packed slot s holds PyTorch gate GATE_PERM[s]
    wt = w.T
    out = jnp.zeros((rows, NGATES * PAD), jnp.float32)
    for s, g in enumerate(GATE_PERM):
        out = out.at[:in_sz, s * PAD:s * PAD + H_REAL].set(
            wt[:, g * H_REAL:(g + 1) * H_REAL])
    return out


def _pad_gate_b(b):
    out = jnp.zeros((1, NGATES * PAD), jnp.float32)
    for s, g in enumerate(GATE_PERM):
        out = out.at[0, s * PAD:s * PAD + H_REAL].set(b[g * H_REAL:(g + 1) * H_REAL])
    return out


def pack_params(raw):
    p = {}
    p["wih0"] = _pad_gate_w(raw["w_ih_0"], IN_REAL, IN_PAD)           # (32, 512)
    p["wihr"] = jnp.stack([_pad_gate_w(raw[f"w_ih_{l}"], H_REAL, PAD)
                           for l in range(1, NLAYERS)])               # (2, 128, 512)
    p["whh"] = jnp.stack([_pad_gate_w(raw[f"w_hh_{l}"], H_REAL, PAD)
                          for l in range(NLAYERS)])                   # (3, 128, 512)
    p["b"] = jnp.stack([_pad_gate_b(raw[f"b_ih_{l}"] + raw[f"b_hh_{l}"])
                        for l in range(NLAYERS)])                     # (3, 1, 512)

    def pad_linear(w, b, in_sz, out_sz):
        wp = jnp.zeros((PAD, PAD), jnp.float32).at[:in_sz, :out_sz].set(w.T)
        bp = jnp.zeros((1, PAD), jnp.float32).at[0, :out_sz].set(b)
        return wp, bp

    def pad_bn(scale, shift, n):
        sp = jnp.ones((1, PAD), jnp.float32).at[0, :n].set(scale)
        tp = jnp.zeros((1, PAD), jnp.float32).at[0, :n].set(shift)
        return sp, tp

    p["w1"], p["b1"] = pad_linear(raw["w1"], raw["b1"], H_REAL, HID1)
    p["w2"], p["b2"] = pad_linear(raw["w2"], raw["b2"], HID1, HID2)
    p["wr"], p["br"] = pad_linear(raw["wr"], raw["br"], HID2, 1)
    p["s1"], p["t1"] = pad_bn(raw["bn1_scale"], raw["bn1_shift"], HID1)
    p["s2"], p["t2"] = pad_bn(raw["bn2_scale"], raw["bn2_shift"], HID2)
    return p


# ------------------------------- wrapper ------------------------------------
def _tpu_config():
    """Generation-aware (physical VMEM bytes, dual-TensorCore?) with safe fallbacks."""
    kind = ""
    try:
        kind = jax.devices()[0].device_kind.lower()
    except Exception:
        pass
    vmem_cap = None
    try:
        vmem_cap = int(pltpu.get_tpu_info().vmem_capacity_bytes)
    except Exception:
        vmem_cap = None
    if not vmem_cap or vmem_cap <= 0:
        vmem_cap = (64 << 20) if "v7" in kind else (128 << 20)
    two_cores = "v7" in kind
    return vmem_cap, two_cores


def _choose_tiling(T, B, vmem_cap, two_cores):
    """Largest batch tile whose resident VMEM fits ~60% of physical VMEM."""
    Tc = min(T, TC_MAX)
    b8 = max(8, ((B + 7) // 8) * 8)
    budget = max(int(vmem_cap * 0.6) - (6 << 20), 8 << 20)
    # per batch-row resident f32 bytes (VMEM lane-pads minor dims to 128):
    #   x block (x2 buffers) + lstm_out block (x2) + hbuf scratch + windowed xproj
    per_row = 4 * PAD * (2 * T + 2 * T + T + Tc * NGATES)
    tile = 8
    for cand in (8, 16, 32, 64, 128, 256):
        if cand <= b8 and cand * per_row <= budget:
            tile = cand
    # Dual-TC chips (v7x): guarantee >= 2 grid tiles so "parallel" actually
    # shards the batch across both TensorCores.
    if two_cores and b8 >= 16:
        while tile > 8 and -(-B // tile) < 2:
            tile //= 2
    return tile, Tc


def _full_spec(a):
    nd = a.ndim
    return pl.BlockSpec(tuple(a.shape), lambda b, _nd=nd: (0,) * _nd)


def regression1_forward(x, packed):
    B, T, F = x.shape
    assert F == IN_REAL
    vmem_cap, two_cores = _tpu_config()
    TILE_B, Tc = _choose_tiling(T, B, vmem_cap, two_cores)
    Bp = ((B + TILE_B - 1) // TILE_B) * TILE_B
    num_tiles = Bp // TILE_B

    # Time-major, batch-padded input; features padded only to 32 lanes so this
    # wrapper-side pass writes 4x less HBM than a 128-lane pad.
    # TODO(synk): feed time-major x / consume time-major lstm_out downstream to
    #             remove this transpose and the output swapaxes entirely.
    xp = jnp.zeros((T, Bp, IN_PAD), jnp.float32)
    xp = xp.at[:, :B, :IN_REAL].set(jnp.swapaxes(x, 0, 1).astype(jnp.float32))

    args = (xp, packed["wih0"], packed["wihr"], packed["whh"], packed["b"],
            packed["w1"], packed["b1"], packed["s1"], packed["t1"],
            packed["w2"], packed["b2"], packed["s2"], packed["t2"],
            packed["wr"], packed["br"])
    weight_args = args[1:]

    in_specs = [pl.BlockSpec((T, TILE_B, IN_PAD), lambda b: (0, b, 0))]
    in_specs += [_full_spec(a) for a in weight_args]
    out_specs = (pl.BlockSpec((T, TILE_B, H_REAL), lambda b: (0, b, 0)),
                 pl.BlockSpec((TILE_B, PAD), lambda b: (b, 0)),
                 pl.BlockSpec((TILE_B, PAD), lambda b: (b, 0)))
    out_shapes = (jax.ShapeDtypeStruct((T, Bp, H_REAL), jnp.float32),
                  jax.ShapeDtypeStruct((Bp, PAD), jnp.float32),
                  jax.ShapeDtypeStruct((Bp, PAD), jnp.float32))
    scratch_shapes = [pltpu.VMEM((Tc, TILE_B, NGATES * PAD), jnp.float32),  # windowed x@W_ih
                      pltpu.VMEM((T, TILE_B, PAD), jnp.float32)]            # inter-layer h

    # Explicit VMEM limit: double-buffered blocks + lane-padded VMEM tiles,
    # never requesting more than 85% of the chip's physical VMEM.
    weight_bytes = sum(int(a.size) * 4 for a in weight_args)
    big_blocks = 2 * 2 * (T * TILE_B * PAD * 4)            # x + lstm_out (lane-padded, x2 buffers)
    small_blocks = 2 * 2 * (TILE_B * PAD * 4)
    scratch_bytes = (Tc * TILE_B * NGATES * PAD + T * TILE_B * PAD) * 4
    est = 2 * weight_bytes + big_blocks + small_blocks + scratch_bytes
    vmem_limit = int(min(max(int(est * 1.25), 32 << 20), int(vmem_cap * 0.85)))

    G = NGATES * PAD
    flops = int(2 * T * Bp * G * (IN_PAD + 2 * PAD)        # hoisted x@W_ih projections
                + NLAYERS * 2 * T * Bp * PAD * G           # recurrent h@W_hh
                + 3 * 2 * Bp * PAD * PAD)                  # FC head
    transcendentals = int(NLAYERS * T * Bp * 5 * PAD)      # 3 sigm + 2 tanh per step
    bytes_accessed = int(sum(int(a.size) * 4 for a in args)
                         + (T * Bp * H_REAL + 2 * Bp * PAD) * 4)

    lstm_p, gf_p, rul_p = pl.pallas_call(
        _regression1_kernel,
        out_shape=out_shapes,
        grid_spec=pltpu.PrefetchScalarGridSpec(
            num_scalar_prefetch=0,
            grid=(num_tiles,),
            in_specs=in_specs,
            out_specs=out_specs,
            scratch_shapes=scratch_shapes),
        compiler_params=pltpu.CompilerParams(
            dimension_semantics=("parallel",),
            vmem_limit_bytes=vmem_limit),
        cost_estimate=pl.CostEstimate(flops=flops,
                                      transcendentals=transcendentals,
                                      bytes_accessed=bytes_accessed),
    )(*args)

    lstm_out = jnp.swapaxes(lstm_p, 0, 1)[:B]               # (B, T, 100)
    gf_out = gf_p[:B, :HID2]                                # (B, 25)
    rul = rul_p[:B, :1]                                     # (B, 1)
    return lstm_out, gf_out, rul


# ---------------------------- pure-JAX reference -----------------------------
def reference_forward(x, raw):
    B, T, _ = x.shape
    prec = lax.Precision.HIGHEST
    inp = x
    for l in range(NLAYERS):
        w_ih, w_hh = raw[f"w_ih_{l}"], raw[f"w_hh_{l}"]
        b = raw[f"b_ih_{l}"] + raw[f"b_hh_{l}"]

        def step(carry, xt):
            h, c = carry
            gates = (jnp.dot(xt, w_ih.T, precision=prec)
                     + jnp.dot(h, w_hh.T, precision=prec) + b)
            i, f, g, o = jnp.split(gates, NGATES, axis=-1)
            c = jax.nn.sigmoid(f) * c + jax.nn.sigmoid(i) * jnp.tanh(g)
            h = jax.nn.sigmoid(o) * jnp.tanh(c)
            return (h, c), h

        carry0 = (jnp.zeros((B, H_REAL), jnp.float32),
                  jnp.zeros((B, H_REAL), jnp.float32))
        _, ys = lax.scan(step, carry0, jnp.swapaxes(inp, 0, 1))
        inp = jnp.swapaxes(ys, 0, 1)
    lstm_out = inp
    z = lstm_out[:, -1, :]
    z = jnp.dot(z, raw["w1"].T, precision=prec) + raw["b1"]
    z = jnp.maximum(z * raw["bn1_scale"] + raw["bn1_shift"], 0.0)
    z = jnp.dot(z, raw["w2"].T, precision=prec) + raw["b2"]
    z = jnp.maximum(z * raw["bn2_scale"] + raw["bn2_shift"], 0.0)
    gf = z
    rul = jnp.dot(gf, raw["wr"].T, precision=prec) + raw["br"]
    return lstm_out, gf, rul


# --------------------------------- main --------------------------------------
if __name__ == "__main__":
    key = jax.random.PRNGKey(0)
    kp, kx = jax.random.split(key)
    B, T = 2, 8
    x = jax.random.normal(kx, (B, T, IN_REAL), jnp.float32)

    raw = init_raw_params(kp)
    packed = pack_params(raw)

    lstm_out, gf_out, rul = regression1_forward(x, packed)
    jax.block_until_ready((lstm_out, gf_out, rul))

    assert lstm_out.shape == (B, T, H_REAL)
    assert gf_out.shape == (B, HID2)
    assert rul.shape == (B, 1)

    ref_lstm, ref_gf, ref_rul = reference_forward(x, raw)
    ok = (bool(jnp.allclose(lstm_out, ref_lstm, atol=5e-3, rtol=5e-3)) and
          bool(jnp.allclose(gf_out, ref_gf, atol=5e-3, rtol=5e-3)) and
          bool(jnp.allclose(rul, ref_rul, atol=5e-3, rtol=5e-3)))
    if not ok:
        raise RuntimeError("Pallas kernel does not match pure-JAX reference")
    print("KERNEL_OK")
</pallas_src>

<mosaic_0001>
module attributes {stable_mosaic.version = 11 : i64} {
  func.func @_regression1_kernel(%arg0: i32, %arg1: memref<8x8x32xf32, #tpu.memory_space<vmem>>, %arg2: memref<32x512xf32, #tpu.memory_space<vmem>>, %arg3: memref<2x128x512xf32, #tpu.memory_space<vmem>>, %arg4: memref<3x128x512xf32, #tpu.memory_space<vmem>>, %arg5: memref<3x1x512xf32, #tpu.memory_space<vmem>>, %arg6: memref<128x128xf32, #tpu.memory_space<vmem>>, %arg7: memref<1x128xf32, #tpu.memory_space<vmem>>, %arg8: memref<1x128xf32, #tpu.memory_space<vmem>>, %arg9: memref<1x128xf32, #tpu.memory_space<vmem>>, %arg10: memref<128x128xf32, #tpu.memory_space<vmem>>, %arg11: memref<1x128xf32, #tpu.memory_space<vmem>>, %arg12: memref<1x128xf32, #tpu.memory_space<vmem>>, %arg13: memref<1x128xf32, #tpu.memory_space<vmem>>, %arg14: memref<128x128xf32, #tpu.memory_space<vmem>>, %arg15: memref<1x128xf32, #tpu.memory_space<vmem>>, %arg16: memref<8x8x100xf32, #tpu.memory_space<vmem>>, %arg17: memref<8x128xf32, #tpu.memory_space<vmem>>, %arg18: memref<8x128xf32, #tpu.memory_space<vmem>>, %arg19: memref<8x8x512xf32, #tpu.memory_space<vmem>>, %arg20: memref<8x8x128xf32, #tpu.memory_space<vmem>>) attributes {dimension_semantics = [#tpu.dimension_semantics<parallel>], iteration_bounds = array<i64: 1>, scalar_prefetch = 0 : i64, scratch_operands = 2 : i64, tpu.core_type = #tpu.core_type<tc>, window_params = [{transform_indices = @transform_0, window_bounds = array<i64: 8, 8, 32>}, {pipeline_mode = #tpu.pipeline_mode<synchronous>, transform_indices = @transform_1, window_bounds = array<i64: 32, 512>}, {pipeline_mode = #tpu.pipeline_mode<synchronous>, transform_indices = @transform_2, window_bounds = array<i64: 2, 128, 512>}, {pipeline_mode = #tpu.pipeline_mode<synchronous>, transform_indices = @transform_3, window_bounds = array<i64: 3, 128, 512>}, {pipeline_mode = #tpu.pipeline_mode<synchronous>, transform_indices = @transform_4, window_bounds = array<i64: 3, 1, 512>}, {pipeline_mode = #tpu.pipeline_mode<synchronous>, transform_indices = @transform_5, window_bounds = array<i64: 128, 128>}, {pipeline_mode = #tpu.pipeline_mode<synchronous>, transform_indices = @transform_6, window_bounds = array<i64: 1, 128>}, {pipeline_mode = #tpu.pipeline_mode<synchronous>, transform_indices = @transform_7, window_bounds = array<i64: 1, 128>}, {pipeline_mode = #tpu.pipeline_mode<synchronous>, transform_indices = @transform_8, window_bounds = array<i64: 1, 128>}, {pipeline_mode = #tpu.pipeline_mode<synchronous>, transform_indices = @transform_9, window_bounds = array<i64: 128, 128>}, {pipeline_mode = #tpu.pipeline_mode<synchronous>, transform_indices = @transform_10, window_bounds = array<i64: 1, 128>}, {pipeline_mode = #tpu.pipeline_mode<synchronous>, transform_indices = @transform_11, window_bounds = array<i64: 1, 128>}, {pipeline_mode = #tpu.pipeline_mode<synchronous>, transform_indices = @transform_12, window_bounds = array<i64: 1, 128>}, {pipeline_mode = #tpu.pipeline_mode<synchronous>, transform_indices = @transform_13, window_bounds = array<i64: 128, 128>}, {pipeline_mode = #tpu.pipeline_mode<synchronous>, transform_indices = @transform_14, window_bounds = array<i64: 1, 128>}, {transform_indices = @transform_15, window_bounds = array<i64: 8, 8, 100>}, {transform_indices = @transform_16, window_bounds = array<i64: 8, 128>}, {transform_indices = @transform_17, window_bounds = array<i64: 8, 128>}]} {
    %c0 = arith.constant 0 : index
    %c0_0 = arith.constant 0 : index
    %c0_1 = arith.constant 0 : index
    %0 = vector.load %arg4[%c0, %c0_0, %c0_1] : memref<3x128x512xf32, #tpu.memory_space<vmem>>, vector<1x128x512xf32>
    %1 = vector.shape_cast %0 : vector<1x128x512xf32> to vector<128x512xf32>
    %c0_2 = arith.constant 0 : index
    %c0_3 = arith.constant 0 : index
    %c0_4 = arith.constant 0 : index
    %2 = vector.load %arg5[%c0_2, %c0_3, %c0_4] : memref<3x1x512xf32, #tpu.memory_space<vmem>>, vector<1x1x512xf32>
    %3 = vector.shape_cast %2 : vector<1x1x512xf32> to vector<1x512xf32>
    %cst = arith.constant 0.000000e+00 : f32
    %4 = vector.broadcast %cst : f32 to vector<8x128xf32>
    %cst_5 = arith.constant 0.000000e+00 : f32
    %5 = vector.broadcast %cst_5 : f32 to vector<8x128xf32>
    %c0_6 = arith.constant 0 : index
    %c0_7 = arith.constant 0 : index
    %c0_8 = arith.constant 0 : index
    %6 = vector.load %arg1[%c0_6, %c0_7, %c0_8] : memref<8x8x32xf32, #tpu.memory_space<vmem>>, vector<8x8x32xf32>
    %7 = vector.shape_cast %6 : vector<8x8x32xf32> to vector<64x32xf32>
    %c0_9 = arith.constant 0 : index
    %c0_10 = arith.constant 0 : index
    %8 = vector.load %arg2[%c0_9, %c0_10] : memref<32x512xf32, #tpu.memory_space<vmem>>, vector<32x512xf32>
    %cst_11 = arith.constant dense<0.000000e+00> : vector<64x512xf32>
    %9 = tpu.matmul %7, %8, %cst_11 {dimension_numbers = #tpu.dot_dimension_numbers<[1], [0], [0], [1], [0, 0, 1, 1], [], []>} : vector<64x32xf32>, vector<32x512xf32>, vector<64x512xf32> -> vector<64x512xf32>
    %10 = vector.broadcast %3 : vector<1x512xf32> to vector<64x512xf32>
    %11 = arith.addf %9, %10 : vector<64x512xf32>
    %12 = vector.shape_cast %11 : vector<64x512xf32> to vector<8x8x512xf32>
    %c0_12 = arith.constant 0 : index
    %c0_13 = arith.constant 0 : index
    %c0_14 = arith.constant 0 : index
    %13 = vector.load %arg19[%c0_12, %c0_13, %c0_14] : memref<8x8x512xf32, #tpu.memory_space<vmem>>, vector<8x8x512xf32>
    tpu.vector_store %arg19[%c0_12, %c0_13, %c0_14], %12 {strides = array<i32>} : memref<8x8x512xf32, #tpu.memory_space<vmem>>, vector<8x8x512xf32>,
    %c0_i32 = arith.constant 0 : i32
    %cst_15 = arith.constant dense<0.000000e+00> : vector<8x512xf32>
    %14 = tpu.matmul %4, %1, %cst_15 {dimension_numbers = #tpu.dot_dimension_numbers<[1], [0], [0], [1], [0, 0, 1, 1], [], []>} : vector<8x128xf32>, vector<128x512xf32>, vector<8x512xf32> -> vector<8x512xf32>
    %15 = arith.index_cast %c0_i32 : i32 to index
    %c0_16 = arith.constant 0 : index
    %c0_17 = arith.constant 0 : index
    %16 = vector.load %arg19[%15, %c0_16, %c0_17] : memref<8x8x512xf32, #tpu.memory_space<vmem>>, vector<1x8x512xf32>
    %17 = vector.shape_cast %16 : vector<1x8x512xf32> to vector<8x512xf32>
    %18 = arith.addf %14, %17 : vector<8x512xf32>
    %19 = vector.extract_strided_slice %18 {offsets = [0, 0], sizes = [8, 384], strides = [1, 1]} : vector<8x512xf32> to vector<8x384xf32>
    %20 = arith.negf %19 : vector<8x384xf32>
    %21 = math.exp %20 : vector<8x384xf32>
    %cst_18 = arith.constant 1.000000e+00 : f32
    %22 = vector.broadcast %cst_18 : f32 to vector<8x384xf32>
    %23 = arith.addf %22, %21 : vector<8x384xf32>
    %24 = arith.divf %22, %23 : vector<8x384xf32>
    %25 = vector.extract_strided_slice %24 {offsets = [0, 0], sizes = [8, 128], strides = [1, 1]} : vector<8x384xf32> to vector<8x128xf32>
    %26 = vector.extract_strided_slice %24 {offsets = [0, 128], sizes = [8, 128], strides = [1, 1]} : vector<8x384xf32> to vector<8x128xf32>
    %27 = vector.extract_strided_slice %24 {offsets = [0, 256], sizes = [8, 128], strides = [1, 1]} : vector<8x384xf32> to vector<8x128xf32>
    %28 = vector.extract_strided_slice %18 {offsets = [0, 384], sizes = [8, 128], strides = [1, 1]} : vector<8x512xf32> to vector<8x128xf32>
    %29 = math.tanh %28 : vector<8x128xf32>
    %30 = arith.mulf %26, %5 : vector<8x128xf32>
    %31 = arith.mulf %25, %29 : vector<8x128xf32>
    %32 = arith.addf %30, %31 : vector<8x128xf32>
    %33 = math.tanh %32 : vector<8x128xf32>
    %34 = arith.mulf %27, %33 : vector<8x128xf32>
    %c0_i32_19 = arith.constant 0 : i32
    %35 = arith.addi %c0_i32_19, %c0_i32 : i32
    %36 = arith.index_cast %35 : i32 to index
    %c0_20 = arith.constant 0 : index
    %c0_21 = arith.constant 0 : index
    %37 = vector.load %arg20[%36, %c0_20, %c0_21] : memref<8x8x128xf32, #tpu.memory_space<vmem>>, vector<1x8x128xf32>
    %38 = vector.shape_cast %37 : vector<1x8x128xf32> to vector<8x128xf32>
    %39 = vector.shape_cast %34 : vector<8x128xf32> to vector<1x8x128xf32>
    tpu.vector_store %arg20[%36, %c0_20, %c0_21], %39 {strides = array<i32>} : memref<8x8x128xf32, #tpu.memory_space<vmem>>, vector<1x8x128xf32>,
    %c1_i32 = arith.constant 1 : i32
    %cst_22 = arith.constant dense<0.000000e+00> : vector<8x512xf32>
    %40 = tpu.matmul %34, %1, %cst_22 {dimension_numbers = #tpu.dot_dimension_numbers<[1], [0], [0], [1], [0, 0, 1, 1], [], []>} : vector<8x128xf32>, vector<128x512xf32>, vector<8x512xf32> -> vector<8x512xf32>
    %41 = arith.index_cast %c1_i32 : i32 to index
    %c0_23 = arith.constant 0 : index
    %c0_24 = arith.constant 0 : index
    %42 = vector.load %arg19[%41, %c0_23, %c0_24] : memref<8x8x512xf32, #tpu.memory_space<vmem>>, vector<1x8x512xf32>
    %43 = vector.shape_cast %42 : vector<1x8x512xf32> to vector<8x512xf32>
    %44 = arith.addf %40, %43 : vector<8x512xf32>
    %45 = vector.extract_strided_slice %44 {offsets = [0, 0], sizes = [8, 384], strides = [1, 1]} : vector<8x512xf32> to vector<8x384xf32>
    %46 = arith.negf %45 : vector<8x384xf32>
    %47 = math.exp %46 : vector<8x384xf32>
    %cst_25 = arith.constant 1.000000e+00 : f32
    %48 = vector.broadcast %cst_25 : f32 to vector<8x384xf32>
    %49 = arith.addf %48, %47 : vector<8x384xf32>
    %50 = arith.divf %48, %49 : vector<8x384xf32>
    %51 = vector.extract_strided_slice %50 {offsets = [0, 0], sizes = [8, 128], strides = [1, 1]} : vector<8x384xf32> to vector<8x128xf32>
    %52 = vector.extract_strided_slice %50 {offsets = [0, 128], sizes = [8, 128], strides = [1, 1]} : vector<8x384xf32> to vector<8x128xf32>
    %53 = vector.extract_strided_slice %50 {offsets = [0, 256], sizes = [8, 128], strides = [1, 1]} : vector<8x384xf32> to vector<8x128xf32>
    %54 = vector.extract_strided_slice %44 {offsets = [0, 384], sizes = [8, 128], strides = [1, 1]} : vector<8x512xf32> to vector<8x128xf32>
    %55 = math.tanh %54 : vector<8x128xf32>
    %56 = arith.mulf %52, %32 : vector<8x128xf32>
    %57 = arith.mulf %51, %55 : vector<8x128xf32>
    %58 = arith.addf %56, %57 : vector<8x128xf32>
    %59 = math.tanh %58 : vector<8x128xf32>
    %60 = arith.mulf %53, %59 : vector<8x128xf32>
    %c0_i32_26 = arith.constant 0 : i32
    %61 = arith.addi %c0_i32_26, %c1_i32 : i32
    %62 = arith.index_cast %61 : i32 to index
    %c0_27 = arith.constant 0 : index
    %c0_28 = arith.constant 0 : index
    %63 = vector.load %arg20[%62, %c0_27, %c0_28] : memref<8x8x128xf32, #tpu.memory_space<vmem>>, vector<1x8x128xf32>
    %64 = vector.shape_cast %63 : vector<1x8x128xf32> to vector<8x128xf32>
    %65 = vector.shape_cast %60 : vector<8x128xf32> to vector<1x8x128xf32>
    tpu.vector_store %arg20[%62, %c0_27, %c0_28], %65 {strides = array<i32>} : memref<8x8x128xf32, #tpu.memory_space<vmem>>, vector<1x8x128xf32>,
    %c2_i32 = arith.constant 2 : i32
    %cst_29 = arith.constant dense<0.000000e+00> : vector<8x512xf32>
    %66 = tpu.matmul %60, %1, %cst_29 {dimension_numbers = #tpu.dot_dimension_numbers<[1], [0], [0], [1], [0, 0, 1, 1], [], []>} : vector<8x128xf32>, vector<128x512xf32>, vector<8x512xf32> -> vector<8x512xf32>
    %67 = arith.index_cast %c2_i32 : i32 to index
    %c0_30 = arith.constant 0 : index
    %c0_31 = arith.constant 0 : index
    %68 = vector.load %arg19[%67, %c0_30, %c0_31] : memref<8x8x512xf32, #tpu.memory_space<vmem>>, vector<1x8x512xf32>
    %69 = vector.shape_cast %68 : vector<1x8x512xf32> to vector<8x512xf32>
    %70 = arith.addf %66, %69 : vector<8x512xf32>
    %71 = vector.extract_strided_slice %70 {offsets = [0, 0], sizes = [8, 384], strides = [1, 1]} : vector<8x512xf32> to vector<8x384xf32>
    %72 = arith.negf %71 : vector<8x384xf32>
    %73 = math.exp %72 : vector<8x384xf32>
    %cst_32 = arith.constant 1.000000e+00 : f32
    %74 = vector.broadcast %cst_32 : f32 to vector<8x384xf32>
    %75 = arith.addf %74, %73 : vector<8x384xf32>
    %76 = arith.divf %74, %75 : vector<8x384xf32>
    %77 = vector.extract_strided_slice %76 {offsets = [0, 0], sizes = [8, 128], strides = [1, 1]} : vector<8x384xf32> to vector<8x128xf32>
    %78 = vector.extract_strided_slice %76 {offsets = [0, 128], sizes = [8, 128], strides = [1, 1]} : vector<8x384xf32> to vector<8x128xf32>
    %79 = vector.extract_strided_slice %76 {offsets = [0, 256], sizes = [8, 128], strides = [1, 1]} : vector<8x384xf32> to vector<8x128xf32>
    %80 = vector.extract_strided_slice %70 {offsets = [0, 384], sizes = [8, 128], strides = [1, 1]} : vector<8x512xf32> to vector<8x128xf32>
    %81 = math.tanh %80 : vector<8x128xf32>
    %82 = arith.mulf %78, %58 : vector<8x128xf32>
    %83 = arith.mulf %77, %81 : vector<8x128xf32>
    %84 = arith.addf %82, %83 : vector<8x128xf32>
    %85 = math.tanh %84 : vector<8x128xf32>
    %86 = arith.mulf %79, %85 : vector<8x128xf32>
    %c0_i32_33 = arith.constant 0 : i32
    %87 = arith.addi %c0_i32_33, %c2_i32 : i32
    %88 = arith.index_cast %87 : i32 to index
    %c0_34 = arith.constant 0 : index
    %c0_35 = arith.constant 0 : index
    %89 = vector.load %arg20[%88, %c0_34, %c0_35] : memref<8x8x128xf32, #tpu.memory_space<vmem>>, vector<1x8x128xf32>
    %90 = vector.shape_cast %89 : vector<1x8x128xf32> to vector<8x128xf32>
    %91 = vector.shape_cast %86 : vector<8x128xf32> to vector<1x8x128xf32>
    tpu.vector_store %arg20[%88, %c0_34, %c0_35], %91 {strides = array<i32>} : memref<8x8x128xf32, #tpu.memory_space<vmem>>, vector<1x8x128xf32>,
    %c3_i32 = arith.constant 3 : i32
    %cst_36 = arith.constant dense<0.000000e+00> : vector<8x512xf32>
    %92 = tpu.matmul %86, %1, %cst_36 {dimension_numbers = #tpu.dot_dimension_numbers<[1], [0], [0], [1], [0, 0, 1, 1], [], []>} : vector<8x128xf32>, vector<128x512xf32>, vector<8x512xf32> -> vector<8x512xf32>
    %93 = arith.index_cast %c3_i32 : i32 to index
    %c0_37 = arith.constant 0 : index
    %c0_38 = arith.constant 0 : index
    %94 = vector.load %arg19[%93, %c0_37, %c0_38] : memref<8x8x512xf32, #tpu.memory_space<vmem>>, vector<1x8x512xf32>
    %95 = vector.shape_cast %94 : vector<1x8x512xf32> to vector<8x512xf32>
    %96 = arith.addf %92, %95 : vector<8x512xf32>
    %97 = vector.extract_strided_slice %96 {offsets = [0, 0], sizes = [8, 384], strides = [1, 1]} : vector<8x512xf32> to vector<8x384xf32>
    %98 = arith.negf %97 : vector<8x384xf32>
    %99 = math.exp %98 : vector<8x384xf32>
    %cst_39 = arith.constant 1.000000e+00 : f32
    %100 = vector.broadcast %cst_39 : f32 to vector<8x384xf32>
    %101 = arith.addf %100, %99 : vector<8x384xf32>
    %102 = arith.divf %100, %101 : vector<8x384xf32>
    %103 = vector.extract_strided_slice %102 {offsets = [0, 0], sizes = [8, 128], strides = [1, 1]} : vector<8x384xf32> to vector<8x128xf32>
    %104 = vector.extract_strided_slice %102 {offsets = [0, 128], sizes = [8, 128], strides = [1, 1]} : vector<8x384xf32> to vector<8x128xf32>
    %105 = vector.extract_strided_slice %102 {offsets = [0, 256], sizes = [8, 128], strides = [1, 1]} : vector<8x384xf32> to vector<8x128xf32>
    %106 = vector.extract_strided_slice %96 {offsets = [0, 384], sizes = [8, 128], strides = [1, 1]} : vector<8x512xf32> to vector<8x128xf32>
    %107 = math.tanh %106 : vector<8x128xf32>
    %108 = arith.mulf %104, %84 : vector<8x128xf32>
    %109 = arith.mulf %103, %107 : vector<8x128xf32>
    %110 = arith.addf %108, %109 : vector<8x128xf32>
    %111 = math.tanh %110 : vector<8x128xf32>
    %112 = arith.mulf %105, %111 : vector<8x128xf32>
    %c0_i32_40 = arith.constant 0 : i32
    %113 = arith.addi %c0_i32_40, %c3_i32 : i32
    %114 = arith.index_cast %113 : i32 to index
    %c0_41 = arith.constant 0 : index
    %c0_42 = arith.constant 0 : index
    %115 = vector.load %arg20[%114, %c0_41, %c0_42] : memref<8x8x128xf32, #tpu.memory_space<vmem>>, vector<1x8x128xf32>
    %116 = vector.shape_cast %115 : vector<1x8x128xf32> to vector<8x128xf32>
    %117 = vector.shape_cast %112 : vector<8x128xf32> to vector<1x8x128xf32>
    tpu.vector_store %arg20[%114, %c0_41, %c0_42], %117 {strides = array<i32>} : memref<8x8x128xf32, #tpu.memory_space<vmem>>, vector<1x8x128xf32>,
    %c4_i32 = arith.constant 4 : i32
    %cst_43 = arith.constant dense<0.000000e+00> : vector<8x512xf32>
    %118 = tpu.matmul %112, %1, %cst_43 {dimension_numbers = #tpu.dot_dimension_numbers<[1], [0], [0], [1], [0, 0, 1, 1], [], []>} : vector<8x128xf32>, vector<128x512xf32>, vector<8x512xf32> -> vector<8x512xf32>
    %119 = arith.index_cast %c4_i32 : i32 to index
    %c0_44 = arith.constant 0 : index
    %c0_45 = arith.constant 0 : index
    %120 = vector.load %arg19[%119, %c0_44, %c0_45] : memref<8x8x512xf32, #tpu.memory_space<vmem>>, vector<1x8x512xf32>
    %121 = vector.shape_cast %120 : vector<1x8x512xf32> to vector<8x512xf32>
    %122 = arith.addf %118, %121 : vector<8x512xf32>
    %123 = vector.extract_strided_slice %122 {offsets = [0, 0], sizes = [8, 384], strides = [1, 1]} : vector<8x512xf32> to vector<8x384xf32>
    %124 = arith.negf %123 : vector<8x384xf32>
    %125 = math.exp %124 : vector<8x384xf32>
    %cst_46 = arith.constant 1.000000e+00 : f32
    %126 = vector.broadcast %cst_46 : f32 to vector<8x384xf32>
    %127 = arith.addf %126, %125 : vector<8x384xf32>
    %128 = arith.divf %126, %127 : vector<8x384xf32>
    %129 = vector.extract_strided_slice %128 {offsets = [0, 0], sizes = [8, 128], strides = [1, 1]} : vector<8x384xf32> to vector<8x128xf32>
    %130 = vector.extract_strided_slice %128 {offsets = [0, 128], sizes = [8, 128], strides = [1, 1]} : vector<8x384xf32> to vector<8x128xf32>
    %131 = vector.extract_strided_slice %128 {offsets = [0, 256], sizes = [8, 128], strides = [1, 1]} : vector<8x384xf32> to vector<8x128xf32>
    %132 = vector.extract_strided_slice %122 {offsets = [0, 384], sizes = [8, 128], strides = [1, 1]} : vector<8x512xf32> to vector<8x128xf32>
    %133 = math.tanh %132 : vector<8x128xf32>
    %134 = arith.mulf %130, %110 : vector<8x128xf32>
    %135 = arith.mulf %129, %133 : vector<8x128xf32>
    %136 = arith.addf %134, %135 : vector<8x128xf32>
    %137 = math.tanh %136 : vector<8x128xf32>
    %138 = arith.mulf %131, %137 : vector<8x128xf32>
    %c0_i32_47 = arith.constant 0 : i32
    %139 = arith.addi %c0_i32_47, %c4_i32 : i32
    %140 = arith.index_cast %139 : i32 to index
    %c0_48 = arith.constant 0 : index
    %c0_49 = arith.constant 0 : index
    %141 = vector.load %arg20[%140, %c0_48, %c0_49] : memref<8x8x128xf32, #tpu.memory_space<vmem>>, vector<1x8x128xf32>
    %142 = vector.shape_cast %141 : vector<1x8x128xf32> to vector<8x128xf32>
    %143 = vector.shape_cast %138 : vector<8x128xf32> to vector<1x8x128xf32>
    tpu.vector_store %arg20[%140, %c0_48, %c0_49], %143 {strides = array<i32>} : memref<8x8x128xf32, #tpu.memory_space<vmem>>, vector<1x8x128xf32>,
    %c5_i32 = arith.constant 5 : i32
    %cst_50 = arith.constant dense<0.000000e+00> : vector<8x512xf32>
    %144 = tpu.matmul %138, %1, %cst_50 {dimension_numbers = #tpu.dot_dimension_numbers<[1], [0], [0], [1], [0, 0, 1, 1], [], []>} : vector<8x128xf32>, vector<128x512xf32>, vector<8x512xf32> -> vector<8x512xf32>
    %145 = arith.index_cast %c5_i32 : i32 to index
    %c0_51 = arith.constant 0 : index
    %c0_52 = arith.constant 0 : index
    %146 = vector.load %arg19[%145, %c0_51, %c0_52] : memref<8x8x512xf32, #tpu.memory_space<vmem>>, vector<1x8x512xf32>
    %147 = vector.shape_cast %146 : vector<1x8x512xf32> to vector<8x512xf32>
    %148 = arith.addf %144, %147 : vector<8x512xf32>
    %149 = vector.extract_strided_slice %148 {offsets = [0, 0], sizes = [8, 384], strides = [1, 1]} : vector<8x512xf32> to vector<8x384xf32>
    %150 = arith.negf %149 : vector<8x384xf32>
    %151 = math.exp %150 : vector<8x384xf32>
    %cst_53 = arith.constant 1.000000e+00 : f32
    %152 = vector.broadcast %cst_53 : f32 to vector<8x384xf32>
    %153 = arith.addf %152, %151 : vector<8x384xf32>
    %154 = arith.divf %152, %153 : vector<8x384xf32>
    %155 = vector.extract_strided_slice %154 {offsets = [0, 0], sizes = [8, 128], strides = [1, 1]} : vector<8x384xf32> to vector<8x128xf32>
    %156 = vector.extract_strided_slice %154 {offsets = [0, 128], sizes = [8, 128], strides = [1, 1]} : vector<8x384xf32> to vector<8x128xf32>
    %157 = vector.extract_strided_slice %154 {offsets = [0, 256], sizes = [8, 128], strides = [1, 1]} : vector<8x384xf32> to vector<8x128xf32>
    %158 = vector.extract_strided_slice %148 {offsets = [0, 384], sizes = [8, 128], strides = [1, 1]} : vector<8x512xf32> to vector<8x128xf32>
    %159 = math.tanh %158 : vector<8x128xf32>
    %160 = arith.mulf %156, %136 : vector<8x128xf32>
    %161 = arith.mulf %155, %159 : vector<8x128xf32>
    %162 = arith.addf %160, %161 : vector<8x128xf32>
    %163 = math.tanh %162 : vector<8x128xf32>
    %164 = arith.mulf %157, %163 : vector<8x128xf32>
    %c0_i32_54 = arith.constant 0 : i32
    %165 = arith.addi %c0_i32_54, %c5_i32 : i32
    %166 = arith.index_cast %165 : i32 to index
    %c0_55 = arith.constant 0 : index
    %c0_56 = arith.constant 0 : index
    %167 = vector.load %arg20[%166, %c0_55, %c0_56] : memref<8x8x128xf32, #tpu.memory_space<vmem>>, vector<1x8x128xf32>
    %168 = vector.shape_cast %167 : vector<1x8x128xf32> to vector<8x128xf32>
    %169 = vector.shape_cast %164 : vector<8x128xf32> to vector<1x8x128xf32>
    tpu.vector_store %arg20[%166, %c0_55, %c0_56], %169 {strides = array<i32>} : memref<8x8x128xf32, #tpu.memory_space<vmem>>, vector<1x8x128xf32>,
    %c6_i32 = arith.constant 6 : i32
    %cst_57 = arith.constant dense<0.000000e+00> : vector<8x512xf32>
    %170 = tpu.matmul %164, %1, %cst_57 {dimension_numbers = #tpu.dot_dimension_numbers<[1], [0], [0], [1], [0, 0, 1, 1], [], []>} : vector<8x128xf32>, vector<128x512xf32>, vector<8x512xf32> -> vector<8x512xf32>
    %171 = arith.index_cast %c6_i32 : i32 to index
    %c0_58 = arith.constant 0 : index
    %c0_59 = arith.constant 0 : index
    %172 = vector.load %arg19[%171, %c0_58, %c0_59] : memref<8x8x512xf32, #tpu.memory_space<vmem>>, vector<1x8x512xf32>
    %173 = vector.shape_cast %172 : vector<1x8x512xf32> to vector<8x512xf32>
    %174 = arith.addf %170, %173 : vector<8x512xf32>
    %175 = vector.extract_strided_slice %174 {offsets = [0, 0], sizes = [8, 384], strides = [1, 1]} : vector<8x512xf32> to vector<8x384xf32>
    %176 = arith.negf %175 : vector<8x384xf32>
    %177 = math.exp %176 : vector<8x384xf32>
    %cst_60 = arith.constant 1.000000e+00 : f32
    %178 = vector.broadcast %cst_60 : f32 to vector<8x384xf32>
    %179 = arith.addf %178, %177 : vector<8x384xf32>
    %180 = arith.divf %178, %179 : vector<8x384xf32>
    %181 = vector.extract_strided_slice %180 {offsets = [0, 0], sizes = [8, 128], strides = [1, 1]} : vector<8x384xf32> to vector<8x128xf32>
    %182 = vector.extract_strided_slice %180 {offsets = [0, 128], sizes = [8, 128], strides = [1, 1]} : vector<8x384xf32> to vector<8x128xf32>
    %183 = vector.extract_strided_slice %180 {offsets = [0, 256], sizes = [8, 128], strides = [1, 1]} : vector<8x384xf32> to vector<8x128xf32>
    %184 = vector.extract_strided_slice %174 {offsets = [0, 384], sizes = [8, 128], strides = [1, 1]} : vector<8x512xf32> to vector<8x128xf32>
    %185 = math.tanh %184 : vector<8x128xf32>
    %186 = arith.mulf %182, %162 : vector<8x128xf32>
    %187 = arith.mulf %181, %185 : vector<8x128xf32>
    %188 = arith.addf %186, %187 : vector<8x128xf32>
    %189 = math.tanh %188 : vector<8x128xf32>
    %190 = arith.mulf %183, %189 : vector<8x128xf32>
    %c0_i32_61 = arith.constant 0 : i32
    %191 = arith.addi %c0_i32_61, %c6_i32 : i32
    %192 = arith.index_cast %191 : i32 to index
    %c0_62 = arith.constant 0 : index
    %c0_63 = arith.constant 0 : index
    %193 = vector.load %arg20[%192, %c0_62, %c0_63] : memref<8x8x128xf32, #tpu.memory_space<vmem>>, vector<1x8x128xf32>
    %194 = vector.shape_cast %193 : vector<1x8x128xf32> to vector<8x128xf32>
    %195 = vector.shape_cast %190 : vector<8x128xf32> to vector<1x8x128xf32>
    tpu.vector_store %arg20[%192, %c0_62, %c0_63], %195 {strides = array<i32>} : memref<8x8x128xf32, #tpu.memory_space<vmem>>, vector<1x8x128xf32>,
    %c7_i32 = arith.constant 7 : i32
    %cst_64 = arith.constant dense<0.000000e+00> : vector<8x512xf32>
    %196 = tpu.matmul %190, %1, %cst_64 {dimension_numbers = #tpu.dot_dimension_numbers<[1], [0], [0], [1], [0, 0, 1, 1], [], []>} : vector<8x128xf32>, vector<128x512xf32>, vector<8x512xf32> -> vector<8x512xf32>
    %197 = arith.index_cast %c7_i32 : i32 to index
    %c0_65 = arith.constant 0 : index
    %c0_66 = arith.constant 0 : index
    %198 = vector.load %arg19[%197, %c0_65, %c0_66] : memref<8x8x512xf32, #tpu.memory_space<vmem>>, vector<1x8x512xf32>
    %199 = vector.shape_cast %198 : vector<1x8x512xf32> to vector<8x512xf32>
    %200 = arith.addf %196, %199 : vector<8x512xf32>
    %201 = vector.extract_strided_slice %200 {offsets = [0, 0], sizes = [8, 384], strides = [1, 1]} : vector<8x512xf32> to vector<8x384xf32>
    %202 = arith.negf %201 : vector<8x384xf32>
    %203 = math.exp %202 : vector<8x384xf32>
    %cst_67 = arith.constant 1.000000e+00 : f32
    %204 = vector.broadcast %cst_67 : f32 to vector<8x384xf32>
    %205 = arith.addf %204, %203 : vector<8x384xf32>
    %206 = arith.divf %204, %205 : vector<8x384xf32>
    %207 = vector.extract_strided_slice %206 {offsets = [0, 0], sizes = [8, 128], strides = [1, 1]} : vector<8x384xf32> to vector<8x128xf32>
    %208 = vector.extract_strided_slice %206 {offsets = [0, 128], sizes = [8, 128], strides = [1, 1]} : vector<8x384xf32> to vector<8x128xf32>
    %209 = vector.extract_strided_slice %206 {offsets = [0, 256], sizes = [8, 128], strides = [1, 1]} : vector<8x384xf32> to vector<8x128xf32>
    %210 = vector.extract_strided_slice %200 {offsets = [0, 384], sizes = [8, 128], strides = [1, 1]} : vector<8x512xf32> to vector<8x128xf32>
    %211 = math.tanh %210 : vector<8x128xf32>
    %212 = arith.mulf %208, %188 : vector<8x128xf32>
    %213 = arith.mulf %207, %211 : vector<8x128xf32>
    %214 = arith.addf %212, %213 : vector<8x128xf32>
    %215 = math.tanh %214 : vector<8x128xf32>
    %216 = arith.mulf %209, %215 : vector<8x128xf32>
    %c0_i32_68 = arith.constant 0 : i32
    %217 = arith.addi %c0_i32_68, %c7_i32 : i32
    %218 = arith.index_cast %217 : i32 to index
    %c0_69 = arith.constant 0 : index
    %c0_70 = arith.constant 0 : index
    %219 = vector.load %arg20[%218, %c0_69, %c0_70] : memref<8x8x128xf32, #tpu.memory_space<vmem>>, vector<1x8x128xf32>
    %220 = vector.shape_cast %219 : vector<1x8x128xf32> to vector<8x128xf32>
    %221 = vector.shape_cast %216 : vector<8x128xf32> to vector<1x8x128xf32>
    tpu.vector_store %arg20[%218, %c0_69, %c0_70], %221 {strides = array<i32>} : memref<8x8x128xf32, #tpu.memory_space<vmem>>, vector<1x8x128xf32>,
    %c8_i32 = arith.constant 8 : i32
    %c1 = arith.constant 1 : index
    %c0_71 = arith.constant 0 : index
    %c0_72 = arith.constant 0 : index
    %222 = vector.load %arg4[%c1, %c0_71, %c0_72] : memref<3x128x512xf32, #tpu.memory_space<vmem>>, vector<1x128x512xf32>
    %223 = vector.shape_cast %222 : vector<1x128x512xf32> to vector<128x512xf32>
    %c1_73 = arith.constant 1 : index
    %c0_74 = arith.constant 0 : index
    %c0_75 = arith.constant 0 : index
    %224 = vector.load %arg5[%c1_73, %c0_74, %c0_75] : memref<3x1x512xf32, #tpu.memory_space<vmem>>, vector<1x1x512xf32>
    %225 = vector.shape_cast %224 : vector<1x1x512xf32> to vector<1x512xf32>
    %cst_76 = arith.constant 0.000000e+00 : f32
    %226 = vector.broadcast %cst_76 : f32 to vector<8x128xf32>
    %cst_77 = arith.constant 0.000000e+00 : f32
    %227 = vector.broadcast %cst_77 : f32 to vector<8x128xf32>
    %c0_78 = arith.constant 0 : index
    %c0_79 = arith.constant 0 : index
    %c0_80 = arith.constant 0 : index
    %228 = vector.load %arg20[%c0_78, %c0_79, %c0_80] : memref<8x8x128xf32, #tpu.memory_space<vmem>>, vector<8x8x128xf32>
    %229 = vector.shape_cast %228 : vector<8x8x128xf32> to vector<64x128xf32>
    %c0_81 = arith.constant 0 : index
    %c0_82 = arith.constant 0 : index
    %c0_83 = arith.constant 0 : index
    %230 = vector.load %arg3[%c0_81, %c0_82, %c0_83] : memref<2x128x512xf32, #tpu.memory_space<vmem>>, vector<1x128x512xf32>
    %231 = vector.shape_cast %230 : vector<1x128x512xf32> to vector<128x512xf32>
    %cst_84 = arith.constant dense<0.000000e+00> : vector<64x512xf32>
    %232 = tpu.matmul %229, %231, %cst_84 {dimension_numbers = #tpu.dot_dimension_numbers<[1], [0], [0], [1], [0, 0, 1, 1], [], []>} : vector<64x128xf32>, vector<128x512xf32>, vector<64x512xf32> -> vector<64x512xf32>
    %233 = vector.broadcast %225 : vector<1x512xf32> to vector<64x512xf32>
    %234 = arith.addf %232, %233 : vector<64x512xf32>
    %235 = vector.shape_cast %234 : vector<64x512xf32> to vector<8x8x512xf32>
    %c0_85 = arith.constant 0 : index
    %c0_86 = arith.constant 0 : index
    %c0_87 = arith.constant 0 : index
    %236 = vector.load %arg19[%c0_85, %c0_86, %c0_87] : memref<8x8x512xf32, #tpu.memory_space<vmem>>, vector<8x8x512xf32>
    tpu.vector_store %arg19[%c0_85, %c0_86, %c0_87], %235 {strides = array<i32>} : memref<8x8x512xf32, #tpu.memory_space<vmem>>, vector<8x8x512xf32>,
    %c0_i32_88 = arith.constant 0 : i32
    %cst_89 = arith.constant dense<0.000000e+00> : vector<8x512xf32>
    %237 = tpu.matmul %226, %223, %cst_89 {dimension_numbers = #tpu.dot_dimension_numbers<[1], [0], [0], [1], [0, 0, 1, 1], [], []>} : vector<8x128xf32>, vector<128x512xf32>, vector<8x512xf32> -> vector<8x512xf32>
    %238 = arith.index_cast %c0_i32_88 : i32 to index
    %c0_90 = arith.constant 0 : index
    %c0_91 = arith.constant 0 : index
    %239 = vector.load %arg19[%238, %c0_90, %c0_91] : memref<8x8x512xf32, #tpu.memory_space<vmem>>, vector<1x8x512xf32>
    %240 = vector.shape_cast %239 : vector<1x8x512xf32> to vector<8x512xf32>
    %241 = arith.addf %237, %240 : vector<8x512xf32>
    %242 = vector.extract_strided_slice %241 {offsets = [0, 0], sizes = [8, 384], strides = [1, 1]} : vector<8x512xf32> to vector<8x384xf32>
    %243 = arith.negf %242 : vector<8x384xf32>
    %244 = math.exp %243 : vector<8x384xf32>
    %cst_92 = arith.constant 1.000000e+00 : f32
    %245 = vector.broadcast %cst_92 : f32 to vector<8x384xf32>
    %246 = arith.addf %245, %244 : vector<8x384xf32>
    %247 = arith.divf %245, %246 : vector<8x384xf32>
    %248 = vector.extract_strided_slice %247 {offsets = [0, 0], sizes = [8, 128], strides = [1, 1]} : vector<8x384xf32> to vector<8x128xf32>
    %249 = vector.extract_strided_slice %247 {offsets = [0, 128], sizes = [8, 128], strides = [1, 1]} : vector<8x384xf32> to vector<8x128xf32>
    %250 = vector.extract_strided_slice %247 {offsets = [0, 256], sizes = [8, 128], strides = [1, 1]} : vector<8x384xf32> to vector<8x128xf32>
    %251 = vector.extract_strided_slice %241 {offsets = [0, 384], sizes = [8, 128], strides = [1, 1]} : vector<8x512xf32> to vector<8x128xf32>
    %252 = math.tanh %251 : vector<8x128xf32>
    %253 = arith.mulf %249, %227 : vector<8x128xf32>
    %254 = arith.mulf %248, %252 : vector<8x128xf32>
    %255 = arith.addf %253, %254 : vector<8x128xf32>
    %256 = math.tanh %255 : vector<8x128xf32>
    %257 = arith.mulf %250, %256 : vector<8x128xf32>
    %c0_i32_93 = arith.constant 0 : i32
    %258 = arith.addi %c0_i32_93, %c0_i32_88 : i32
    %259 = arith.index_cast %258 : i32 to index
    %c0_94 = arith.constant 0 : index
    %c0_95 = arith.constant 0 : index
    %260 = vector.load %arg20[%259, %c0_94, %c0_95] : memref<8x8x128xf32, #tpu.memory_space<vmem>>, vector<1x8x128xf32>
    %261 = vector.shape_cast %260 : vector<1x8x128xf32> to vector<8x128xf32>
    %262 = vector.shape_cast %257 : vector<8x128xf32> to vector<1x8x128xf32>
    tpu.vector_store %arg20[%259, %c0_94, %c0_95], %262 {strides = array<i32>} : memref<8x8x128xf32, #tpu.memory_space<vmem>>, vector<1x8x128xf32>,
    %c1_i32_96 = arith.constant 1 : i32
    %cst_97 = arith.constant dense<0.000000e+00> : vector<8x512xf32>
    %263 = tpu.matmul %257, %223, %cst_97 {dimension_numbers = #tpu.dot_dimension_numbers<[1], [0], [0], [1], [0, 0, 1, 1], [], []>} : vector<8x128xf32>, vector<128x512xf32>, vector<8x512xf32> -> vector<8x512xf32>
    %264 = arith.index_cast %c1_i32_96 : i32 to index
    %c0_98 = arith.constant 0 : index
    %c0_99 = arith.constant 0 : index
    %265 = vector.load %arg19[%264, %c0_98, %c0_99] : memref<8x8x512xf32, #tpu.memory_space<vmem>>, vector<1x8x512xf32>
    %266 = vector.shape_cast %265 : vector<1x8x512xf32> to vector<8x512xf32>
    %267 = arith.addf %263, %266 : vector<8x512xf32>
    %268 = vector.extract_strided_slice %267 {offsets = [0, 0], sizes = [8, 384], strides = [1, 1]} : vector<8x512xf32> to vector<8x384xf32>
    %269 = arith.negf %268 : vector<8x384xf32>
    %270 = math.exp %269 : vector<8x384xf32>
    %cst_100 = arith.constant 1.000000e+00 : f32
    %271 = vector.broadcast %cst_100 : f32 to vector<8x384xf32>
    %272 = arith.addf %271, %270 : vector<8x384xf32>
    %273 = arith.divf %271, %272 : vector<8x384xf32>
    %274 = vector.extract_strided_slice %273 {offsets = [0, 0], sizes = [8, 128], strides = [1, 1]} : vector<8x384xf32> to vector<8x128xf32>
    %275 = vector.extract_strided_slice %273 {offsets = [0, 128], sizes = [8, 128], strides = [1, 1]} : vector<8x384xf32> to vector<8x128xf32>
    %276 = vector.extract_strided_slice %273 {offsets = [0, 256], sizes = [8, 128], strides = [1, 1]} : vector<8x384xf32> to vector<8x128xf32>
    %277 = vector.extract_strided_slice %267 {offsets = [0, 384], sizes = [8, 128], strides = [1, 1]} : vector<8x512xf32> to vector<8x128xf32>
    %278 = math.tanh %277 : vector<8x128xf32>
    %279 = arith.mulf %275, %255 : vector<8x128xf32>
    %280 = arith.mulf %274, %278 : vector<8x128xf32>
    %281 = arith.addf %279, %280 : vector<8x128xf32>
    %282 = math.tanh %281 : vector<8x128xf32>
    %283 = arith.mulf %276, %282 : vector<8x128xf32>
    %c0_i32_101 = arith.constant 0 : i32
    %284 = arith.addi %c0_i32_101, %c1_i32_96 : i32
    %285 = arith.index_cast %284 : i32 to index
    %c0_102 = arith.constant 0 : index
    %c0_103 = arith.constant 0 : index
    %286 = vector.load %arg20[%285, %c0_102, %c0_103] : memref<8x8x128xf32, #tpu.memory_space<vmem>>, vector<1x8x128xf32>
    %287 = vector.shape_cast %286 : vector<1x8x128xf32> to vector<8x128xf32>
    %288 = vector.shape_cast %283 : vector<8x128xf32> to vector<1x8x128xf32>
    tpu.vector_store %arg20[%285, %c0_102, %c0_103], %288 {strides = array<i32>} : memref<8x8x128xf32, #tpu.memory_space<vmem>>, vector<1x8x128xf32>,
    %c2_i32_104 = arith.constant 2 : i32
    %cst_105 = arith.constant dense<0.000000e+00> : vector<8x512xf32>
    %289 = tpu.matmul %283, %223, %cst_105 {dimension_numbers = #tpu.dot_dimension_numbers<[1], [0], [0], [1], [0, 0, 1, 1], [], []>} : vector<8x128xf32>, vector<128x512xf32>, vector<8x512xf32> -> vector<8x512xf32>
    %290 = arith.index_cast %c2_i32_104 : i32 to index
    %c0_106 = arith.constant 0 : index
    %c0_107 = arith.constant 0 : index
    %291 = vector.load %arg19[%290, %c0_106, %c0_107] : memref<8x8x512xf32, #tpu.memory_space<vmem>>, vector<1x8x512xf32>
    %292 = vector.shape_cast %291 : vector<1x8x512xf32> to vector<8x512xf32>
    %293 = arith.addf %289, %292 : vector<8x512xf32>
    %294 = vector.extract_strided_slice %293 {offsets = [0, 0], sizes = [8, 384], strides = [1, 1]} : vector<8x512xf32> to vector<8x384xf32>
    %295 = arith.negf %294 : vector<8x384xf32>
    %296 = math.exp %295 : vector<8x384xf32>
    %cst_108 = arith.constant 1.000000e+00 : f32
    %297 = vector.broadcast %cst_108 : f32 to vector<8x384xf32>
    %298 = arith.addf %297, %296 : vector<8x384xf32>
    %299 = arith.divf %297, %298 : vector<8x384xf32>
    %300 = vector.extract_strided_slice %299 {offsets = [0, 0], sizes = [8, 128], strides = [1, 1]} : vector<8x384xf32> to vector<8x128xf32>
    %301 = vector.extract_strided_slice %299 {offsets = [0, 128], sizes = [8, 128], strides = [1, 1]} : vector<8x384xf32> to vector<8x128xf32>
    %302 = vector.extract_strided_slice %299 {offsets = [0, 256], sizes = [8, 128], strides = [1, 1]} : vector<8x384xf32> to vector<8x128xf32>
    %303 = vector.extract_strided_slice %293 {offsets = [0, 384], sizes = [8, 128], strides = [1, 1]} : vector<8x512xf32> to vector<8x128xf32>
    %304 = math.tanh %303 : vector<8x128xf32>
    %305 = arith.mulf %301, %281 : vector<8x128xf32>
    %306 = arith.mulf %300, %304 : vector<8x128xf32>
    %307 = arith.addf %305, %306 : vector<8x128xf32>
    %308 = math.tanh %307 : vector<8x128xf32>
    %309 = arith.mulf %302, %308 : vector<8x128xf32>
    %c0_i32_109 = arith.constant 0 : i32
    %310 = arith.addi %c0_i32_109, %c2_i32_104 : i32
    %311 = arith.index_cast %310 : i32 to index
    %c0_110 = arith.constant 0 : index
    %c0_111 = arith.constant 0 : index
    %312 = vector.load %arg20[%311, %c0_110, %c0_111] : memref<8x8x128xf32, #tpu.memory_space<vmem>>, vector<1x8x128xf32>
    %313 = vector.shape_cast %312 : vector<1x8x128xf32> to vector<8x128xf32>
    %314 = vector.shape_cast %309 : vector<8x128xf32> to vector<1x8x128xf32>
    tpu.vector_store %arg20[%311, %c0_110, %c0_111], %314 {strides = array<i32>} : memref<8x8x128xf32, #tpu.memory_space<vmem>>, vector<1x8x128xf32>,
    %c3_i32_112 = arith.constant 3 : i32
    %cst_113 = arith.constant dense<0.000000e+00> : vector<8x512xf32>
    %315 = tpu.matmul %309, %223, %cst_113 {dimension_numbers = #tpu.dot_dimension_numbers<[1], [0], [0], [1], [0, 0, 1, 1], [], []>} : vector<8x128xf32>, vector<128x512xf32>, vector<8x512xf32> -> vector<8x512xf32>
    %316 = arith.index_cast %c3_i32_112 : i32 to index
    %c0_114 = arith.constant 0 : index
    %c0_115 = arith.constant 0 : index
    %317 = vector.load %arg19[%316, %c0_114, %c0_115] : memref<8x8x512xf32, #tpu.memory_space<vmem>>, vector<1x8x512xf32>
    %318 = vector.shape_cast %317 : vector<1x8x512xf32> to vector<8x512xf32>
    %319 = arith.addf %315, %318 : vector<8x512xf32>
    %320 = vector.extract_strided_slice %319 {offsets = [0, 0], sizes = [8, 384], strides = [1, 1]} : vector<8x512xf32> to vector<8x384xf32>
    %321 = arith.negf %320 : vector<8x384xf32>
    %322 = math.exp %321 : vector<8x384xf32>
    %cst_116 = arith.constant 1.000000e+00 : f32
    %323 = vector.broadcast %cst_116 : f32 to vector<8x384xf32>
    %324 = arith.addf %323, %322 : vector<8x384xf32>
    %325 = arith.divf %323, %324 : vector<8x384xf32>
    %326 = vector.extract_strided_slice %325 {offsets = [0, 0], sizes = [8, 128], strides = [1, 1]} : vector<8x384xf32> to vector<8x128xf32>
    %327 = vector.extract_strided_slice %325 {offsets = [0, 128], sizes = [8, 128], strides = [1, 1]} : vector<8x384xf32> to vector<8x128xf32>
    %328 = vector.extract_strided_slice %325 {offsets = [0, 256], sizes = [8, 128], strides = [1, 1]} : vector<8x384xf32> to vector<8x128xf32>
    %329 = vector.extract_strided_slice %319 {offsets = [0, 384], sizes = [8, 128], strides = [1, 1]} : vector<8x512xf32> to vector<8x128xf32>
    %330 = math.tanh %329 : vector<8x128xf32>
    %331 = arith.mulf %327, %307 : vector<8x128xf32>
    %332 = arith.mulf %326, %330 : vector<8x128xf32>
    %333 = arith.addf %331, %332 : vector<8x128xf32>
    %334 = math.tanh %333 : vector<8x128xf32>
    %335 = arith.mulf %328, %334 : vector<8x128xf32>
    %c0_i32_117 = arith.constant 0 : i32
    %336 = arith.addi %c0_i32_117, %c3_i32_112 : i32
    %337 = arith.index_cast %336 : i32 to index
    %c0_118 = arith.constant 0 : index
    %c0_119 = arith.constant 0 : index
    %338 = vector.load %arg20[%337, %c0_118, %c0_119] : memref<8x8x128xf32, #tpu.memory_space<vmem>>, vector<1x8x128xf32>
    %339 = vector.shape_cast %338 : vector<1x8x128xf32> to vector<8x128xf32>
    %340 = vector.shape_cast %335 : vector<8x128xf32> to vector<1x8x128xf32>
    tpu.vector_store %arg20[%337, %c0_118, %c0_119], %340 {strides = array<i32>} : memref<8x8x128xf32, #tpu.memory_space<vmem>>, vector<1x8x128xf32>,
    %c4_i32_120 = arith.constant 4 : i32
    %cst_121 = arith.constant dense<0.000000e+00> : vector<8x512xf32>
    %341 = tpu.matmul %335, %223, %cst_121 {dimension_numbers = #tpu.dot_dimension_numbers<[1], [0], [0], [1], [0, 0, 1, 1], [], []>} : vector<8x128xf32>, vector<128x512xf32>, vector<8x512xf32> -> vector<8x512xf32>
    %342 = arith.index_cast %c4_i32_120 : i32 to index
    %c0_122 = arith.constant 0 : index
    %c0_123 = arith.constant 0 : index
    %343 = vector.load %arg19[%342, %c0_122, %c0_123] : memref<8x8x512xf32, #tpu.memory_space<vmem>>, vector<1x8x512xf32>
    %344 = vector.shape_cast %343 : vector<1x8x512xf32> to vector<8x512xf32>
    %345 = arith.addf %341, %344 : vector<8x512xf32>
    %346 = vector.extract_strided_slice %345 {offsets = [0, 0], sizes = [8, 384], strides = [1, 1]} : vector<8x512xf32> to vector<8x384xf32>
    %347 = arith.negf %346 : vector<8x384xf32>
    %348 = math.exp %347 : vector<8x384xf32>
    %cst_124 = arith.constant 1.000000e+00 : f32
    %349 = vector.broadcast %cst_124 : f32 to vector<8x384xf32>
    %350 = arith.addf %349, %348 : vector<8x384xf32>
    %351 = arith.divf %349, %350 : vector<8x384xf32>
    %352 = vector.extract_strided_slice %351 {offsets = [0, 0], sizes = [8, 128], strides = [1, 1]} : vector<8x384xf32> to vector<8x128xf32>
    %353 = vector.extract_strided_slice %351 {offsets = [0, 128], sizes = [8, 128], strides = [1, 1]} : vector<8x384xf32> to vector<8x128xf32>
    %354 = vector.extract_strided_slice %351 {offsets = [0, 256], sizes = [8, 128], strides = [1, 1]} : vector<8x384xf32> to vector<8x128xf32>
    %355 = vector.extract_strided_slice %345 {offsets = [0, 384], sizes = [8, 128], strides = [1, 1]} : vector<8x512xf32> to vector<8x128xf32>
    %356 = math.tanh %355 : vector<8x128xf32>
    %357 = arith.mulf %353, %333 : vector<8x128xf32>
    %358 = arith.mulf %352, %356 : vector<8x128xf32>
    %359 = arith.addf %357, %358 : vector<8x128xf32>
    %360 = math.tanh %359 : vector<8x128xf32>
    %361 = arith.mulf %354, %360 : vector<8x128xf32>
    %c0_i32_125 = arith.constant 0 : i32
    %362 = arith.addi %c0_i32_125, %c4_i32_120 : i32
    %363 = arith.index_cast %362 : i32 to index
    %c0_126 = arith.constant 0 : index
    %c0_127 = arith.constant 0 : index
    %364 = vector.load %arg20[%363, %c0_126, %c0_127] : memref<8x8x128xf32, #tpu.memory_space<vmem>>, vector<1x8x128xf32>
    %365 = vector.shape_cast %364 : vector<1x8x128xf32> to vector<8x128xf32>
    %366 = vector.shape_cast %361 : vector<8x128xf32> to vector<1x8x128xf32>
    tpu.vector_store %arg20[%363, %c0_126, %c0_127], %366 {strides = array<i32>} : memref<8x8x128xf32, #tpu.memory_space<vmem>>, vector<1x8x128xf32>,
    %c5_i32_128 = arith.constant 5 : i32
    %cst_129 = arith.constant dense<0.000000e+00> : vector<8x512xf32>
    %367 = tpu.matmul %361, %223, %cst_129 {dimension_numbers = #tpu.dot_dimension_numbers<[1], [0], [0], [1], [0, 0, 1, 1], [], []>} : vector<8x128xf32>, vector<128x512xf32>, vector<8x512xf32> -> vector<8x512xf32>
    %368 = arith.index_cast %c5_i32_128 : i32 to index
    %c0_130 = arith.constant 0 : index
    %c0_131 = arith.constant 0 : index
    %369 = vector.load %arg19[%368, %c0_130, %c0_131] : memref<8x8x512xf32, #tpu.memory_space<vmem>>, vector<1x8x512xf32>
    %370 = vector.shape_cast %369 : vector<1x8x512xf32> to vector<8x512xf32>
    %371 = arith.addf %367, %370 : vector<8x512xf32>
    %372 = vector.extract_strided_slice %371 {offsets = [0, 0], sizes = [8, 384], strides = [1, 1]} : vector<8x512xf32> to vector<8x384xf32>
    %373 = arith.negf %372 : vector<8x384xf32>
    %374 = math.exp %373 : vector<8x384xf32>
    %cst_132 = arith.constant 1.000000e+00 : f32
    %375 = vector.broadcast %cst_132 : f32 to vector<8x384xf32>
    %376 = arith.addf %375, %374 : vector<8x384xf32>
    %377 = arith.divf %375, %376 : vector<8x384xf32>
    %378 = vector.extract_strided_slice %377 {offsets = [0, 0], sizes = [8, 128], strides = [1, 1]} : vector<8x384xf32> to vector<8x128xf32>
    %379 = vector.extract_strided_slice %377 {offsets = [0, 128], sizes = [8, 128], strides = [1, 1]} : vector<8x384xf32> to vector<8x128xf32>
    %380 = vector.extract_strided_slice %377 {offsets = [0, 256], sizes = [8, 128], strides = [1, 1]} : vector<8x384xf32> to vector<8x128xf32>
    %381 = vector.extract_strided_slice %371 {offsets = [0, 384], sizes = [8, 128], strides = [1, 1]} : vector<8x512xf32> to vector<8x128xf32>
    %382 = math.tanh %381 : vector<8x128xf32>
    %383 = arith.mulf %379, %359 : vector<8x128xf32>
    %384 = arith.mulf %378, %382 : vector<8x128xf32>
    %385 = arith.addf %383, %384 : vector<8x128xf32>
    %386 = math.tanh %385 : vector<8x128xf32>
    %387 = arith.mulf %380, %386 : vector<8x128xf32>
    %c0_i32_133 = arith.constant 0 : i32
    %388 = arith.addi %c0_i32_133, %c5_i32_128 : i32
    %389 = arith.index_cast %388 : i32 to index
    %c0_134 = arith.constant 0 : index
    %c0_135 = arith.constant 0 : index
    %390 = vector.load %arg20[%389, %c0_134, %c0_135] : memref<8x8x128xf32, #tpu.memory_space<vmem>>, vector<1x8x128xf32>
    %391 = vector.shape_cast %390 : vector<1x8x128xf32> to vector<8x128xf32>
    %392 = vector.shape_cast %387 : vector<8x128xf32> to vector<1x8x128xf32>
    tpu.vector_store %arg20[%389, %c0_134, %c0_135], %392 {strides = array<i32>} : memref<8x8x128xf32, #tpu.memory_space<vmem>>, vector<1x8x128xf32>,
    %c6_i32_136 = arith.constant 6 : i32
    %cst_137 = arith.constant dense<0.000000e+00> : vector<8x512xf32>
    %393 = tpu.matmul %387, %223, %cst_137 {dimension_numbers = #tpu.dot_dimension_numbers<[1], [0], [0], [1], [0, 0, 1, 1], [], []>} : vector<8x128xf32>, vector<128x512xf32>, vector<8x512xf32> -> vector<8x512xf32>
    %394 = arith.index_cast %c6_i32_136 : i32 to index
    %c0_138 = arith.constant 0 : index
    %c0_139 = arith.constant 0 : index
    %395 = vector.load %arg19[%394, %c0_138, %c0_139] : memref<8x8x512xf32, #tpu.memory_space<vmem>>, vector<1x8x512xf32>
    %396 = vector.shape_cast %395 : vector<1x8x512xf32> to vector<8x512xf32>
    %397 = arith.addf %393, %396 : vector<8x512xf32>
    %398 = vector.extract_strided_slice %397 {offsets = [0, 0], sizes = [8, 384], strides = [1, 1]} : vector<8x512xf32> to vector<8x384xf32>
    %399 = arith.negf %398 : vector<8x384xf32>
    %400 = math.exp %399 : vector<8x384xf32>
    %cst_140 = arith.constant 1.000000e+00 : f32
    %401 = vector.broadcast %cst_140 : f32 to vector<8x384xf32>
    %402 = arith.addf %401, %400 : vector<8x384xf32>
    %403 = arith.divf %401, %402 : vector<8x384xf32>
    %404 = vector.extract_strided_slice %403 {offsets = [0, 0], sizes = [8, 128], strides = [1, 1]} : vector<8x384xf32> to vector<8x128xf32>
    %405 = vector.extract_strided_slice %403 {offsets = [0, 128], sizes = [8, 128], strides = [1, 1]} : vector<8x384xf32> to vector<8x128xf32>
    %406 = vector.extract_strided_slice %403 {offsets = [0, 256], sizes = [8, 128], strides = [1, 1]} : vector<8x384xf32> to vector<8x128xf32>
    %407 = vector.extract_strided_slice %397 {offsets = [0, 384], sizes = [8, 128], strides = [1, 1]} : vector<8x512xf32> to vector<8x128xf32>
    %408 = math.tanh %407 : vector<8x128xf32>
    %409 = arith.mulf %405, %385 : vector<8x128xf32>
    %410 = arith.mulf %404, %408 : vector<8x128xf32>
    %411 = arith.addf %409, %410 : vector<8x128xf32>
    %412 = math.tanh %411 : vector<8x128xf32>
    %413 = arith.mulf %406, %412 : vector<8x128xf32>
    %c0_i32_141 = arith.constant 0 : i32
    %414 = arith.addi %c0_i32_141, %c6_i32_136 : i32
    %415 = arith.index_cast %414 : i32 to index
    %c0_142 = arith.constant 0 : index
    %c0_143 = arith.constant 0 : index
    %416 = vector.load %arg20[%415, %c0_142, %c0_143] : memref<8x8x128xf32, #tpu.memory_space<vmem>>, vector<1x8x128xf32>
    %417 = vector.shape_cast %416 : vector<1x8x128xf32> to vector<8x128xf32>
    %418 = vector.shape_cast %413 : vector<8x128xf32> to vector<1x8x128xf32>
    tpu.vector_store %arg20[%415, %c0_142, %c0_143], %418 {strides = array<i32>} : memref<8x8x128xf32, #tpu.memory_space<vmem>>, vector<1x8x128xf32>,
    %c7_i32_144 = arith.constant 7 : i32
    %cst_145 = arith.constant dense<0.000000e+00> : vector<8x512xf32>
    %419 = tpu.matmul %413, %223, %cst_145 {dimension_numbers = #tpu.dot_dimension_numbers<[1], [0], [0], [1], [0, 0, 1, 1], [], []>} : vector<8x128xf32>, vector<128x512xf32>, vector<8x512xf32> -> vector<8x512xf32>
    %420 = arith.index_cast %c7_i32_144 : i32 to index
    %c0_146 = arith.constant 0 : index
    %c0_147 = arith.constant 0 : index
    %421 = vector.load %arg19[%420, %c0_146, %c0_147] : memref<8x8x512xf32, #tpu.memory_space<vmem>>, vector<1x8x512xf32>
    %422 = vector.shape_cast %421 : vector<1x8x512xf32> to vector<8x512xf32>
    %423 = arith.addf %419, %422 : vector<8x512xf32>
    %424 = vector.extract_strided_slice %423 {offsets = [0, 0], sizes = [8, 384], strides = [1, 1]} : vector<8x512xf32> to vector<8x384xf32>
    %425 = arith.negf %424 : vector<8x384xf32>
    %426 = math.exp %425 : vector<8x384xf32>
    %cst_148 = arith.constant 1.000000e+00 : f32
    %427 = vector.broadcast %cst_148 : f32 to vector<8x384xf32>
    %428 = arith.addf %427, %426 : vector<8x384xf32>
    %429 = arith.divf %427, %428 : vector<8x384xf32>
    %430 = vector.extract_strided_slice %429 {offsets = [0, 0], sizes = [8, 128], strides = [1, 1]} : vector<8x384xf32> to vector<8x128xf32>
    %431 = vector.extract_strided_slice %429 {offsets = [0, 128], sizes = [8, 128], strides = [1, 1]} : vector<8x384xf32> to vector<8x128xf32>
    %432 = vector.extract_strided_slice %429 {offsets = [0, 256], sizes = [8, 128], strides = [1, 1]} : vector<8x384xf32> to vector<8x128xf32>
    %433 = vector.extract_strided_slice %423 {offsets = [0, 384], sizes = [8, 128], strides = [1, 1]} : vector<8x512xf32> to vector<8x128xf32>
    %434 = math.tanh %433 : vector<8x128xf32>
    %435 = arith.mulf %431, %411 : vector<8x128xf32>
    %436 = arith.mulf %430, %434 : vector<8x128xf32>
    %437 = arith.addf %435, %436 : vector<8x128xf32>
    %438 = math.tanh %437 : vector<8x128xf32>
    %439 = arith.mulf %432, %438 : vector<8x128xf32>
    %c0_i32_149 = arith.constant 0 : i32
    %440 = arith.addi %c0_i32_149, %c7_i32_144 : i32
    %441 = arith.index_cast %440 : i32 to index
    %c0_150 = arith.constant 0 : index
    %c0_151 = arith.constant 0 : index
    %442 = vector.load %arg20[%441, %c0_150, %c0_151] : memref<8x8x128xf32, #tpu.memory_space<vmem>>, vector<1x8x128xf32>
    %443 = vector.shape_cast %442 : vector<1x8x128xf32> to vector<8x128xf32>
    %444 = vector.shape_cast %439 : vector<8x128xf32> to vector<1x8x128xf32>
    tpu.vector_store %arg20[%441, %c0_150, %c0_151], %444 {strides = array<i32>} : memref<8x8x128xf32, #tpu.memory_space<vmem>>, vector<1x8x128xf32>,
    %c8_i32_152 = arith.constant 8 : i32
    %c2 = arith.constant 2 : index
    %c0_153 = arith.constant 0 : index
    %c0_154 = arith.constant 0 : index
    %445 = vector.load %arg4[%c2, %c0_153, %c0_154] : memref<3x128x512xf32, #tpu.memory_space<vmem>>, vector<1x128x512xf32>
    %446 = vector.shape_cast %445 : vector<1x128x512xf32> to vector<128x512xf32>
    %c2_155 = arith.constant 2 : index
    %c0_156 = arith.constant 0 : index
    %c0_157 = arith.constant 0 : index
    %447 = vector.load %arg5[%c2_155, %c0_156, %c0_157] : memref<3x1x512xf32, #tpu.memory_space<vmem>>, vector<1x1x512xf32>
    %448 = vector.shape_cast %447 : vector<1x1x512xf32> to vector<1x512xf32>
    %cst_158 = arith.constant 0.000000e+00 : f32
    %449 = vector.broadcast %cst_158 : f32 to vector<8x128xf32>
    %cst_159 = arith.constant 0.000000e+00 : f32
    %450 = vector.broadcast %cst_159 : f32 to vector<8x128xf32>
    %c0_160 = arith.constant 0 : index
    %c0_161 = arith.constant 0 : index
    %c0_162 = arith.constant 0 : index
    %451 = vector.load %arg20[%c0_160, %c0_161, %c0_162] : memref<8x8x128xf32, #tpu.memory_space<vmem>>, vector<8x8x128xf32>
    %452 = vector.shape_cast %451 : vector<8x8x128xf32> to vector<64x128xf32>
    %c1_163 = arith.constant 1 : index
    %c0_164 = arith.constant 0 : index
    %c0_165 = arith.constant 0 : index
    %453 = vector.load %arg3[%c1_163, %c0_164, %c0_165] : memref<2x128x512xf32, #tpu.memory_space<vmem>>, vector<1x128x512xf32>
    %454 = vector.shape_cast %453 : vector<1x128x512xf32> to vector<128x512xf32>
    %cst_166 = arith.constant dense<0.000000e+00> : vector<64x512xf32>
    %455 = tpu.matmul %452, %454, %cst_166 {dimension_numbers = #tpu.dot_dimension_numbers<[1], [0], [0], [1], [0, 0, 1, 1], [], []>} : vector<64x128xf32>, vector<128x512xf32>, vector<64x512xf32> -> vector<64x512xf32>
    %456 = vector.broadcast %448 : vector<1x512xf32> to vector<64x512xf32>
    %457 = arith.addf %455, %456 : vector<64x512xf32>
    %458 = vector.shape_cast %457 : vector<64x512xf32> to vector<8x8x512xf32>
    %c0_167 = arith.constant 0 : index
    %c0_168 = arith.constant 0 : index
    %c0_169 = arith.constant 0 : index
    %459 = vector.load %arg19[%c0_167, %c0_168, %c0_169] : memref<8x8x512xf32, #tpu.memory_space<vmem>>, vector<8x8x512xf32>
    tpu.vector_store %arg19[%c0_167, %c0_168, %c0_169], %458 {strides = array<i32>} : memref<8x8x512xf32, #tpu.memory_space<vmem>>, vector<8x8x512xf32>,
    %c0_i32_170 = arith.constant 0 : i32
    %cst_171 = arith.constant dense<0.000000e+00> : vector<8x512xf32>
    %460 = tpu.matmul %449, %446, %cst_171 {dimension_numbers = #tpu.dot_dimension_numbers<[1], [0], [0], [1], [0, 0, 1, 1], [], []>} : vector<8x128xf32>, vector<128x512xf32>, vector<8x512xf32> -> vector<8x512xf32>
    %461 = arith.index_cast %c0_i32_170 : i32 to index
    %c0_172 = arith.constant 0 : index
    %c0_173 = arith.constant 0 : index
    %462 = vector.load %arg19[%461, %c0_172, %c0_173] : memref<8x8x512xf32, #tpu.memory_space<vmem>>, vector<1x8x512xf32>
    %463 = vector.shape_cast %462 : vector<1x8x512xf32> to vector<8x512xf32>
    %464 = arith.addf %460, %463 : vector<8x512xf32>
    %465 = vector.extract_strided_slice %464 {offsets = [0, 0], sizes = [8, 384], strides = [1, 1]} : vector<8x512xf32> to vector<8x384xf32>
    %466 = arith.negf %465 : vector<8x384xf32>
    %467 = math.exp %466 : vector<8x384xf32>
    %cst_174 = arith.constant 1.000000e+00 : f32
    %468 = vector.broadcast %cst_174 : f32 to vector<8x384xf32>
    %469 = arith.addf %468, %467 : vector<8x384xf32>
    %470 = arith.divf %468, %469 : vector<8x384xf32>
    %471 = vector.extract_strided_slice %470 {offsets = [0, 0], sizes = [8, 128], strides = [1, 1]} : vector<8x384xf32> to vector<8x128xf32>
    %472 = vector.extract_strided_slice %470 {offsets = [0, 128], sizes = [8, 128], strides = [1, 1]} : vector<8x384xf32> to vector<8x128xf32>
    %473 = vector.extract_strided_slice %470 {offsets = [0, 256], sizes = [8, 128], strides = [1, 1]} : vector<8x384xf32> to vector<8x128xf32>
    %474 = vector.extract_strided_slice %464 {offsets = [0, 384], sizes = [8, 128], strides = [1, 1]} : vector<8x512xf32> to vector<8x128xf32>
    %475 = math.tanh %474 : vector<8x128xf32>
    %476 = arith.mulf %472, %450 : vector<8x128xf32>
    %477 = arith.mulf %471, %475 : vector<8x128xf32>
    %478 = arith.addf %476, %477 : vector<8x128xf32>
    %479 = math.tanh %478 : vector<8x128xf32>
    %480 = arith.mulf %473, %479 : vector<8x128xf32>
    %c0_i32_175 = arith.constant 0 : i32
    %481 = arith.addi %c0_i32_175, %c0_i32_170 : i32
    %482 = arith.index_cast %481 : i32 to index
    %c0_176 = arith.constant 0 : index
    %c0_177 = arith.constant 0 : index
    %483 = vector.load %arg20[%482, %c0_176, %c0_177] : memref<8x8x128xf32, #tpu.memory_space<vmem>>, vector<1x8x128xf32>
    %484 = vector.shape_cast %483 : vector<1x8x128xf32> to vector<8x128xf32>
    %485 = vector.shape_cast %480 : vector<8x128xf32> to vector<1x8x128xf32>
    tpu.vector_store %arg20[%482, %c0_176, %c0_177], %485 {strides = array<i32>} : memref<8x8x128xf32, #tpu.memory_space<vmem>>, vector<1x8x128xf32>,
    %c1_i32_178 = arith.constant 1 : i32
    %cst_179 = arith.constant dense<0.000000e+00> : vector<8x512xf32>
    %486 = tpu.matmul %480, %446, %cst_179 {dimension_numbers = #tpu.dot_dimension_numbers<[1], [0], [0], [1], [0, 0, 1, 1], [], []>} : vector<8x128xf32>, vector<128x512xf32>, vector<8x512xf32> -> vector<8x512xf32>
    %487 = arith.index_cast %c1_i32_178 : i32 to index
    %c0_180 = arith.constant 0 : index
    %c0_181 = arith.constant 0 : index
    %488 = vector.load %arg19[%487, %c0_180, %c0_181] : memref<8x8x512xf32, #tpu.memory_space<vmem>>, vector<1x8x512xf32>
    %489 = vector.shape_cast %488 : vector<1x8x512xf32> to vector<8x512xf32>
    %490 = arith.addf %486, %489 : vector<8x512xf32>
    %491 = vector.extract_strided_slice %490 {offsets = [0, 0], sizes = [8, 384], strides = [1, 1]} : vector<8x512xf32> to vector<8x384xf32>
    %492 = arith.negf %491 : vector<8x384xf32>
    %493 = math.exp %492 : vector<8x384xf32>
    %cst_182 = arith.constant 1.000000e+00 : f32
    %494 = vector.broadcast %cst_182 : f32 to vector<8x384xf32>
    %495 = arith.addf %494, %493 : vector<8x384xf32>
    %496 = arith.divf %494, %495 : vector<8x384xf32>
    %497 = vector.extract_strided_slice %496 {offsets = [0, 0], sizes = [8, 128], strides = [1, 1]} : vector<8x384xf32> to vector<8x128xf32>
    %498 = vector.extract_strided_slice %496 {offsets = [0, 128], sizes = [8, 128], strides = [1, 1]} : vector<8x384xf32> to vector<8x128xf32>
    %499 = vector.extract_strided_slice %496 {offsets = [0, 256], sizes = [8, 128], strides = [1, 1]} : vector<8x384xf32> to vector<8x128xf32>
    %500 = vector.extract_strided_slice %490 {offsets = [0, 384], sizes = [8, 128], strides = [1, 1]} : vector<8x512xf32> to vector<8x128xf32>
    %501 = math.tanh %500 : vector<8x128xf32>
    %502 = arith.mulf %498, %478 : vector<8x128xf32>
    %503 = arith.mulf %497, %501 : vector<8x128xf32>
    %504 = arith.addf %502, %503 : vector<8x128xf32>
    %505 = math.tanh %504 : vector<8x128xf32>
    %506 = arith.mulf %499, %505 : vector<8x128xf32>
    %c0_i32_183 = arith.constant 0 : i32
    %507 = arith.addi %c0_i32_183, %c1_i32_178 : i32
    %508 = arith.index_cast %507 : i32 to index
    %c0_184 = arith.constant 0 : index
    %c0_185 = arith.constant 0 : index
    %509 = vector.load %arg20[%508, %c0_184, %c0_185] : memref<8x8x128xf32, #tpu.memory_space<vmem>>, vector<1x8x128xf32>
    %510 = vector.shape_cast %509 : vector<1x8x128xf32> to vector<8x128xf32>
    %511 = vector.shape_cast %506 : vector<8x128xf32> to vector<1x8x128xf32>
    tpu.vector_store %arg20[%508, %c0_184, %c0_185], %511 {strides = array<i32>} : memref<8x8x128xf32, #tpu.memory_space<vmem>>, vector<1x8x128xf32>,
    %c2_i32_186 = arith.constant 2 : i32
    %cst_187 = arith.constant dense<0.000000e+00> : vector<8x512xf32>
    %512 = tpu.matmul %506, %446, %cst_187 {dimension_numbers = #tpu.dot_dimension_numbers<[1], [0], [0], [1], [0, 0, 1, 1], [], []>} : vector<8x128xf32>, vector<128x512xf32>, vector<8x512xf32> -> vector<8x512xf32>
    %513 = arith.index_cast %c2_i32_186 : i32 to index
    %c0_188 = arith.constant 0 : index
    %c0_189 = arith.constant 0 : index
    %514 = vector.load %arg19[%513, %c0_188, %c0_189] : memref<8x8x512xf32, #tpu.memory_space<vmem>>, vector<1x8x512xf32>
    %515 = vector.shape_cast %514 : vector<1x8x512xf32> to vector<8x512xf32>
    %516 = arith.addf %512, %515 : vector<8x512xf32>
    %517 = vector.extract_strided_slice %516 {offsets = [0, 0], sizes = [8, 384], strides = [1, 1]} : vector<8x512xf32> to vector<8x384xf32>
    %518 = arith.negf %517 : vector<8x384xf32>
    %519 = math.exp %518 : vector<8x384xf32>
    %cst_190 = arith.constant 1.000000e+00 : f32
    %520 = vector.broadcast %cst_190 : f32 to vector<8x384xf32>
    %521 = arith.addf %520, %519 : vector<8x384xf32>
    %522 = arith.divf %520, %521 : vector<8x384xf32>
    %523 = vector.extract_strided_slice %522 {offsets = [0, 0], sizes = [8, 128], strides = [1, 1]} : vector<8x384xf32> to vector<8x128xf32>
    %524 = vector.extract_strided_slice %522 {offsets = [0, 128], sizes = [8, 128], strides = [1, 1]} : vector<8x384xf32> to vector<8x128xf32>
    %525 = vector.extract_strided_slice %522 {offsets = [0, 256], sizes = [8, 128], strides = [1, 1]} : vector<8x384xf32> to vector<8x128xf32>
    %526 = vector.extract_strided_slice %516 {offsets = [0, 384], sizes = [8, 128], strides = [1, 1]} : vector<8x512xf32> to vector<8x128xf32>
    %527 = math.tanh %526 : vector<8x128xf32>
    %528 = arith.mulf %524, %504 : vector<8x128xf32>
    %529 = arith.mulf %523, %527 : vector<8x128xf32>
    %530 = arith.addf %528, %529 : vector<8x128xf32>
    %531 = math.tanh %530 : vector<8x128xf32>
    %532 = arith.mulf %525, %531 : vector<8x128xf32>
    %c0_i32_191 = arith.constant 0 : i32
    %533 = arith.addi %c0_i32_191, %c2_i32_186 : i32
    %534 = arith.index_cast %533 : i32 to index
    %c0_192 = arith.constant 0 : index
    %c0_193 = arith.constant 0 : index
    %535 = vector.load %arg20[%534, %c0_192, %c0_193] : memref<8x8x128xf32, #tpu.memory_space<vmem>>, vector<1x8x128xf32>
    %536 = vector.shape_cast %535 : vector<1x8x128xf32> to vector<8x128xf32>
    %537 = vector.shape_cast %532 : vector<8x128xf32> to vector<1x8x128xf32>
    tpu.vector_store %arg20[%534, %c0_192, %c0_193], %537 {strides = array<i32>} : memref<8x8x128xf32, #tpu.memory_space<vmem>>, vector<1x8x128xf32>,
    %c3_i32_194 = arith.constant 3 : i32
    %cst_195 = arith.constant dense<0.000000e+00> : vector<8x512xf32>
    %538 = tpu.matmul %532, %446, %cst_195 {dimension_numbers = #tpu.dot_dimension_numbers<[1], [0], [0], [1], [0, 0, 1, 1], [], []>} : vector<8x128xf32>, vector<128x512xf32>, vector<8x512xf32> -> vector<8x512xf32>
    %539 = arith.index_cast %c3_i32_194 : i32 to index
    %c0_196 = arith.constant 0 : index
    %c0_197 = arith.constant 0 : index
    %540 = vector.load %arg19[%539, %c0_196, %c0_197] : memref<8x8x512xf32, #tpu.memory_space<vmem>>, vector<1x8x512xf32>
    %541 = vector.shape_cast %540 : vector<1x8x512xf32> to vector<8x512xf32>
    %542 = arith.addf %538, %541 : vector<8x512xf32>
    %543 = vector.extract_strided_slice %542 {offsets = [0, 0], sizes = [8, 384], strides = [1, 1]} : vector<8x512xf32> to vector<8x384xf32>
    %544 = arith.negf %543 : vector<8x384xf32>
    %545 = math.exp %544 : vector<8x384xf32>
    %cst_198 = arith.constant 1.000000e+00 : f32
    %546 = vector.broadcast %cst_198 : f32 to vector<8x384xf32>
    %547 = arith.addf %546, %545 : vector<8x384xf32>
    %548 = arith.divf %546, %547 : vector<8x384xf32>
    %549 = vector.extract_strided_slice %548 {offsets = [0, 0], sizes = [8, 128], strides = [1, 1]} : vector<8x384xf32> to vector<8x128xf32>
    %550 = vector.extract_strided_slice %548 {offsets = [0, 128], sizes = [8, 128], strides = [1, 1]} : vector<8x384xf32> to vector<8x128xf32>
    %551 = vector.extract_strided_slice %548 {offsets = [0, 256], sizes = [8, 128], strides = [1, 1]} : vector<8x384xf32> to vector<8x128xf32>
    %552 = vector.extract_strided_slice %542 {offsets = [0, 384], sizes = [8, 128], strides = [1, 1]} : vector<8x512xf32> to vector<8x128xf32>
    %553 = math.tanh %552 : vector<8x128xf32>
    %554 = arith.mulf %550, %530 : vector<8x128xf32>
    %555 = arith.mulf %549, %553 : vector<8x128xf32>
    %556 = arith.addf %554, %555 : vector<8x128xf32>
    %557 = math.tanh %556 : vector<8x128xf32>
    %558 = arith.mulf %551, %557 : vector<8x128xf32>
    %c0_i32_199 = arith.constant 0 : i32
    %559 = arith.addi %c0_i32_199, %c3_i32_194 : i32
    %560 = arith.index_cast %559 : i32 to index
    %c0_200 = arith.constant 0 : index
    %c0_201 = arith.constant 0 : index
    %561 = vector.load %arg20[%560, %c0_200, %c0_201] : memref<8x8x128xf32, #tpu.memory_space<vmem>>, vector<1x8x128xf32>
    %562 = vector.shape_cast %561 : vector<1x8x128xf32> to vector<8x128xf32>
    %563 = vector.shape_cast %558 : vector<8x128xf32> to vector<1x8x128xf32>
    tpu.vector_store %arg20[%560, %c0_200, %c0_201], %563 {strides = array<i32>} : memref<8x8x128xf32, #tpu.memory_space<vmem>>, vector<1x8x128xf32>,
    %c4_i32_202 = arith.constant 4 : i32
    %cst_203 = arith.constant dense<0.000000e+00> : vector<8x512xf32>
    %564 = tpu.matmul %558, %446, %cst_203 {dimension_numbers = #tpu.dot_dimension_numbers<[1], [0], [0], [1], [0, 0, 1, 1], [], []>} : vector<8x128xf32>, vector<128x512xf32>, vector<8x512xf32> -> vector<8x512xf32>
    %565 = arith.index_cast %c4_i32_202 : i32 to index
    %c0_204 = arith.constant 0 : index
    %c0_205 = arith.constant 0 : index
    %566 = vector.load %arg19[%565, %c0_204, %c0_205] : memref<8x8x512xf32, #tpu.memory_space<vmem>>, vector<1x8x512xf32>
    %567 = vector.shape_cast %566 : vector<1x8x512xf32> to vector<8x512xf32>
    %568 = arith.addf %564, %567 : vector<8x512xf32>
    %569 = vector.extract_strided_slice %568 {offsets = [0, 0], sizes = [8, 384], strides = [1, 1]} : vector<8x512xf32> to vector<8x384xf32>
    %570 = arith.negf %569 : vector<8x384xf32>
    %571 = math.exp %570 : vector<8x384xf32>
    %cst_206 = arith.constant 1.000000e+00 : f32
    %572 = vector.broadcast %cst_206 : f32 to vector<8x384xf32>
    %573 = arith.addf %572, %571 : vector<8x384xf32>
    %574 = arith.divf %572, %573 : vector<8x384xf32>
    %575 = vector.extract_strided_slice %574 {offsets = [0, 0], sizes = [8, 128], strides = [1, 1]} : vector<8x384xf32> to vector<8x128xf32>
    %576 = vector.extract_strided_slice %574 {offsets = [0, 128], sizes = [8, 128], strides = [1, 1]} : vector<8x384xf32> to vector<8x128xf32>
    %577 = vector.extract_strided_slice %574 {offsets = [0, 256], sizes = [8, 128], strides = [1, 1]} : vector<8x384xf32> to vector<8x128xf32>
    %578 = vector.extract_strided_slice %568 {offsets = [0, 384], sizes = [8, 128], strides = [1, 1]} : vector<8x512xf32> to vector<8x128xf32>
    %579 = math.tanh %578 : vector<8x128xf32>
    %580 = arith.mulf %576, %556 : vector<8x128xf32>
    %581 = arith.mulf %575, %579 : vector<8x128xf32>
    %582 = arith.addf %580, %581 : vector<8x128xf32>
    %583 = math.tanh %582 : vector<8x128xf32>
    %584 = arith.mulf %577, %583 : vector<8x128xf32>
    %c0_i32_207 = arith.constant 0 : i32
    %585 = arith.addi %c0_i32_207, %c4_i32_202 : i32
    %586 = arith.index_cast %585 : i32 to index
    %c0_208 = arith.constant 0 : index
    %c0_209 = arith.constant 0 : index
    %587 = vector.load %arg20[%586, %c0_208, %c0_209] : memref<8x8x128xf32, #tpu.memory_space<vmem>>, vector<1x8x128xf32>
    %588 = vector.shape_cast %587 : vector<1x8x128xf32> to vector<8x128xf32>
    %589 = vector.shape_cast %584 : vector<8x128xf32> to vector<1x8x128xf32>
    tpu.vector_store %arg20[%586, %c0_208, %c0_209], %589 {strides = array<i32>} : memref<8x8x128xf32, #tpu.memory_space<vmem>>, vector<1x8x128xf32>,
    %c5_i32_210 = arith.constant 5 : i32
    %cst_211 = arith.constant dense<0.000000e+00> : vector<8x512xf32>
    %590 = tpu.matmul %584, %446, %cst_211 {dimension_numbers = #tpu.dot_dimension_numbers<[1], [0], [0], [1], [0, 0, 1, 1], [], []>} : vector<8x128xf32>, vector<128x512xf32>, vector<8x512xf32> -> vector<8x512xf32>
    %591 = arith.index_cast %c5_i32_210 : i32 to index
    %c0_212 = arith.constant 0 : index
    %c0_213 = arith.constant 0 : index
    %592 = vector.load %arg19[%591, %c0_212, %c0_213] : memref<8x8x512xf32, #tpu.memory_space<vmem>>, vector<1x8x512xf32>
    %593 = vector.shape_cast %592 : vector<1x8x512xf32> to vector<8x512xf32>
    %594 = arith.addf %590, %593 : vector<8x512xf32>
    %595 = vector.extract_strided_slice %594 {offsets = [0, 0], sizes = [8, 384], strides = [1, 1]} : vector<8x512xf32> to vector<8x384xf32>
    %596 = arith.negf %595 : vector<8x384xf32>
    %597 = math.exp %596 : vector<8x384xf32>
    %cst_214 = arith.constant 1.000000e+00 : f32
    %598 = vector.broadcast %cst_214 : f32 to vector<8x384xf32>
    %599 = arith.addf %598, %597 : vector<8x384xf32>
    %600 = arith.divf %598, %599 : vector<8x384xf32>
    %601 = vector.extract_strided_slice %600 {offsets = [0, 0], sizes = [8, 128], strides = [1, 1]} : vector<8x384xf32> to vector<8x128xf32>
    %602 = vector.extract_strided_slice %600 {offsets = [0, 128], sizes = [8, 128], strides = [1, 1]} : vector<8x384xf32> to vector<8x128xf32>
    %603 = vector.extract_strided_slice %600 {offsets = [0, 256], sizes = [8, 128], strides = [1, 1]} : vector<8x384xf32> to vector<8x128xf32>
    %604 = vector.extract_strided_slice %594 {offsets = [0, 384], sizes = [8, 128], strides = [1, 1]} : vector<8x512xf32> to vector<8x128xf32>
    %605 = math.tanh %604 : vector<8x128xf32>
    %606 = arith.mulf %602, %582 : vector<8x128xf32>
    %607 = arith.mulf %601, %605 : vector<8x128xf32>
    %608 = arith.addf %606, %607 : vector<8x128xf32>
    %609 = math.tanh %608 : vector<8x128xf32>
    %610 = arith.mulf %603, %609 : vector<8x128xf32>
    %c0_i32_215 = arith.constant 0 : i32
    %611 = arith.addi %c0_i32_215, %c5_i32_210 : i32
    %612 = arith.index_cast %611 : i32 to index
    %c0_216 = arith.constant 0 : index
    %c0_217 = arith.constant 0 : index
    %613 = vector.load %arg20[%612, %c0_216, %c0_217] : memref<8x8x128xf32, #tpu.memory_space<vmem>>, vector<1x8x128xf32>
    %614 = vector.shape_cast %613 : vector<1x8x128xf32> to vector<8x128xf32>
    %615 = vector.shape_cast %610 : vector<8x128xf32> to vector<1x8x128xf32>
    tpu.vector_store %arg20[%612, %c0_216, %c0_217], %615 {strides = array<i32>} : memref<8x8x128xf32, #tpu.memory_space<vmem>>, vector<1x8x128xf32>,
    %c6_i32_218 = arith.constant 6 : i32
    %cst_219 = arith.constant dense<0.000000e+00> : vector<8x512xf32>
    %616 = tpu.matmul %610, %446, %cst_219 {dimension_numbers = #tpu.dot_dimension_numbers<[1], [0], [0], [1], [0, 0, 1, 1], [], []>} : vector<8x128xf32>, vector<128x512xf32>, vector<8x512xf32> -> vector<8x512xf32>
    %617 = arith.index_cast %c6_i32_218 : i32 to index
    %c0_220 = arith.constant 0 : index
    %c0_221 = arith.constant 0 : index
    %618 = vector.load %arg19[%617, %c0_220, %c0_221] : memref<8x8x512xf32, #tpu.memory_space<vmem>>, vector<1x8x512xf32>
    %619 = vector.shape_cast %618 : vector<1x8x512xf32> to vector<8x512xf32>
    %620 = arith.addf %616, %619 : vector<8x512xf32>
    %621 = vector.extract_strided_slice %620 {offsets = [0, 0], sizes = [8, 384], strides = [1, 1]} : vector<8x512xf32> to vector<8x384xf32>
    %622 = arith.negf %621 : vector<8x384xf32>
    %623 = math.exp %622 : vector<8x384xf32>
    %cst_222 = arith.constant 1.000000e+00 : f32
    %624 = vector.broadcast %cst_222 : f32 to vector<8x384xf32>
    %625 = arith.addf %624, %623 : vector<8x384xf32>
    %626 = arith.divf %624, %625 : vector<8x384xf32>
    %627 = vector.extract_strided_slice %626 {offsets = [0, 0], sizes = [8, 128], strides = [1, 1]} : vector<8x384xf32> to vector<8x128xf32>
    %628 = vector.extract_strided_slice %626 {offsets = [0, 128], sizes = [8, 128], strides = [1, 1]} : vector<8x384xf32> to vector<8x128xf32>
    %629 = vector.extract_strided_slice %626 {offsets = [0, 256], sizes = [8, 128], strides = [1, 1]} : vector<8x384xf32> to vector<8x128xf32>
    %630 = vector.extract_strided_slice %620 {offsets = [0, 384], sizes = [8, 128], strides = [1, 1]} : vector<8x512xf32> to vector<8x128xf32>
    %631 = math.tanh %630 : vector<8x128xf32>
    %632 = arith.mulf %628, %608 : vector<8x128xf32>
    %633 = arith.mulf %627, %631 : vector<8x128xf32>
    %634 = arith.addf %632, %633 : vector<8x128xf32>
    %635 = math.tanh %634 : vector<8x128xf32>
    %636 = arith.mulf %629, %635 : vector<8x128xf32>
    %c0_i32_223 = arith.constant 0 : i32
    %637 = arith.addi %c0_i32_223, %c6_i32_218 : i32
    %638 = arith.index_cast %637 : i32 to index
    %c0_224 = arith.constant 0 : index
    %c0_225 = arith.constant 0 : index
    %639 = vector.load %arg20[%638, %c0_224, %c0_225] : memref<8x8x128xf32, #tpu.memory_space<vmem>>, vector<1x8x128xf32>
    %640 = vector.shape_cast %639 : vector<1x8x128xf32> to vector<8x128xf32>
    %641 = vector.shape_cast %636 : vector<8x128xf32> to vector<1x8x128xf32>
    tpu.vector_store %arg20[%638, %c0_224, %c0_225], %641 {strides = array<i32>} : memref<8x8x128xf32, #tpu.memory_space<vmem>>, vector<1x8x128xf32>,
    %c7_i32_226 = arith.constant 7 : i32
    %cst_227 = arith.constant dense<0.000000e+00> : vector<8x512xf32>
    %642 = tpu.matmul %636, %446, %cst_227 {dimension_numbers = #tpu.dot_dimension_numbers<[1], [0], [0], [1], [0, 0, 1, 1], [], []>} : vector<8x128xf32>, vector<128x512xf32>, vector<8x512xf32> -> vector<8x512xf32>
    %643 = arith.index_cast %c7_i32_226 : i32 to index
    %c0_228 = arith.constant 0 : index
    %c0_229 = arith.constant 0 : index
    %644 = vector.load %arg19[%643, %c0_228, %c0_229] : memref<8x8x512xf32, #tpu.memory_space<vmem>>, vector<1x8x512xf32>
    %645 = vector.shape_cast %644 : vector<1x8x512xf32> to vector<8x512xf32>
    %646 = arith.addf %642, %645 : vector<8x512xf32>
    %647 = vector.extract_strided_slice %646 {offsets = [0, 0], sizes = [8, 384], strides = [1, 1]} : vector<8x512xf32> to vector<8x384xf32>
    %648 = arith.negf %647 : vector<8x384xf32>
    %649 = math.exp %648 : vector<8x384xf32>
    %cst_230 = arith.constant 1.000000e+00 : f32
    %650 = vector.broadcast %cst_230 : f32 to vector<8x384xf32>
    %651 = arith.addf %650, %649 : vector<8x384xf32>
    %652 = arith.divf %650, %651 : vector<8x384xf32>
    %653 = vector.extract_strided_slice %652 {offsets = [0, 0], sizes = [8, 128], strides = [1, 1]} : vector<8x384xf32> to vector<8x128xf32>
    %654 = vector.extract_strided_slice %652 {offsets = [0, 128], sizes = [8, 128], strides = [1, 1]} : vector<8x384xf32> to vector<8x128xf32>
    %655 = vector.extract_strided_slice %652 {offsets = [0, 256], sizes = [8, 128], strides = [1, 1]} : vector<8x384xf32> to vector<8x128xf32>
    %656 = vector.extract_strided_slice %646 {offsets = [0, 384], sizes = [8, 128], strides = [1, 1]} : vector<8x512xf32> to vector<8x128xf32>
    %657 = math.tanh %656 : vector<8x128xf32>
    %658 = arith.mulf %654, %634 : vector<8x128xf32>
    %659 = arith.mulf %653, %657 : vector<8x128xf32>
    %660 = arith.addf %658, %659 : vector<8x128xf32>
    %661 = math.tanh %660 : vector<8x128xf32>
    %662 = arith.mulf %655, %661 : vector<8x128xf32>
    %c0_i32_231 = arith.constant 0 : i32
    %663 = arith.addi %c0_i32_231, %c7_i32_226 : i32
    %664 = arith.index_cast %663 : i32 to index
    %c0_232 = arith.constant 0 : index
    %c0_233 = arith.constant 0 : index
    %665 = vector.load %arg20[%664, %c0_232, %c0_233] : memref<8x8x128xf32, #tpu.memory_space<vmem>>, vector<1x8x128xf32>
    %666 = vector.shape_cast %665 : vector<1x8x128xf32> to vector<8x128xf32>
    %667 = vector.shape_cast %662 : vector<8x128xf32> to vector<1x8x128xf32>
    tpu.vector_store %arg20[%664, %c0_232, %c0_233], %667 {strides = array<i32>} : memref<8x8x128xf32, #tpu.memory_space<vmem>>, vector<1x8x128xf32>,
    %c8_i32_234 = arith.constant 8 : i32
    %c0_235 = arith.constant 0 : index
    %c0_236 = arith.constant 0 : index
    %c0_237 = arith.constant 0 : index
    %668 = vector.load %arg20[%c0_235, %c0_236, %c0_237] : memref<8x8x128xf32, #tpu.memory_space<vmem>>, vector<8x8x100xf32>
    %c0_238 = arith.constant 0 : index
    %c0_239 = arith.constant 0 : index
    %c0_240 = arith.constant 0 : index
    %669 = vector.load %arg16[%c0_238, %c0_239, %c0_240] : memref<8x8x100xf32, #tpu.memory_space<vmem>>, vector<8x8x100xf32>
    tpu.vector_store %arg16[%c0_238, %c0_239, %c0_240], %668 {strides = array<i32>} : memref<8x8x100xf32, #tpu.memory_space<vmem>>, vector<8x8x100xf32>,
    %c0_241 = arith.constant 0 : index
    %c0_242 = arith.constant 0 : index
    %670 = vector.load %arg6[%c0_241, %c0_242] : memref<128x128xf32, #tpu.memory_space<vmem>>, vector<128x128xf32>
    %cst_243 = arith.constant dense<0.000000e+00> : vector<8x128xf32>
    %671 = tpu.matmul %662, %670, %cst_243 {dimension_numbers = #tpu.dot_dimension_numbers<[1], [0], [0], [1], [0, 0, 1, 1], [], []>} : vector<8x128xf32>, vector<128x128xf32>, vector<8x128xf32> -> vector<8x128xf32>
    %c0_244 = arith.constant 0 : index
    %c0_245 = arith.constant 0 : index
    %672 = vector.load %arg7[%c0_244, %c0_245] : memref<1x128xf32, #tpu.memory_space<vmem>>, vector<1x128xf32>
    %673 = vector.broadcast %672 : vector<1x128xf32> to vector<8x128xf32>
    %674 = arith.addf %671, %673 : vector<8x128xf32>
    %c0_246 = arith.constant 0 : index
    %c0_247 = arith.constant 0 : index
    %675 = vector.load %arg8[%c0_246, %c0_247] : memref<1x128xf32, #tpu.memory_space<vmem>>, vector<1x128xf32>
    %676 = vector.broadcast %675 : vector<1x128xf32> to vector<8x128xf32>
    %677 = arith.mulf %674, %676 : vector<8x128xf32>
    %c0_248 = arith.constant 0 : index
    %c0_249 = arith.constant 0 : index
    %678 = vector.load %arg9[%c0_248, %c0_249] : memref<1x128xf32, #tpu.memory_space<vmem>>, vector<1x128xf32>
    %679 = vector.broadcast %678 : vector<1x128xf32> to vector<8x128xf32>
    %680 = arith.addf %677, %679 : vector<8x128xf32>
    %cst_250 = arith.constant 0.000000e+00 : f32
    %681 = vector.broadcast %cst_250 : f32 to vector<8x128xf32>
    %682 = arith.maximumf %680, %681 : vector<8x128xf32>
    %c0_251 = arith.constant 0 : index
    %c0_252 = arith.constant 0 : index
    %683 = vector.load %arg10[%c0_251, %c0_252] : memref<128x128xf32, #tpu.memory_space<vmem>>, vector<128x128xf32>
    %cst_253 = arith.constant dense<0.000000e+00> : vector<8x128xf32>
    %684 = tpu.matmul %682, %683, %cst_253 {dimension_numbers = #tpu.dot_dimension_numbers<[1], [0], [0], [1], [0, 0, 1, 1], [], []>} : vector<8x128xf32>, vector<128x128xf32>, vector<8x128xf32> -> vector<8x128xf32>
    %c0_254 = arith.constant 0 : index
    %c0_255 = arith.constant 0 : index
    %685 = vector.load %arg11[%c0_254, %c0_255] : memref<1x128xf32, #tpu.memory_space<vmem>>, vector<1x128xf32>
    %686 = vector.broadcast %685 : vector<1x128xf32> to vector<8x128xf32>
    %687 = arith.addf %684, %686 : vector<8x128xf32>
    %c0_256 = arith.constant 0 : index
    %c0_257 = arith.constant 0 : index
    %688 = vector.load %arg12[%c0_256, %c0_257] : memref<1x128xf32, #tpu.memory_space<vmem>>, vector<1x128xf32>
    %689 = vector.broadcast %688 : vector<1x128xf32> to vector<8x128xf32>
    %690 = arith.mulf %687, %689 : vector<8x128xf32>
    %c0_258 = arith.constant 0 : index
    %c0_259 = arith.constant 0 : index
    %691 = vector.load %arg13[%c0_258, %c0_259] : memref<1x128xf32, #tpu.memory_space<vmem>>, vector<1x128xf32>
    %692 = vector.broadcast %691 : vector<1x128xf32> to vector<8x128xf32>
    %693 = arith.addf %690, %692 : vector<8x128xf32>
    %cst_260 = arith.constant 0.000000e+00 : f32
    %694 = vector.broadcast %cst_260 : f32 to vector<8x128xf32>
    %695 = arith.maximumf %693, %694 : vector<8x128xf32>
    %c0_261 = arith.constant 0 : index
    %c0_262 = arith.constant 0 : index
    %696 = vector.load %arg17[%c0_261, %c0_262] : memref<8x128xf32, #tpu.memory_space<vmem>>, vector<8x128xf32>
    tpu.vector_store %arg17[%c0_261, %c0_262], %695 {strides = array<i32>} : memref<8x128xf32, #tpu.memory_space<vmem>>, vector<8x128xf32>,
    %c0_263 = arith.constant 0 : index
    %c0_264 = arith.constant 0 : index
    %697 = vector.load %arg14[%c0_263, %c0_264] : memref<128x128xf32, #tpu.memory_space<vmem>>, vector<128x128xf32>
    %cst_265 = arith.constant dense<0.000000e+00> : vector<8x128xf32>
    %698 = tpu.matmul %695, %697, %cst_265 {dimension_numbers = #tpu.dot_dimension_numbers<[1], [0], [0], [1], [0, 0, 1, 1], [], []>} : vector<8x128xf32>, vector<128x128xf32>, vector<8x128xf32> -> vector<8x128xf32>
    %c0_266 = arith.constant 0 : index
    %c0_267 = arith.constant 0 : index
    %699 = vector.load %arg15[%c0_266, %c0_267] : memref<1x128xf32, #tpu.memory_space<vmem>>, vector<1x128xf32>
    %700 = vector.broadcast %699 : vector<1x128xf32> to vector<8x128xf32>
    %701 = arith.addf %698, %700 : vector<8x128xf32>
    %c0_268 = arith.constant 0 : index
    %c0_269 = arith.constant 0 : index
    %702 = vector.load %arg18[%c0_268, %c0_269] : memref<8x128xf32, #tpu.memory_space<vmem>>, vector<8x128xf32>
    tpu.vector_store %arg18[%c0_268, %c0_269], %701 {strides = array<i32>} : memref<8x128xf32, #tpu.memory_space<vmem>>, vector<8x128xf32>,
    return
  }
  func.func @transform_0(%arg0: i32) -> (i32, i32, i32) {
    %c0_i32 = arith.constant 0 : i32
    %c0_i32_0 = arith.constant 0 : i32
    %c0_i32_1 = arith.constant 0 : i32
    return %c0_i32, %arg0, %c0_i32_0 : i32, i32, i32
  }
  func.func @transform_1(%arg0: i32) -> (i32, i32) {
    %c0_i32 = arith.constant 0 : i32
    %c0_i32_0 = arith.constant 0 : i32
    %c0_i32_1 = arith.constant 0 : i32
    return %c0_i32, %c0_i32_0 : i32, i32
  }
  func.func @transform_2(%arg0: i32) -> (i32, i32, i32) {
    %c0_i32 = arith.constant 0 : i32
    %c0_i32_0 = arith.constant 0 : i32
    %c0_i32_1 = arith.constant 0 : i32
    %c0_i32_2 = arith.constant 0 : i32
    return %c0_i32, %c0_i32_0, %c0_i32_1 : i32, i32, i32
  }
  func.func @transform_3(%arg0: i32) -> (i32, i32, i32) {
    %c0_i32 = arith.constant 0 : i32
    %c0_i32_0 = arith.constant 0 : i32
    %c0_i32_1 = arith.constant 0 : i32
    %c0_i32_2 = arith.constant 0 : i32
    return %c0_i32, %c0_i32_0, %c0_i32_1 : i32, i32, i32
  }
  func.func @transform_4(%arg0: i32) -> (i32, i32, i32) {
    %c0_i32 = arith.constant 0 : i32
    %c0_i32_0 = arith.constant 0 : i32
    %c0_i32_1 = arith.constant 0 : i32
    %c0_i32_2 = arith.constant 0 : i32
    return %c0_i32, %c0_i32_0, %c0_i32_1 : i32, i32, i32
  }
  func.func @transform_5(%arg0: i32) -> (i32, i32) {
    %c0_i32 = arith.constant 0 : i32
    %c0_i32_0 = arith.constant 0 : i32
    %c0_i32_1 = arith.constant 0 : i32
    return %c0_i32, %c0_i32_0 : i32, i32
  }
  func.func @transform_6(%arg0: i32) -> (i32, i32) {
    %c0_i32 = arith.constant 0 : i32
    %c0_i32_0 = arith.constant 0 : i32
    %c0_i32_1 = arith.constant 0 : i32
    return %c0_i32, %c0_i32_0 : i32, i32
  }
  func.func @transform_7(%arg0: i32) -> (i32, i32) {
    %c0_i32 = arith.constant 0 : i32
    %c0_i32_0 = arith.constant 0 : i32
    %c0_i32_1 = arith.constant 0 : i32
    return %c0_i32, %c0_i32_0 : i32, i32
  }
  func.func @transform_8(%arg0: i32) -> (i32, i32) {
    %c0_i32 = arith.constant 0 : i32
    %c0_i32_0 = arith.constant 0 : i32
    %c0_i32_1 = arith.constant 0 : i32
    return %c0_i32, %c0_i32_0 : i32, i32
  }
  func.func @transform_9(%arg0: i32) -> (i32, i32) {
    %c0_i32 = arith.constant 0 : i32
    %c0_i32_0 = arith.constant 0 : i32
    %c0_i32_1 = arith.constant 0 : i32
    return %c0_i32, %c0_i32_0 : i32, i32
  }
  func.func @transform_10(%arg0: i32) -> (i32, i32) {
    %c0_i32 = arith.constant 0 : i32
    %c0_i32_0 = arith.constant 0 : i32
    %c0_i32_1 = arith.constant 0 : i32
    return %c0_i32, %c0_i32_0 : i32, i32
  }
  func.func @transform_11(%arg0: i32) -> (i32, i32) {
    %c0_i32 = arith.constant 0 : i32
    %c0_i32_0 = arith.constant 0 : i32
    %c0_i32_1 = arith.constant 0 : i32
    return %c0_i32, %c0_i32_0 : i32, i32
  }
  func.func @transform_12(%arg0: i32) -> (i32, i32) {
    %c0_i32 = arith.constant 0 : i32
    %c0_i32_0 = arith.constant 0 : i32
    %c0_i32_1 = arith.constant 0 : i32
    return %c0_i32, %c0_i32_0 : i32, i32
  }
  func.func @transform_13(%arg0: i32) -> (i32, i32) {
    %c0_i32 = arith.constant 0 : i32
    %c0_i32_0 = arith.constant 0 : i32
    %c0_i32_1 = arith.constant 0 : i32
    return %c0_i32, %c0_i32_0 : i32, i32
  }
  func.func @transform_14(%arg0: i32) -> (i32, i32) {
    %c0_i32 = arith.constant 0 : i32
    %c0_i32_0 = arith.constant 0 : i32
    %c0_i32_1 = arith.constant 0 : i32
    return %c0_i32, %c0_i32_0 : i32, i32
  }
  func.func @transform_15(%arg0: i32) -> (i32, i32, i32) {
    %c0_i32 = arith.constant 0 : i32
    %c0_i32_0 = arith.constant 0 : i32
    %c0_i32_1 = arith.constant 0 : i32
    return %c0_i32, %arg0, %c0_i32_0 : i32, i32, i32
  }
  func.func @transform_16(%arg0: i32) -> (i32, i32) {
    %c0_i32 = arith.constant 0 : i32
    %c0_i32_0 = arith.constant 0 : i32
    return %arg0, %c0_i32 : i32, i32
  }
  func.func @transform_17(%arg0: i32) -> (i32, i32) {
    %c0_i32 = arith.constant 0 : i32
    %c0_i32_0 = arith.constant 0 : i32
    return %arg0, %c0_i32 : i32, i32
  }
}

</mosaic_0001>

<bundles_post_ra>
// kernel: tpu_custom_call.1
= control target key start
LH: loop header
LB: loop body
LE: loop exit
PB: predicated region body
PF: predicated region fallthrough
CT: control target
= control target key end

     0   :  { %s10195_s0 = inlined_call_operand.hbm [shape: f32[8,8,32], index: 0, kind: input, shape index: {}]   ;;  %s10196_s1 = inlined_call_operand.hbm [shape: f32[32,512], index: 1, kind: input, shape index: {}]   ;;  %s10197_s2 = inlined_call_operand.hbm [shape: f32[2,128,512], index: 2, kind: input, shape index: {}]   ;;  %s10198_s3 = inlined_call_operand.hbm [shape: f32[3,128,512], index: 3, kind: input, shape index: {}]   ;;  %s10199_s4 = inlined_call_operand.hbm [shape: f32[3,1,512], index: 4, kind: input, shape index: {}]   ;;  %s10200_s5 = inlined_call_operand.hbm [shape: f32[128,128], index: 5, kind: input, shape index: {}]   ;;  %s10201_s6 = inlined_call_operand.vmem [shape: f32[1,128], index: 6, kind: input, shape index: {}]   ;;  %s10202_s7 = inlined_call_operand.vmem [shape: f32[1,128], index: 7, kind: input, shape index: {}]   ;;  %s10203_s8 = inlined_call_operand.vmem [shape: f32[1,128], index: 8, kind: input, shape index: {}]   ;;  %s10204_s9 = inlined_call_operand.hbm [shape: f32[128,128], index: 9, kind: input, shape index: {}]   ;;  %s10205_s10 = inlined_call_operand.vmem [shape: f32[1,128], index: 10, kind: input, shape index: {}]   ;;  %s10206_s11 = inlined_call_operand.vmem [shape: f32[1,128], index: 11, kind: input, shape index: {}]   ;;  %s10207_s12 = inlined_call_operand.vmem [shape: f32[1,128], index: 12, kind: input, shape index: {}]   ;;  %s10208_s13 = inlined_call_operand.hbm [shape: f32[128,128], index: 13, kind: input, shape index: {}]   ;;  %s10209_s14 = inlined_call_operand.vmem [shape: f32[1,128], index: 14, kind: input, shape index: {}]   ;;  %s10210_s15 = inlined_call_operand.hbm [shape: f32[8,8,100], index: 15, kind: output, shape index: {0}]   ;;  %s10211_s16 = inlined_call_operand.hbm [shape: f32[8,128], index: 16, kind: output, shape index: {1}]   ;;  %s10212_s17 = inlined_call_operand.hbm [shape: f32[8,128], index: 17, kind: output, shape index: {2}]  }
   0x1   :  { %10529 = sst [smem:[#allocation86_spill]] %s10195_s0 }
   0x2   :  { %10530 = sst [smem:[#allocation87_spill]] %s10196_s1 }
   0x3   :  { %23 = vsyncpa [#allocation5], 0 }
   0x4   :  { %24 = vsyncpa [#allocation8], 0 }
   0x5   :  { %25 = vsyncpa [#allocation11], 0 }
   0x6   :  { %26 = vsyncpa [#allocation14], 0 }
   0x7   :  { %27 = vsyncpa [#allocation17], 0 }
   0x8   :  { %28 = vsyncpa [#allocation6], 0 }
   0x9   :  { %29 = vsyncpa [#allocation20], 0  ;;  %s6972_s24 = smov [#allocation7]  }
   0xa   :  { %s47_s25 = sshll.u32 %s6972_s24, 4  ;;  %s48_s25 = int_to_ptr.vmem [resolvable:$true] %s47_s25 }
   0xb   :  { %s6746_s26 = scalar_lea.vmem %s48_s25, 2048  ;;  %p6751_p1 = scmp.lt.s32.totalorder %s48_s25, %s48_s25 }
   0xc   :  { %p6747_p0 = scmp.ne.s32.totalorder %s48_s25, %s6746_s26  ;;  %p6752_p2 = scmp.lt.s32.totalorder %s6746_s26, %s6746_s26 }
   0xe   :  { %p6753_p3 = por %p6752_p2, %p6751_p1 }
  0x10   :  { %p6754_p4 = pnand %p6753_p3, %p6747_p0 }
  0x12   :  { %6757 = shalt.err (!%p6754_p4)
}
  0x13   :  { %s6973_s27 = smov 512   ;;  %s6974_s28 = smov 32  }
  0x14   :  { %s10531_s30 = sld [smem:[#allocation87_spill]]  ;;  %s6975_s18 = smov [#allocation10]  }
  0x15   :  { %s71_s19 = sshll.u32 %s6975_s18, 4  ;;  %s72_s19 = int_to_ptr.vmem [resolvable:$true] %s71_s19 }
  0x16   :  { %s6766_s1 = scalar_lea.vmem %s72_s19, 24576  ;;  %p6771_p6 = scmp.lt.s32.totalorder %s72_s19, %s72_s19 }
  0x17   :  { %p6767_p5 = scmp.ne.s32.totalorder %s72_s19, %s6766_s1  ;;  %p6772_p7 = scmp.lt.s32.totalorder %s6766_s1, %s6766_s1 }
  0x19   :  { %p6773_p8 = por %p6772_p7, %p6771_p6 }
  0x1a   :  { %53 = dma.hbm_to_vmem [thread:$0]  %s10531_s30, 2048, %s48_s25, [#allocation8], %s6973_s27, %s6973_s27, %s6974_s28  }
  0x1b   :  { %p6774_p9 = pnand %p6773_p8, %p6767_p5 }
  0x1d   :  { %6777 = shalt.err (!%p6774_p9)
}
  0x1e   :  { %77 = dma.hbm_to_vmem [thread:$0]  %s10198_s3, 24576, %s72_s19, [#allocation11], %s6973_s27, %s6973_s27, %s6974_s28  }
  0x1f   :  { %s6976_s22 = smov [#allocation13]   ;;  %s6977_s24 = smov [#allocation4]  }
  0x20   :  { %s95_s23 = sshll.u32 %s6976_s22, 4  ;;  %s35_s25 = sshll.u32 %s6977_s24, 4  ;;  %s96_s23 = int_to_ptr.vmem [resolvable:$true] %s95_s23  ;;  %s36_s25 = int_to_ptr.vmem [resolvable:$true] %s35_s25 }
  0x21   :  { %s6786_s26 = scalar_lea.vmem %s96_s23, 2048  ;;  %p6791_p11 = scmp.lt.s32.totalorder %s96_s23, %s96_s23 }
  0x22   :  { %p6787_p10 = scmp.ne.s32.totalorder %s96_s23, %s6786_s26  ;;  %p6792_p12 = scmp.lt.s32.totalorder %s6786_s26, %s6786_s26 }
  0x24   :  { %p6793_p13 = por %p6792_p12, %p6791_p11 }
  0x26   :  { %p6794_p0 = pnand %p6793_p13, %p6787_p10 }
  0x28   :  { %6797 = shalt.err (!%p6794_p0)
}
  0x29   :  { %s6978_s29 = smov 128   ;;  %s6979_s0 = smov 8  }
  0x2a   :  { %101 = dma.hbm_to_vmem [thread:$0]  %s10200_s5, 2048, %s96_s23, [#allocation14], %s6978_s29, %s6978_s29, %s6979_s0  }
  0x2b   :  { %s6806_s18 = scalar_lea.vmem %s36_s25, 1024  ;;  %p6811_p2 = scmp.lt.s32.totalorder %s36_s25, %s36_s25 }
  0x2c   :  { %p6807_p1 = scmp.ne.s32.totalorder %s36_s25, %s6806_s18  ;;  %p6812_p3 = scmp.lt.s32.totalorder %s6806_s18, %s6806_s18 }
  0x2e   :  { %p6813_p4 = por %p6812_p3, %p6811_p2 }
  0x30   :  { %p6814_p5 = pnand %p6813_p4, %p6807_p1 }
  0x32   :  { %6817 = shalt.err (!%p6814_p5)
}
  0x33   :  { %s10532_s20 = sld [smem:[#allocation86_spill]]  ;;  %s6980_s21 = smov [#allocation9]  }
  0x34   :  { %s59_s22 = sshll.u32 %s6980_s21, 4  ;;  %s6981_s24 = smov [#allocation12]   ;;  %s60_s22 = int_to_ptr.vmem [resolvable:$true] %s59_s22 }
  0x35   :  { %s83_s26 = sshll.u32 %s6981_s24, 4  ;;  %s6826_s5 = scalar_lea.vmem %s60_s22, 16384  ;;  %s84_s26 = int_to_ptr.vmem [resolvable:$true] %s83_s26 }
  0x36   :  { %p6827_p6 = scmp.ne.s32.totalorder %s60_s22, %s6826_s5  ;;  %p6831_p7 = scmp.lt.s32.totalorder %s60_s22, %s60_s22 }
  0x37   :  { %p6832_p8 = scmp.lt.s32.totalorder %s6826_s5, %s6826_s5 }
  0x39   :  { %41 = dma.hbm_to_vmem [thread:$0]  %s10532_s20, 1024, %s36_s25, [#allocation5], %s6978_s29, %s6978_s29, %s6979_s0  }
  0x3a   :  { %p6833_p9 = por %p6832_p8, %p6831_p7 }
  0x3c   :  { %p6834_p10 = pnand %p6833_p9, %p6827_p6 }
  0x3e   :  { %6837 = shalt.err (!%p6834_p10)
}
  0x3f   :  { %65 = dma.hbm_to_vmem [thread:$0]  %s10197_s2, 16384, %s60_s22, [#allocation8], %s6973_s27, %s6973_s27, %s6974_s28  }
  0x40   :  { %s6846_s25 = scalar_lea.vmem %s84_s26, 192  ;;  %p6851_p12 = scmp.lt.s32.totalorder %s84_s26, %s84_s26 }
  0x41   :  { %p6847_p11 = scmp.ne.s32.totalorder %s84_s26, %s6846_s25  ;;  %p6852_p13 = scmp.lt.s32.totalorder %s6846_s25, %s6846_s25 }
  0x43   :  { %p6853_p0 = por %p6852_p13, %p6851_p12 }
  0x45   :  { %p6854_p1 = pnand %p6853_p0, %p6847_p11 }
  0x47   :  { %6857 = shalt.err (!%p6854_p1)
}
  0x48   :  { %s6982_s3 = smov 64   ;;  %s6983_s18 = smov 4  }
  0x49   :  { %89 = dma.hbm_to_vmem [thread:$0]  %s10199_s4, 192, %s84_s26, [#allocation11], %s6982_s3, %s6982_s3, %s6983_s18  }
  0x4a   :  { %s6984_s20 = smov [#allocation15]   ;;  %s6985_s24 = smov [#allocation16]  }
  0x4b   :  { %s113_s21 = sshll.u32 %s6984_s20, 4  ;;  %s131_s5 = sshll.u32 %s6985_s24, 4  ;;  %s114_s21 = int_to_ptr.vmem [resolvable:$true] %s113_s21  ;;  %s132_s5 = int_to_ptr.vmem [resolvable:$true] %s131_s5 }
  0x4c   :  { %s6866_s2 = scalar_lea.vmem %s114_s21, 2048  ;;  %p6871_p3 = scmp.lt.s32.totalorder %s114_s21, %s114_s21 }
  0x4d   :  { %p6867_p2 = scmp.ne.s32.totalorder %s114_s21, %s6866_s2  ;;  %p6872_p4 = scmp.lt.s32.totalorder %s6866_s2, %s6866_s2 }
  0x4f   :  { %p6873_p5 = por %p6872_p4, %p6871_p3 }
  0x51   :  { %p6874_p6 = pnand %p6873_p5, %p6867_p2 }
  0x53   :  { %6877 = shalt.err (!%p6874_p6)
}
  0x54   :  { %119 = dma.hbm_to_vmem [thread:$0]  %s10204_s9, 2048, %s114_s21, [#allocation14], %s6978_s29, %s6978_s29, %s6979_s0  }
  0x55   :  { %s6886_s4 = scalar_lea.vmem %s132_s5, 2048  ;;  %p6891_p8 = scmp.lt.s32.totalorder %s132_s5, %s132_s5 }
  0x56   :  { %p6887_p7 = scmp.ne.s32.totalorder %s132_s5, %s6886_s4  ;;  %p6892_p9 = scmp.lt.s32.totalorder %s6886_s4, %s6886_s4 }
  0x58   :  { %p6893_p10 = por %p6892_p9, %p6891_p8 }
  0x5a   :  { %p6894_p11 = pnand %p6893_p10, %p6887_p7 }
  0x5c   :  { %6897 = shalt.err (!%p6894_p11)
}
  0x5d   :  { %137 = dma.hbm_to_vmem [thread:$0]  %s10208_s13, 2048, %s132_s5, [#allocation17], %s6978_s29, %s6978_s29, %s6979_s0  }
  0x5e   :  { %6958 = dma.done.wait [#allocation5], 1024  }
  0x5f   :  { %6959 = vsyncadd [#allocation5], 4294966272 }
  0x60   :  { %6960 = dma.done.wait [#allocation8], 18432  }
  0x61   :  { %6961 = vsyncadd [#allocation8], 4294948864 }
  0x62   :  { %6962 = dma.done.wait [#allocation11], 24768  }
  0x63   :  { %6963 = vsyncadd [#allocation11], 4294942528 }
  0x64   :  { %6964 = dma.done.wait [#allocation14], 4096  }
  0x65   :  { %6965 = vsyncadd [#allocation14], 4294963200 }
  0x66   :  { %6966 = dma.done.wait [#allocation17], 2048  }
  0x67   :  { %6967 = vsyncadd [#allocation17], 4294965248  ;;  %v10213_v0 = vmov 0.0   ;;  %v250_v1 = vld [vmem:[#allocation7 + $0x68] sm:$0xff]  ;;  %v252_v2 = vld [vmem:[#allocation7 + $0x78] sm:$0xff]  ;;  %vm274_vm0 = vcmask 261120  }
  0x68   :  { %363 = vmatprep.mubr.f32.mxu0 %v10213_v0  ;;  %476 = vmatprep.mubr.f32.mxu1 %v10213_v0  ;;  %v249_v3 = vld [vmem:[#allocation7 + $0x60] sm:$0xff]  ;;  %v251_v4 = vld [vmem:[#allocation7 + $0x70] sm:$0xff]  ;;  %v246_v5 = vld [vmem:[#allocation7 + $0x48] sm:$0xff]  ;;  %vm5520_vm1 = vcmask 818176   ;;  %vm6987_vm2 = vmmov 0   ;;  %s6988_s20 = smov [#allocation19]  }
  0x69   :  { %323 = vmatprep.subr.mxu0 %v250_v1  ;;  %436 = vmatprep.subr.mxu1 %v252_v2  ;;  %v248_v6 = vld [vmem:[#allocation7 + $0x58] sm:$0xff]  ;;  %v245_v7 = vld [vmem:[#allocation7 + $0x40] sm:$0xff]  ;;  %v247_v8 = vld [vmem:[#allocation7 + $0x50] sm:$0xff]  ;;  %s5862_s21 = sshll.u32 %s6988_s20, 4  ;;  %s6989_s24 = smov [#allocation18]   ;;  %s5863_s21 = int_to_ptr.vmem [resolvable:$true] %s5862_s21 }
  0x6a   :  { %324 = vmatpush1.msra.mxu0 %v249_v3  ;;  %437 = vmatpush1.msra.mxu1 %v251_v4  ;;  %v242_v9 = vld [vmem:[#allocation7 + $0x28] sm:$0xff]  ;;  %v244_v10 = vld [vmem:[#allocation7 + $0x38] sm:$0xff]  ;;  %v241_v11 = vld [vmem:[#allocation7 + $0x20] sm:$0xff]  ;;  %s6898_s5 = scalar_lea.vmem %s5863_s21, 128  ;;  %p6903_p13 = scmp.lt.s32.totalorder %s5863_s21, %s5863_s21 }
  0x6b   :  { %325 = vmatprep.subr.mxu0 %v246_v5  ;;  %438 = vmatprep.subr.mxu1 %v248_v6  ;;  %v243_v12 = vld [vmem:[#allocation7 + $0x30] sm:$0xff]  ;;  %v238_v13 = vld [vmem:[#allocation7 + $0x8] sm:$0xff]  ;;  %v240_v14 = vld [vmem:[#allocation7 + $0x18] sm:$0xff]  ;;  %p6899_p12 = scmp.ne.s32.totalorder %s5863_s21, %s6898_s5  ;;  %p6904_p0 = scmp.lt.s32.totalorder %s6898_s5, %s6898_s5 }
  0x6c   :  { %326 = vmatpush1.msra.mxu0 %v245_v7  ;;  %439 = vmatpush1.msra.mxu1 %v247_v8  ;;  %v237_v15 = vld [vmem:[#allocation7] sm:$0xff]  ;;  %v239_v16 = vld [vmem:[#allocation7 + $0x10] sm:$0xff]  ;;  %v7128_v18 = vld [vmem:[#allocation10 + $0x1e8] sm:$0xff] }
  0x6d   :  { %327 = vmatprep.subr.mxu0 %v242_v9  ;;  %440 = vmatprep.subr.mxu1 %v244_v10  ;;  %v229_v17 = vld [vmem:[#allocation4] sm:$0xff]  ;;  %10533 = vst [vmem:[#allocation29_spill] sm:$0xff] %v7128_v18  ;;  %v7130_v19 = vld [vmem:[#allocation10 + $0x1f8] sm:$0xff]  ;;  %v7134_v21 = vld [vmem:[#allocation10 + $0x1f0] sm:$0xff]  ;;  %p6905_p1 = por %p6904_p0, %p6903_p13 }
  0x6e   :  { %328 = vmatpush1.msra.mxu0 %v241_v11  ;;  %441 = vmatpush1.msra.mxu1 %v243_v12  ;;  %10534 = vst [vmem:[#allocation30_spill] sm:$0xff] %v7130_v19  ;;  %v7132_v20 = vld [vmem:[#allocation10 + $0x1e0] sm:$0xff]  ;;  %v7138_v22 = vld [vmem:[#allocation10 + $0x1c8] sm:$0xff]  ;;  %v7140_v23 = vld [vmem:[#allocation10 + $0x1d8] sm:$0xff] }
  0x6f   :  { %329 = vmatprep.subr.mxu0 %v238_v13  ;;  %442 = vmatprep.subr.mxu1 %v240_v14  ;;  %v7146_v24 = vld [vmem:[#allocation10 + $0x1c0] sm:$0xff]  ;;  %v7148_v25 = vld [vmem:[#allocation10 + $0x1d0] sm:$0xff]  ;;  %v230_v26 = vld [vmem:[#allocation4 + $0x8] sm:$0xff]  ;;  %p6906_p2 = pnand %p6905_p1, %p6899_p12 }
  0x70   :  { %330 = vmatpush1.msra.mxu0 %v237_v15  ;;  %443 = vmatpush1.msra.mxu1 %v239_v16  ;;  %v7154_v27 = vld [vmem:[#allocation10 + $0x1a8] sm:$0xff]  ;;  %v7156_v28 = vld [vmem:[#allocation10 + $0x1b8] sm:$0xff]  ;;  %v7160_v29 = vld [vmem:[#allocation10 + $0x1a0] sm:$0xff] }
  0x71   :  { %5892 = vmatmul.mubr.msk.f32.vlgmr.msra.gmra.mxu0 %vm274_vm0, %v229_v17  ;;  %5900 = vmatmul.mubr.msk.f32.vlgmr.msra.gmra.mxu1 %vm274_vm0, %v229_v17  ;;  %v7162_v30 = vld [vmem:[#allocation10 + $0x1b0] sm:$0xff]  ;;  %v7166_v31 = vld [vmem:[#allocation10 + $0x188] sm:$0xff]  ;;  %v7168_v32 = vld [vmem:[#allocation10 + $0x198] sm:$0xff] }
  0x72   :  { %561 = vmatprep.subr.mxu0 %v7128_v18  ;;  %632 = vmatprep.subr.mxu1 %v7130_v19  ;;  %v7174_v33 = vld [vmem:[#allocation10 + $0x180] sm:$0xff]  ;;  %v7176_v34 = vld [vmem:[#allocation10 + $0x190] sm:$0xff]  ;;  %v7182_v36 = vld [vmem:[#allocation10 + $0x168] sm:$0xff] }
  0x73   :  { %562 = vmatpush1.msra.mxu0 %v7132_v20  ;;  %633 = vmatpush1.msra.mxu1 %v7134_v21  ;;  %v231_v35 = vld [vmem:[#allocation4 + $0x10] sm:$0xff]  ;;  %v7184_v37 = vld [vmem:[#allocation10 + $0x178] sm:$0xff]  ;;  %v7188_v38 = vld [vmem:[#allocation10 + $0x160] sm:$0xff] }
  0x74   :  { %563 = vmatprep.subr.mxu0 %v7138_v22  ;;  %634 = vmatprep.subr.mxu1 %v7140_v23  ;;  %v7190_v39 = vld [vmem:[#allocation10 + $0x170] sm:$0xff]  ;;  %v7194_v40 = vld [vmem:[#allocation10 + $0x148] sm:$0xff]  ;;  %v7196_v41 = vld [vmem:[#allocation10 + $0x158] sm:$0xff] }
  0x75   :  { %369 = vmatprep.mubr.f32.mxu0 %v10213_v0  ;;  %482 = vmatprep.mubr.f32.mxu1 %v10213_v0  ;;  %v7202_v42 = vld [vmem:[#allocation10 + $0x140] sm:$0xff]  ;;  %v7204_v43 = vld [vmem:[#allocation10 + $0x150] sm:$0xff]  ;;  %v232_v44 = vld [vmem:[#allocation4 + $0x18] sm:$0xff] }
  0x76   :  { %564 = vmatpush1.msra.mxu0 %v7146_v24  ;;  %635 = vmatpush1.msra.mxu1 %v7148_v25  ;;  %v7210_v45 = vld [vmem:[#allocation10 + $0x128] sm:$0xff]  ;;  %v7212_v46 = vld [vmem:[#allocation10 + $0x138] sm:$0xff]  ;;  %v7216_v47 = vld [vmem:[#allocation10 + $0x120] sm:$0xff] }
  0x77   :  { %5893 = vmatmul.mubr.msk.f32.gmra.mxu0 %vm274_vm0, %v230_v26  ;;  %5901 = vmatmul.mubr.msk.f32.gmra.mxu1 %vm274_vm0, %v230_v26  ;;  %v7218_v48 = vld [vmem:[#allocation10 + $0x130] sm:$0xff]  ;;  %v7222_v49 = vld [vmem:[#allocation10 + $0x108] sm:$0xff]  ;;  %v7224_v50 = vld [vmem:[#allocation10 + $0x118] sm:$0xff] }
  0x78   :  { %565 = vmatprep.subr.mxu0 %v7154_v27  ;;  %636 = vmatprep.subr.mxu1 %v7156_v28  ;;  %v7230_v51 = vld [vmem:[#allocation10 + $0x100] sm:$0xff]  ;;  %v7232_v52 = vld [vmem:[#allocation10 + $0x110] sm:$0xff]  ;;  %v7238_v54 = vld [vmem:[#allocation10 + $0xe8] sm:$0xff] }
  0x79   :  { %566 = vmatpush1.msra.mxu0 %v7160_v29  ;;  %637 = vmatpush1.msra.mxu1 %v7162_v30  ;;  %v233_v53 = vld [vmem:[#allocation4 + $0x20] sm:$0xff]  ;;  %v7240_v55 = vld [vmem:[#allocation10 + $0xf8] sm:$0xff]  ;;  %v7246_v57 = vld [vmem:[#allocation10 + $0xf0] sm:$0xff] }
  0x7a   :  { %567 = vmatprep.subr.mxu0 %v7166_v31  ;;  %638 = vmatprep.subr.mxu1 %v7168_v32  ;;  %v7244_v56 = vld [vmem:[#allocation10 + $0xe0] sm:$0xff]  ;;  %v7250_v58 = vld [vmem:[#allocation10 + $0xc8] sm:$0xff]  ;;  %v7252_v59 = vld [vmem:[#allocation10 + $0xd8] sm:$0xff] }
  0x7b   :  { %375 = vmatprep.mubr.f32.mxu0 %v10213_v0  ;;  %488 = vmatprep.mubr.f32.mxu1 %v10213_v0  ;;  %v7258_v60 = vld [vmem:[#allocation10 + $0xc0] sm:$0xff]  ;;  %v7260_v61 = vld [vmem:[#allocation10 + $0xd0] sm:$0xff]  ;;  %v234_v62 = vld [vmem:[#allocation4 + $0x28] sm:$0xff] }
  0x7c   :  { %568 = vmatpush1.msra.mxu0 %v7174_v33  ;;  %639 = vmatpush1.msra.mxu1 %v7176_v34  ;;  %v7266_v63 = vld [vmem:[#allocation10 + $0xa8] sm:$0xff]  ;;  %v7268_v1 = vld [vmem:[#allocation10 + $0xb8] sm:$0xff]  ;;  %v7272_v2 = vld [vmem:[#allocation10 + $0xa0] sm:$0xff] }
  0x7d   :  { %5894 = vmatmul.mubr.msk.f32.gmra.mxu0 %vm274_vm0, %v231_v35  ;;  %5902 = vmatmul.mubr.msk.f32.gmra.mxu1 %vm274_vm0, %v231_v35  ;;  %v7274_v3 = vld [vmem:[#allocation10 + $0xb0] sm:$0xff]  ;;  %v7278_v4 = vld [vmem:[#allocation10 + $0x88] sm:$0xff]  ;;  %v7280_v5 = vld [vmem:[#allocation10 + $0x98] sm:$0xff] }
  0x7e   :  { %569 = vmatprep.subr.mxu0 %v7182_v36  ;;  %640 = vmatprep.subr.mxu1 %v7184_v37  ;;  %10535 = vst [vmem:[#allocation31_spill] sm:$0xff] %v7278_v4  ;;  %10536 = vst [vmem:[#allocation32_spill] sm:$0xff] %v7280_v5  ;;  %v7286_v6 = vld [vmem:[#allocation10 + $0x80] sm:$0xff]  ;;  %v7288_v7 = vld [vmem:[#allocation10 + $0x90] sm:$0xff] }
  0x7f   :  { %570 = vmatpush1.msra.mxu0 %v7188_v38  ;;  %641 = vmatpush1.msra.mxu1 %v7190_v39  ;;  %10537 = vst [vmem:[#allocation33_spill] sm:$0xff] %v7286_v6  ;;  %10538 = vst [vmem:[#allocation34_spill] sm:$0xff] %v7288_v7  ;;  %v235_v8 = vld [vmem:[#allocation4 + $0x30] sm:$0xff]  ;;  %v7294_v9 = vld [vmem:[#allocation10 + $0x68] sm:$0xff] }
  0x80   :  { %571 = vmatprep.subr.mxu0 %v7194_v40  ;;  %642 = vmatprep.subr.mxu1 %v7196_v41  ;;  %10539 = vst [vmem:[#allocation35_spill] sm:$0xff] %v7294_v9  ;;  %v7296_v10 = vld [vmem:[#allocation10 + $0x78] sm:$0xff]  ;;  %v7300_v11 = vld [vmem:[#allocation10 + $0x60] sm:$0xff]  ;;  %v7302_v12 = vld [vmem:[#allocation10 + $0x70] sm:$0xff] }
  0x81   :  { %381 = vmatprep.mubr.f32.mxu0 %v10213_v0  ;;  %494 = vmatprep.mubr.f32.mxu1 %v10213_v0  ;;  %10540 = vst [vmem:[#allocation36_spill] sm:$0xff] %v7296_v10  ;;  %10541 = vst [vmem:[#allocation37_spill] sm:$0xff] %v7300_v11  ;;  %v7306_v13 = vld [vmem:[#allocation10 + $0x48] sm:$0xff]  ;;  %v7308_v14 = vld [vmem:[#allocation10 + $0x58] sm:$0xff] }
  0x82   :  { %572 = vmatpush1.msra.mxu0 %v7202_v42  ;;  %643 = vmatpush1.msra.mxu1 %v7204_v43  ;;  %10542 = vst [vmem:[#allocation38_spill] sm:$0xff] %v7302_v12  ;;  %10543 = vst [vmem:[#allocation39_spill] sm:$0xff] %v7306_v13  ;;  %v7314_v15 = vld [vmem:[#allocation10 + $0x40] sm:$0xff]  ;;  %v7316_v16 = vld [vmem:[#allocation10 + $0x50] sm:$0xff] }
  0x83   :  { %5895 = vmatmul.mubr.msk.f32.gmra.mxu0 %vm274_vm0, %v232_v44  ;;  %5903 = vmatmul.mubr.msk.f32.gmra.mxu1 %vm274_vm0, %v232_v44  ;;  %10544 = vst [vmem:[#allocation40_spill] sm:$0xff] %v7308_v14  ;;  %10545 = vst [vmem:[#allocation41_spill] sm:$0xff] %v7314_v15  ;;  %v236_v17 = vld [vmem:[#allocation4 + $0x38] sm:$0xff]  ;;  %v7322_v26 = vld [vmem:[#allocation10 + $0x28] sm:$0xff] }
  0x84   :  { %573 = vmatprep.subr.mxu0 %v7210_v45  ;;  %644 = vmatprep.subr.mxu1 %v7212_v46  ;;  %10546 = vst [vmem:[#allocation42_spill] sm:$0xff] %v7316_v16  ;;  %10547 = vst [vmem:[#allocation43_spill] sm:$0xff] %v7322_v26  ;;  %v7324_v35 = vld [vmem:[#allocation10 + $0x38] sm:$0xff]  ;;  %v7328_v44 = vld [vmem:[#allocation10 + $0x20] sm:$0xff] }
  0x85   :  { %574 = vmatpush1.msra.mxu0 %v7216_v47  ;;  %645 = vmatpush1.msra.mxu1 %v7218_v48  ;;  %10548 = vst [vmem:[#allocation44_spill] sm:$0xff] %v7324_v35  ;;  %10549 = vst [vmem:[#allocation45_spill] sm:$0xff] %v7328_v44 }
  0x86   :  { %575 = vmatprep.subr.mxu0 %v7222_v49  ;;  %646 = vmatprep.subr.mxu1 %v7224_v50 }
  0x87   :  { %387 = vmatprep.mubr.f32.mxu0 %v10213_v0  ;;  %500 = vmatprep.mubr.f32.mxu1 %v10213_v0 }
  0x88   :  { %576 = vmatpush1.msra.mxu0 %v7230_v51  ;;  %647 = vmatpush1.msra.mxu1 %v7232_v52 }
  0x89   :  { %5896 = vmatmul.mubr.msk.f32.gmra.mxu0 %vm274_vm0, %v233_v53  ;;  %5904 = vmatmul.mubr.msk.f32.gmra.mxu1 %vm274_vm0, %v233_v53  ;;  %v7330_v53 = vld [vmem:[#allocation10 + $0x30] sm:$0xff] }
  0x8a   :  { %577 = vmatprep.subr.mxu0 %v7238_v54  ;;  %648 = vmatprep.subr.mxu1 %v7240_v55  ;;  %10550 = vst [vmem:[#allocation46_spill] sm:$0xff] %v7330_v53 }
  0x8b   :  { %578 = vmatpush1.msra.mxu0 %v7244_v56  ;;  %649 = vmatpush1.msra.mxu1 %v7246_v57 }
  0x8c   :  { %579 = vmatprep.subr.mxu0 %v7250_v58  ;;  %650 = vmatprep.subr.mxu1 %v7252_v59 }
  0x8d   :  { %393 = vmatprep.mubr.f32.mxu0 %v10213_v0  ;;  %506 = vmatprep.mubr.f32.mxu1 %v10213_v0 }
  0x8e   :  { %580 = vmatpush1.msra.mxu0 %v7258_v60  ;;  %651 = vmatpush1.msra.mxu1 %v7260_v61 }
  0x8f   :  { %5897 = vmatmul.mubr.msk.f32.gmra.mxu0 %vm274_vm0, %v234_v62  ;;  %5905 = vmatmul.mubr.msk.f32.gmra.mxu1 %vm274_vm0, %v234_v62  ;;  %v7334_v62 = vld [vmem:[#allocation10 + $0x8] sm:$0xff] }
  0x90   :  { %581 = vmatprep.subr.mxu0 %v7266_v63  ;;  %652 = vmatprep.subr.mxu1 %v7268_v1  ;;  %10551 = vst [vmem:[#allocation47_spill] sm:$0xff] %v7334_v62 }
  0x91   :  { %582 = vmatpush1.msra.mxu0 %v7272_v2  ;;  %653 = vmatpush1.msra.mxu1 %v7274_v3 }
  0x92   :  { %583 = vmatprep.subr.mxu0 %v7278_v4  ;;  %654 = vmatprep.subr.mxu1 %v7280_v5 }
  0x93   :  { %399 = vmatprep.mubr.f32.mxu0 %v10213_v0  ;;  %512 = vmatprep.mubr.f32.mxu1 %v10213_v0 }
  0x94   :  { %584 = vmatpush1.msra.mxu0 %v7286_v6  ;;  %655 = vmatpush1.msra.mxu1 %v7288_v7 }
  0x95   :  { %5898 = vmatmul.mubr.msk.f32.gmra.mxu0 %vm274_vm0, %v235_v8  ;;  %5906 = vmatmul.mubr.msk.f32.gmra.mxu1 %vm274_vm0, %v235_v8  ;;  %v7336_v8 = vld [vmem:[#allocation10 + $0x18] sm:$0xff] }
  0x96   :  { %585 = vmatprep.subr.mxu0 %v7294_v9  ;;  %656 = vmatprep.subr.mxu1 %v7296_v10  ;;  %10552 = vst [vmem:[#allocation48_spill] sm:$0xff] %v7336_v8 }
  0x97   :  { %586 = vmatpush1.msra.mxu0 %v7300_v11  ;;  %657 = vmatpush1.msra.mxu1 %v7302_v12 }
  0x98   :  { %587 = vmatprep.subr.mxu0 %v7306_v13  ;;  %658 = vmatprep.subr.mxu1 %v7308_v14 }
  0x99   :  { %405 = vmatprep.mubr.f32.mxu0 %v10213_v0  ;;  %518 = vmatprep.mubr.f32.mxu1 %v10213_v0  ;;  %v7340_v0 = vld [vmem:[#allocation10] sm:$0xff] }
  0x9a   :  { %588 = vmatpush1.msra.mxu0 %v7314_v15  ;;  %659 = vmatpush1.msra.mxu1 %v7316_v16  ;;  %10553 = vst [vmem:[#allocation49_spill] sm:$0xff] %v7340_v0  ;;  %v7344_v16 = vld [vmem:[#allocation10 + $0x10] sm:$0xff] }
  0x9b   :  { %5899 = vmatmul.mubr.msk.f32.gmra.mxu0 %vm274_vm0, %v236_v17  ;;  %5907 = vmatmul.mubr.msk.f32.gmra.mxu1 %vm274_vm0, %v236_v17  ;;  %10554 = vst [vmem:[#allocation50_spill] sm:$0xff] %v7344_v16  ;;  %v10555_v17 = vmov 0.0  }
  0x9c   :  { %589 = vmatprep.subr.mxu0 %v7322_v26  ;;  %660 = vmatprep.subr.mxu1 %v7324_v35 }
  0x9d   :  { %590 = vmatpush1.msra.mxu0 %v7328_v44  ;;  %661 = vmatpush1.msra.mxu1 %v7330_v53 }
  0x9e   :  { %591 = vmatprep.subr.mxu0 %v7334_v62  ;;  %662 = vmatprep.subr.mxu1 %v7336_v8 }
  0x9f   :  { %592 = vmatpush1.msra.mxu0 %v7340_v0  ;;  %625 = vmatprep.mubr.f32.mxu0 %v10555_v17 }
  0xa0   :  { %663 = vmatpush1.msra.mxu1 %v7344_v16  ;;  %696 = vmatprep.mubr.f32.mxu1 %v10555_v17 }
  0xa1   :  { %626 = vmatmul.mubr.f32.vlgmr.msra.gmra.mxu0 %v10555_v17  ;;  %697 = vmatmul.mubr.f32.vlgmr.msra.gmra.mxu1 %v10555_v17 }
  0xa2   :  { %733 = vmatprep.subr.mxu0 %v7128_v18  ;;  %804 = vmatprep.subr.mxu1 %v7130_v19 }
  0xa3   :  { %734 = vmatpush1.msra.mxu0 %v7132_v20  ;;  %805 = vmatpush1.msra.mxu1 %v7134_v21 }
  0xa4   :  { %735 = vmatprep.subr.mxu0 %v7138_v22  ;;  %806 = vmatprep.subr.mxu1 %v7140_v23 }
  0xa5   :  { %736 = vmatpush1.msra.mxu0 %v7146_v24  ;;  %807 = vmatpush1.msra.mxu1 %v7148_v25 }
  0xa6   :  { %737 = vmatprep.subr.mxu0 %v7154_v27  ;;  %808 = vmatprep.subr.mxu1 %v7156_v28 }
  0xa7   :  { %738 = vmatpush1.msra.mxu0 %v7160_v29  ;;  %809 = vmatpush1.msra.mxu1 %v7162_v30 }
  0xa8   :  { %739 = vmatprep.subr.mxu0 %v7166_v31  ;;  %810 = vmatprep.subr.mxu1 %v7168_v32 }
  0xa9   :  { %740 = vmatpush1.msra.mxu0 %v7174_v33  ;;  %811 = vmatpush1.msra.mxu1 %v7176_v34 }
  0xaa   :  { %741 = vmatprep.subr.mxu0 %v7182_v36  ;;  %812 = vmatprep.subr.mxu1 %v7184_v37 }
  0xab   :  { %742 = vmatpush1.msra.mxu0 %v7188_v38  ;;  %813 = vmatpush1.msra.mxu1 %v7190_v39 }
  0xac   :  { %743 = vmatprep.subr.mxu0 %v7194_v40  ;;  %814 = vmatprep.subr.mxu1 %v7196_v41 }
  0xad   :  { %744 = vmatpush1.msra.mxu0 %v7202_v42  ;;  %815 = vmatpush1.msra.mxu1 %v7204_v43 }
  0xae   :  { %745 = vmatprep.subr.mxu0 %v7210_v45  ;;  %816 = vmatprep.subr.mxu1 %v7212_v46 }
  0xaf   :  { %746 = vmatpush1.msra.mxu0 %v7216_v47  ;;  %817 = vmatpush1.msra.mxu1 %v7218_v48 }
  0xb0   :  { %747 = vmatprep.subr.mxu0 %v7222_v49  ;;  %818 = vmatprep.subr.mxu1 %v7224_v50 }
  0xb1   :  { %748 = vmatpush1.msra.mxu0 %v7230_v51  ;;  %819 = vmatpush1.msra.mxu1 %v7232_v52 }
  0xb2   :  { %749 = vmatprep.subr.mxu0 %v7238_v54  ;;  %820 = vmatprep.subr.mxu1 %v7240_v55 }
  0xb3   :  { %750 = vmatpush1.msra.mxu0 %v7244_v56  ;;  %821 = vmatpush1.msra.mxu1 %v7246_v57 }
  0xb4   :  { %751 = vmatprep.subr.mxu0 %v7250_v58  ;;  %822 = vmatprep.subr.mxu1 %v7252_v59 }
  0xb5   :  { %752 = vmatpush1.msra.mxu0 %v7258_v60  ;;  %823 = vmatpush1.msra.mxu1 %v7260_v61 }
  0xb6   :  { %753 = vmatprep.subr.mxu0 %v7266_v63  ;;  %824 = vmatprep.subr.mxu1 %v7268_v1 }
  0xb7   :  { %754 = vmatpush1.msra.mxu0 %v7272_v2  ;;  %825 = vmatpush1.msra.mxu1 %v7274_v3 }
  0xb8   :  { %755 = vmatprep.subr.mxu0 %v7278_v4  ;;  %826 = vmatprep.subr.mxu1 %v7280_v5  ;;  %v10556_v4 = vld [vmem:[#allocation42_spill] sm:$0xff] }
  0xb9   :  { %756 = vmatpush1.msra.mxu0 %v7286_v6  ;;  %827 = vmatpush1.msra.mxu1 %v7288_v7 }
  0xba   :  { %757 = vmatprep.subr.mxu0 %v7294_v9  ;;  %828 = vmatprep.subr.mxu1 %v7296_v10 }
  0xbb   :  { %758 = vmatpush1.msra.mxu0 %v7300_v11  ;;  %829 = vmatpush1.msra.mxu1 %v7302_v12 }
  0xbc   :  { %759 = vmatprep.subr.mxu0 %v7306_v13  ;;  %830 = vmatprep.subr.mxu1 %v7308_v14 }
  0xbd   :  { %760 = vmatpush1.msra.mxu0 %v7314_v15  ;;  %831 = vmatpush1.msra.mxu1 %v10556_v4 }
  0xbe   :  { %761 = vmatprep.subr.mxu0 %v7322_v26  ;;  %832 = vmatprep.subr.mxu1 %v7324_v35  ;;  %v254_v35 = vlaneseq }
  0xbf   :  { %762 = vmatpush1.msra.mxu0 %v7328_v44  ;;  %833 = vmatpush1.msra.mxu1 %v7330_v53 }
  0xc0   :  { %763 = vmatprep.subr.mxu0 %v7334_v62  ;;  %834 = vmatprep.subr.mxu1 %v7336_v8  ;;  %v255_v44 = vshrl.u32 %v254_v35, 7 }
  0xc1   :  { %764 = vmatpush1.msra.mxu0 %v7340_v0  ;;  %797 = vmatprep.mubr.f32.mxu0 %v10555_v17  ;;  %v228_v0 = vld [vmem:[#allocation12] sm:$0xf] }
  0xc2   :  { %835 = vmatpush1.msra.mxu1 %v7344_v16  ;;  %868 = vmatprep.mubr.f32.mxu1 %v10555_v17  ;;  %v7426_v62 = vsub.s32 0, %v255_v44  ;;  %v7428_v8 = vsub.s32 2, %v255_v44  ;;  %v7434_v17 = vsub.s32 1, %v255_v44 }
  0xc3   :  { %906 = vmatprep.subr.mxu0 %v7128_v18  ;;  %977 = vmatprep.subr.mxu1 %v7130_v19  ;;  %v7436_v18 = vsub.s32 3, %v255_v44 }
  0xc4   :  { %10557 = vst [vmem:[#allocation51_spill] sm:$0xff] %v7426_v62  ;;  %10558 = vst [vmem:[#allocation52_spill] sm:$0xff] %v7428_v8  ;;  %v257_v19 = vrot.slane %v228_v0, %v7426_v62  ;;  %v7440_v35 = vrot.slane %v228_v0, %v7428_v8  ;;  %v261_v13 = vrot.slane %v228_v0, %v7434_v17 }
  0xc5   :  { %10559 = vst [vmem:[#allocation53_spill] sm:$0xff] %v7434_v17  ;;  %10560 = vst [vmem:[#allocation54_spill] sm:$0xff] %v7436_v18  ;;  %v7444_v12 = vrot.slane %v228_v0, %v7436_v18 }
 0x131   :  { %v7422_v26 = vpop.f32.mrf.mxu0  ;;  %v7424_v53 = vpop.f32.mrf.mxu1 }
 0x133   :  { %v7430_v4 = vpop.f32.mrf.mxu0  ;;  %v7432_v16 = vpop.f32.mrf.mxu1 }
 0x137   :  { %v371_v15 = vpop.f32.mrf.mxu0  ;;  %v484_v14 = vpop.f32.mrf.mxu1 }
 0x138   :  { %v7446_v11 = vadd.f32 %v371_v15, %v257_v19  ;;  %v7449_v10 = vadd.f32 %v484_v14, %v7440_v35 }
 0x139   :  { %v373_v9 = vpop.f32.mrf.mxu0  ;;  %v486_v44 = vpop.f32.mrf.mxu1 }
 0x13a   :  { %10561 = vst [vmem:[#allocation55_spill] sm:$0xff] %v7446_v11  ;;  %10562 = vst [vmem:[#allocation56_spill] sm:$0xff] %v7449_v10  ;;  %v7451_v7 = vadd.f32 %v373_v9, %v261_v13  ;;  %v7454_v62 = vadd.f32 %v486_v44, %v7444_v12 }
 0x13c   :  { %10563 = vst [vmem:[#allocation57_spill] sm:$0xff] %v7451_v7  ;;  %10564 = vst [vmem:[#allocation58_spill] sm:$0xff] %v7454_v62 }
 0x13d   :  { %v377_v8 = vpop.f32.mrf.mxu0  ;;  %v490_v6 = vpop.f32.mrf.mxu1 }
 0x13e   :  { %v7456_v5 = vadd.f32 %v377_v8, %v257_v19  ;;  %v7459_v17 = vadd.f32 %v490_v6, %v7440_v35 }
 0x13f   :  { %v379_v0 = vpop.f32.mrf.mxu0  ;;  %v492_v15 = vpop.f32.mrf.mxu1 }
 0x140   :  { %10565 = vst [vmem:[#allocation59_spill] sm:$0xff] %v7456_v5  ;;  %10566 = vst [vmem:[#allocation60_spill] sm:$0xff] %v7459_v17  ;;  %v7461_v18 = vadd.f32 %v379_v0, %v261_v13  ;;  %v7464_v14 = vadd.f32 %v492_v15, %v7444_v12 }
 0x142   :  { %10567 = vst [vmem:[#allocation61_spill] sm:$0xff] %v7461_v18  ;;  %10568 = vst [vmem:[#allocation62_spill] sm:$0xff] %v7464_v14 }
 0x143   :  { %v383_v10 = vpop.f32.mrf.mxu0  ;;  %v496_v9 = vpop.f32.mrf.mxu1 }
 0x144   :  { %v7466_v7 = vadd.f32 %v383_v10, %v257_v19  ;;  %v7469_v44 = vadd.f32 %v496_v9, %v7440_v35 }
 0x145   :  { %v385_v62 = vpop.f32.mrf.mxu0  ;;  %v498_v8 = vpop.f32.mrf.mxu1 }
 0x146   :  { %10569 = vst [vmem:[#allocation63_spill] sm:$0xff] %v7466_v7  ;;  %10570 = vst [vmem:[#allocation64_spill] sm:$0xff] %v7469_v44  ;;  %v7471_v5 = vadd.f32 %v385_v62, %v261_v13  ;;  %v7474_v6 = vadd.f32 %v498_v8, %v7444_v12 }
 0x148   :  { %10571 = vst [vmem:[#allocation65_spill] sm:$0xff] %v7471_v5  ;;  %10572 = vst [vmem:[#allocation66_spill] sm:$0xff] %v7474_v6 }
 0x149   :  { %v389_v17 = vpop.f32.mrf.mxu0  ;;  %v502_v0 = vpop.f32.mrf.mxu1 }
 0x14a   :  { %v7476_v18 = vadd.f32 %v389_v17, %v257_v19  ;;  %v7479_v15 = vadd.f32 %v502_v0, %v7440_v35 }
 0x14b   :  { %v391_v14 = vpop.f32.mrf.mxu0  ;;  %v504_v10 = vpop.f32.mrf.mxu1 }
 0x14c   :  { %10573 = vst [vmem:[#allocation67_spill] sm:$0xff] %v7476_v18  ;;  %10574 = vst [vmem:[#allocation68_spill] sm:$0xff] %v7479_v15  ;;  %v7481_v7 = vadd.f32 %v391_v14, %v261_v13  ;;  %v7484_v9 = vadd.f32 %v504_v10, %v7444_v12 }
 0x14e   :  { %10575 = vst [vmem:[#allocation69_spill] sm:$0xff] %v7481_v7  ;;  %10576 = vst [vmem:[#allocation70_spill] sm:$0xff] %v7484_v9 }
 0x14f   :  { %v395_v44 = vpop.f32.mrf.mxu0  ;;  %v508_v62 = vpop.f32.mrf.mxu1 }
 0x150   :  { %v7486_v5 = vadd.f32 %v395_v44, %v257_v19  ;;  %v7489_v8 = vadd.f32 %v508_v62, %v7440_v35 }
 0x151   :  { %v397_v6 = vpop.f32.mrf.mxu0  ;;  %v510_v17 = vpop.f32.mrf.mxu1 }
 0x152   :  { %10577 = vst [vmem:[#allocation71_spill] sm:$0xff] %v7486_v5  ;;  %10578 = vst [vmem:[#allocation72_spill] sm:$0xff] %v7489_v8  ;;  %v7491_v18 = vadd.f32 %v397_v6, %v261_v13  ;;  %v7494_v0 = vadd.f32 %v510_v17, %v7444_v12 }
 0x154   :  { %10579 = vst [vmem:[#allocation73_spill] sm:$0xff] %v7491_v18  ;;  %10580 = vst [vmem:[#allocation74_spill] sm:$0xff] %v7494_v0 }
 0x155   :  { %v401_v15 = vpop.f32.mrf.mxu0  ;;  %v514_v14 = vpop.f32.mrf.mxu1 }
 0x156   :  { %v7496_v7 = vadd.f32 %v401_v15, %v257_v19  ;;  %v7499_v10 = vadd.f32 %v514_v14, %v7440_v35 }
 0x157   :  { %v403_v9 = vpop.f32.mrf.mxu0  ;;  %v516_v44 = vpop.f32.mrf.mxu1 }
 0x158   :  { %10581 = vst [vmem:[#allocation75_spill] sm:$0xff] %v7496_v7  ;;  %10582 = vst [vmem:[#allocation76_spill] sm:$0xff] %v7499_v10  ;;  %v7501_v5 = vadd.f32 %v403_v9, %v261_v13  ;;  %v7504_v62 = vadd.f32 %v516_v44, %v7444_v12  ;;  %v366_v9 = vadd.f32 %v7422_v26, %v257_v19 }
 0x159   :  { %v368_v44 = vadd.f32 %v7430_v4, %v261_v13 }
 0x15a   :  { %10583 = vst [vmem:[#allocation77_spill] sm:$0xff] %v7501_v5  ;;  %10584 = vst [vmem:[#allocation78_spill] sm:$0xff] %v7504_v62 }
 0x15b   :  { %v407_v8 = vpop.f32.mrf.mxu0  ;;  %v520_v6 = vpop.f32.mrf.mxu1 }
 0x15c   :  { %v7506_v18 = vadd.f32 %v407_v8, %v257_v19  ;;  %v7509_v17 = vadd.f32 %v520_v6, %v7440_v35 }
 0x15d   :  { %v409_v0 = vpop.f32.mrf.mxu0  ;;  %v522_v15 = vpop.f32.mrf.mxu1 }
 0x15e   :  { %10585 = vst [vmem:[#allocation79_spill] sm:$0xff] %v7506_v18  ;;  %10586 = vst [vmem:[#allocation80_spill] sm:$0xff] %v7509_v17  ;;  %v7511_v7 = vadd.f32 %v409_v0, %v261_v13  ;;  %v7514_v14 = vadd.f32 %v522_v15, %v7444_v12  ;;  %v479_v0 = vadd.f32 %v7424_v53, %v7440_v35 }
 0x15f   :  { %v481_v15 = vadd.f32 %v7432_v16, %v7444_v12 }
 0x160   :  { %10587 = vst [vmem:[#allocation81_spill] sm:$0xff] %v7511_v7  ;;  %10588 = vst [vmem:[#allocation82_spill] sm:$0xff] %v7514_v14 }
 0x161   :  { %v627_v10 = vpop.f32.mrf.mxu0  ;;  %v698_v6 = vpop.f32.mrf.mxu1 }
 0x162   :  { %v628_v62 = vadd.f32 %v627_v10, %v366_v9  ;;  %v699_v17 = vadd.f32 %v698_v6, %v479_v0  ;;  %v10593_v6 = vld [vmem:[#allocation34_spill] sm:$0xff]  ;;  %v10594_v0 = vld [vmem:[#allocation35_spill] sm:$0xff] }
 0x163   :  { %v629_v5 = vpop.f32.mrf.mxu0  ;;  %v700_v7 = vpop.f32.mrf.mxu1 }
 0x164   :  { %v5908_v11 = vmul.f32 -1.442695, %v628_v62  ;;  %v630_v8 = vadd.f32 %v629_v5, %v368_v44  ;;  %v5910_v19 = vmul.f32 -1.442695, %v699_v17  ;;  %v701_v14 = vadd.f32 %v700_v7, %v481_v15  ;;  %v10590_v17 = vld [vmem:[#allocation31_spill] sm:$0xff]  ;;  %v10595_v15 = vld [vmem:[#allocation36_spill] sm:$0xff] }
 0x166   :  { %6162 = vpow2.f32 %v5908_v11  ;;  %v5909_v18 = vmul.f32 -1.442695, %v630_v8  ;;  %v10592_v8 = vld [vmem:[#allocation33_spill] sm:$0xff] }
 0x168   :  { %6164 = vpow2.f32 %v5909_v18 }
 0x169   :  { %6166 = vpow2.f32 %v5910_v19  ;;  %v10596_v19 = vld [vmem:[#allocation37_spill] sm:$0xff] }
 0x173   :  { %v6163_v26 = vpop.eup %6162 }
 0x174   :  { %v712_v4 = vadd.f32 1.0, %v6163_v26  ;;  %v10597_v26 = vld [vmem:[#allocation38_spill] sm:$0xff] }
 0x175   :  { %v6165_v13 = vpop.eup %6164 }
 0x176   :  { %6168 = vrcp.f32 %v712_v4  ;;  %v713_v5 = vadd.f32 1.0, %v6165_v13  ;;  %v6167_v18 = vpop.eup %6166  ;;  %v10598_v4 = vld [vmem:[#allocation39_spill] sm:$0xff]  ;;  %v10599_v13 = vld [vmem:[#allocation40_spill] sm:$0xff] }
 0x177   :  { %6170 = vtanh.f32 %v701_v14  ;;  %v714_v53 = vadd.f32 1.0, %v6167_v18  ;;  %v10591_v14 = vld [vmem:[#allocation32_spill] sm:$0xff]  ;;  %v10601_v18 = vld [vmem:[#allocation42_spill] sm:$0xff] }
 0x178   :  { %6172 = vrcp.f32 %v713_v5  ;;  %v10600_v5 = vld [vmem:[#allocation41_spill] sm:$0xff] }
 0x179   :  { %6174 = vrcp.f32 %v714_v53  ;;  %v10605_v53 = vld [vmem:[#allocation46_spill] sm:$0xff] }
 0x183   :  { %v6169_v11 = vpop.eup %6168 }
 0x184   :  { %v6171_v10 = vpop.eup %6170 }
 0x185   :  { %v6173_v62 = vpop.eup %6172  ;;  %v723_v9 = vmul.f32 %v6171_v10, %v6169_v11  ;;  %v10602_v11 = vld [vmem:[#allocation43_spill] sm:$0xff]  ;;  %v10603_v10 = vld [vmem:[#allocation44_spill] sm:$0xff] }
 0x186   :  { %v722_v35 = vmul.f32 0.0, %v6173_v62  ;;  %v6175_v7 = vpop.eup %6174  ;;  %v10604_v62 = vld [vmem:[#allocation45_spill] sm:$0xff] }
 0x188   :  { %v7522_v44 = vadd.f32 %v723_v9, %v722_v35  ;;  %v10606_v35 = vld [vmem:[#allocation47_spill] sm:$0xff]  ;;  %v10607_v9 = vld [vmem:[#allocation48_spill] sm:$0xff] }
 0x18a   :  { %6176 = vtanh.f32 %v7522_v44 }
 0x197   :  { %v6177_v12 = vpop.eup %6176 }
 0x198   :  { %v7525_v16 = vmul.f32 %v6177_v12, %v6175_v7  ;;  %v10608_v7 = vld [vmem:[#allocation49_spill] sm:$0xff]  ;;  %v10609_v12 = vmov 0.0  }
 0x19a   :  { %10589 = vst [vmem:[#allocation83_spill] sm:$0xff] %v7525_v16  ;;  %798 = vmatmul.mubr.f32.vlgmr.msra.gmra.mxu0 %v7525_v16  ;;  %869 = vmatmul.mubr.f32.vlgmr.msra.gmra.mxu1 %v7525_v16  ;;  %v10610_v16 = vld [vmem:[#allocation50_spill] sm:$0xff] }
 0x19b   :  { %907 = vmatpush1.msra.mxu0 %v7132_v20  ;;  %978 = vmatpush1.msra.mxu1 %v7134_v21 }
 0x19c   :  { %908 = vmatprep.subr.mxu0 %v7138_v22  ;;  %979 = vmatprep.subr.mxu1 %v7140_v23 }
 0x19d   :  { %909 = vmatpush1.msra.mxu0 %v7146_v24  ;;  %980 = vmatpush1.msra.mxu1 %v7148_v25 }
 0x19e   :  { %910 = vmatprep.subr.mxu0 %v7154_v27  ;;  %981 = vmatprep.subr.mxu1 %v7156_v28 }
 0x19f   :  { %911 = vmatpush1.msra.mxu0 %v7160_v29  ;;  %982 = vmatpush1.msra.mxu1 %v7162_v30 }
 0x1a0   :  { %912 = vmatprep.subr.mxu0 %v7166_v31  ;;  %983 = vmatprep.subr.mxu1 %v7168_v32 }
 0x1a1   :  { %913 = vmatpush1.msra.mxu0 %v7174_v33  ;;  %984 = vmatpush1.msra.mxu1 %v7176_v34 }
 0x1a2   :  { %914 = vmatprep.subr.mxu0 %v7182_v36  ;;  %985 = vmatprep.subr.mxu1 %v7184_v37 }
 0x1a3   :  { %915 = vmatpush1.msra.mxu0 %v7188_v38  ;;  %986 = vmatpush1.msra.mxu1 %v7190_v39 }
 0x1a4   :  { %916 = vmatprep.subr.mxu0 %v7194_v40  ;;  %987 = vmatprep.subr.mxu1 %v7196_v41 }
 0x1a5   :  { %917 = vmatpush1.msra.mxu0 %v7202_v42  ;;  %988 = vmatpush1.msra.mxu1 %v7204_v43 }
 0x1a6   :  { %918 = vmatprep.subr.mxu0 %v7210_v45  ;;  %989 = vmatprep.subr.mxu1 %v7212_v46 }
 0x1a7   :  { %919 = vmatpush1.msra.mxu0 %v7216_v47  ;;  %990 = vmatpush1.msra.mxu1 %v7218_v48 }
 0x1a8   :  { %920 = vmatprep.subr.mxu0 %v7222_v49  ;;  %991 = vmatprep.subr.mxu1 %v7224_v50 }
 0x1a9   :  { %921 = vmatpush1.msra.mxu0 %v7230_v51  ;;  %992 = vmatpush1.msra.mxu1 %v7232_v52 }
 0x1aa   :  { %922 = vmatprep.subr.mxu0 %v7238_v54  ;;  %993 = vmatprep.subr.mxu1 %v7240_v55 }
 0x1ab   :  { %923 = vmatpush1.msra.mxu0 %v7244_v56  ;;  %994 = vmatpush1.msra.mxu1 %v7246_v57 }
 0x1ac   :  { %924 = vmatprep.subr.mxu0 %v7250_v58  ;;  %995 = vmatprep.subr.mxu1 %v7252_v59 }
 0x1ad   :  { %925 = vmatpush1.msra.mxu0 %v7258_v60  ;;  %996 = vmatpush1.msra.mxu1 %v7260_v61 }
 0x1ae   :  { %926 = vmatprep.subr.mxu0 %v7266_v63  ;;  %997 = vmatprep.subr.mxu1 %v7268_v1 }
 0x1af   :  { %927 = vmatpush1.msra.mxu0 %v7272_v2  ;;  %998 = vmatpush1.msra.mxu1 %v7274_v3 }
 0x1b0   :  { %928 = vmatprep.subr.mxu0 %v10590_v17  ;;  %999 = vmatprep.subr.mxu1 %v10591_v14 }
 0x1b1   :  { %929 = vmatpush1.msra.mxu0 %v10592_v8  ;;  %1000 = vmatpush1.msra.mxu1 %v10593_v6 }
 0x1b2   :  { %930 = vmatprep.subr.mxu0 %v10594_v0  ;;  %1001 = vmatprep.subr.mxu1 %v10595_v15 }
 0x1b3   :  { %931 = vmatpush1.msra.mxu0 %v10596_v19  ;;  %1002 = vmatpush1.msra.mxu1 %v10597_v26  ;;  %v10615_v26 = vld [vmem:[#allocation56_spill] sm:$0xff] }
 0x1b4   :  { %932 = vmatprep.subr.mxu0 %v10598_v4  ;;  %1003 = vmatprep.subr.mxu1 %v10599_v13 }
 0x1b5   :  { %933 = vmatpush1.msra.mxu0 %v10600_v5  ;;  %1004 = vmatpush1.msra.mxu1 %v10601_v18  ;;  %v10611_v18 = vld [vmem:[#allocation29_spill] sm:$0xff] }
 0x1b6   :  { %934 = vmatprep.subr.mxu0 %v10602_v11  ;;  %1005 = vmatprep.subr.mxu1 %v10603_v10  ;;  %v10612_v11 = vld [vmem:[#allocation30_spill] sm:$0xff] }
 0x1b7   :  { %935 = vmatpush1.msra.mxu0 %v10604_v62  ;;  %1006 = vmatpush1.msra.mxu1 %v10605_v53  ;;  %v10613_v62 = vld [vmem:[#allocation55_spill] sm:$0xff] }
 0x1b8   :  { %936 = vmatprep.subr.mxu0 %v10606_v35  ;;  %1007 = vmatprep.subr.mxu1 %v10607_v9  ;;  %v10614_v35 = vld [vmem:[#allocation57_spill] sm:$0xff] }
 0x1b9   :  { %937 = vmatpush1.msra.mxu0 %v10608_v7  ;;  %970 = vmatprep.mubr.f32.mxu0 %v10609_v12 }
 0x1ba   :  { %1008 = vmatpush1.msra.mxu1 %v10610_v16  ;;  %1041 = vmatprep.mubr.f32.mxu1 %v10609_v12  ;;  %v10616_v12 = vld [vmem:[#allocation58_spill] sm:$0xff] }
 0x1bb   :  { %1079 = vmatprep.subr.mxu0 %v10611_v18  ;;  %1150 = vmatprep.subr.mxu1 %v10612_v11 }
 0x25a   :  { %v799_v10 = vpop.f32.mrf.mxu0  ;;  %v870_v7 = vpop.f32.mrf.mxu1 }
 0x25b   :  { %v800_v5 = vadd.f32 %v799_v10, %v10613_v62  ;;  %v871_v19 = vadd.f32 %v870_v7, %v10615_v26 }
 0x25c   :  { %v801_v53 = vpop.f32.mrf.mxu0  ;;  %v872_v16 = vpop.f32.mrf.mxu1 }
 0x25d   :  { %v5911_v13 = vmul.f32 -1.442695, %v800_v5  ;;  %v802_v4 = vadd.f32 %v801_v53, %v10614_v35  ;;  %v5913_v15 = vmul.f32 -1.442695, %v871_v19  ;;  %v873_v0 = vadd.f32 %v872_v16, %v10616_v12 }
 0x25f   :  { %6178 = vpow2.f32 %v5911_v13  ;;  %v5912_v9 = vmul.f32 -1.442695, %v802_v4 }
 0x261   :  { %6180 = vpow2.f32 %v5912_v9 }
 0x262   :  { %6182 = vpow2.f32 %v5913_v15 }
 0x263   :  { %6184 = vtanh.f32 %v873_v0 }
 0x26c   :  { %v6179_v18 = vpop.eup %6178 }
 0x26d   :  { %v884_v6 = vadd.f32 1.0, %v6179_v18  ;;  %v10640_v18 = vld [vmem:[#allocation60_spill] sm:$0xff] }
 0x26e   :  { %v6181_v11 = vpop.eup %6180 }
 0x26f   :  { %6186 = vrcp.f32 %v884_v6  ;;  %v885_v10 = vadd.f32 1.0, %v6181_v11  ;;  %v6183_v5 = vpop.eup %6182  ;;  %v10639_v6 = vld [vmem:[#allocation61_spill] sm:$0xff] }
 0x270   :  { %v6185_v62 = vpop.eup %6184  ;;  %v886_v35 = vadd.f32 1.0, %v6183_v5 }
 0x271   :  { %6188 = vrcp.f32 %v885_v10 }
 0x272   :  { %6190 = vrcp.f32 %v886_v35 }
 0x27c   :  { %v6187_v13 = vpop.eup %6186 }
 0x27d   :  { %v895_v4 = vmul.f32 %v6187_v13, %v6185_v62  ;;  %v10641_v62 = vld [vmem:[#allocation62_spill] sm:$0xff] }
 0x27e   :  { %v6189_v53 = vpop.eup %6188 }
 0x27f   :  { %v894_v26 = vmul.f32 %v6189_v53, %v7522_v44  ;;  %v6191_v16 = vpop.eup %6190 }
 0x281   :  { %v7600_v9 = vadd.f32 %v895_v4, %v894_v26 }
 0x283   :  { %6192 = vtanh.f32 %v7600_v9 }
 0x290   :  { %v6193_v15 = vpop.eup %6192 }
 0x291   :  { %v7603_v19 = vmul.f32 %v6193_v15, %v6191_v16 }
 0x293   :  { %10617 = vst [vmem:[#allocation31_spill] sm:$0xff] %v7603_v19  ;;  %971 = vmatmul.mubr.f32.vlgmr.msra.gmra.mxu0 %v7603_v19  ;;  %1042 = vmatmul.mubr.f32.vlgmr.msra.gmra.mxu1 %v7603_v19  ;;  %v7752_v19 = vld [vmem:[#allocation10 + $0x150] sm:$0xff] }
 0x294   :  { %1080 = vmatpush1.msra.mxu0 %v7132_v20  ;;  %1151 = vmatpush1.msra.mxu1 %v7134_v21  ;;  %v10618_v20 = vld [vmem:[#allocation34_spill] sm:$0xff]  ;;  %v10619_v21 = vld [vmem:[#allocation35_spill] sm:$0xff] }
 0x295   :  { %1081 = vmatprep.subr.mxu0 %v7138_v22  ;;  %1152 = vmatprep.subr.mxu1 %v7140_v23  ;;  %v10620_v22 = vld [vmem:[#allocation36_spill] sm:$0xff]  ;;  %v10621_v23 = vld [vmem:[#allocation37_spill] sm:$0xff] }
 0x296   :  { %1082 = vmatpush1.msra.mxu0 %v7146_v24  ;;  %1153 = vmatpush1.msra.mxu1 %v7148_v25  ;;  %v10622_v24 = vld [vmem:[#allocation38_spill] sm:$0xff]  ;;  %v10623_v25 = vld [vmem:[#allocation39_spill] sm:$0xff] }
 0x297   :  { %1083 = vmatprep.subr.mxu0 %v7154_v27  ;;  %1154 = vmatprep.subr.mxu1 %v7156_v28  ;;  %v10624_v27 = vld [vmem:[#allocation40_spill] sm:$0xff]  ;;  %v10625_v28 = vld [vmem:[#allocation41_spill] sm:$0xff] }
 0x298   :  { %1084 = vmatpush1.msra.mxu0 %v7160_v29  ;;  %1155 = vmatpush1.msra.mxu1 %v7162_v30  ;;  %v10626_v29 = vld [vmem:[#allocation42_spill] sm:$0xff]  ;;  %v10627_v30 = vld [vmem:[#allocation43_spill] sm:$0xff] }
 0x299   :  { %1085 = vmatprep.subr.mxu0 %v7166_v31  ;;  %1156 = vmatprep.subr.mxu1 %v7168_v32  ;;  %v10628_v31 = vld [vmem:[#allocation44_spill] sm:$0xff]  ;;  %v10629_v32 = vld [vmem:[#allocation45_spill] sm:$0xff] }
 0x29a   :  { %1086 = vmatpush1.msra.mxu0 %v7174_v33  ;;  %1157 = vmatpush1.msra.mxu1 %v7176_v34  ;;  %v10630_v33 = vld [vmem:[#allocation46_spill] sm:$0xff]  ;;  %v10631_v34 = vld [vmem:[#allocation47_spill] sm:$0xff] }
 0x29b   :  { %1087 = vmatprep.subr.mxu0 %v7182_v36  ;;  %1158 = vmatprep.subr.mxu1 %v7184_v37  ;;  %v10632_v36 = vld [vmem:[#allocation48_spill] sm:$0xff]  ;;  %v10633_v37 = vld [vmem:[#allocation49_spill] sm:$0xff] }
 0x29c   :  { %1088 = vmatpush1.msra.mxu0 %v7188_v38  ;;  %1159 = vmatpush1.msra.mxu1 %v7190_v39  ;;  %v10634_v38 = vmov 0.0   ;;  %v10635_v39 = vld [vmem:[#allocation50_spill] sm:$0xff] }
 0x29d   :  { %1089 = vmatprep.subr.mxu0 %v7194_v40  ;;  %1160 = vmatprep.subr.mxu1 %v7196_v41  ;;  %v7671_v40 = vld [vmem:[#allocation10 + $0x1e8] sm:$0xff]  ;;  %v7674_v41 = vld [vmem:[#allocation10 + $0x1f8] sm:$0xff] }
 0x29e   :  { %1090 = vmatpush1.msra.mxu0 %v7202_v42  ;;  %1161 = vmatpush1.msra.mxu1 %v7204_v43  ;;  %10636 = vst [vmem:[#allocation32_spill] sm:$0xff] %v7671_v40  ;;  %10637 = vst [vmem:[#allocation33_spill] sm:$0xff] %v7674_v41  ;;  %v10638_v43 = vld [vmem:[#allocation59_spill] sm:$0xff] }
 0x29f   :  { %1091 = vmatprep.subr.mxu0 %v7210_v45  ;;  %1162 = vmatprep.subr.mxu1 %v7212_v46 }
 0x2a0   :  { %1092 = vmatpush1.msra.mxu0 %v7216_v47  ;;  %1163 = vmatpush1.msra.mxu1 %v7218_v48 }
 0x2a1   :  { %1093 = vmatprep.subr.mxu0 %v7222_v49  ;;  %1164 = vmatprep.subr.mxu1 %v7224_v50 }
 0x2a2   :  { %1094 = vmatpush1.msra.mxu0 %v7230_v51  ;;  %1165 = vmatpush1.msra.mxu1 %v7232_v52 }
 0x2a3   :  { %1095 = vmatprep.subr.mxu0 %v7238_v54  ;;  %1166 = vmatprep.subr.mxu1 %v7240_v55 }
 0x2a4   :  { %1096 = vmatpush1.msra.mxu0 %v7244_v56  ;;  %1167 = vmatpush1.msra.mxu1 %v7246_v57 }
 0x2a5   :  { %1097 = vmatprep.subr.mxu0 %v7250_v58  ;;  %1168 = vmatprep.subr.mxu1 %v7252_v59 }
 0x2a6   :  { %1098 = vmatpush1.msra.mxu0 %v7258_v60  ;;  %1169 = vmatpush1.msra.mxu1 %v7260_v61 }
 0x2a7   :  { %1099 = vmatprep.subr.mxu0 %v7266_v63  ;;  %1170 = vmatprep.subr.mxu1 %v7268_v1 }
 0x2a8   :  { %1100 = vmatpush1.msra.mxu0 %v7272_v2  ;;  %1171 = vmatpush1.msra.mxu1 %v7274_v3 }
 0x2a9   :  { %1101 = vmatprep.subr.mxu0 %v10590_v17  ;;  %1172 = vmatprep.subr.mxu1 %v10591_v14 }
 0x2aa   :  { %1102 = vmatpush1.msra.mxu0 %v10592_v8  ;;  %1173 = vmatpush1.msra.mxu1 %v10618_v20 }
 0x2ab   :  { %1103 = vmatprep.subr.mxu0 %v10619_v21  ;;  %1174 = vmatprep.subr.mxu1 %v10620_v22 }
 0x2ac   :  { %1104 = vmatpush1.msra.mxu0 %v10621_v23  ;;  %1175 = vmatpush1.msra.mxu1 %v10622_v24 }
 0x2ad   :  { %1105 = vmatprep.subr.mxu0 %v10623_v25  ;;  %1176 = vmatprep.subr.mxu1 %v10624_v27 }
 0x2ae   :  { %1106 = vmatpush1.msra.mxu0 %v10625_v28  ;;  %1177 = vmatpush1.msra.mxu1 %v10626_v29 }
 0x2af   :  { %1107 = vmatprep.subr.mxu0 %v10627_v30  ;;  %1178 = vmatprep.subr.mxu1 %v10628_v31 }
 0x2b0   :  { %1108 = vmatpush1.msra.mxu0 %v10629_v32  ;;  %1179 = vmatpush1.msra.mxu1 %v10630_v33 }
 0x2b1   :  { %1109 = vmatprep.subr.mxu0 %v10631_v34  ;;  %1180 = vmatprep.subr.mxu1 %v10632_v36 }
 0x2b2   :  { %1110 = vmatpush1.msra.mxu0 %v10633_v37  ;;  %1143 = vmatprep.mubr.f32.mxu0 %v10634_v38 }
 0x2b3   :  { %1181 = vmatpush1.msra.mxu1 %v10635_v39  ;;  %1214 = vmatprep.mubr.f32.mxu1 %v10634_v38 }
 0x2b4   :  { %1252 = vmatprep.subr.mxu0 %v7671_v40  ;;  %1323 = vmatprep.subr.mxu1 %v7674_v41 }
 0x353   :  { %v972_v42 = vpop.f32.mrf.mxu0  ;;  %v1043_v12 = vpop.f32.mrf.mxu1 }
 0x354   :  { %v973_v45 = vadd.f32 %v972_v42, %v10638_v43  ;;  %v1044_v11 = vadd.f32 %v1043_v12, %v10640_v18  ;;  %v7689_v18 = vld [vmem:[#allocation10 + $0x1e0] sm:$0xff] }
 0x355   :  { %v974_v46 = vpop.f32.mrf.mxu0  ;;  %v1045_v10 = vpop.f32.mrf.mxu1 }
 0x356   :  { %v5914_v44 = vmul.f32 -1.442695, %v973_v45  ;;  %v975_v0 = vadd.f32 %v974_v46, %v10639_v6  ;;  %v5916_v5 = vmul.f32 -1.442695, %v1044_v11  ;;  %v1046_v13 = vadd.f32 %v1045_v10, %v10641_v62  ;;  %v7692_v11 = vld [vmem:[#allocation10 + $0x1f0] sm:$0xff]  ;;  %v7698_v10 = vld [vmem:[#allocation10 + $0x1d8] sm:$0xff] }
 0x357   :  { %v7704_v62 = vld [vmem:[#allocation10 + $0x1d0] sm:$0xff] }
 0x358   :  { %6194 = vpow2.f32 %v5914_v44  ;;  %v5915_v7 = vmul.f32 -1.442695, %v975_v0 }
 0x35a   :  { %6196 = vpow2.f32 %v5915_v7 }
 0x35b   :  { %6198 = vpow2.f32 %v5916_v5  ;;  %v7701_v5 = vld [vmem:[#allocation10 + $0x1c0] sm:$0xff] }
 0x35c   :  { %6200 = vtanh.f32 %v1046_v13  ;;  %v7707_v13 = vld [vmem:[#allocation10 + $0x1a8] sm:$0xff] }
 0x365   :  { %v6195_v4 = vpop.eup %6194 }
 0x366   :  { %v1057_v53 = vadd.f32 1.0, %v6195_v4  ;;  %v7710_v4 = vld [vmem:[#allocation10 + $0x1b8] sm:$0xff] }
 0x367   :  { %v6197_v35 = vpop.eup %6196 }
 0x368   :  { %6202 = vrcp.f32 %v1057_v53  ;;  %v1058_v26 = vadd.f32 1.0, %v6197_v35  ;;  %v6199_v16 = vpop.eup %6198  ;;  %v7713_v53 = vld [vmem:[#allocation10 + $0x1a0] sm:$0xff]  ;;  %v7716_v35 = vld [vmem:[#allocation10 + $0x1b0] sm:$0xff] }
 0x369   :  { %v6201_v15 = vpop.eup %6200  ;;  %v1059_v46 = vadd.f32 1.0, %v6199_v16  ;;  %v7722_v16 = vld [vmem:[#allocation10 + $0x198] sm:$0xff] }
 0x36a   :  { %6204 = vrcp.f32 %v1058_v26  ;;  %v7719_v26 = vld [vmem:[#allocation10 + $0x188] sm:$0xff] }
 0x36b   :  { %6206 = vrcp.f32 %v1059_v46  ;;  %v7737_v46 = vld [vmem:[#allocation10 + $0x160] sm:$0xff] }
 0x36c   :  { %10643 = vst [vmem:[#allocation30_spill] sm:$0xff] %v7737_v46 }
 0x375   :  { %v6203_v42 = vpop.eup %6202 }
 0x376   :  { %v1068_v43 = vmul.f32 %v6203_v42, %v6201_v15  ;;  %v7725_v15 = vld [vmem:[#allocation10 + $0x180] sm:$0xff]  ;;  %v7728_v42 = vld [vmem:[#allocation10 + $0x190] sm:$0xff] }
 0x377   :  { %v6205_v45 = vpop.eup %6204 }
 0x378   :  { %v1067_v44 = vmul.f32 %v6205_v45, %v7600_v9  ;;  %v6207_v0 = vpop.eup %6206  ;;  %v7695_v9 = vld [vmem:[#allocation10 + $0x1c8] sm:$0xff]  ;;  %v7734_v45 = vld [vmem:[#allocation10 + $0x178] sm:$0xff] }
 0x37a   :  { %v7682_v6 = vadd.f32 %v1068_v43, %v1067_v44  ;;  %v7731_v43 = vld [vmem:[#allocation10 + $0x168] sm:$0xff]  ;;  %v7740_v44 = vld [vmem:[#allocation10 + $0x170] sm:$0xff] }
 0x37b   :  { %10644 = vst [vmem:[#allocation55_spill] sm:$0xff] %v7740_v44 }
 0x37c   :  { %6208 = vtanh.f32 %v7682_v6 }
 0x389   :  { %v6209_v7 = vpop.eup %6208 }
 0x38a   :  { %v7685_v12 = vmul.f32 %v6209_v7, %v6207_v0  ;;  %v7743_v0 = vld [vmem:[#allocation10 + $0x148] sm:$0xff]  ;;  %v7746_v7 = vld [vmem:[#allocation10 + $0x158] sm:$0xff] }
 0x38c   :  { %10642 = vst [vmem:[#allocation29_spill] sm:$0xff] %v7685_v12  ;;  %1144 = vmatmul.mubr.f32.vlgmr.msra.gmra.mxu0 %v7685_v12  ;;  %1215 = vmatmul.mubr.f32.vlgmr.msra.gmra.mxu1 %v7685_v12  ;;  %v7749_v12 = vld [vmem:[#allocation10 + $0x140] sm:$0xff] }
 0x38d   :  { %1253 = vmatpush1.msra.mxu0 %v7689_v18  ;;  %1324 = vmatpush1.msra.mxu1 %v7692_v11 }
 0x38e   :  { %1254 = vmatprep.subr.mxu0 %v7695_v9  ;;  %1325 = vmatprep.subr.mxu1 %v7698_v10 }
 0x38f   :  { %1255 = vmatpush1.msra.mxu0 %v7701_v5  ;;  %1326 = vmatpush1.msra.mxu1 %v7704_v62 }
 0x390   :  { %1256 = vmatprep.subr.mxu0 %v7707_v13  ;;  %1327 = vmatprep.subr.mxu1 %v7710_v4 }
 0x391   :  { %1257 = vmatpush1.msra.mxu0 %v7713_v53  ;;  %1328 = vmatpush1.msra.mxu1 %v7716_v35 }
 0x392   :  { %1258 = vmatprep.subr.mxu0 %v7719_v26  ;;  %1329 = vmatprep.subr.mxu1 %v7722_v16 }
 0x393   :  { %1259 = vmatpush1.msra.mxu0 %v7725_v15  ;;  %1330 = vmatpush1.msra.mxu1 %v7728_v42 }
 0x394   :  { %1260 = vmatprep.subr.mxu0 %v7731_v43  ;;  %1331 = vmatprep.subr.mxu1 %v7734_v45 }
 0x395   :  { %1261 = vmatpush1.msra.mxu0 %v7737_v46  ;;  %1332 = vmatpush1.msra.mxu1 %v7740_v44  ;;  %v7755_v46 = vld [vmem:[#allocation10 + $0x128] sm:$0xff]  ;;  %v7758_v44 = vld [vmem:[#allocation10 + $0x138] sm:$0xff] }
 0x396   :  { %1262 = vmatprep.subr.mxu0 %v7743_v0  ;;  %1333 = vmatprep.subr.mxu1 %v7746_v7 }
 0x397   :  { %1263 = vmatpush1.msra.mxu0 %v7749_v12  ;;  %1334 = vmatpush1.msra.mxu1 %v7752_v19 }
 0x398   :  { %1264 = vmatprep.subr.mxu0 %v7755_v46  ;;  %1335 = vmatprep.subr.mxu1 %v7758_v44 }
 0x399   :  { %1265 = vmatpush1.msra.mxu0 %v7216_v47  ;;  %1336 = vmatpush1.msra.mxu1 %v7218_v48  ;;  %v10645_v48 = vld [vmem:[#allocation63_spill] sm:$0xff] }
 0x39a   :  { %1266 = vmatprep.subr.mxu0 %v7222_v49  ;;  %1337 = vmatprep.subr.mxu1 %v7224_v50 }
 0x39b   :  { %1267 = vmatpush1.msra.mxu0 %v7230_v51  ;;  %1338 = vmatpush1.msra.mxu1 %v7232_v52  ;;  %v10646_v52 = vld [vmem:[#allocation65_spill] sm:$0xff] }
 0x39c   :  { %1268 = vmatprep.subr.mxu0 %v7238_v54  ;;  %1339 = vmatprep.subr.mxu1 %v7240_v55 }
 0x39d   :  { %1269 = vmatpush1.msra.mxu0 %v7244_v56  ;;  %1340 = vmatpush1.msra.mxu1 %v7246_v57  ;;  %v10647_v57 = vld [vmem:[#allocation64_spill] sm:$0xff] }
 0x39e   :  { %1270 = vmatprep.subr.mxu0 %v7250_v58  ;;  %1341 = vmatprep.subr.mxu1 %v7252_v59 }
 0x39f   :  { %1271 = vmatpush1.msra.mxu0 %v7258_v60  ;;  %1342 = vmatpush1.msra.mxu1 %v7260_v61  ;;  %v10648_v61 = vld [vmem:[#allocation66_spill] sm:$0xff] }
 0x3a0   :  { %1272 = vmatprep.subr.mxu0 %v7266_v63  ;;  %1343 = vmatprep.subr.mxu1 %v7268_v1 }
 0x3a1   :  { %1273 = vmatpush1.msra.mxu0 %v7272_v2  ;;  %1344 = vmatpush1.msra.mxu1 %v7274_v3 }
 0x3a2   :  { %1274 = vmatprep.subr.mxu0 %v10590_v17  ;;  %1345 = vmatprep.subr.mxu1 %v10591_v14 }
 0x3a3   :  { %1275 = vmatpush1.msra.mxu0 %v10592_v8  ;;  %1346 = vmatpush1.msra.mxu1 %v10618_v20 }
 0x3a4   :  { %1276 = vmatprep.subr.mxu0 %v10619_v21  ;;  %1347 = vmatprep.subr.mxu1 %v10620_v22 }
 0x3a5   :  { %1277 = vmatpush1.msra.mxu0 %v10621_v23  ;;  %1348 = vmatpush1.msra.mxu1 %v10622_v24 }
 0x3a6   :  { %1278 = vmatprep.subr.mxu0 %v10623_v25  ;;  %1349 = vmatprep.subr.mxu1 %v10624_v27 }
 0x3a7   :  { %1279 = vmatpush1.msra.mxu0 %v10625_v28  ;;  %1350 = vmatpush1.msra.mxu1 %v10626_v29 }
 0x3a8   :  { %1280 = vmatprep.subr.mxu0 %v10627_v30  ;;  %1351 = vmatprep.subr.mxu1 %v10628_v31  ;;  %v10650_v30 = vld [vmem:[#allocation30_spill] sm:$0xff]  ;;  %v10651_v31 = vld [vmem:[#allocation55_spill] sm:$0xff] }
 0x3a9   :  { %1281 = vmatpush1.msra.mxu0 %v10629_v32  ;;  %1352 = vmatpush1.msra.mxu1 %v10630_v33  ;;  %v7839_v32 = vld [vmem:[#allocation10 + $0x120] sm:$0xff]  ;;  %v7842_v33 = vld [vmem:[#allocation10 + $0x130] sm:$0xff] }
 0x3aa   :  { %1282 = vmatprep.subr.mxu0 %v10631_v34  ;;  %1353 = vmatprep.subr.mxu1 %v10632_v36  ;;  %v7845_v34 = vld [vmem:[#allocation10 + $0x108] sm:$0xff]  ;;  %v7848_v36 = vld [vmem:[#allocation10 + $0x118] sm:$0xff] }
 0x3ab   :  { %1283 = vmatpush1.msra.mxu0 %v10633_v37  ;;  %1316 = vmatprep.mubr.f32.mxu0 %v10634_v38  ;;  %v7851_v37 = vld [vmem:[#allocation10 + $0x100] sm:$0xff] }
 0x3ac   :  { %1354 = vmatpush1.msra.mxu1 %v10635_v39  ;;  %1387 = vmatprep.mubr.f32.mxu1 %v10634_v38  ;;  %v7854_v39 = vld [vmem:[#allocation10 + $0x110] sm:$0xff] }
 0x3ad   :  { %1425 = vmatprep.subr.mxu0 %v7671_v40  ;;  %1496 = vmatprep.subr.mxu1 %v7674_v41 }
 0x44c   :  { %v1145_v47 = vpop.f32.mrf.mxu0  ;;  %v1216_v56 = vpop.f32.mrf.mxu1 }
 0x44d   :  { %v1146_v49 = vadd.f32 %v1145_v47, %v10645_v48  ;;  %v1217_v58 = vadd.f32 %v1216_v56, %v10647_v57  ;;  %v7860_v47 = vld [vmem:[#allocation10 + $0xf8] sm:$0xff]  ;;  %v7863_v48 = vld [vmem:[#allocation10 + $0xe0] sm:$0xff] }
 0x44e   :  { %v1147_v50 = vpop.f32.mrf.mxu0  ;;  %v1218_v59 = vpop.f32.mrf.mxu1  ;;  %v7884_v56 = vld [vmem:[#allocation10 + $0xb8] sm:$0xff]  ;;  %v7887_v57 = vld [vmem:[#allocation10 + $0xa0] sm:$0xff] }
 0x44f   :  { %v5917_v51 = vmul.f32 -1.442695, %v1146_v49  ;;  %v1148_v54 = vadd.f32 %v1147_v50, %v10646_v52  ;;  %v5919_v60 = vmul.f32 -1.442695, %v1217_v58  ;;  %v1219_v63 = vadd.f32 %v1218_v59, %v10648_v61  ;;  %v7866_v49 = vld [vmem:[#allocation10 + $0xf0] sm:$0xff]  ;;  %v7869_v50 = vld [vmem:[#allocation10 + $0xc8] sm:$0xff] }
 0x450   :  { %v7875_v52 = vld [vmem:[#allocation10 + $0xc0] sm:$0xff]  ;;  %v7890_v58 = vld [vmem:[#allocation10 + $0xb0] sm:$0xff]  ;;  %v7893_v59 = vld [vmem:[#allocation10 + $0x88] sm:$0xff] }
 0x451   :  { %6210 = vpow2.f32 %v5917_v51  ;;  %v5918_v55 = vmul.f32 -1.442695, %v1148_v54  ;;  %v7872_v51 = vld [vmem:[#allocation10 + $0xd8] sm:$0xff]  ;;  %v7878_v54 = vld [vmem:[#allocation10 + $0xd0] sm:$0xff]  ;;  %v7899_v61 = vld [vmem:[#allocation10 + $0x80] sm:$0xff] }
 0x453   :  { %6212 = vpow2.f32 %v5918_v55  ;;  %v7881_v55 = vld [vmem:[#allocation10 + $0xa8] sm:$0xff] }
 0x454   :  { %6214 = vpow2.f32 %v5919_v60  ;;  %v7896_v60 = vld [vmem:[#allocation10 + $0x98] sm:$0xff] }
 0x455   :  { %6216 = vtanh.f32 %v1219_v63  ;;  %v7902_v63 = vld [vmem:[#allocation10 + $0x90] sm:$0xff] }
 0x456   :  { %10652 = vst [vmem:[#allocation56_spill] sm:$0xff] %v7902_v63 }
 0x45e   :  { %v6211_v1 = vpop.eup %6210 }
 0x45f   :  { %v1230_v2 = vadd.f32 1.0, %v6211_v1  ;;  %v7905_v1 = vld [vmem:[#allocation10 + $0x68] sm:$0xff] }
 0x460   :  { %v6213_v3 = vpop.eup %6212  ;;  %10653 = vst [vmem:[#allocation58_spill] sm:$0xff] %v7905_v1 }
 0x461   :  { %6218 = vrcp.f32 %v1230_v2  ;;  %v1231_v17 = vadd.f32 1.0, %v6213_v3  ;;  %v6215_v14 = vpop.eup %6214  ;;  %v7908_v2 = vld [vmem:[#allocation10 + $0x78] sm:$0xff]  ;;  %v7911_v3 = vld [vmem:[#allocation10 + $0x60] sm:$0xff] }
 0x462   :  { %v6217_v8 = vpop.eup %6216  ;;  %v1232_v23 = vadd.f32 1.0, %v6215_v14  ;;  %10654 = vst [vmem:[#allocation34_spill] sm:$0xff] %v7908_v2  ;;  %10655 = vst [vmem:[#allocation35_spill] sm:$0xff] %v7911_v3  ;;  %v7917_v14 = vld [vmem:[#allocation10 + $0x48] sm:$0xff] }
 0x463   :  { %6220 = vrcp.f32 %v1231_v17  ;;  %v7914_v17 = vld [vmem:[#allocation10 + $0x70] sm:$0xff]  ;;  %10657 = vst [vmem:[#allocation37_spill] sm:$0xff] %v7917_v14 }
 0x464   :  { %6222 = vrcp.f32 %v1232_v23  ;;  %10656 = vst [vmem:[#allocation36_spill] sm:$0xff] %v7914_v17  ;;  %v7932_v23 = vld [vmem:[#allocation10 + $0x38] sm:$0xff] }
 0x465   :  { %10662 = vst [vmem:[#allocation42_spill] sm:$0xff] %v7932_v23 }
 0x46e   :  { %v6219_v20 = vpop.eup %6218 }
 0x46f   :  { %v1241_v21 = vmul.f32 %v6219_v20, %v6217_v8  ;;  %v7920_v8 = vld [vmem:[#allocation10 + $0x58] sm:$0xff]  ;;  %v7923_v20 = vld [vmem:[#allocation10 + $0x40] sm:$0xff] }
 0x470   :  { %v6221_v22 = vpop.eup %6220  ;;  %10658 = vst [vmem:[#allocation38_spill] sm:$0xff] %v7920_v8  ;;  %10659 = vst [vmem:[#allocation39_spill] sm:$0xff] %v7923_v20 }
 0x471   :  { %v1240_v24 = vmul.f32 %v6221_v22, %v7682_v6  ;;  %v6223_v27 = vpop.eup %6222  ;;  %v7857_v6 = vld [vmem:[#allocation10 + $0xe8] sm:$0xff] }
 0x472   :  { %v7929_v22 = vld [vmem:[#allocation10 + $0x28] sm:$0xff] }
 0x473   :  { %v7808_v25 = vadd.f32 %v1241_v21, %v1240_v24  ;;  %v7926_v21 = vld [vmem:[#allocation10 + $0x50] sm:$0xff]  ;;  %10661 = vst [vmem:[#allocation41_spill] sm:$0xff] %v7929_v22  ;;  %v7935_v24 = vld [vmem:[#allocation10 + $0x20] sm:$0xff] }
 0x474   :  { %10660 = vst [vmem:[#allocation40_spill] sm:$0xff] %v7926_v21  ;;  %10663 = vst [vmem:[#allocation43_spill] sm:$0xff] %v7935_v24 }
 0x475   :  { %6224 = vtanh.f32 %v7808_v25 }
 0x482   :  { %v6225_v28 = vpop.eup %6224 }
 0x483   :  { %v7811_v29 = vmul.f32 %v6225_v28, %v6223_v27  ;;  %v7938_v27 = vld [vmem:[#allocation10 + $0x30] sm:$0xff]  ;;  %v7941_v28 = vld [vmem:[#allocation10 + $0x8] sm:$0xff] }
 0x484   :  { %10664 = vst [vmem:[#allocation44_spill] sm:$0xff] %v7938_v27  ;;  %10665 = vst [vmem:[#allocation45_spill] sm:$0xff] %v7941_v28 }
 0x485   :  { %10649 = vst [vmem:[#allocation57_spill] sm:$0xff] %v7811_v29  ;;  %1317 = vmatmul.mubr.f32.vlgmr.msra.gmra.mxu0 %v7811_v29  ;;  %1388 = vmatmul.mubr.f32.vlgmr.msra.gmra.mxu1 %v7811_v29  ;;  %v7944_v29 = vld [vmem:[#allocation10 + $0x18] sm:$0xff] }
 0x486   :  { %1426 = vmatpush1.msra.mxu0 %v7689_v18  ;;  %1497 = vmatpush1.msra.mxu1 %v7692_v11  ;;  %10666 = vst [vmem:[#allocation46_spill] sm:$0xff] %v7944_v29 }
 0x487   :  { %1427 = vmatprep.subr.mxu0 %v7695_v9  ;;  %1498 = vmatprep.subr.mxu1 %v7698_v10 }
 0x488   :  { %1428 = vmatpush1.msra.mxu0 %v7701_v5  ;;  %1499 = vmatpush1.msra.mxu1 %v7704_v62 }
 0x489   :  { %1429 = vmatprep.subr.mxu0 %v7707_v13  ;;  %1500 = vmatprep.subr.mxu1 %v7710_v4 }
 0x48a   :  { %1430 = vmatpush1.msra.mxu0 %v7713_v53  ;;  %1501 = vmatpush1.msra.mxu1 %v7716_v35 }
 0x48b   :  { %1431 = vmatprep.subr.mxu0 %v7719_v26  ;;  %1502 = vmatprep.subr.mxu1 %v7722_v16 }
 0x48c   :  { %1432 = vmatpush1.msra.mxu0 %v7725_v15  ;;  %1503 = vmatpush1.msra.mxu1 %v7728_v42 }
 0x48d   :  { %1433 = vmatprep.subr.mxu0 %v7731_v43  ;;  %1504 = vmatprep.subr.mxu1 %v7734_v45 }
 0x48e   :  { %1434 = vmatpush1.msra.mxu0 %v10650_v30  ;;  %1505 = vmatpush1.msra.mxu1 %v10651_v31 }
 0x48f   :  { %1435 = vmatprep.subr.mxu0 %v7743_v0  ;;  %1506 = vmatprep.subr.mxu1 %v7746_v7 }
 0x490   :  { %1436 = vmatpush1.msra.mxu0 %v7749_v12  ;;  %1507 = vmatpush1.msra.mxu1 %v7752_v19 }
 0x491   :  { %1437 = vmatprep.subr.mxu0 %v7755_v46  ;;  %1508 = vmatprep.subr.mxu1 %v7758_v44 }
 0x492   :  { %1438 = vmatpush1.msra.mxu0 %v7839_v32  ;;  %1509 = vmatpush1.msra.mxu1 %v7842_v33 }
 0x493   :  { %1439 = vmatprep.subr.mxu0 %v7845_v34  ;;  %1510 = vmatprep.subr.mxu1 %v7848_v36 }
 0x494   :  { %1440 = vmatpush1.msra.mxu0 %v7851_v37  ;;  %1511 = vmatpush1.msra.mxu1 %v7854_v39 }
 0x495   :  { %1441 = vmatprep.subr.mxu0 %v7857_v6  ;;  %1512 = vmatprep.subr.mxu1 %v7860_v47 }
 0x496   :  { %1442 = vmatpush1.msra.mxu0 %v7863_v48  ;;  %1513 = vmatpush1.msra.mxu1 %v7866_v49 }
 0x497   :  { %1443 = vmatprep.subr.mxu0 %v7869_v50  ;;  %1514 = vmatprep.subr.mxu1 %v7872_v51 }
 0x498   :  { %1444 = vmatpush1.msra.mxu0 %v7875_v52  ;;  %1515 = vmatpush1.msra.mxu1 %v7878_v54 }
 0x499   :  { %1445 = vmatprep.subr.mxu0 %v7881_v55  ;;  %1516 = vmatprep.subr.mxu1 %v7884_v56 }
 0x49a   :  { %1446 = vmatpush1.msra.mxu0 %v7887_v57  ;;  %1517 = vmatpush1.msra.mxu1 %v7890_v58 }
 0x49b   :  { %1447 = vmatprep.subr.mxu0 %v7893_v59  ;;  %1518 = vmatprep.subr.mxu1 %v7896_v60 }
 0x49c   :  { %1448 = vmatpush1.msra.mxu0 %v7899_v61  ;;  %1519 = vmatpush1.msra.mxu1 %v7902_v63 }
 0x49d   :  { %1449 = vmatprep.subr.mxu0 %v7905_v1  ;;  %1520 = vmatprep.subr.mxu1 %v7908_v2 }
 0x49e   :  { %1450 = vmatpush1.msra.mxu0 %v7911_v3  ;;  %1521 = vmatpush1.msra.mxu1 %v7914_v17  ;;  %v10671_v17 = vld [vmem:[#allocation68_spill] sm:$0xff] }
 0x49f   :  { %1451 = vmatprep.subr.mxu0 %v7917_v14  ;;  %1522 = vmatprep.subr.mxu1 %v7920_v8 }
 0x4a0   :  { %1452 = vmatpush1.msra.mxu0 %v7923_v20  ;;  %1523 = vmatpush1.msra.mxu1 %v7926_v21  ;;  %v10670_v20 = vld [vmem:[#allocation69_spill] sm:$0xff] }
 0x4a1   :  { %1453 = vmatprep.subr.mxu0 %v7929_v22  ;;  %1524 = vmatprep.subr.mxu1 %v7932_v23  ;;  %v7947_v22 = vld [vmem:[#allocation10] sm:$0xff]  ;;  %v7951_v23 = vld [vmem:[#allocation10 + $0x10] sm:$0xff] }
 0x4a2   :  { %1454 = vmatpush1.msra.mxu0 %v7935_v24  ;;  %1525 = vmatpush1.msra.mxu1 %v7938_v27  ;;  %10667 = vst [vmem:[#allocation47_spill] sm:$0xff] %v7947_v22  ;;  %10668 = vst [vmem:[#allocation48_spill] sm:$0xff] %v7951_v23  ;;  %v10669_v27 = vld [vmem:[#allocation67_spill] sm:$0xff] }
 0x4a3   :  { %1455 = vmatprep.subr.mxu0 %v7941_v28  ;;  %1526 = vmatprep.subr.mxu1 %v7944_v29 }
 0x4a4   :  { %1456 = vmatpush1.msra.mxu0 %v7947_v22  ;;  %1489 = vmatprep.mubr.f32.mxu0 %v10634_v38 }
 0x4a5   :  { %1527 = vmatpush1.msra.mxu1 %v7951_v23  ;;  %1560 = vmatprep.mubr.f32.mxu1 %v10634_v38  ;;  %v10672_v38 = vld [vmem:[#allocation70_spill] sm:$0xff] }
 0x4a6   :  { %1598 = vmatprep.subr.mxu0 %v7671_v40  ;;  %1669 = vmatprep.subr.mxu1 %v7674_v41 }
 0x545   :  { %v1318_v28 = vpop.f32.mrf.mxu0  ;;  %v1389_v14 = vpop.f32.mrf.mxu1 }
 0x546   :  { %v1319_v24 = vadd.f32 %v1318_v28, %v10669_v27  ;;  %v1390_v3 = vadd.f32 %v1389_v14, %v10671_v17  ;;  %v10680_v28 = vld [vmem:[#allocation38_spill] sm:$0xff] }
 0x547   :  { %v1320_v29 = vpop.f32.mrf.mxu0  ;;  %v1391_v23 = vpop.f32.mrf.mxu1 }
 0x548   :  { %v5920_v21 = vmul.f32 -1.442695, %v1319_v24  ;;  %v1321_v8 = vadd.f32 %v1320_v29, %v10670_v20  ;;  %v5922_v2 = vmul.f32 -1.442695, %v1390_v3  ;;  %v1392_v1 = vadd.f32 %v1391_v23, %v10672_v38  ;;  %v10678_v3 = vld [vmem:[#allocation36_spill] sm:$0xff]  ;;  %v10679_v23 = vld [vmem:[#allocation37_spill] sm:$0xff] }
 0x54a   :  { %6226 = vpow2.f32 %v5920_v21  ;;  %v5921_v22 = vmul.f32 -1.442695, %v1321_v8 }
 0x54c   :  { %6228 = vpow2.f32 %v5921_v22 }
 0x54d   :  { %6230 = vpow2.f32 %v5922_v2 }
 0x54e   :  { %6232 = vtanh.f32 %v1392_v1  ;;  %v10677_v1 = vld [vmem:[#allocation35_spill] sm:$0xff] }
 0x557   :  { %v6227_v40 = vpop.eup %6226 }
 0x558   :  { %v1403_v63 = vadd.f32 1.0, %v6227_v40 }
 0x559   :  { %v6229_v41 = vpop.eup %6228 }
 0x55a   :  { %6234 = vrcp.f32 %v1403_v63  ;;  %v1404_v27 = vadd.f32 1.0, %v6229_v41  ;;  %v6231_v24 = vpop.eup %6230  ;;  %v10674_v41 = vld [vmem:[#allocation56_spill] sm:$0xff]  ;;  %v10676_v63 = vld [vmem:[#allocation34_spill] sm:$0xff] }
 0x55b   :  { %v6233_v29 = vpop.eup %6232  ;;  %v1405_v22 = vadd.f32 1.0, %v6231_v24  ;;  %v10682_v24 = vld [vmem:[#allocation40_spill] sm:$0xff] }
 0x55c   :  { %6236 = vrcp.f32 %v1404_v27  ;;  %v10681_v27 = vld [vmem:[#allocation39_spill] sm:$0xff] }
 0x55d   :  { %6238 = vrcp.f32 %v1405_v22  ;;  %v10687_v22 = vld [vmem:[#allocation45_spill] sm:$0xff] }
 0x567   :  { %v6235_v20 = vpop.eup %6234 }
 0x568   :  { %v1414_v8 = vmul.f32 %v6235_v20, %v6233_v29  ;;  %v10683_v29 = vld [vmem:[#allocation41_spill] sm:$0xff]  ;;  %v10684_v20 = vld [vmem:[#allocation42_spill] sm:$0xff] }
 0x569   :  { %v6237_v21 = vpop.eup %6236 }
 0x56a   :  { %v1413_v17 = vmul.f32 %v6237_v21, %v7808_v25  ;;  %v6239_v38 = vpop.eup %6238  ;;  %v10675_v25 = vld [vmem:[#allocation58_spill] sm:$0xff]  ;;  %v10686_v21 = vld [vmem:[#allocation44_spill] sm:$0xff] }
 0x56c   :  { %v7962_v14 = vadd.f32 %v1414_v8, %v1413_v17  ;;  %v10685_v8 = vld [vmem:[#allocation43_spill] sm:$0xff]  ;;  %v10688_v17 = vld [vmem:[#allocation46_spill] sm:$0xff] }
 0x56e   :  { %6240 = vtanh.f32 %v7962_v14 }
 0x57b   :  { %v6241_v40 = vpop.eup %6240 }
 0x57c   :  { %v7965_v2 = vmul.f32 %v6241_v40, %v6239_v38  ;;  %v10689_v38 = vld [vmem:[#allocation47_spill] sm:$0xff]  ;;  %v10690_v40 = vmov 0.0  }
 0x57e   :  { %10673 = vst [vmem:[#allocation49_spill] sm:$0xff] %v7965_v2  ;;  %1490 = vmatmul.mubr.f32.vlgmr.msra.gmra.mxu0 %v7965_v2  ;;  %1561 = vmatmul.mubr.f32.vlgmr.msra.gmra.mxu1 %v7965_v2  ;;  %v10691_v2 = vld [vmem:[#allocation48_spill] sm:$0xff] }
 0x57f   :  { %1599 = vmatpush1.msra.mxu0 %v7689_v18  ;;  %1670 = vmatpush1.msra.mxu1 %v7692_v11 }
 0x580   :  { %1600 = vmatprep.subr.mxu0 %v7695_v9  ;;  %1671 = vmatprep.subr.mxu1 %v7698_v10 }
 0x581   :  { %1601 = vmatpush1.msra.mxu0 %v7701_v5  ;;  %1672 = vmatpush1.msra.mxu1 %v7704_v62 }
 0x582   :  { %1602 = vmatprep.subr.mxu0 %v7707_v13  ;;  %1673 = vmatprep.subr.mxu1 %v7710_v4 }
 0x583   :  { %1603 = vmatpush1.msra.mxu0 %v7713_v53  ;;  %1674 = vmatpush1.msra.mxu1 %v7716_v35 }
 0x584   :  { %1604 = vmatprep.subr.mxu0 %v7719_v26  ;;  %1675 = vmatprep.subr.mxu1 %v7722_v16 }
 0x585   :  { %1605 = vmatpush1.msra.mxu0 %v7725_v15  ;;  %1676 = vmatpush1.msra.mxu1 %v7728_v42 }
 0x586   :  { %1606 = vmatprep.subr.mxu0 %v7731_v43  ;;  %1677 = vmatprep.subr.mxu1 %v7734_v45 }
 0x587   :  { %1607 = vmatpush1.msra.mxu0 %v10650_v30  ;;  %1678 = vmatpush1.msra.mxu1 %v10651_v31 }
 0x588   :  { %1608 = vmatprep.subr.mxu0 %v7743_v0  ;;  %1679 = vmatprep.subr.mxu1 %v7746_v7 }
 0x589   :  { %1609 = vmatpush1.msra.mxu0 %v7749_v12  ;;  %1680 = vmatpush1.msra.mxu1 %v7752_v19 }
 0x58a   :  { %1610 = vmatprep.subr.mxu0 %v7755_v46  ;;  %1681 = vmatprep.subr.mxu1 %v7758_v44 }
 0x58b   :  { %1611 = vmatpush1.msra.mxu0 %v7839_v32  ;;  %1682 = vmatpush1.msra.mxu1 %v7842_v33 }
 0x58c   :  { %1612 = vmatprep.subr.mxu0 %v7845_v34  ;;  %1683 = vmatprep.subr.mxu1 %v7848_v36 }
 0x58d   :  { %1613 = vmatpush1.msra.mxu0 %v7851_v37  ;;  %1684 = vmatpush1.msra.mxu1 %v7854_v39 }
 0x58e   :  { %1614 = vmatprep.subr.mxu0 %v7857_v6  ;;  %1685 = vmatprep.subr.mxu1 %v7860_v47 }
 0x58f   :  { %1615 = vmatpush1.msra.mxu0 %v7863_v48  ;;  %1686 = vmatpush1.msra.mxu1 %v7866_v49 }
 0x590   :  { %1616 = vmatprep.subr.mxu0 %v7869_v50  ;;  %1687 = vmatprep.subr.mxu1 %v7872_v51 }
 0x591   :  { %1617 = vmatpush1.msra.mxu0 %v7875_v52  ;;  %1688 = vmatpush1.msra.mxu1 %v7878_v54 }
 0x592   :  { %1618 = vmatprep.subr.mxu0 %v7881_v55  ;;  %1689 = vmatprep.subr.mxu1 %v7884_v56 }
 0x593   :  { %1619 = vmatpush1.msra.mxu0 %v7887_v57  ;;  %1690 = vmatpush1.msra.mxu1 %v7890_v58 }
 0x594   :  { %1620 = vmatprep.subr.mxu0 %v7893_v59  ;;  %1691 = vmatprep.subr.mxu1 %v7896_v60 }
 0x595   :  { %1621 = vmatpush1.msra.mxu0 %v7899_v61  ;;  %1692 = vmatpush1.msra.mxu1 %v10674_v41 }
 0x596   :  { %1622 = vmatprep.subr.mxu0 %v10675_v25  ;;  %1693 = vmatprep.subr.mxu1 %v10676_v63 }
 0x597   :  { %1623 = vmatpush1.msra.mxu0 %v10677_v1  ;;  %1694 = vmatpush1.msra.mxu1 %v10678_v3  ;;  %v10696_v3 = vld [vmem:[#allocation72_spill] sm:$0xff] }
 0x598   :  { %1624 = vmatprep.subr.mxu0 %v10679_v23  ;;  %1695 = vmatprep.subr.mxu1 %v10680_v28 }
 0x599   :  { %1625 = vmatpush1.msra.mxu0 %v10681_v27  ;;  %1696 = vmatpush1.msra.mxu1 %v10682_v24  ;;  %v10692_v24 = vld [vmem:[#allocation32_spill] sm:$0xff] }
 0x59a   :  { %1626 = vmatprep.subr.mxu0 %v10683_v29  ;;  %1697 = vmatprep.subr.mxu1 %v10684_v20  ;;  %v10693_v29 = vld [vmem:[#allocation33_spill] sm:$0xff] }
 0x59b   :  { %1627 = vmatpush1.msra.mxu0 %v10685_v8  ;;  %1698 = vmatpush1.msra.mxu1 %v10686_v21  ;;  %v10694_v8 = vld [vmem:[#allocation71_spill] sm:$0xff] }
 0x59c   :  { %1628 = vmatprep.subr.mxu0 %v10687_v22  ;;  %1699 = vmatprep.subr.mxu1 %v10688_v17  ;;  %v10695_v22 = vld [vmem:[#allocation73_spill] sm:$0xff] }
 0x59d   :  { %1629 = vmatpush1.msra.mxu0 %v10689_v38  ;;  %1662 = vmatprep.mubr.f32.mxu0 %v10690_v40 }
 0x59e   :  { %1700 = vmatpush1.msra.mxu1 %v10691_v2  ;;  %1733 = vmatprep.mubr.f32.mxu1 %v10690_v40  ;;  %v10697_v40 = vld [vmem:[#allocation74_spill] sm:$0xff] }
 0x59f   :  { %1771 = vmatprep.subr.mxu0 %v10692_v24  ;;  %1842 = vmatprep.subr.mxu1 %v10693_v29 }
 0x63e   :  { %v1491_v20 = vpop.f32.mrf.mxu0  ;;  %v1562_v38 = vpop.f32.mrf.mxu1 }
 0x63f   :  { %v1492_v27 = vadd.f32 %v1491_v20, %v10694_v8  ;;  %v1563_v1 = vadd.f32 %v1562_v38, %v10696_v3 }
 0x640   :  { %v1493_v21 = vpop.f32.mrf.mxu0  ;;  %v1564_v2 = vpop.f32.mrf.mxu1 }
 0x641   :  { %v5923_v28 = vmul.f32 -1.442695, %v1492_v27  ;;  %v1494_v23 = vadd.f32 %v1493_v21, %v10695_v22  ;;  %v5925_v63 = vmul.f32 -1.442695, %v1563_v1  ;;  %v1565_v25 = vadd.f32 %v1564_v2, %v10697_v40 }
 0x643   :  { %6242 = vpow2.f32 %v5923_v28  ;;  %v5924_v17 = vmul.f32 -1.442695, %v1494_v23 }
 0x645   :  { %6244 = vpow2.f32 %v5924_v17 }
 0x646   :  { %6246 = vpow2.f32 %v5925_v63 }
 0x647   :  { %6248 = vtanh.f32 %v1565_v25 }
 0x650   :  { %v6243_v24 = vpop.eup %6242 }
 0x651   :  { %v1576_v41 = vadd.f32 1.0, %v6243_v24  ;;  %v2074_v24 = vld [vmem:[#allocation9 + $0x1e0] sm:$0xff] }
 0x652   :  { %v6245_v29 = vpop.eup %6244 }
 0x653   :  { %6250 = vrcp.f32 %v1576_v41  ;;  %v1577_v20 = vadd.f32 1.0, %v6245_v29  ;;  %v6247_v27 = vpop.eup %6246  ;;  %v2076_v29 = vld [vmem:[#allocation9 + $0x1f0] sm:$0xff] }
 0x654   :  { %v6249_v8 = vpop.eup %6248  ;;  %v1578_v22 = vadd.f32 1.0, %v6247_v27  ;;  %v2073_v27 = vld [vmem:[#allocation9 + $0x1d8] sm:$0xff] }
 0x655   :  { %6252 = vrcp.f32 %v1577_v20  ;;  %v2071_v20 = vld [vmem:[#allocation9 + $0x1c8] sm:$0xff] }
 0x656   :  { %6254 = vrcp.f32 %v1578_v22  ;;  %v2066_v22 = vld [vmem:[#allocation9 + $0x1a0] sm:$0xff] }
 0x660   :  { %v6251_v28 = vpop.eup %6250 }
 0x661   :  { %v1587_v23 = vmul.f32 %v6251_v28, %v6249_v8  ;;  %v2070_v8 = vld [vmem:[#allocation9 + $0x1c0] sm:$0xff]  ;;  %v2072_v28 = vld [vmem:[#allocation9 + $0x1d0] sm:$0xff] }
 0x662   :  { %v6253_v21 = vpop.eup %6252 }
 0x663   :  { %v1586_v3 = vmul.f32 %v6253_v21, %v7962_v14  ;;  %v6255_v2 = vpop.eup %6254  ;;  %v2069_v21 = vld [vmem:[#allocation9 + $0x1b8] sm:$0xff] }
 0x665   :  { %v8040_v17 = vadd.f32 %v1587_v23, %v1586_v3  ;;  %v2067_v23 = vld [vmem:[#allocation9 + $0x1a8] sm:$0xff]  ;;  %v2068_v3 = vld [vmem:[#allocation9 + $0x1b0] sm:$0xff] }
 0x667   :  { %6256 = vtanh.f32 %v8040_v17 }
 0x674   :  { %v6257_v63 = vpop.eup %6256 }
 0x675   :  { %v8043_v1 = vmul.f32 %v6257_v63, %v6255_v2  ;;  %v2065_v2 = vld [vmem:[#allocation9 + $0x198] sm:$0xff]  ;;  %v2062_v63 = vld [vmem:[#allocation9 + $0x180] sm:$0xff] }
 0x677   :  { %1663 = vmatmul.mubr.f32.vlgmr.msra.gmra.mxu0 %v8043_v1  ;;  %1734 = vmatmul.mubr.f32.vlgmr.msra.gmra.mxu1 %v8043_v1 }
 0x678   :  { %1772 = vmatpush1.msra.mxu0 %v7689_v18  ;;  %1843 = vmatpush1.msra.mxu1 %v7692_v11  ;;  %v10700_v18 = vld [vmem:[#allocation34_spill] sm:$0xff]  ;;  %v10701_v11 = vld [vmem:[#allocation35_spill] sm:$0xff] }
 0x679   :  { %1773 = vmatprep.subr.mxu0 %v7695_v9  ;;  %1844 = vmatprep.subr.mxu1 %v7698_v10  ;;  %v10702_v9 = vld [vmem:[#allocation36_spill] sm:$0xff]  ;;  %v10703_v10 = vld [vmem:[#allocation37_spill] sm:$0xff] }
 0x67a   :  { %1774 = vmatpush1.msra.mxu0 %v7701_v5  ;;  %1845 = vmatpush1.msra.mxu1 %v7704_v62  ;;  %v10704_v5 = vld [vmem:[#allocation38_spill] sm:$0xff]  ;;  %v10705_v62 = vld [vmem:[#allocation39_spill] sm:$0xff] }
 0x67b   :  { %1775 = vmatprep.subr.mxu0 %v7707_v13  ;;  %1846 = vmatprep.subr.mxu1 %v7710_v4  ;;  %v10706_v13 = vld [vmem:[#allocation40_spill] sm:$0xff]  ;;  %v10707_v4 = vld [vmem:[#allocation41_spill] sm:$0xff] }
 0x67c   :  { %1776 = vmatpush1.msra.mxu0 %v7713_v53  ;;  %1847 = vmatpush1.msra.mxu1 %v7716_v35  ;;  %v10708_v53 = vld [vmem:[#allocation42_spill] sm:$0xff]  ;;  %v10709_v35 = vld [vmem:[#allocation43_spill] sm:$0xff] }
 0x67d   :  { %1777 = vmatprep.subr.mxu0 %v7719_v26  ;;  %1848 = vmatprep.subr.mxu1 %v7722_v16  ;;  %v10710_v26 = vld [vmem:[#allocation44_spill] sm:$0xff]  ;;  %v10711_v16 = vld [vmem:[#allocation45_spill] sm:$0xff] }
 0x67e   :  { %1778 = vmatpush1.msra.mxu0 %v7725_v15  ;;  %1849 = vmatpush1.msra.mxu1 %v7728_v42  ;;  %v10712_v15 = vld [vmem:[#allocation46_spill] sm:$0xff]  ;;  %v10713_v42 = vld [vmem:[#allocation47_spill] sm:$0xff] }
 0x67f   :  { %1779 = vmatprep.subr.mxu0 %v7731_v43  ;;  %1850 = vmatprep.subr.mxu1 %v7734_v45  ;;  %v10714_v43 = vld [vmem:[#allocation48_spill] sm:$0xff]  ;;  %v10715_v45 = vmov 0.0  }
 0x680   :  { %1780 = vmatpush1.msra.mxu0 %v10650_v30  ;;  %1851 = vmatpush1.msra.mxu1 %v10651_v31 }
 0x681   :  { %1781 = vmatprep.subr.mxu0 %v7743_v0  ;;  %1852 = vmatprep.subr.mxu1 %v7746_v7  ;;  %v10716_v7 = vld [vmem:[#allocation75_spill] sm:$0xff] }
 0x682   :  { %1782 = vmatpush1.msra.mxu0 %v7749_v12  ;;  %1853 = vmatpush1.msra.mxu1 %v7752_v19  ;;  %v10698_v19 = vld [vmem:[#allocation56_spill] sm:$0xff]  ;;  %v10699_v12 = vld [vmem:[#allocation58_spill] sm:$0xff] }
 0x683   :  { %1783 = vmatprep.subr.mxu0 %v7755_v46  ;;  %1854 = vmatprep.subr.mxu1 %v7758_v44  ;;  %v2075_v46 = vld [vmem:[#allocation9 + $0x1e8] sm:$0xff]  ;;  %v2077_v44 = vld [vmem:[#allocation9 + $0x1f8] sm:$0xff] }
 0x684   :  { %1784 = vmatpush1.msra.mxu0 %v7839_v32  ;;  %1855 = vmatpush1.msra.mxu1 %v7842_v33  ;;  %v10717_v33 = vld [vmem:[#allocation77_spill] sm:$0xff] }
 0x685   :  { %1785 = vmatprep.subr.mxu0 %v7845_v34  ;;  %1856 = vmatprep.subr.mxu1 %v7848_v36 }
 0x686   :  { %1786 = vmatpush1.msra.mxu0 %v7851_v37  ;;  %1857 = vmatpush1.msra.mxu1 %v7854_v39  ;;  %v10718_v39 = vld [vmem:[#allocation76_spill] sm:$0xff] }
 0x687   :  { %1787 = vmatprep.subr.mxu0 %v7857_v6  ;;  %1858 = vmatprep.subr.mxu1 %v7860_v47 }
 0x688   :  { %1788 = vmatpush1.msra.mxu0 %v7863_v48  ;;  %1859 = vmatpush1.msra.mxu1 %v7866_v49  ;;  %v10719_v49 = vld [vmem:[#allocation78_spill] sm:$0xff] }
 0x689   :  { %1789 = vmatprep.subr.mxu0 %v7869_v50  ;;  %1860 = vmatprep.subr.mxu1 %v7872_v51 }
 0x68a   :  { %1790 = vmatpush1.msra.mxu0 %v7875_v52  ;;  %1861 = vmatpush1.msra.mxu1 %v7878_v54 }
 0x68b   :  { %1791 = vmatprep.subr.mxu0 %v7881_v55  ;;  %1862 = vmatprep.subr.mxu1 %v7884_v56 }
 0x68c   :  { %1792 = vmatpush1.msra.mxu0 %v7887_v57  ;;  %1863 = vmatpush1.msra.mxu1 %v7890_v58 }
 0x68d   :  { %1793 = vmatprep.subr.mxu0 %v7893_v59  ;;  %1864 = vmatprep.subr.mxu1 %v7896_v60 }
 0x68e   :  { %1794 = vmatpush1.msra.mxu0 %v7899_v61  ;;  %1865 = vmatpush1.msra.mxu1 %v10698_v19  ;;  %v2064_v19 = vld [vmem:[#allocation9 + $0x190] sm:$0xff] }
 0x68f   :  { %1795 = vmatprep.subr.mxu0 %v10699_v12  ;;  %1866 = vmatprep.subr.mxu1 %v10700_v18  ;;  %v2059_v12 = vld [vmem:[#allocation9 + $0x168] sm:$0xff]  ;;  %v2061_v18 = vld [vmem:[#allocation9 + $0x178] sm:$0xff] }
 0x690   :  { %1796 = vmatpush1.msra.mxu0 %v10701_v11  ;;  %1867 = vmatpush1.msra.mxu1 %v10702_v9  ;;  %v2058_v11 = vld [vmem:[#allocation9 + $0x160] sm:$0xff]  ;;  %v2060_v9 = vld [vmem:[#allocation9 + $0x170] sm:$0xff] }
 0x691   :  { %1797 = vmatprep.subr.mxu0 %v10703_v10  ;;  %1868 = vmatprep.subr.mxu1 %v10704_v5  ;;  %v2055_v10 = vld [vmem:[#allocation9 + $0x148] sm:$0xff]  ;;  %v2057_v5 = vld [vmem:[#allocation9 + $0x158] sm:$0xff] }
 0x692   :  { %1798 = vmatpush1.msra.mxu0 %v10705_v62  ;;  %1869 = vmatpush1.msra.mxu1 %v10706_v13  ;;  %v2054_v62 = vld [vmem:[#allocation9 + $0x140] sm:$0xff]  ;;  %v2056_v13 = vld [vmem:[#allocation9 + $0x150] sm:$0xff] }
 0x693   :  { %1799 = vmatprep.subr.mxu0 %v10707_v4  ;;  %1870 = vmatprep.subr.mxu1 %v10708_v53  ;;  %v2051_v4 = vld [vmem:[#allocation9 + $0x128] sm:$0xff]  ;;  %v2053_v53 = vld [vmem:[#allocation9 + $0x138] sm:$0xff] }
 0x694   :  { %1800 = vmatpush1.msra.mxu0 %v10709_v35  ;;  %1871 = vmatpush1.msra.mxu1 %v10710_v26  ;;  %v2050_v35 = vld [vmem:[#allocation9 + $0x120] sm:$0xff]  ;;  %v2052_v26 = vld [vmem:[#allocation9 + $0x130] sm:$0xff] }
 0x695   :  { %1801 = vmatprep.subr.mxu0 %v10711_v16  ;;  %1872 = vmatprep.subr.mxu1 %v10712_v15  ;;  %v2047_v16 = vld [vmem:[#allocation9 + $0x108] sm:$0xff]  ;;  %v2049_v15 = vld [vmem:[#allocation9 + $0x118] sm:$0xff] }
 0x696   :  { %1802 = vmatpush1.msra.mxu0 %v10713_v42  ;;  %1873 = vmatpush1.msra.mxu1 %v10714_v43  ;;  %v2046_v42 = vld [vmem:[#allocation9 + $0x100] sm:$0xff]  ;;  %v2048_v43 = vld [vmem:[#allocation9 + $0x110] sm:$0xff] }
 0x697   :  { %1835 = vmatprep.mubr.f32.mxu0 %v10715_v45  ;;  %1906 = vmatprep.mubr.f32.mxu1 %v10715_v45 }
 0x698   :  { %2099 = vmatprep.subr.mxu0 %v2075_v46  ;;  %2212 = vmatprep.subr.mxu1 %v2077_v44  ;;  %v2043_v46 = vld [vmem:[#allocation9 + $0xe8] sm:$0xff]  ;;  %v2045_v44 = vld [vmem:[#allocation9 + $0xf8] sm:$0xff] }
 0x737   :  { %v1664_v0 = vpop.f32.mrf.mxu0  ;;  %v1735_v37 = vpop.f32.mrf.mxu1 }
 0x738   :  { %v1665_v30 = vadd.f32 %v1664_v0, %v10716_v7  ;;  %v1736_v6 = vadd.f32 %v1735_v37, %v10718_v39  ;;  %v2042_v0 = vld [vmem:[#allocation9 + $0xe0] sm:$0xff]  ;;  %v2044_v7 = vld [vmem:[#allocation9 + $0xf0] sm:$0xff] }
 0x739   :  { %v1666_v31 = vpop.f32.mrf.mxu0  ;;  %v1737_v47 = vpop.f32.mrf.mxu1  ;;  %v2034_v37 = vld [vmem:[#allocation9 + $0xa0] sm:$0xff]  ;;  %v2036_v39 = vld [vmem:[#allocation9 + $0xb0] sm:$0xff] }
 0x73a   :  { %v5926_v32 = vmul.f32 -1.442695, %v1665_v30  ;;  %v1667_v34 = vadd.f32 %v1666_v31, %v10717_v33  ;;  %v5928_v48 = vmul.f32 -1.442695, %v1736_v6  ;;  %v1738_v50 = vadd.f32 %v1737_v47, %v10719_v49  ;;  %v2039_v30 = vld [vmem:[#allocation9 + $0xc8] sm:$0xff]  ;;  %v2041_v31 = vld [vmem:[#allocation9 + $0xd8] sm:$0xff] }
 0x73b   :  { %v2040_v33 = vld [vmem:[#allocation9 + $0xd0] sm:$0xff]  ;;  %v2031_v6 = vld [vmem:[#allocation9 + $0x88] sm:$0xff]  ;;  %v2033_v47 = vld [vmem:[#allocation9 + $0x98] sm:$0xff] }
 0x73c   :  { %6258 = vpow2.f32 %v5926_v32  ;;  %v5927_v36 = vmul.f32 -1.442695, %v1667_v34  ;;  %v2038_v32 = vld [vmem:[#allocation9 + $0xc0] sm:$0xff]  ;;  %v2035_v34 = vld [vmem:[#allocation9 + $0xa8] sm:$0xff]  ;;  %v2032_v49 = vld [vmem:[#allocation9 + $0x90] sm:$0xff] }
 0x73e   :  { %6260 = vpow2.f32 %v5927_v36  ;;  %v2037_v36 = vld [vmem:[#allocation9 + $0xb8] sm:$0xff] }
 0x73f   :  { %6262 = vpow2.f32 %v5928_v48  ;;  %v2030_v48 = vld [vmem:[#allocation9 + $0x80] sm:$0xff] }
 0x740   :  { %6264 = vtanh.f32 %v1738_v50  ;;  %v2027_v50 = vld [vmem:[#allocation9 + $0x68] sm:$0xff] }
 0x749   :  { %v6259_v51 = vpop.eup %6258 }
 0x74a   :  { %v1749_v52 = vadd.f32 1.0, %v6259_v51  ;;  %v2029_v51 = vld [vmem:[#allocation9 + $0x78] sm:$0xff] }
 0x74b   :  { %v6261_v54 = vpop.eup %6260 }
 0x74c   :  { %6266 = vrcp.f32 %v1749_v52  ;;  %v1750_v55 = vadd.f32 1.0, %v6261_v54  ;;  %v6263_v56 = vpop.eup %6262  ;;  %v2026_v52 = vld [vmem:[#allocation9 + $0x60] sm:$0xff]  ;;  %v2028_v54 = vld [vmem:[#allocation9 + $0x70] sm:$0xff] }
 0x74d   :  { %v6265_v57 = vpop.eup %6264  ;;  %v1751_v61 = vadd.f32 1.0, %v6263_v56  ;;  %v2025_v56 = vld [vmem:[#allocation9 + $0x58] sm:$0xff] }
 0x74e   :  { %6268 = vrcp.f32 %v1750_v55  ;;  %v2023_v55 = vld [vmem:[#allocation9 + $0x48] sm:$0xff] }
 0x74f   :  { %6270 = vrcp.f32 %v1751_v61  ;;  %v2018_v61 = vld [vmem:[#allocation9 + $0x20] sm:$0xff] }
 0x759   :  { %v6267_v58 = vpop.eup %6266 }
 0x75a   :  { %v1760_v59 = vmul.f32 %v6267_v58, %v6265_v57  ;;  %v2022_v57 = vld [vmem:[#allocation9 + $0x40] sm:$0xff]  ;;  %v2024_v58 = vld [vmem:[#allocation9 + $0x50] sm:$0xff] }
 0x75b   :  { %v6269_v60 = vpop.eup %6268 }
 0x75c   :  { %v1759_v14 = vmul.f32 %v6269_v60, %v8040_v17  ;;  %v6271_v25 = vpop.eup %6270  ;;  %v2063_v17 = vld [vmem:[#allocation9 + $0x188] sm:$0xff]  ;;  %v2021_v60 = vld [vmem:[#allocation9 + $0x38] sm:$0xff] }
 0x75e   :  { %v8116_v41 = vadd.f32 %v1760_v59, %v1759_v14  ;;  %v2019_v59 = vld [vmem:[#allocation9 + $0x28] sm:$0xff]  ;;  %v2020_v14 = vld [vmem:[#allocation9 + $0x30] sm:$0xff] }
 0x760   :  { %6272 = vtanh.f32 %v8116_v41 }
 0x76d   :  { %v6273_v38 = vpop.eup %6272 }
 0x76e   :  { %v8119_v40 = vmul.f32 %v6273_v38, %v6271_v25  ;;  %v2015_v25 = vld [vmem:[#allocation9 + $0x8] sm:$0xff]  ;;  %v2017_v38 = vld [vmem:[#allocation9 + $0x18] sm:$0xff] }
 0x770   :  { %1836 = vmatmul.mubr.f32.vlgmr.msra.gmra.mxu0 %v8119_v40  ;;  %1907 = vmatmul.mubr.f32.vlgmr.msra.gmra.mxu1 %v8119_v40 }
 0x771   :  { %2100 = vmatpush1.msra.mxu0 %v2074_v24  ;;  %2213 = vmatpush1.msra.mxu1 %v2076_v29  ;;  %v2014_v24 = vld [vmem:[#allocation9] sm:$0xff]  ;;  %v2016_v29 = vld [vmem:[#allocation9 + $0x10] sm:$0xff] }
 0x772   :  { %2101 = vmatprep.subr.mxu0 %v2071_v20  ;;  %2214 = vmatprep.subr.mxu1 %v2073_v27  ;;  %v10720_v20 = vld [vmem:[#allocation83_spill] sm:$0xff] }
 0x773   :  { %2102 = vmatpush1.msra.mxu0 %v2070_v8  ;;  %2215 = vmatpush1.msra.mxu1 %v2072_v28  ;;  %v10721_v27 = vld [vmem:[#allocation31_spill] sm:$0xff]  ;;  %v10722_v8 = vld [vmem:[#allocation29_spill] sm:$0xff] }
 0x774   :  { %2103 = vmatprep.subr.mxu0 %v2067_v23  ;;  %2216 = vmatprep.subr.mxu1 %v2069_v21  ;;  %v10723_v28 = vld [vmem:[#allocation57_spill] sm:$0xff]  ;;  %v8153_v21 = vld [vmem:[#allocation10 + $0x3e8] sm:$0xff] }
 0x775   :  { %2104 = vmatpush1.msra.mxu0 %v2066_v22  ;;  %2217 = vmatpush1.msra.mxu1 %v2068_v3  ;;  %v10724_v23 = vld [vmem:[#allocation49_spill] sm:$0xff]  ;;  %10725 = vst [vmem:[#allocation50_spill] sm:$0xff] %v8153_v21  ;;  %v8161_v3 = vld [vmem:[#allocation10 + $0x3f0] sm:$0xff] }
 0x776   :  { %2105 = vmatprep.subr.mxu0 %v2063_v17  ;;  %2218 = vmatprep.subr.mxu1 %v2065_v2  ;;  %v8155_v22 = vld [vmem:[#allocation10 + $0x3f8] sm:$0xff]  ;;  %v8171_v2 = vld [vmem:[#allocation10 + $0x3c0] sm:$0xff] }
 0x777   :  { %2106 = vmatpush1.msra.mxu0 %v2062_v63  ;;  %2219 = vmatpush1.msra.mxu1 %v2064_v19  ;;  %10726 = vst [vmem:[#allocation59_spill] sm:$0xff] %v8155_v22  ;;  %v8167_v17 = vld [vmem:[#allocation10 + $0x3d8] sm:$0xff]  ;;  %v8173_v63 = vld [vmem:[#allocation10 + $0x3d0] sm:$0xff]  ;;  %v8177_v19 = vld [vmem:[#allocation10 + $0x3a8] sm:$0xff] }
 0x778   :  { %2107 = vmatprep.subr.mxu0 %v2059_v12  ;;  %2220 = vmatprep.subr.mxu1 %v2061_v18  ;;  %v8179_v12 = vld [vmem:[#allocation10 + $0x3b8] sm:$0xff]  ;;  %v8183_v18 = vld [vmem:[#allocation10 + $0x3a0] sm:$0xff] }
 0x779   :  { %2108 = vmatpush1.msra.mxu0 %v2058_v11  ;;  %2221 = vmatpush1.msra.mxu1 %v2060_v9  ;;  %v8185_v11 = vld [vmem:[#allocation10 + $0x3b0] sm:$0xff]  ;;  %v8189_v9 = vld [vmem:[#allocation10 + $0x388] sm:$0xff] }
 0x77a   :  { %2109 = vmatprep.subr.mxu0 %v2055_v10  ;;  %2222 = vmatprep.subr.mxu1 %v2057_v5  ;;  %v8191_v10 = vld [vmem:[#allocation10 + $0x398] sm:$0xff]  ;;  %v8195_v5 = vld [vmem:[#allocation10 + $0x380] sm:$0xff] }
 0x77b   :  { %2110 = vmatpush1.msra.mxu0 %v2054_v62  ;;  %2223 = vmatpush1.msra.mxu1 %v2056_v13  ;;  %v8197_v62 = vld [vmem:[#allocation10 + $0x390] sm:$0xff]  ;;  %v8201_v13 = vld [vmem:[#allocation10 + $0x368] sm:$0xff] }
 0x77c   :  { %2111 = vmatprep.subr.mxu0 %v2051_v4  ;;  %2224 = vmatprep.subr.mxu1 %v2053_v53  ;;  %v8203_v4 = vld [vmem:[#allocation10 + $0x378] sm:$0xff]  ;;  %v8207_v53 = vld [vmem:[#allocation10 + $0x360] sm:$0xff] }
 0x77d   :  { %2112 = vmatpush1.msra.mxu0 %v2050_v35  ;;  %2225 = vmatpush1.msra.mxu1 %v2052_v26  ;;  %v8209_v35 = vld [vmem:[#allocation10 + $0x370] sm:$0xff]  ;;  %v8213_v26 = vld [vmem:[#allocation10 + $0x348] sm:$0xff] }
 0x77e   :  { %2113 = vmatprep.subr.mxu0 %v2047_v16  ;;  %2226 = vmatprep.subr.mxu1 %v2049_v15  ;;  %v8215_v16 = vld [vmem:[#allocation10 + $0x358] sm:$0xff]  ;;  %v8219_v15 = vld [vmem:[#allocation10 + $0x340] sm:$0xff] }
 0x77f   :  { %2114 = vmatpush1.msra.mxu0 %v2046_v42  ;;  %2227 = vmatpush1.msra.mxu1 %v2048_v43  ;;  %v8221_v42 = vld [vmem:[#allocation10 + $0x350] sm:$0xff]  ;;  %v8225_v43 = vld [vmem:[#allocation10 + $0x328] sm:$0xff] }
 0x780   :  { %2115 = vmatprep.subr.mxu0 %v2043_v46  ;;  %2228 = vmatprep.subr.mxu1 %v2045_v44  ;;  %v8227_v46 = vld [vmem:[#allocation10 + $0x338] sm:$0xff]  ;;  %v8231_v44 = vld [vmem:[#allocation10 + $0x320] sm:$0xff] }
 0x781   :  { %2116 = vmatpush1.msra.mxu0 %v2042_v0  ;;  %2229 = vmatpush1.msra.mxu1 %v2044_v7  ;;  %v8233_v0 = vld [vmem:[#allocation10 + $0x330] sm:$0xff]  ;;  %v8237_v7 = vld [vmem:[#allocation10 + $0x308] sm:$0xff] }
 0x782   :  { %2117 = vmatprep.subr.mxu0 %v2039_v30  ;;  %2230 = vmatprep.subr.mxu1 %v2041_v31  ;;  %v8239_v30 = vld [vmem:[#allocation10 + $0x318] sm:$0xff]  ;;  %v8243_v31 = vld [vmem:[#allocation10 + $0x300] sm:$0xff] }
 0x783   :  { %2118 = vmatpush1.msra.mxu0 %v2038_v32  ;;  %2231 = vmatpush1.msra.mxu1 %v2040_v33  ;;  %v8245_v32 = vld [vmem:[#allocation10 + $0x310] sm:$0xff]  ;;  %v8249_v33 = vld [vmem:[#allocation10 + $0x2e8] sm:$0xff] }
 0x784   :  { %2119 = vmatprep.subr.mxu0 %v2035_v34  ;;  %2232 = vmatprep.subr.mxu1 %v2037_v36  ;;  %v8251_v34 = vld [vmem:[#allocation10 + $0x2f8] sm:$0xff]  ;;  %v8255_v36 = vld [vmem:[#allocation10 + $0x2e0] sm:$0xff] }
 0x785   :  { %2120 = vmatpush1.msra.mxu0 %v2034_v37  ;;  %2233 = vmatpush1.msra.mxu1 %v2036_v39  ;;  %v8257_v37 = vld [vmem:[#allocation10 + $0x2f0] sm:$0xff]  ;;  %v8261_v39 = vld [vmem:[#allocation10 + $0x2c8] sm:$0xff] }
 0x786   :  { %2121 = vmatprep.subr.mxu0 %v2031_v6  ;;  %2234 = vmatprep.subr.mxu1 %v2033_v47  ;;  %v8263_v6 = vld [vmem:[#allocation10 + $0x2d8] sm:$0xff]  ;;  %v8267_v47 = vld [vmem:[#allocation10 + $0x2c0] sm:$0xff] }
 0x787   :  { %2122 = vmatpush1.msra.mxu0 %v2030_v48  ;;  %2235 = vmatpush1.msra.mxu1 %v2032_v49  ;;  %v8269_v48 = vld [vmem:[#allocation10 + $0x2d0] sm:$0xff]  ;;  %v8273_v49 = vld [vmem:[#allocation10 + $0x2a8] sm:$0xff] }
 0x788   :  { %2123 = vmatprep.subr.mxu0 %v2027_v50  ;;  %2236 = vmatprep.subr.mxu1 %v2029_v51  ;;  %v8275_v50 = vld [vmem:[#allocation10 + $0x2b8] sm:$0xff]  ;;  %v8279_v51 = vld [vmem:[#allocation10 + $0x2a0] sm:$0xff] }
 0x789   :  { %2124 = vmatpush1.msra.mxu0 %v2026_v52  ;;  %2237 = vmatpush1.msra.mxu1 %v2028_v54  ;;  %v8281_v52 = vld [vmem:[#allocation10 + $0x2b0] sm:$0xff]  ;;  %v8285_v54 = vld [vmem:[#allocation10 + $0x288] sm:$0xff] }
 0x78a   :  { %2125 = vmatprep.subr.mxu0 %v2023_v55  ;;  %2238 = vmatprep.subr.mxu1 %v2025_v56  ;;  %10727 = vst [vmem:[#allocation61_spill] sm:$0xff] %v8281_v52  ;;  %10728 = vst [vmem:[#allocation60_spill] sm:$0xff] %v8285_v54  ;;  %v8287_v55 = vld [vmem:[#allocation10 + $0x298] sm:$0xff]  ;;  %v8291_v56 = vld [vmem:[#allocation10 + $0x280] sm:$0xff] }
 0x78b   :  { %2126 = vmatpush1.msra.mxu0 %v2022_v57  ;;  %2239 = vmatpush1.msra.mxu1 %v2024_v58  ;;  %10729 = vst [vmem:[#allocation62_spill] sm:$0xff] %v8287_v55  ;;  %10730 = vst [vmem:[#allocation63_spill] sm:$0xff] %v8291_v56  ;;  %v8293_v57 = vld [vmem:[#allocation10 + $0x290] sm:$0xff]  ;;  %v8297_v58 = vld [vmem:[#allocation10 + $0x268] sm:$0xff] }
 0x78c   :  { %2127 = vmatprep.subr.mxu0 %v2019_v59  ;;  %2240 = vmatprep.subr.mxu1 %v2021_v60  ;;  %10731 = vst [vmem:[#allocation65_spill] sm:$0xff] %v8293_v57  ;;  %10732 = vst [vmem:[#allocation64_spill] sm:$0xff] %v8297_v58  ;;  %v8299_v59 = vld [vmem:[#allocation10 + $0x278] sm:$0xff]  ;;  %v8303_v60 = vld [vmem:[#allocation10 + $0x260] sm:$0xff] }
 0x78d   :  { %2128 = vmatpush1.msra.mxu0 %v2018_v61  ;;  %2241 = vmatpush1.msra.mxu1 %v2020_v14  ;;  %10733 = vst [vmem:[#allocation66_spill] sm:$0xff] %v8299_v59  ;;  %10734 = vst [vmem:[#allocation30_spill] sm:$0xff] %v8303_v60  ;;  %v8305_v61 = vld [vmem:[#allocation10 + $0x270] sm:$0xff]  ;;  %v8309_v14 = vld [vmem:[#allocation10 + $0x248] sm:$0xff] }
 0x78e   :  { %2129 = vmatprep.subr.mxu0 %v2015_v25  ;;  %2242 = vmatprep.subr.mxu1 %v2017_v38  ;;  %10735 = vst [vmem:[#allocation55_spill] sm:$0xff] %v8305_v61  ;;  %10736 = vst [vmem:[#allocation67_spill] sm:$0xff] %v8309_v14  ;;  %v8311_v25 = vld [vmem:[#allocation10 + $0x258] sm:$0xff]  ;;  %v8315_v38 = vld [vmem:[#allocation10 + $0x240] sm:$0xff] }
 0x78f   :  { %2130 = vmatpush1.msra.mxu0 %v2014_v24  ;;  %2163 = vmatprep.mubr.f32.mxu0 %v10715_v45  ;;  %10737 = vst [vmem:[#allocation69_spill] sm:$0xff] %v8311_v25  ;;  %10738 = vst [vmem:[#allocation68_spill] sm:$0xff] %v8315_v38  ;;  %v8317_v24 = vld [vmem:[#allocation10 + $0x250] sm:$0xff] }
 0x790   :  { %2243 = vmatpush1.msra.mxu1 %v2016_v29  ;;  %2276 = vmatprep.mubr.f32.mxu1 %v10715_v45  ;;  %10739 = vst [vmem:[#allocation70_spill] sm:$0xff] %v8317_v24  ;;  %v8321_v29 = vld [vmem:[#allocation10 + $0x228] sm:$0xff] }
 0x791   :  { %2164 = vmatmul.mubr.f32.vlgmr.msra.gmra.mxu0 %v10720_v20  ;;  %2277 = vmatmul.mubr.f32.vlgmr.msra.gmra.mxu1 %v10720_v20  ;;  %10740 = vst [vmem:[#allocation32_spill] sm:$0xff] %v8321_v29  ;;  %v8323_v20 = vld [vmem:[#allocation10 + $0x238] sm:$0xff] }
 0x792   :  { %2169 = vmatprep.mubr.f32.mxu0 %v10715_v45  ;;  %2282 = vmatprep.mubr.f32.mxu1 %v10715_v45  ;;  %10741 = vst [vmem:[#allocation33_spill] sm:$0xff] %v8323_v20 }
 0x793   :  { %2361 = vmatprep.subr.mxu0 %v8153_v21  ;;  %2432 = vmatprep.subr.mxu1 %v8155_v22 }
 0x794   :  { %2433 = vmatpush1.msra.mxu1 %v8161_v3 }
 0x795   :  { %2170 = vmatmul.mubr.f32.gmra.mxu0 %v10721_v27  ;;  %2283 = vmatmul.mubr.f32.gmra.mxu1 %v10721_v27  ;;  %v8327_v27 = vld [vmem:[#allocation10 + $0x220] sm:$0xff] }
 0x796   :  { %2175 = vmatprep.mubr.f32.mxu0 %v10715_v45  ;;  %2288 = vmatprep.mubr.f32.mxu1 %v10715_v45  ;;  %10742 = vst [vmem:[#allocation71_spill] sm:$0xff] %v8327_v27 }
 0x797   :  { %2434 = vmatprep.subr.mxu1 %v8167_v17 }
 0x798   :  { %2435 = vmatpush1.msra.mxu1 %v8173_v63 }
 0x799   :  { %2176 = vmatmul.mubr.f32.gmra.mxu0 %v10722_v8  ;;  %2289 = vmatmul.mubr.f32.gmra.mxu1 %v10722_v8  ;;  %v8329_v8 = vld [vmem:[#allocation10 + $0x230] sm:$0xff] }
 0x79a   :  { %2181 = vmatprep.mubr.f32.mxu0 %v10715_v45  ;;  %2294 = vmatprep.mubr.f32.mxu1 %v10715_v45  ;;  %10743 = vst [vmem:[#allocation73_spill] sm:$0xff] %v8329_v8 }
 0x79b   :  { %2436 = vmatprep.subr.mxu1 %v8179_v12 }
 0x79c   :  { %2437 = vmatpush1.msra.mxu1 %v8185_v11 }
 0x79d   :  { %2182 = vmatmul.mubr.f32.gmra.mxu0 %v10723_v28  ;;  %2295 = vmatmul.mubr.f32.gmra.mxu1 %v10723_v28  ;;  %v8331_v28 = vld [vmem:[#allocation10 + $0x208] sm:$0xff] }
 0x79e   :  { %2187 = vmatprep.mubr.f32.mxu0 %v10715_v45  ;;  %2300 = vmatprep.mubr.f32.mxu1 %v10715_v45  ;;  %10744 = vst [vmem:[#allocation72_spill] sm:$0xff] %v8331_v28 }
 0x79f   :  { %2438 = vmatprep.subr.mxu1 %v8191_v10 }
 0x7a0   :  { %2439 = vmatpush1.msra.mxu1 %v8197_v62 }
 0x7a1   :  { %2188 = vmatmul.mubr.f32.gmra.mxu0 %v10724_v23  ;;  %2301 = vmatmul.mubr.f32.gmra.mxu1 %v10724_v23  ;;  %v8335_v23 = vld [vmem:[#allocation10 + $0x218] sm:$0xff] }
 0x7a2   :  { %2193 = vmatprep.mubr.f32.mxu0 %v10715_v45  ;;  %2306 = vmatprep.mubr.f32.mxu1 %v10715_v45  ;;  %10745 = vst [vmem:[#allocation74_spill] sm:$0xff] %v8335_v23 }
 0x7a3   :  { %2440 = vmatprep.subr.mxu1 %v8203_v4 }
 0x7a4   :  { %2441 = vmatpush1.msra.mxu1 %v8209_v35 }
 0x7a5   :  { %2194 = vmatmul.mubr.f32.gmra.mxu0 %v8043_v1  ;;  %2307 = vmatmul.mubr.f32.gmra.mxu1 %v8043_v1  ;;  %v8159_v1 = vld [vmem:[#allocation10 + $0x3e0] sm:$0xff] }
 0x7a6   :  { %2199 = vmatprep.mubr.f32.mxu0 %v10715_v45  ;;  %2312 = vmatprep.mubr.f32.mxu1 %v10715_v45 }
 0x7a7   :  { %2362 = vmatpush1.msra.mxu0 %v8159_v1  ;;  %2442 = vmatprep.subr.mxu1 %v8215_v16 }
 0x7a8   :  { %2443 = vmatpush1.msra.mxu1 %v8221_v42 }
 0x7a9   :  { %2200 = vmatmul.mubr.f32.gmra.mxu0 %v8119_v40  ;;  %2313 = vmatmul.mubr.f32.gmra.mxu1 %v8119_v40  ;;  %v8165_v40 = vld [vmem:[#allocation10 + $0x3c8] sm:$0xff] }
 0x7aa   :  { %2205 = vmatprep.mubr.f32.mxu0 %v10715_v45  ;;  %2318 = vmatprep.mubr.f32.mxu1 %v10715_v45 }
 0x7ab   :  { %2363 = vmatprep.subr.mxu0 %v8165_v40  ;;  %2444 = vmatprep.subr.mxu1 %v8227_v46 }
 0x7ac   :  { %2364 = vmatpush1.msra.mxu0 %v8171_v2  ;;  %2445 = vmatpush1.msra.mxu1 %v8233_v0 }
 0x7ad   :  { %2365 = vmatprep.subr.mxu0 %v8177_v19  ;;  %2446 = vmatprep.subr.mxu1 %v8239_v30 }
 0x7ae   :  { %2366 = vmatpush1.msra.mxu0 %v8183_v18  ;;  %2447 = vmatpush1.msra.mxu1 %v8245_v32 }
 0x7af   :  { %2367 = vmatprep.subr.mxu0 %v8189_v9  ;;  %2448 = vmatprep.subr.mxu1 %v8251_v34 }
 0x7b0   :  { %2368 = vmatpush1.msra.mxu0 %v8195_v5  ;;  %2449 = vmatpush1.msra.mxu1 %v8257_v37 }
 0x7b1   :  { %2369 = vmatprep.subr.mxu0 %v8201_v13  ;;  %2450 = vmatprep.subr.mxu1 %v8263_v6 }
 0x7b2   :  { %2370 = vmatpush1.msra.mxu0 %v8207_v53  ;;  %2451 = vmatpush1.msra.mxu1 %v8269_v48 }
 0x7b3   :  { %2371 = vmatprep.subr.mxu0 %v8213_v26  ;;  %2452 = vmatprep.subr.mxu1 %v8275_v50 }
 0x7b4   :  { %2372 = vmatpush1.msra.mxu0 %v8219_v15  ;;  %2453 = vmatpush1.msra.mxu1 %v8281_v52 }
 0x7b5   :  { %2373 = vmatprep.subr.mxu0 %v8225_v43  ;;  %2454 = vmatprep.subr.mxu1 %v8287_v55 }
 0x7b6   :  { %2374 = vmatpush1.msra.mxu0 %v8231_v44  ;;  %2455 = vmatpush1.msra.mxu1 %v8293_v57 }
 0x7b7   :  { %2375 = vmatprep.subr.mxu0 %v8237_v7  ;;  %2456 = vmatprep.subr.mxu1 %v8299_v59 }
 0x7b8   :  { %2376 = vmatpush1.msra.mxu0 %v8243_v31  ;;  %2457 = vmatpush1.msra.mxu1 %v8305_v61 }
 0x7b9   :  { %2377 = vmatprep.subr.mxu0 %v8249_v33  ;;  %2458 = vmatprep.subr.mxu1 %v8311_v25 }
 0x7ba   :  { %2378 = vmatpush1.msra.mxu0 %v8255_v36  ;;  %2459 = vmatpush1.msra.mxu1 %v8317_v24  ;;  %v8337_v24 = vld [vmem:[#allocation10 + $0x200] sm:$0xff] }
 0x7bb   :  { %2379 = vmatprep.subr.mxu0 %v8261_v39  ;;  %2460 = vmatprep.subr.mxu1 %v8323_v20  ;;  %10746 = vst [vmem:[#allocation56_spill] sm:$0xff] %v8337_v24 }
 0x7bc   :  { %2380 = vmatpush1.msra.mxu0 %v8267_v47  ;;  %2461 = vmatpush1.msra.mxu1 %v8329_v8  ;;  %v10748_v8 = vld [vmem:[#allocation79_spill] sm:$0xff] }
 0x7bd   :  { %2381 = vmatprep.subr.mxu0 %v8273_v49  ;;  %2462 = vmatprep.subr.mxu1 %v8335_v23  ;;  %v10750_v23 = vld [vmem:[#allocation80_spill] sm:$0xff] }
 0x7be   :  { %2382 = vmatpush1.msra.mxu0 %v8279_v51 }
 0x7bf   :  { %2383 = vmatprep.subr.mxu0 %v8285_v54 }
 0x7c0   :  { %2384 = vmatpush1.msra.mxu0 %v8291_v56 }
 0x7c1   :  { %2385 = vmatprep.subr.mxu0 %v8297_v58 }
 0x7c2   :  { %2386 = vmatpush1.msra.mxu0 %v8303_v60 }
 0x7c3   :  { %2387 = vmatprep.subr.mxu0 %v8309_v14  ;;  %v10749_v14 = vld [vmem:[#allocation81_spill] sm:$0xff] }
 0x7c4   :  { %2388 = vmatpush1.msra.mxu0 %v8315_v38  ;;  %v8339_v38 = vld [vmem:[#allocation10 + $0x210] sm:$0xff] }
 0x7c5   :  { %2389 = vmatprep.subr.mxu0 %v8321_v29  ;;  %10747 = vst [vmem:[#allocation58_spill] sm:$0xff] %v8339_v38  ;;  %2463 = vmatpush1.msra.mxu1 %v8339_v38  ;;  %v10751_v38 = vld [vmem:[#allocation82_spill] sm:$0xff] }
 0x7c6   :  { %2390 = vmatpush1.msra.mxu0 %v8327_v27  ;;  %2603 = vmatprep.subr.mxu1 %v8155_v22 }
 0x7c7   :  { %2391 = vmatprep.subr.mxu0 %v8331_v28 }
 0x7c8   :  { %2392 = vmatpush1.msra.mxu0 %v8337_v24 }
 0x7c9   :  { %2532 = vmatprep.subr.mxu0 %v8153_v21 }
 0x830   :  { %v1837_v27 = vpop.f32.mrf.mxu0  ;;  %v1908_v28 = vpop.f32.mrf.mxu1 }
 0x831   :  { %v1838_v20 = vadd.f32 %v1837_v27, %v10748_v8  ;;  %v1909_v59 = vadd.f32 %v1908_v28, %v10750_v23  ;;  %v10758_v23 = vld [vmem:[#allocation67_spill] sm:$0xff] }
 0x832   :  { %v1839_v29 = vpop.f32.mrf.mxu0  ;;  %v1910_v24 = vpop.f32.mrf.mxu1 }
 0x833   :  { %v5929_v25 = vmul.f32 -1.442695, %v1838_v20  ;;  %v1840_v61 = vadd.f32 %v1839_v29, %v10749_v14  ;;  %v5931_v58 = vmul.f32 -1.442695, %v1909_v59  ;;  %v1911_v57 = vadd.f32 %v1910_v24, %v10751_v38  ;;  %v10757_v24 = vld [vmem:[#allocation55_spill] sm:$0xff] }
 0x835   :  { %6274 = vpow2.f32 %v5929_v25  ;;  %v5930_v60 = vmul.f32 -1.442695, %v1840_v61 }
 0x837   :  { %6276 = vpow2.f32 %v5930_v60 }
 0x838   :  { %6278 = vpow2.f32 %v5931_v58  ;;  %v10756_v58 = vld [vmem:[#allocation30_spill] sm:$0xff] }
 0x839   :  { %6280 = vtanh.f32 %v1911_v57  ;;  %v10755_v57 = vld [vmem:[#allocation66_spill] sm:$0xff] }
 0x842   :  { %v6275_v21 = vpop.eup %6274 }
 0x843   :  { %v1922_v56 = vadd.f32 1.0, %v6275_v21 }
 0x844   :  { %v6277_v22 = vpop.eup %6276 }
 0x845   :  { %6282 = vrcp.f32 %v1922_v56  ;;  %v1923_v27 = vadd.f32 1.0, %v6277_v22  ;;  %v6279_v20 = vpop.eup %6278  ;;  %v10753_v22 = vld [vmem:[#allocation65_spill] sm:$0xff]  ;;  %v10754_v56 = vld [vmem:[#allocation64_spill] sm:$0xff] }
 0x846   :  { %v6281_v14 = vpop.eup %6280  ;;  %v1924_v29 = vadd.f32 1.0, %v6279_v20  ;;  %v10760_v20 = vld [vmem:[#allocation68_spill] sm:$0xff] }
 0x847   :  { %6284 = vrcp.f32 %v1923_v27  ;;  %v10759_v27 = vld [vmem:[#allocation69_spill] sm:$0xff] }
 0x848   :  { %6286 = vrcp.f32 %v1924_v29  ;;  %v10765_v29 = vld [vmem:[#allocation73_spill] sm:$0xff] }
 0x852   :  { %v6283_v25 = vpop.eup %6282 }
 0x853   :  { %v1933_v61 = vmul.f32 %v6283_v25, %v6281_v14  ;;  %v10761_v14 = vld [vmem:[#allocation70_spill] sm:$0xff]  ;;  %v10762_v25 = vld [vmem:[#allocation32_spill] sm:$0xff] }
 0x854   :  { %v6285_v60 = vpop.eup %6284 }
 0x855   :  { %v1932_v8 = vmul.f32 %v6285_v60, %v8116_v41  ;;  %v6287_v59 = vpop.eup %6286  ;;  %v10752_v41 = vld [vmem:[#allocation63_spill] sm:$0xff] }
 0x856   :  { %v10764_v60 = vld [vmem:[#allocation71_spill] sm:$0xff] }
 0x857   :  { %v1934_v28 = vadd.f32 %v1933_v61, %v1932_v8  ;;  %v10763_v61 = vld [vmem:[#allocation33_spill] sm:$0xff]  ;;  %v10766_v8 = vld [vmem:[#allocation72_spill] sm:$0xff] }
 0x859   :  { %6288 = vtanh.f32 %v1934_v28  ;;  %v10767_v28 = vld [vmem:[#allocation74_spill] sm:$0xff] }
 0x866   :  { %v6289_v38 = vpop.eup %6288 }
 0x867   :  { %v1936_v21 = vmul.f32 %v6289_v38, %v6287_v59  ;;  %v10768_v59 = vld [vmem:[#allocation56_spill] sm:$0xff]  ;;  %v10769_v38 = vld [vmem:[#allocation58_spill] sm:$0xff] }
 0x869   :  { %2206 = vmatmul.mubr.f32.gmra.mxu0 %v1936_v21  ;;  %2319 = vmatmul.mubr.f32.gmra.mxu1 %v1936_v21  ;;  %v10770_v21 = vld [vmem:[#allocation50_spill] sm:$0xff] }
 0x86a   :  { %2425 = vmatprep.mubr.f32.mxu0 %v10715_v45  ;;  %2496 = vmatprep.mubr.f32.mxu1 %v10715_v45 }
 0x86d   :  { %2426 = vmatmul.mubr.f32.vlgmr.msra.gmra.mxu0 %v10715_v45  ;;  %2497 = vmatmul.mubr.f32.vlgmr.msra.gmra.mxu1 %v10715_v45 }
 0x86e   :  { %2533 = vmatpush1.msra.mxu0 %v8159_v1  ;;  %2604 = vmatpush1.msra.mxu1 %v8161_v3 }
 0x86f   :  { %2534 = vmatprep.subr.mxu0 %v8165_v40  ;;  %2605 = vmatprep.subr.mxu1 %v8167_v17 }
 0x870   :  { %2535 = vmatpush1.msra.mxu0 %v8171_v2  ;;  %2606 = vmatpush1.msra.mxu1 %v8173_v63 }
 0x871   :  { %2536 = vmatprep.subr.mxu0 %v8177_v19  ;;  %2607 = vmatprep.subr.mxu1 %v8179_v12 }
 0x872   :  { %2537 = vmatpush1.msra.mxu0 %v8183_v18  ;;  %2608 = vmatpush1.msra.mxu1 %v8185_v11 }
 0x873   :  { %2538 = vmatprep.subr.mxu0 %v8189_v9  ;;  %2609 = vmatprep.subr.mxu1 %v8191_v10 }
 0x874   :  { %2539 = vmatpush1.msra.mxu0 %v8195_v5  ;;  %2610 = vmatpush1.msra.mxu1 %v8197_v62 }
 0x875   :  { %2540 = vmatprep.subr.mxu0 %v8201_v13  ;;  %2611 = vmatprep.subr.mxu1 %v8203_v4 }
 0x876   :  { %2541 = vmatpush1.msra.mxu0 %v8207_v53  ;;  %2612 = vmatpush1.msra.mxu1 %v8209_v35 }
 0x877   :  { %2542 = vmatprep.subr.mxu0 %v8213_v26  ;;  %2613 = vmatprep.subr.mxu1 %v8215_v16 }
 0x878   :  { %2543 = vmatpush1.msra.mxu0 %v8219_v15  ;;  %2614 = vmatpush1.msra.mxu1 %v8221_v42 }
 0x879   :  { %2544 = vmatprep.subr.mxu0 %v8225_v43  ;;  %2615 = vmatprep.subr.mxu1 %v8227_v46 }
 0x87a   :  { %2545 = vmatpush1.msra.mxu0 %v8231_v44  ;;  %2616 = vmatpush1.msra.mxu1 %v8233_v0 }
 0x87b   :  { %2546 = vmatprep.subr.mxu0 %v8237_v7  ;;  %2617 = vmatprep.subr.mxu1 %v8239_v30 }
 0x87c   :  { %2547 = vmatpush1.msra.mxu0 %v8243_v31  ;;  %2618 = vmatpush1.msra.mxu1 %v8245_v32 }
 0x87d   :  { %2548 = vmatprep.subr.mxu0 %v8249_v33  ;;  %2619 = vmatprep.subr.mxu1 %v8251_v34 }
 0x87e   :  { %2549 = vmatpush1.msra.mxu0 %v8255_v36  ;;  %2620 = vmatpush1.msra.mxu1 %v8257_v37 }
 0x87f   :  { %2550 = vmatprep.subr.mxu0 %v8261_v39  ;;  %2621 = vmatprep.subr.mxu1 %v8263_v6 }
 0x880   :  { %2551 = vmatpush1.msra.mxu0 %v8267_v47  ;;  %2622 = vmatpush1.msra.mxu1 %v8269_v48 }
 0x881   :  { %2552 = vmatprep.subr.mxu0 %v8273_v49  ;;  %2623 = vmatprep.subr.mxu1 %v8275_v50 }
 0x882   :  { %2553 = vmatpush1.msra.mxu0 %v8279_v51  ;;  %2624 = vmatpush1.msra.mxu1 %v8281_v52 }
 0x883   :  { %2554 = vmatprep.subr.mxu0 %v8285_v54  ;;  %2625 = vmatprep.subr.mxu1 %v8287_v55 }
 0x884   :  { %2555 = vmatpush1.msra.mxu0 %v10752_v41  ;;  %2626 = vmatpush1.msra.mxu1 %v10753_v22 }
 0x885   :  { %2556 = vmatprep.subr.mxu0 %v10754_v56  ;;  %2627 = vmatprep.subr.mxu1 %v10755_v57 }
 0x886   :  { %2557 = vmatpush1.msra.mxu0 %v10756_v58  ;;  %2628 = vmatpush1.msra.mxu1 %v10757_v24 }
 0x887   :  { %2558 = vmatprep.subr.mxu0 %v10758_v23  ;;  %2629 = vmatprep.subr.mxu1 %v10759_v27 }
 0x888   :  { %2559 = vmatpush1.msra.mxu0 %v10760_v20  ;;  %2630 = vmatpush1.msra.mxu1 %v10761_v14  ;;  %v2278_v14 = vpop.f32.mrf.mxu1 }
 0x889   :  { %2560 = vmatprep.subr.mxu0 %v10762_v25  ;;  %2631 = vmatprep.subr.mxu1 %v10763_v61  ;;  %v10771_v25 = vld [vmem:[#allocation59_spill] sm:$0xff]  ;;  %v2165_v61 = vpop.f32.mrf.mxu0 }
 0x88a   :  { %2561 = vmatpush1.msra.mxu0 %v10764_v60  ;;  %2632 = vmatpush1.msra.mxu1 %v10765_v29 }
 0x88b   :  { %2562 = vmatprep.subr.mxu0 %v10766_v8  ;;  %2633 = vmatprep.subr.mxu1 %v10767_v28  ;;  %v2167_v60 = vpop.f32.mrf.mxu0  ;;  %v2280_v8 = vpop.f32.mrf.mxu1 }
 0x88c   :  { %2563 = vmatpush1.msra.mxu0 %v10768_v59  ;;  %2596 = vmatprep.mubr.f32.mxu0 %v10715_v45 }
 0x88d   :  { %2634 = vmatpush1.msra.mxu1 %v10769_v38  ;;  %2667 = vmatprep.mubr.f32.mxu1 %v10715_v45  ;;  %v8422_v29 = vpop.f32.mrf.mxu0  ;;  %v8426_v28 = vpop.f32.mrf.mxu1 }
 0x88e   :  { %2703 = vmatprep.subr.mxu0 %v10770_v21  ;;  %2774 = vmatprep.subr.mxu1 %v10771_v25  ;;  %10772 = vst [vmem:[#allocation34_spill] sm:$0xff] %v8422_v29  ;;  %10774 = vst [vmem:[#allocation36_spill] sm:$0xff] %v8426_v28 }
 0x88f   :  { %v8424_v20 = vpop.f32.mrf.mxu0  ;;  %v8430_v27 = vpop.f32.mrf.mxu1 }
 0x890   :  { %10773 = vst [vmem:[#allocation35_spill] sm:$0xff] %v8424_v20  ;;  %10776 = vst [vmem:[#allocation38_spill] sm:$0xff] %v8430_v27 }
 0x891   :  { %v8428_v59 = vpop.f32.mrf.mxu0  ;;  %v8434_v45 = vpop.f32.mrf.mxu1 }
 0x892   :  { %10775 = vst [vmem:[#allocation37_spill] sm:$0xff] %v8428_v59  ;;  %10778 = vst [vmem:[#allocation40_spill] sm:$0xff] %v8434_v45 }
 0x893   :  { %v8432_v38 = vpop.f32.mrf.mxu0  ;;  %v8438_v25 = vpop.f32.mrf.mxu1 }
 0x894   :  { %10777 = vst [vmem:[#allocation39_spill] sm:$0xff] %v8432_v38  ;;  %10780 = vst [vmem:[#allocation42_spill] sm:$0xff] %v8438_v25 }
 0x895   :  { %v8436_v21 = vpop.f32.mrf.mxu0  ;;  %v8442_v29 = vpop.f32.mrf.mxu1 }
 0x896   :  { %10779 = vst [vmem:[#allocation41_spill] sm:$0xff] %v8436_v21  ;;  %10782 = vst [vmem:[#allocation44_spill] sm:$0xff] %v8442_v29  ;;  %v2005_v29 = vld [vmem:[#allocation12 + $0x4] sm:$0xf] }
 0x897   :  { %v8440_v23 = vpop.f32.mrf.mxu0  ;;  %v8446_v20 = vpop.f32.mrf.mxu1 }
 0x898   :  { %10781 = vst [vmem:[#allocation43_spill] sm:$0xff] %v8440_v23  ;;  %10784 = vst [vmem:[#allocation46_spill] sm:$0xff] %v8446_v20  ;;  %v10794_v20 = vld [vmem:[#allocation51_spill] sm:$0xff] }
 0x899   :  { %v8444_v24 = vpop.f32.mrf.mxu0  ;;  %v8450_v59 = vpop.f32.mrf.mxu1  ;;  %v8467_v58 = vrot.slane %v2005_v29, %v10794_v20 }
 0x89a   :  { %10783 = vst [vmem:[#allocation45_spill] sm:$0xff] %v8444_v24  ;;  %10786 = vst [vmem:[#allocation48_spill] sm:$0xff] %v8450_v59 }
 0x89b   :  { %v8448_v28 = vpop.f32.mrf.mxu0  ;;  %v8454_v38 = vpop.f32.mrf.mxu1  ;;  %10795 = vst [vmem:[#allocation57_spill] sm:$0xff] %v8467_v58 }
 0x89c   :  { %10785 = vst [vmem:[#allocation47_spill] sm:$0xff] %v8448_v28  ;;  %10788 = vst [vmem:[#allocation77_spill] sm:$0xff] %v8454_v38 }
 0x89d   :  { %v8452_v27 = vpop.f32.mrf.mxu0  ;;  %v8458_v21 = vpop.f32.mrf.mxu1 }
 0x89e   :  { %10787 = vst [vmem:[#allocation75_spill] sm:$0xff] %v8452_v27  ;;  %10790 = vst [vmem:[#allocation78_spill] sm:$0xff] %v8458_v21  ;;  %v10798_v27 = vld [vmem:[#allocation53_spill] sm:$0xff]  ;;  %v2166_v21 = vadd.f32 %v2165_v61, %v8467_v58 }
 0x89f   :  { %v8456_v45 = vpop.f32.mrf.mxu0  ;;  %v8462_v23 = vpop.f32.mrf.mxu1  ;;  %v8474_v38 = vrot.slane %v2005_v29, %v10798_v27 }
 0x8a0   :  { %10789 = vst [vmem:[#allocation76_spill] sm:$0xff] %v8456_v45  ;;  %10792 = vst [vmem:[#allocation31_spill] sm:$0xff] %v8462_v23 }
 0x8a1   :  { %v8460_v25 = vpop.f32.mrf.mxu0  ;;  %v8469_v28 = vpop.f32.mrf.mxu1  ;;  %v2168_v57 = vadd.f32 %v2167_v60, %v8474_v38 }
 0x8a2   :  { %10791 = vst [vmem:[#allocation83_spill] sm:$0xff] %v8460_v25  ;;  %10796 = vst [vmem:[#allocation49_spill] sm:$0xff] %v8469_v28 }
 0x8a3   :  { %v8464_v24 = vpop.f32.mrf.mxu0  ;;  %v8479_v25 = vpop.f32.mrf.mxu1 }
 0x8a4   :  { %10793 = vst [vmem:[#allocation29_spill] sm:$0xff] %v8464_v24  ;;  %10800 = vst [vmem:[#allocation80_spill] sm:$0xff] %v8479_v25  ;;  %v10804_v25 = vld [vmem:[#allocation54_spill] sm:$0xff] }
 0x8a5   :  { %v8491_v58 = vrot.slane %v2005_v29, %v10804_v25 }
 0x929   :  { %v8471_v59 = vpop.f32.mrf.mxu0  ;;  %v8482_v24 = vpop.f32.mrf.mxu1 }
 0x92a   :  { %10797 = vst [vmem:[#allocation79_spill] sm:$0xff] %v8471_v59  ;;  %10801 = vst [vmem:[#allocation82_spill] sm:$0xff] %v8482_v24  ;;  %v10803_v59 = vld [vmem:[#allocation52_spill] sm:$0xff] }
 0x92b   :  { %v8476_v45 = vpop.f32.mrf.mxu0  ;;  %v8484_v41 = vpop.f32.mrf.mxu1  ;;  %v8487_v55 = vrot.slane %v2005_v29, %v10803_v59 }
 0x92c   :  { %10799 = vst [vmem:[#allocation81_spill] sm:$0xff] %v8476_v45  ;;  %10802 = vst [vmem:[#allocation84_spill] sm:$0xff] %v8484_v41 }
 0x92d   :  { %v2427_v23 = vpop.f32.mrf.mxu0  ;;  %v2498_v61 = vpop.f32.mrf.mxu1  ;;  %v2279_v45 = vadd.f32 %v2278_v14, %v8487_v55 }
 0x92e   :  { %v2428_v20 = vadd.f32 %v2427_v23, %v2166_v21  ;;  %v2281_v23 = vadd.f32 %v2280_v8, %v8491_v58 }
 0x92f   :  { %v2429_v56 = vpop.f32.mrf.mxu0  ;;  %v2499_v60 = vadd.f32 %v2498_v61, %v2279_v45  ;;  %v2500_v24 = vpop.f32.mrf.mxu1 }
 0x930   :  { %v5932_v22 = vmul.f32 -1.442695, %v2428_v20  ;;  %v2430_v28 = vadd.f32 %v2429_v56, %v2168_v57  ;;  %v2501_v57 = vadd.f32 %v2500_v24, %v2281_v23  ;;  %v10809_v23 = vld [vmem:[#allocation64_spill] sm:$0xff] }
 0x931   :  { %v5934_v20 = vmul.f32 -1.442695, %v2499_v60 }
 0x932   :  { %6290 = vpow2.f32 %v5932_v22  ;;  %v5933_v27 = vmul.f32 -1.442695, %v2430_v28 }
 0x934   :  { %6292 = vpow2.f32 %v5933_v27 }
 0x935   :  { %6294 = vpow2.f32 %v5934_v20  ;;  %v10810_v20 = vld [vmem:[#allocation66_spill] sm:$0xff] }
 0x93f   :  { %v6291_v56 = vpop.eup %6290 }
 0x940   :  { %v2512_v21 = vadd.f32 1.0, %v6291_v56  ;;  %v10811_v56 = vld [vmem:[#allocation30_spill] sm:$0xff] }
 0x941   :  { %v6293_v22 = vpop.eup %6292 }
 0x942   :  { %6296 = vrcp.f32 %v2512_v21  ;;  %v2513_v28 = vadd.f32 1.0, %v6293_v22  ;;  %v6295_v27 = vpop.eup %6294  ;;  %v10813_v21 = vld [vmem:[#allocation67_spill] sm:$0xff]  ;;  %v10814_v22 = vld [vmem:[#allocation69_spill] sm:$0xff] }
 0x943   :  { %6298 = vtanh.f32 %v2501_v57  ;;  %v2514_v29 = vadd.f32 1.0, %v6295_v27  ;;  %v10812_v57 = vld [vmem:[#allocation55_spill] sm:$0xff]  ;;  %v10816_v27 = vld [vmem:[#allocation70_spill] sm:$0xff] }
 0x944   :  { %6300 = vrcp.f32 %v2513_v28  ;;  %v10815_v28 = vld [vmem:[#allocation68_spill] sm:$0xff] }
 0x945   :  { %6302 = vrcp.f32 %v2514_v29  ;;  %v10818_v29 = vld [vmem:[#allocation33_spill] sm:$0xff] }
 0x94f   :  { %v6297_v59 = vpop.eup %6296 }
 0x950   :  { %v6299_v14 = vpop.eup %6298 }
 0x951   :  { %v6301_v41 = vpop.eup %6300  ;;  %v2523_v45 = vmul.f32 %v6299_v14, %v6297_v59  ;;  %v10808_v59 = vld [vmem:[#allocation65_spill] sm:$0xff]  ;;  %v10817_v14 = vld [vmem:[#allocation32_spill] sm:$0xff] }
 0x952   :  { %v2522_v25 = vmul.f32 0.0, %v6301_v41  ;;  %v6303_v24 = vpop.eup %6302  ;;  %v10806_v41 = vld [vmem:[#allocation62_spill] sm:$0xff] }
 0x954   :  { %v8494_v61 = vadd.f32 %v2523_v45, %v2522_v25  ;;  %v10807_v25 = vld [vmem:[#allocation63_spill] sm:$0xff] }
 0x955   :  { %v10819_v45 = vld [vmem:[#allocation71_spill] sm:$0xff] }
 0x956   :  { %6304 = vtanh.f32 %v8494_v61 }
 0x963   :  { %v6305_v8 = vpop.eup %6304 }
 0x964   :  { %v8497_v60 = vmul.f32 %v6305_v8, %v6303_v24  ;;  %v10820_v24 = vld [vmem:[#allocation73_spill] sm:$0xff]  ;;  %v10821_v8 = vld [vmem:[#allocation72_spill] sm:$0xff] }
 0x966   :  { %10805 = vst [vmem:[#allocation85_spill] sm:$0xff] %v8497_v60  ;;  %2597 = vmatmul.mubr.f32.vlgmr.msra.gmra.mxu0 %v8497_v60  ;;  %2668 = vmatmul.mubr.f32.vlgmr.msra.gmra.mxu1 %v8497_v60  ;;  %v10822_v60 = vld [vmem:[#allocation74_spill] sm:$0xff] }
 0x967   :  { %2704 = vmatpush1.msra.mxu0 %v8159_v1  ;;  %2775 = vmatpush1.msra.mxu1 %v8161_v3 }
 0x968   :  { %2705 = vmatprep.subr.mxu0 %v8165_v40  ;;  %2776 = vmatprep.subr.mxu1 %v8167_v17 }
 0x969   :  { %2706 = vmatpush1.msra.mxu0 %v8171_v2  ;;  %2777 = vmatpush1.msra.mxu1 %v8173_v63 }
 0x96a   :  { %2707 = vmatprep.subr.mxu0 %v8177_v19  ;;  %2778 = vmatprep.subr.mxu1 %v8179_v12 }
 0x96b   :  { %2708 = vmatpush1.msra.mxu0 %v8183_v18  ;;  %2779 = vmatpush1.msra.mxu1 %v8185_v11 }
 0x96c   :  { %2709 = vmatprep.subr.mxu0 %v8189_v9  ;;  %2780 = vmatprep.subr.mxu1 %v8191_v10 }
 0x96d   :  { %2710 = vmatpush1.msra.mxu0 %v8195_v5  ;;  %2781 = vmatpush1.msra.mxu1 %v8197_v62 }
 0x96e   :  { %2711 = vmatprep.subr.mxu0 %v8201_v13  ;;  %2782 = vmatprep.subr.mxu1 %v8203_v4 }
 0x96f   :  { %2712 = vmatpush1.msra.mxu0 %v8207_v53  ;;  %2783 = vmatpush1.msra.mxu1 %v8209_v35 }
 0x970   :  { %2713 = vmatprep.subr.mxu0 %v8213_v26  ;;  %2784 = vmatprep.subr.mxu1 %v8215_v16 }
 0x971   :  { %2714 = vmatpush1.msra.mxu0 %v8219_v15  ;;  %2785 = vmatpush1.msra.mxu1 %v8221_v42 }
 0x972   :  { %2715 = vmatprep.subr.mxu0 %v8225_v43  ;;  %2786 = vmatprep.subr.mxu1 %v8227_v46 }
 0x973   :  { %2716 = vmatpush1.msra.mxu0 %v8231_v44  ;;  %2787 = vmatpush1.msra.mxu1 %v8233_v0 }
 0x974   :  { %2717 = vmatprep.subr.mxu0 %v8237_v7  ;;  %2788 = vmatprep.subr.mxu1 %v8239_v30 }
 0x975   :  { %2718 = vmatpush1.msra.mxu0 %v8243_v31  ;;  %2789 = vmatpush1.msra.mxu1 %v8245_v32 }
 0x976   :  { %2719 = vmatprep.subr.mxu0 %v8249_v33  ;;  %2790 = vmatprep.subr.mxu1 %v8251_v34 }
 0x977   :  { %2720 = vmatpush1.msra.mxu0 %v8255_v36  ;;  %2791 = vmatpush1.msra.mxu1 %v8257_v37 }
 0x978   :  { %2721 = vmatprep.subr.mxu0 %v8261_v39  ;;  %2792 = vmatprep.subr.mxu1 %v8263_v6 }
 0x979   :  { %2722 = vmatpush1.msra.mxu0 %v8267_v47  ;;  %2793 = vmatpush1.msra.mxu1 %v8269_v48 }
 0x97a   :  { %2723 = vmatprep.subr.mxu0 %v8273_v49  ;;  %2794 = vmatprep.subr.mxu1 %v8275_v50 }
 0x97b   :  { %2724 = vmatpush1.msra.mxu0 %v8279_v51  ;;  %2795 = vmatpush1.msra.mxu1 %v8281_v52 }
 0x97c   :  { %2725 = vmatprep.subr.mxu0 %v8285_v54  ;;  %2796 = vmatprep.subr.mxu1 %v10806_v41  ;;  %v10832_v41 = vld [vmem:[#allocation38_spill] sm:$0xff] }
 0x97d   :  { %2726 = vmatpush1.msra.mxu0 %v10807_v25  ;;  %2797 = vmatpush1.msra.mxu1 %v10808_v59 }
 0x97e   :  { %2727 = vmatprep.subr.mxu0 %v10809_v23  ;;  %2798 = vmatprep.subr.mxu1 %v10810_v20 }
 0x97f   :  { %2728 = vmatpush1.msra.mxu0 %v10811_v56  ;;  %2799 = vmatpush1.msra.mxu1 %v10812_v57  ;;  %v10823_v57 = vld [vmem:[#allocation56_spill] sm:$0xff] }
 0x980   :  { %2729 = vmatprep.subr.mxu0 %v10813_v21  ;;  %2800 = vmatprep.subr.mxu1 %v10814_v22  ;;  %v10824_v21 = vmov 0.0   ;;  %v10825_v22 = vld [vmem:[#allocation58_spill] sm:$0xff] }
 0x981   :  { %2730 = vmatpush1.msra.mxu0 %v10815_v28  ;;  %2801 = vmatpush1.msra.mxu1 %v10816_v27  ;;  %v10826_v27 = vld [vmem:[#allocation50_spill] sm:$0xff] }
 0x982   :  { %2731 = vmatprep.subr.mxu0 %v10817_v14  ;;  %2802 = vmatprep.subr.mxu1 %v10818_v29  ;;  %v10827_v14 = vld [vmem:[#allocation59_spill] sm:$0xff]  ;;  %v10828_v29 = vld [vmem:[#allocation57_spill] sm:$0xff] }
 0x983   :  { %2732 = vmatpush1.msra.mxu0 %v10819_v45  ;;  %2803 = vmatpush1.msra.mxu1 %v10820_v24  ;;  %v10829_v45 = vld [vmem:[#allocation34_spill] sm:$0xff] }
 0x984   :  { %2733 = vmatprep.subr.mxu0 %v10821_v8  ;;  %2804 = vmatprep.subr.mxu1 %v10822_v60  ;;  %v2172_v28 = vadd.f32 %v10829_v45, %v10828_v29  ;;  %v10830_v8 = vld [vmem:[#allocation35_spill] sm:$0xff]  ;;  %v2287_v45 = vadd.f32 %v10832_v41, %v8491_v58 }
 0x985   :  { %2734 = vmatpush1.msra.mxu0 %v10823_v57  ;;  %2767 = vmatprep.mubr.f32.mxu0 %v10824_v21  ;;  %v2174_v56 = vadd.f32 %v10830_v8, %v8474_v38 }
 0x986   :  { %2805 = vmatpush1.msra.mxu1 %v10825_v22  ;;  %2838 = vmatprep.mubr.f32.mxu1 %v10824_v21  ;;  %v10831_v21 = vld [vmem:[#allocation36_spill] sm:$0xff] }
 0x987   :  { %2874 = vmatprep.subr.mxu0 %v10826_v27  ;;  %2945 = vmatprep.subr.mxu1 %v10827_v14  ;;  %v2285_v27 = vadd.f32 %v10831_v21, %v8487_v55 }
 0xa26   :  { %v2598_v24 = vpop.f32.mrf.mxu0  ;;  %v2669_v22 = vpop.f32.mrf.mxu1 }
 0xa27   :  { %v2599_v60 = vadd.f32 %v2598_v24, %v2172_v28  ;;  %v2670_v25 = vadd.f32 %v2669_v22, %v2285_v27  ;;  %v10848_v24 = vld [vmem:[#allocation33_spill] sm:$0xff] }
 0xa28   :  { %v2600_v20 = vpop.f32.mrf.mxu0  ;;  %v2671_v14 = vpop.f32.mrf.mxu1 }
 0xa29   :  { %v5935_v57 = vmul.f32 -1.442695, %v2599_v60  ;;  %v2601_v23 = vadd.f32 %v2600_v20, %v2174_v56  ;;  %v5937_v29 = vmul.f32 -1.442695, %v2670_v25  ;;  %v2672_v54 = vadd.f32 %v2671_v14, %v2287_v45  ;;  %v10846_v14 = vld [vmem:[#allocation70_spill] sm:$0xff]  ;;  %v10849_v45 = vld [vmem:[#allocation71_spill] sm:$0xff] }
 0xa2b   :  { %6306 = vpow2.f32 %v5935_v57  ;;  %v5936_v59 = vmul.f32 -1.442695, %v2601_v23 }
 0xa2d   :  { %6308 = vpow2.f32 %v5936_v59 }
 0xa2e   :  { %6310 = vpow2.f32 %v5937_v29  ;;  %v10847_v29 = vld [vmem:[#allocation32_spill] sm:$0xff] }
 0xa2f   :  { %6312 = vtanh.f32 %v2672_v54  ;;  %v10844_v54 = vld [vmem:[#allocation69_spill] sm:$0xff] }
 0xa38   :  { %v6307_v52 = vpop.eup %6306 }
 0xa39   :  { %v2683_v8 = vadd.f32 1.0, %v6307_v52 }
 0xa3a   :  { %v6309_v28 = vpop.eup %6308 }
 0xa3b   :  { %6314 = vrcp.f32 %v2683_v8  ;;  %v2684_v60 = vadd.f32 1.0, %v6309_v28  ;;  %v6311_v59 = vpop.eup %6310  ;;  %v10850_v8 = vld [vmem:[#allocation73_spill] sm:$0xff]  ;;  %v10851_v28 = vld [vmem:[#allocation72_spill] sm:$0xff] }
 0xa3c   :  { %v6313_v23 = vpop.eup %6312  ;;  %v2685_v21 = vadd.f32 1.0, %v6311_v59  ;;  %v10853_v59 = vld [vmem:[#allocation56_spill] sm:$0xff] }
 0xa3d   :  { %6316 = vrcp.f32 %v2684_v60  ;;  %v10852_v60 = vld [vmem:[#allocation74_spill] sm:$0xff] }
 0xa3e   :  { %6318 = vrcp.f32 %v2685_v21  ;;  %v10858_v21 = vld [vmem:[#allocation57_spill] sm:$0xff] }
 0xa48   :  { %v6315_v20 = vpop.eup %6314 }
 0xa49   :  { %v2694_v56 = vmul.f32 %v6315_v20, %v6313_v23  ;;  %v10854_v23 = vmov 0.0   ;;  %v10855_v20 = vld [vmem:[#allocation58_spill] sm:$0xff] }
 0xa4a   :  { %v6317_v57 = vpop.eup %6316 }
 0xa4b   :  { %v2693_v22 = vmul.f32 %v6317_v57, %v8494_v61  ;;  %v6319_v52 = vpop.eup %6318  ;;  %v10845_v61 = vld [vmem:[#allocation68_spill] sm:$0xff]  ;;  %v10857_v57 = vld [vmem:[#allocation59_spill] sm:$0xff] }
 0xa4d   :  { %v8576_v27 = vadd.f32 %v2694_v56, %v2693_v22  ;;  %v10856_v56 = vld [vmem:[#allocation50_spill] sm:$0xff]  ;;  %v10859_v22 = vld [vmem:[#allocation37_spill] sm:$0xff] }
 0xa4f   :  { %6320 = vtanh.f32 %v8576_v27 }
 0xa5c   :  { %v6321_v41 = vpop.eup %6320 }
 0xa5d   :  { %v8579_v25 = vmul.f32 %v6321_v41, %v6319_v52  ;;  %v2178_v52 = vadd.f32 %v10859_v22, %v10858_v21 }
 0xa5f   :  { %10833 = vst [vmem:[#allocation34_spill] sm:$0xff] %v8579_v25  ;;  %2768 = vmatmul.mubr.f32.vlgmr.msra.gmra.mxu0 %v8579_v25  ;;  %2839 = vmatmul.mubr.f32.vlgmr.msra.gmra.mxu1 %v8579_v25  ;;  %v10860_v25 = vld [vmem:[#allocation39_spill] sm:$0xff] }
 0xa60   :  { %2875 = vmatpush1.msra.mxu0 %v8159_v1  ;;  %2946 = vmatpush1.msra.mxu1 %v8161_v3  ;;  %v10834_v1 = vld [vmem:[#allocation61_spill] sm:$0xff]  ;;  %v10835_v3 = vld [vmem:[#allocation60_spill] sm:$0xff] }
 0xa61   :  { %2876 = vmatprep.subr.mxu0 %v8165_v40  ;;  %2947 = vmatprep.subr.mxu1 %v8167_v17  ;;  %v10836_v40 = vld [vmem:[#allocation62_spill] sm:$0xff]  ;;  %v10837_v17 = vld [vmem:[#allocation63_spill] sm:$0xff] }
 0xa62   :  { %2877 = vmatpush1.msra.mxu0 %v8171_v2  ;;  %2948 = vmatpush1.msra.mxu1 %v8173_v63  ;;  %v10838_v2 = vld [vmem:[#allocation65_spill] sm:$0xff]  ;;  %v10839_v63 = vld [vmem:[#allocation64_spill] sm:$0xff] }
 0xa63   :  { %2878 = vmatprep.subr.mxu0 %v8177_v19  ;;  %2949 = vmatprep.subr.mxu1 %v8179_v12  ;;  %v10840_v19 = vld [vmem:[#allocation66_spill] sm:$0xff] }
 0xa64   :  { %2879 = vmatpush1.msra.mxu0 %v8183_v18  ;;  %2950 = vmatpush1.msra.mxu1 %v8185_v11  ;;  %v10841_v12 = vld [vmem:[#allocation30_spill] sm:$0xff]  ;;  %v10842_v18 = vld [vmem:[#allocation55_spill] sm:$0xff] }
 0xa65   :  { %2880 = vmatprep.subr.mxu0 %v8189_v9  ;;  %2951 = vmatprep.subr.mxu1 %v8191_v10  ;;  %v10843_v11 = vld [vmem:[#allocation67_spill] sm:$0xff] }
 0xa66   :  { %2881 = vmatpush1.msra.mxu0 %v8195_v5  ;;  %2952 = vmatpush1.msra.mxu1 %v8197_v62 }
 0xa67   :  { %2882 = vmatprep.subr.mxu0 %v8201_v13  ;;  %2953 = vmatprep.subr.mxu1 %v8203_v4 }
 0xa68   :  { %2883 = vmatpush1.msra.mxu0 %v8207_v53  ;;  %2954 = vmatpush1.msra.mxu1 %v8209_v35 }
 0xa69   :  { %2884 = vmatprep.subr.mxu0 %v8213_v26  ;;  %2955 = vmatprep.subr.mxu1 %v8215_v16 }
 0xa6a   :  { %2885 = vmatpush1.msra.mxu0 %v8219_v15  ;;  %2956 = vmatpush1.msra.mxu1 %v8221_v42 }
 0xa6b   :  { %2886 = vmatprep.subr.mxu0 %v8225_v43  ;;  %2957 = vmatprep.subr.mxu1 %v8227_v46 }
 0xa6c   :  { %2887 = vmatpush1.msra.mxu0 %v8231_v44  ;;  %2958 = vmatpush1.msra.mxu1 %v8233_v0 }
 0xa6d   :  { %2888 = vmatprep.subr.mxu0 %v8237_v7  ;;  %2959 = vmatprep.subr.mxu1 %v8239_v30 }
 0xa6e   :  { %2889 = vmatpush1.msra.mxu0 %v8243_v31  ;;  %2960 = vmatpush1.msra.mxu1 %v8245_v32 }
 0xa6f   :  { %2890 = vmatprep.subr.mxu0 %v8249_v33  ;;  %2961 = vmatprep.subr.mxu1 %v8251_v34 }
 0xa70   :  { %2891 = vmatpush1.msra.mxu0 %v8255_v36  ;;  %2962 = vmatpush1.msra.mxu1 %v8257_v37 }
 0xa71   :  { %2892 = vmatprep.subr.mxu0 %v8261_v39  ;;  %2963 = vmatprep.subr.mxu1 %v8263_v6 }
 0xa72   :  { %2893 = vmatpush1.msra.mxu0 %v8267_v47  ;;  %2964 = vmatpush1.msra.mxu1 %v8269_v48 }
 0xa73   :  { %2894 = vmatprep.subr.mxu0 %v8273_v49  ;;  %2965 = vmatprep.subr.mxu1 %v8275_v50 }
 0xa74   :  { %2895 = vmatpush1.msra.mxu0 %v8279_v51  ;;  %2966 = vmatpush1.msra.mxu1 %v10834_v1 }
 0xa75   :  { %2896 = vmatprep.subr.mxu0 %v10835_v3  ;;  %2967 = vmatprep.subr.mxu1 %v10836_v40 }
 0xa76   :  { %2897 = vmatpush1.msra.mxu0 %v10837_v17  ;;  %2968 = vmatpush1.msra.mxu1 %v10838_v2 }
 0xa77   :  { %2898 = vmatprep.subr.mxu0 %v10839_v63  ;;  %2969 = vmatprep.subr.mxu1 %v10840_v19 }
 0xa78   :  { %2899 = vmatpush1.msra.mxu0 %v10841_v12  ;;  %2970 = vmatpush1.msra.mxu1 %v10842_v18 }
 0xa79   :  { %2900 = vmatprep.subr.mxu0 %v10843_v11  ;;  %2971 = vmatprep.subr.mxu1 %v10844_v54 }
 0xa7a   :  { %2901 = vmatpush1.msra.mxu0 %v10845_v61  ;;  %2972 = vmatpush1.msra.mxu1 %v10846_v14  ;;  %v10862_v14 = vld [vmem:[#allocation42_spill] sm:$0xff] }
 0xa7b   :  { %2902 = vmatprep.subr.mxu0 %v10847_v29  ;;  %2973 = vmatprep.subr.mxu1 %v10848_v24  ;;  %v2293_v22 = vadd.f32 %v10862_v14, %v8491_v58 }
 0xa7c   :  { %2903 = vmatpush1.msra.mxu0 %v10849_v45  ;;  %2974 = vmatpush1.msra.mxu1 %v10850_v8 }
 0xa7d   :  { %2904 = vmatprep.subr.mxu0 %v10851_v28  ;;  %2975 = vmatprep.subr.mxu1 %v10852_v60  ;;  %v2180_v28 = vadd.f32 %v10860_v25, %v8474_v38 }
 0xa7e   :  { %2905 = vmatpush1.msra.mxu0 %v10853_v59  ;;  %2938 = vmatprep.mubr.f32.mxu0 %v10854_v23 }
 0xa7f   :  { %2976 = vmatpush1.msra.mxu1 %v10855_v20  ;;  %3009 = vmatprep.mubr.f32.mxu1 %v10854_v23  ;;  %v10861_v23 = vld [vmem:[#allocation40_spill] sm:$0xff] }
 0xa80   :  { %3045 = vmatprep.subr.mxu0 %v10856_v56  ;;  %3116 = vmatprep.subr.mxu1 %v10857_v57  ;;  %v2291_v56 = vadd.f32 %v10861_v23, %v8487_v55 }
 0xb1f   :  { %v2769_v41 = vpop.f32.mrf.mxu0  ;;  %v2840_v20 = vpop.f32.mrf.mxu1 }
 0xb20   :  { %v2770_v60 = vadd.f32 %v2769_v41, %v2178_v52  ;;  %v2841_v29 = vadd.f32 %v2840_v20, %v2291_v56  ;;  %v8674_v56 = vld [vmem:[#allocation10 + $0x3d8] sm:$0xff] }
 0xb21   :  { %v2771_v8 = vpop.f32.mrf.mxu0  ;;  %v2842_v57 = vpop.f32.mrf.mxu1 }
 0xb22   :  { %v5938_v59 = vmul.f32 -1.442695, %v2770_v60  ;;  %v2772_v45 = vadd.f32 %v2771_v8, %v2180_v28  ;;  %v5940_v21 = vmul.f32 -1.442695, %v2841_v29  ;;  %v2843_v61 = vadd.f32 %v2842_v57, %v2293_v22  ;;  %v8677_v57 = vld [vmem:[#allocation10 + $0x3c0] sm:$0xff]  ;;  %v8680_v22 = vld [vmem:[#allocation10 + $0x3d0] sm:$0xff] }
 0xb24   :  { %6322 = vpow2.f32 %v5938_v59  ;;  %v5939_v24 = vmul.f32 -1.442695, %v2772_v45 }
 0xb26   :  { %6324 = vpow2.f32 %v5939_v24 }
 0xb27   :  { %6326 = vpow2.f32 %v5940_v21  ;;  %v8668_v21 = vld [vmem:[#allocation10 + $0x3f0] sm:$0xff] }
 0xb28   :  { %6328 = vtanh.f32 %v2843_v61  ;;  %v8665_v61 = vld [vmem:[#allocation10 + $0x3e0] sm:$0xff] }
 0xb31   :  { %v6323_v54 = vpop.eup %6322 }
 0xb32   :  { %v2854_v25 = vadd.f32 1.0, %v6323_v54 }
 0xb33   :  { %v6325_v52 = vpop.eup %6324 }
 0xb34   :  { %6330 = vrcp.f32 %v2854_v25  ;;  %v2855_v8 = vadd.f32 1.0, %v6325_v52  ;;  %v6327_v24 = vpop.eup %6326  ;;  %v8683_v25 = vld [vmem:[#allocation10 + $0x3a8] sm:$0xff]  ;;  %v8686_v52 = vld [vmem:[#allocation10 + $0x3b8] sm:$0xff] }
 0xb35   :  { %v6329_v45 = vpop.eup %6328  ;;  %v2856_v23 = vadd.f32 1.0, %v6327_v24  ;;  %v8692_v24 = vld [vmem:[#allocation10 + $0x3b0] sm:$0xff] }
 0xb36   :  { %6332 = vrcp.f32 %v2855_v8  ;;  %v8689_v8 = vld [vmem:[#allocation10 + $0x3a0] sm:$0xff] }
 0xb37   :  { %6334 = vrcp.f32 %v2856_v23 }
 0xb41   :  { %v6331_v28 = vpop.eup %6330 }
 0xb42   :  { %v2865_v60 = vmul.f32 %v6331_v28, %v6329_v45 }
 0xb43   :  { %v6333_v59 = vpop.eup %6332 }
 0xb44   :  { %v2864_v20 = vmul.f32 %v6333_v59, %v8576_v27  ;;  %v6335_v54 = vpop.eup %6334  ;;  %v8671_v27 = vld [vmem:[#allocation10 + $0x3c8] sm:$0xff] }
 0xb46   :  { %v8658_v41 = vadd.f32 %v2865_v60, %v2864_v20 }
 0xb48   :  { %6336 = vtanh.f32 %v8658_v41 }
 0xb55   :  { %v6337_v14 = vpop.eup %6336 }
 0xb56   :  { %v8661_v29 = vmul.f32 %v6337_v14, %v6335_v54 }
 0xb58   :  { %10863 = vst [vmem:[#allocation35_spill] sm:$0xff] %v8661_v29  ;;  %2939 = vmatmul.mubr.f32.vlgmr.msra.gmra.mxu0 %v8661_v29  ;;  %3010 = vmatmul.mubr.f32.vlgmr.msra.gmra.mxu1 %v8661_v29  ;;  %v8916_v29 = vld [vmem:[#allocation10 + $0x238] sm:$0xff] }
 0xb59   :  { %3046 = vmatpush1.msra.mxu0 %v8665_v61  ;;  %3117 = vmatpush1.msra.mxu1 %v8668_v21  ;;  %10898 = vst [vmem:[#allocation42_spill] sm:$0xff] %v8916_v29 }
 0xb5a   :  { %3047 = vmatprep.subr.mxu0 %v8671_v27  ;;  %3118 = vmatprep.subr.mxu1 %v8674_v56 }
 0xb5b   :  { %3048 = vmatpush1.msra.mxu0 %v8677_v57  ;;  %3119 = vmatpush1.msra.mxu1 %v8680_v22 }
 0xb5c   :  { %3049 = vmatprep.subr.mxu0 %v8683_v25  ;;  %3120 = vmatprep.subr.mxu1 %v8686_v52 }
 0xb5d   :  { %3050 = vmatpush1.msra.mxu0 %v8689_v8  ;;  %3121 = vmatpush1.msra.mxu1 %v8692_v24 }
 0xb5e   :  { %3051 = vmatprep.subr.mxu0 %v8189_v9  ;;  %3122 = vmatprep.subr.mxu1 %v8191_v10  ;;  %v10864_v9 = vld [vmem:[#allocation69_spill] sm:$0xff]  ;;  %v10865_v10 = vld [vmem:[#allocation68_spill] sm:$0xff] }
 0xb5f   :  { %3052 = vmatpush1.msra.mxu0 %v8195_v5  ;;  %3123 = vmatpush1.msra.mxu1 %v8197_v62  ;;  %v10866_v5 = vld [vmem:[#allocation70_spill] sm:$0xff]  ;;  %v10867_v62 = vld [vmem:[#allocation32_spill] sm:$0xff] }
 0xb60   :  { %3053 = vmatprep.subr.mxu0 %v8201_v13  ;;  %3124 = vmatprep.subr.mxu1 %v8203_v4  ;;  %v10868_v13 = vld [vmem:[#allocation33_spill] sm:$0xff]  ;;  %v10869_v4 = vld [vmem:[#allocation71_spill] sm:$0xff] }
 0xb61   :  { %3054 = vmatpush1.msra.mxu0 %v8207_v53  ;;  %3125 = vmatpush1.msra.mxu1 %v8209_v35  ;;  %v10870_v53 = vld [vmem:[#allocation73_spill] sm:$0xff]  ;;  %v10871_v35 = vld [vmem:[#allocation72_spill] sm:$0xff] }
 0xb62   :  { %3055 = vmatprep.subr.mxu0 %v8213_v26  ;;  %3126 = vmatprep.subr.mxu1 %v8215_v16  ;;  %v10872_v26 = vld [vmem:[#allocation74_spill] sm:$0xff]  ;;  %v10873_v16 = vld [vmem:[#allocation56_spill] sm:$0xff] }
 0xb63   :  { %3056 = vmatpush1.msra.mxu0 %v8219_v15  ;;  %3127 = vmatpush1.msra.mxu1 %v8221_v42  ;;  %v10874_v15 = vmov 0.0   ;;  %v10875_v42 = vld [vmem:[#allocation58_spill] sm:$0xff] }
 0xb64   :  { %3057 = vmatprep.subr.mxu0 %v8225_v43  ;;  %3128 = vmatprep.subr.mxu1 %v8227_v46  ;;  %v8749_v43 = vld [vmem:[#allocation10 + $0x3e8] sm:$0xff]  ;;  %v8752_v46 = vld [vmem:[#allocation10 + $0x3f8] sm:$0xff] }
 0xb65   :  { %3058 = vmatpush1.msra.mxu0 %v8231_v44  ;;  %3129 = vmatpush1.msra.mxu1 %v8233_v0  ;;  %10876 = vst [vmem:[#allocation36_spill] sm:$0xff] %v8749_v43  ;;  %10877 = vst [vmem:[#allocation38_spill] sm:$0xff] %v8752_v46  ;;  %v10878_v44 = vld [vmem:[#allocation57_spill] sm:$0xff] }
 0xb66   :  { %3059 = vmatprep.subr.mxu0 %v8237_v7  ;;  %3130 = vmatprep.subr.mxu1 %v8239_v30  ;;  %v10879_v0 = vld [vmem:[#allocation41_spill] sm:$0xff] }
 0xb67   :  { %3060 = vmatpush1.msra.mxu0 %v8243_v31  ;;  %3131 = vmatpush1.msra.mxu1 %v8245_v32  ;;  %v2184_v7 = vadd.f32 %v10879_v0, %v10878_v44  ;;  %v10880_v31 = vld [vmem:[#allocation43_spill] sm:$0xff] }
 0xb68   :  { %3061 = vmatprep.subr.mxu0 %v8249_v33  ;;  %3132 = vmatprep.subr.mxu1 %v8251_v34  ;;  %v2186_v32 = vadd.f32 %v10880_v31, %v8474_v38  ;;  %v8817_v0 = vld [vmem:[#allocation10 + $0x328] sm:$0xff]  ;;  %v8826_v31 = vld [vmem:[#allocation10 + $0x330] sm:$0xff] }
 0xb69   :  { %3062 = vmatpush1.msra.mxu0 %v8255_v36  ;;  %3133 = vmatpush1.msra.mxu1 %v8257_v37 }
 0xb6a   :  { %3063 = vmatprep.subr.mxu0 %v8261_v39  ;;  %3134 = vmatprep.subr.mxu1 %v8263_v6 }
 0xb6b   :  { %3064 = vmatpush1.msra.mxu0 %v8267_v47  ;;  %3135 = vmatpush1.msra.mxu1 %v8269_v48  ;;  %v10881_v47 = vld [vmem:[#allocation44_spill] sm:$0xff] }
 0xb6c   :  { %3065 = vmatprep.subr.mxu0 %v8273_v49  ;;  %3136 = vmatprep.subr.mxu1 %v8275_v50  ;;  %v2297_v48 = vadd.f32 %v10881_v47, %v8487_v55  ;;  %v8850_v47 = vld [vmem:[#allocation10 + $0x2f0] sm:$0xff] }
 0xb6d   :  { %3066 = vmatpush1.msra.mxu0 %v8279_v51  ;;  %3137 = vmatpush1.msra.mxu1 %v10834_v1  ;;  %v10882_v51 = vld [vmem:[#allocation46_spill] sm:$0xff] }
 0xb6e   :  { %3067 = vmatprep.subr.mxu0 %v10835_v3  ;;  %3138 = vmatprep.subr.mxu1 %v10836_v40  ;;  %v2299_v1 = vadd.f32 %v10882_v51, %v8491_v58  ;;  %v8862_v51 = vld [vmem:[#allocation10 + $0x2d0] sm:$0xff] }
 0xb6f   :  { %3068 = vmatpush1.msra.mxu0 %v10837_v17  ;;  %3139 = vmatpush1.msra.mxu1 %v10838_v2 }
 0xb70   :  { %3069 = vmatprep.subr.mxu0 %v10839_v63  ;;  %3140 = vmatprep.subr.mxu1 %v10840_v19 }
 0xb71   :  { %3070 = vmatpush1.msra.mxu0 %v10841_v12  ;;  %3141 = vmatpush1.msra.mxu1 %v10842_v18 }
 0xb72   :  { %3071 = vmatprep.subr.mxu0 %v10843_v11  ;;  %3142 = vmatprep.subr.mxu1 %v10864_v9  ;;  %v8784_v9 = vld [vmem:[#allocation10 + $0x398] sm:$0xff] }
 0xb73   :  { %3072 = vmatpush1.msra.mxu0 %v10865_v10  ;;  %3143 = vmatpush1.msra.mxu1 %v10866_v5  ;;  %v8787_v10 = vld [vmem:[#allocation10 + $0x380] sm:$0xff]  ;;  %v8790_v5 = vld [vmem:[#allocation10 + $0x390] sm:$0xff] }
 0xb74   :  { %3073 = vmatprep.subr.mxu0 %v10867_v62  ;;  %3144 = vmatprep.subr.mxu1 %v10868_v13  ;;  %v8793_v62 = vld [vmem:[#allocation10 + $0x368] sm:$0xff]  ;;  %v8796_v13 = vld [vmem:[#allocation10 + $0x378] sm:$0xff] }
 0xb75   :  { %3074 = vmatpush1.msra.mxu0 %v10869_v4  ;;  %3145 = vmatpush1.msra.mxu1 %v10870_v53  ;;  %v8799_v4 = vld [vmem:[#allocation10 + $0x360] sm:$0xff]  ;;  %v8802_v53 = vld [vmem:[#allocation10 + $0x370] sm:$0xff] }
 0xb76   :  { %3075 = vmatprep.subr.mxu0 %v10871_v35  ;;  %3146 = vmatprep.subr.mxu1 %v10872_v26  ;;  %v8805_v35 = vld [vmem:[#allocation10 + $0x348] sm:$0xff]  ;;  %v8808_v26 = vld [vmem:[#allocation10 + $0x358] sm:$0xff] }
 0xb77   :  { %3076 = vmatpush1.msra.mxu0 %v10873_v16  ;;  %3109 = vmatprep.mubr.f32.mxu0 %v10874_v15  ;;  %v8811_v16 = vld [vmem:[#allocation10 + $0x340] sm:$0xff] }
 0xb78   :  { %3147 = vmatpush1.msra.mxu1 %v10875_v42  ;;  %3180 = vmatprep.mubr.f32.mxu1 %v10874_v15  ;;  %v8814_v42 = vld [vmem:[#allocation10 + $0x350] sm:$0xff] }
 0xb79   :  { %3216 = vmatprep.subr.mxu0 %v8749_v43  ;;  %3287 = vmatprep.subr.mxu1 %v8752_v46 }
 0xc18   :  { %v2940_v30 = vpop.f32.mrf.mxu0  ;;  %v3011_v6 = vpop.f32.mrf.mxu1 }
 0xc19   :  { %v2941_v33 = vadd.f32 %v2940_v30, %v2184_v7  ;;  %v3012_v49 = vadd.f32 %v3011_v6, %v2297_v48  ;;  %v8820_v7 = vld [vmem:[#allocation10 + $0x338] sm:$0xff]  ;;  %v8823_v30 = vld [vmem:[#allocation10 + $0x320] sm:$0xff]  ;;  %v8853_v48 = vld [vmem:[#allocation10 + $0x2c8] sm:$0xff] }
 0xc1a   :  { %v2942_v34 = vpop.f32.mrf.mxu0  ;;  %v3013_v50 = vpop.f32.mrf.mxu1  ;;  %v8847_v6 = vld [vmem:[#allocation10 + $0x2e0] sm:$0xff] }
 0xc1b   :  { %v5941_v36 = vmul.f32 -1.442695, %v2941_v33  ;;  %v2943_v37 = vadd.f32 %v2942_v34, %v2186_v32  ;;  %v5943_v3 = vmul.f32 -1.442695, %v3012_v49  ;;  %v3014_v40 = vadd.f32 %v3013_v50, %v2299_v1  ;;  %v8829_v32 = vld [vmem:[#allocation10 + $0x308] sm:$0xff]  ;;  %v8832_v33 = vld [vmem:[#allocation10 + $0x318] sm:$0xff] }
 0xc1c   :  { %v8835_v34 = vld [vmem:[#allocation10 + $0x300] sm:$0xff]  ;;  %v8856_v49 = vld [vmem:[#allocation10 + $0x2d8] sm:$0xff]  ;;  %v8865_v1 = vld [vmem:[#allocation10 + $0x2a8] sm:$0xff] }
 0xc1d   :  { %6338 = vpow2.f32 %v5941_v36  ;;  %v5942_v39 = vmul.f32 -1.442695, %v2943_v37  ;;  %v8838_v36 = vld [vmem:[#allocation10 + $0x310] sm:$0xff]  ;;  %v8841_v37 = vld [vmem:[#allocation10 + $0x2e8] sm:$0xff]  ;;  %v8859_v50 = vld [vmem:[#allocation10 + $0x2c0] sm:$0xff] }
 0xc1f   :  { %6340 = vpow2.f32 %v5942_v39  ;;  %v8844_v39 = vld [vmem:[#allocation10 + $0x2f8] sm:$0xff] }
 0xc20   :  { %6342 = vpow2.f32 %v5943_v3  ;;  %v8868_v3 = vld [vmem:[#allocation10 + $0x2b8] sm:$0xff] }
 0xc21   :  { %6344 = vtanh.f32 %v3014_v40  ;;  %v8871_v40 = vld [vmem:[#allocation10 + $0x2a0] sm:$0xff] }
 0xc2a   :  { %v6339_v17 = vpop.eup %6338 }
 0xc2b   :  { %v3025_v2 = vadd.f32 1.0, %v6339_v17  ;;  %v8874_v17 = vld [vmem:[#allocation10 + $0x2b0] sm:$0xff] }
 0xc2c   :  { %v6341_v63 = vpop.eup %6340  ;;  %10884 = vst [vmem:[#allocation60_spill] sm:$0xff] %v8874_v17 }
 0xc2d   :  { %6346 = vrcp.f32 %v3025_v2  ;;  %v3026_v19 = vadd.f32 1.0, %v6341_v63  ;;  %v6343_v12 = vpop.eup %6342  ;;  %v8877_v2 = vld [vmem:[#allocation10 + $0x288] sm:$0xff]  ;;  %v8880_v63 = vld [vmem:[#allocation10 + $0x298] sm:$0xff] }
 0xc2e   :  { %v6345_v18 = vpop.eup %6344  ;;  %v3027_v60 = vadd.f32 1.0, %v6343_v12  ;;  %10885 = vst [vmem:[#allocation62_spill] sm:$0xff] %v8877_v2  ;;  %10886 = vst [vmem:[#allocation63_spill] sm:$0xff] %v8880_v63  ;;  %v8886_v12 = vld [vmem:[#allocation10 + $0x290] sm:$0xff] }
 0xc2f   :  { %6348 = vrcp.f32 %v3026_v19  ;;  %v8883_v19 = vld [vmem:[#allocation10 + $0x280] sm:$0xff]  ;;  %10888 = vst [vmem:[#allocation64_spill] sm:$0xff] %v8886_v12 }
 0xc30   :  { %6350 = vrcp.f32 %v3027_v60  ;;  %10887 = vst [vmem:[#allocation65_spill] sm:$0xff] %v8883_v19  ;;  %v8901_v60 = vld [vmem:[#allocation10 + $0x248] sm:$0xff] }
 0xc31   :  { %10893 = vst [vmem:[#allocation50_spill] sm:$0xff] %v8901_v60 }
 0xc3a   :  { %v6347_v11 = vpop.eup %6346 }
 0xc3b   :  { %v3036_v45 = vmul.f32 %v6347_v11, %v6345_v18  ;;  %v8889_v18 = vld [vmem:[#allocation10 + $0x268] sm:$0xff]  ;;  %v8892_v11 = vld [vmem:[#allocation10 + $0x278] sm:$0xff] }
 0xc3c   :  { %v6349_v28 = vpop.eup %6348  ;;  %10889 = vst [vmem:[#allocation66_spill] sm:$0xff] %v8889_v18  ;;  %10890 = vst [vmem:[#allocation30_spill] sm:$0xff] %v8892_v11 }
 0xc3d   :  { %v3035_v59 = vmul.f32 %v6349_v28, %v8658_v41  ;;  %v6351_v20 = vpop.eup %6350  ;;  %v8781_v41 = vld [vmem:[#allocation10 + $0x388] sm:$0xff]  ;;  %v8898_v28 = vld [vmem:[#allocation10 + $0x270] sm:$0xff] }
 0xc3e   :  { %10892 = vst [vmem:[#allocation67_spill] sm:$0xff] %v8898_v28 }
 0xc3f   :  { %v8764_v23 = vadd.f32 %v3036_v45, %v3035_v59  ;;  %v8895_v45 = vld [vmem:[#allocation10 + $0x260] sm:$0xff]  ;;  %v8904_v59 = vld [vmem:[#allocation10 + $0x258] sm:$0xff] }
 0xc40   :  { %10891 = vst [vmem:[#allocation55_spill] sm:$0xff] %v8895_v45  ;;  %10894 = vst [vmem:[#allocation59_spill] sm:$0xff] %v8904_v59 }
 0xc41   :  { %6352 = vtanh.f32 %v8764_v23 }
 0xc4e   :  { %v6353_v54 = vpop.eup %6352 }
 0xc4f   :  { %v8767_v14 = vmul.f32 %v6353_v54, %v6351_v20  ;;  %v8907_v20 = vld [vmem:[#allocation10 + $0x240] sm:$0xff]  ;;  %v8910_v54 = vld [vmem:[#allocation10 + $0x250] sm:$0xff] }
 0xc50   :  { %10895 = vst [vmem:[#allocation37_spill] sm:$0xff] %v8907_v20  ;;  %10896 = vst [vmem:[#allocation39_spill] sm:$0xff] %v8910_v54 }
 0xc51   :  { %10883 = vst [vmem:[#allocation61_spill] sm:$0xff] %v8767_v14  ;;  %3110 = vmatmul.mubr.f32.vlgmr.msra.gmra.mxu0 %v8767_v14  ;;  %3181 = vmatmul.mubr.f32.vlgmr.msra.gmra.mxu1 %v8767_v14  ;;  %v8913_v14 = vld [vmem:[#allocation10 + $0x228] sm:$0xff] }
 0xc52   :  { %3217 = vmatpush1.msra.mxu0 %v8665_v61  ;;  %3288 = vmatpush1.msra.mxu1 %v8668_v21  ;;  %10897 = vst [vmem:[#allocation40_spill] sm:$0xff] %v8913_v14 }
 0xc53   :  { %3218 = vmatprep.subr.mxu0 %v8671_v27  ;;  %3289 = vmatprep.subr.mxu1 %v8674_v56 }
 0xc54   :  { %3219 = vmatpush1.msra.mxu0 %v8677_v57  ;;  %3290 = vmatpush1.msra.mxu1 %v8680_v22 }
 0xc55   :  { %3220 = vmatprep.subr.mxu0 %v8683_v25  ;;  %3291 = vmatprep.subr.mxu1 %v8686_v52 }
 0xc56   :  { %3221 = vmatpush1.msra.mxu0 %v8689_v8  ;;  %3292 = vmatpush1.msra.mxu1 %v8692_v24 }
 0xc57   :  { %3222 = vmatprep.subr.mxu0 %v8781_v41  ;;  %3293 = vmatprep.subr.mxu1 %v8784_v9 }
 0xc58   :  { %3223 = vmatpush1.msra.mxu0 %v8787_v10  ;;  %3294 = vmatpush1.msra.mxu1 %v8790_v5 }
 0xc59   :  { %3224 = vmatprep.subr.mxu0 %v8793_v62  ;;  %3295 = vmatprep.subr.mxu1 %v8796_v13 }
 0xc5a   :  { %3225 = vmatpush1.msra.mxu0 %v8799_v4  ;;  %3296 = vmatpush1.msra.mxu1 %v8802_v53 }
 0xc5b   :  { %3226 = vmatprep.subr.mxu0 %v8805_v35  ;;  %3297 = vmatprep.subr.mxu1 %v8808_v26 }
 0xc5c   :  { %3227 = vmatpush1.msra.mxu0 %v8811_v16  ;;  %3298 = vmatpush1.msra.mxu1 %v8814_v42 }
 0xc5d   :  { %3228 = vmatprep.subr.mxu0 %v8817_v0  ;;  %3299 = vmatprep.subr.mxu1 %v8820_v7 }
 0xc5e   :  { %3229 = vmatpush1.msra.mxu0 %v8823_v30  ;;  %3300 = vmatpush1.msra.mxu1 %v8826_v31 }
 0xc5f   :  { %3230 = vmatprep.subr.mxu0 %v8829_v32  ;;  %3301 = vmatprep.subr.mxu1 %v8832_v33 }
 0xc60   :  { %3231 = vmatpush1.msra.mxu0 %v8835_v34  ;;  %3302 = vmatpush1.msra.mxu1 %v8838_v36 }
 0xc61   :  { %3232 = vmatprep.subr.mxu0 %v8841_v37  ;;  %3303 = vmatprep.subr.mxu1 %v8844_v39 }
 0xc62   :  { %3233 = vmatpush1.msra.mxu0 %v8847_v6  ;;  %3304 = vmatpush1.msra.mxu1 %v8850_v47 }
 0xc63   :  { %3234 = vmatprep.subr.mxu0 %v8853_v48  ;;  %3305 = vmatprep.subr.mxu1 %v8856_v49 }
 0xc64   :  { %3235 = vmatpush1.msra.mxu0 %v8859_v50  ;;  %3306 = vmatpush1.msra.mxu1 %v8862_v51 }
 0xc65   :  { %3236 = vmatprep.subr.mxu0 %v8865_v1  ;;  %3307 = vmatprep.subr.mxu1 %v8868_v3 }
 0xc66   :  { %3237 = vmatpush1.msra.mxu0 %v8871_v40  ;;  %3308 = vmatpush1.msra.mxu1 %v8874_v17 }
 0xc67   :  { %3238 = vmatprep.subr.mxu0 %v8877_v2  ;;  %3309 = vmatprep.subr.mxu1 %v8880_v63  ;;  %v10908_v63 = vld [vmem:[#allocation77_spill] sm:$0xff] }
 0xc68   :  { %3239 = vmatpush1.msra.mxu0 %v8883_v19  ;;  %3310 = vmatpush1.msra.mxu1 %v8886_v12 }
 0xc69   :  { %3240 = vmatprep.subr.mxu0 %v8889_v18  ;;  %3311 = vmatprep.subr.mxu1 %v8892_v11 }
 0xc6a   :  { %3241 = vmatpush1.msra.mxu0 %v8895_v45  ;;  %3312 = vmatpush1.msra.mxu1 %v8898_v28 }
 0xc6b   :  { %3242 = vmatprep.subr.mxu0 %v8901_v60  ;;  %3313 = vmatprep.subr.mxu1 %v8904_v59  ;;  %v8919_v60 = vld [vmem:[#allocation10 + $0x220] sm:$0xff]  ;;  %v8922_v59 = vld [vmem:[#allocation10 + $0x230] sm:$0xff] }
 0xc6c   :  { %3243 = vmatpush1.msra.mxu0 %v8907_v20  ;;  %3314 = vmatpush1.msra.mxu1 %v8910_v54  ;;  %10899 = vst [vmem:[#allocation69_spill] sm:$0xff] %v8919_v60  ;;  %10900 = vst [vmem:[#allocation68_spill] sm:$0xff] %v8922_v59  ;;  %v8925_v20 = vld [vmem:[#allocation10 + $0x208] sm:$0xff]  ;;  %v8928_v54 = vld [vmem:[#allocation10 + $0x218] sm:$0xff] }
 0xc6d   :  { %3244 = vmatprep.subr.mxu0 %v8913_v14  ;;  %3315 = vmatprep.subr.mxu1 %v8916_v29  ;;  %10901 = vst [vmem:[#allocation70_spill] sm:$0xff] %v8925_v20  ;;  %10902 = vst [vmem:[#allocation32_spill] sm:$0xff] %v8928_v54  ;;  %v8931_v14 = vld [vmem:[#allocation10 + $0x200] sm:$0xff]  ;;  %v8935_v29 = vld [vmem:[#allocation10 + $0x210] sm:$0xff] }
 0xc6e   :  { %3245 = vmatpush1.msra.mxu0 %v8919_v60  ;;  %3316 = vmatpush1.msra.mxu1 %v8922_v59  ;;  %10903 = vst [vmem:[#allocation33_spill] sm:$0xff] %v8931_v14  ;;  %10904 = vst [vmem:[#allocation71_spill] sm:$0xff] %v8935_v29  ;;  %v10906_v60 = vld [vmem:[#allocation47_spill] sm:$0xff] }
 0xc6f   :  { %3246 = vmatprep.subr.mxu0 %v8925_v20  ;;  %3317 = vmatprep.subr.mxu1 %v8928_v54  ;;  %v10905_v20 = vld [vmem:[#allocation45_spill] sm:$0xff]  ;;  %v2192_v28 = vadd.f32 %v10906_v60, %v8474_v38 }
 0xc70   :  { %3247 = vmatpush1.msra.mxu0 %v8931_v14  ;;  %3280 = vmatprep.mubr.f32.mxu0 %v10874_v15  ;;  %v2190_v59 = vadd.f32 %v10905_v20, %v10878_v44  ;;  %v2305_v20 = vadd.f32 %v10908_v63, %v8491_v58  ;;  %v10912_v63 = vld [vmem:[#allocation63_spill] sm:$0xff] }
 0xc71   :  { %3318 = vmatpush1.msra.mxu1 %v8935_v29  ;;  %3351 = vmatprep.mubr.f32.mxu1 %v10874_v15  ;;  %v10907_v15 = vld [vmem:[#allocation48_spill] sm:$0xff] }
 0xc72   :  { %3387 = vmatprep.subr.mxu0 %v8749_v43  ;;  %3458 = vmatprep.subr.mxu1 %v8752_v46  ;;  %v2303_v43 = vadd.f32 %v10907_v15, %v8487_v55 }
 0xd11   :  { %v3111_v54 = vpop.f32.mrf.mxu0  ;;  %v3182_v29 = vpop.f32.mrf.mxu1 }
 0xd12   :  { %v3112_v14 = vadd.f32 %v3111_v54, %v2190_v59  ;;  %v3183_v19 = vadd.f32 %v3182_v29, %v2303_v43  ;;  %v10914_v54 = vld [vmem:[#allocation64_spill] sm:$0xff] }
 0xd13   :  { %v3113_v45 = vpop.f32.mrf.mxu0  ;;  %v3184_v46 = vpop.f32.mrf.mxu1 }
 0xd14   :  { %v5944_v11 = vmul.f32 -1.442695, %v3112_v14  ;;  %v3114_v18 = vadd.f32 %v3113_v45, %v2192_v28  ;;  %v5946_v44 = vmul.f32 -1.442695, %v3183_v19  ;;  %v3185_v2 = vadd.f32 %v3184_v46, %v2305_v20  ;;  %v10913_v19 = vld [vmem:[#allocation65_spill] sm:$0xff]  ;;  %v10915_v20 = vld [vmem:[#allocation66_spill] sm:$0xff] }
 0xd16   :  { %6354 = vpow2.f32 %v5944_v11  ;;  %v5945_v12 = vmul.f32 -1.442695, %v3114_v18 }
 0xd18   :  { %6356 = vpow2.f32 %v5945_v12 }
 0xd19   :  { %6358 = vpow2.f32 %v5946_v44 }
 0xd1a   :  { %6360 = vtanh.f32 %v3185_v2  ;;  %v10911_v2 = vld [vmem:[#allocation62_spill] sm:$0xff] }
 0xd23   :  { %v6355_v17 = vpop.eup %6354 }
 0xd24   :  { %v3196_v60 = vadd.f32 1.0, %v6355_v17 }
 0xd25   :  { %v6357_v59 = vpop.eup %6356 }
 0xd26   :  { %6362 = vrcp.f32 %v3196_v60  ;;  %v3197_v14 = vadd.f32 1.0, %v6357_v59  ;;  %v6359_v12 = vpop.eup %6358  ;;  %v10916_v60 = vld [vmem:[#allocation30_spill] sm:$0xff]  ;;  %v10917_v59 = vld [vmem:[#allocation55_spill] sm:$0xff] }
 0xd27   :  { %v6361_v18 = vpop.eup %6360  ;;  %v3198_v29 = vadd.f32 1.0, %v6359_v12  ;;  %v10919_v12 = vld [vmem:[#allocation50_spill] sm:$0xff] }
 0xd28   :  { %6364 = vrcp.f32 %v3197_v14  ;;  %v10918_v14 = vld [vmem:[#allocation67_spill] sm:$0xff] }
 0xd29   :  { %6366 = vrcp.f32 %v3198_v29  ;;  %v10924_v29 = vld [vmem:[#allocation42_spill] sm:$0xff] }
 0xd33   :  { %v6363_v11 = vpop.eup %6362 }
 0xd34   :  { %v3207_v45 = vmul.f32 %v6363_v11, %v6361_v18  ;;  %v10920_v18 = vld [vmem:[#allocation59_spill] sm:$0xff]  ;;  %v10921_v11 = vld [vmem:[#allocation37_spill] sm:$0xff] }
 0xd35   :  { %v6365_v15 = vpop.eup %6364 }
 0xd36   :  { %v3206_v43 = vmul.f32 %v6365_v15, %v8764_v23  ;;  %v6367_v46 = vpop.eup %6366  ;;  %v10910_v23 = vld [vmem:[#allocation60_spill] sm:$0xff] }
 0xd37   :  { %v10923_v15 = vld [vmem:[#allocation40_spill] sm:$0xff] }
 0xd38   :  { %v8950_v28 = vadd.f32 %v3207_v45, %v3206_v43  ;;  %v10922_v45 = vld [vmem:[#allocation39_spill] sm:$0xff]  ;;  %v10925_v43 = vld [vmem:[#allocation69_spill] sm:$0xff] }
 0xd3a   :  { %6368 = vtanh.f32 %v8950_v28 }
 0xd47   :  { %v6369_v44 = vpop.eup %6368 }
 0xd48   :  { %v8953_v17 = vmul.f32 %v6369_v44, %v6367_v46  ;;  %v10926_v46 = vld [vmem:[#allocation68_spill] sm:$0xff]  ;;  %v10927_v44 = vld [vmem:[#allocation70_spill] sm:$0xff] }
 0xd4a   :  { %10909 = vst [vmem:[#allocation73_spill] sm:$0xff] %v8953_v17  ;;  %3281 = vmatmul.mubr.f32.vlgmr.msra.gmra.mxu0 %v8953_v17  ;;  %3352 = vmatmul.mubr.f32.vlgmr.msra.gmra.mxu1 %v8953_v17  ;;  %v10928_v17 = vld [vmem:[#allocation32_spill] sm:$0xff] }
 0xd4b   :  { %3388 = vmatpush1.msra.mxu0 %v8665_v61  ;;  %3459 = vmatpush1.msra.mxu1 %v8668_v21 }
 0xd4c   :  { %3389 = vmatprep.subr.mxu0 %v8671_v27  ;;  %3460 = vmatprep.subr.mxu1 %v8674_v56 }
 0xd4d   :  { %3390 = vmatpush1.msra.mxu0 %v8677_v57  ;;  %3461 = vmatpush1.msra.mxu1 %v8680_v22 }
 0xd4e   :  { %3391 = vmatprep.subr.mxu0 %v8683_v25  ;;  %3462 = vmatprep.subr.mxu1 %v8686_v52 }
 0xd4f   :  { %3392 = vmatpush1.msra.mxu0 %v8689_v8  ;;  %3463 = vmatpush1.msra.mxu1 %v8692_v24 }
 0xd50   :  { %3393 = vmatprep.subr.mxu0 %v8781_v41  ;;  %3464 = vmatprep.subr.mxu1 %v8784_v9 }
 0xd51   :  { %3394 = vmatpush1.msra.mxu0 %v8787_v10  ;;  %3465 = vmatpush1.msra.mxu1 %v8790_v5 }
 0xd52   :  { %3395 = vmatprep.subr.mxu0 %v8793_v62  ;;  %3466 = vmatprep.subr.mxu1 %v8796_v13 }
 0xd53   :  { %3396 = vmatpush1.msra.mxu0 %v8799_v4  ;;  %3467 = vmatpush1.msra.mxu1 %v8802_v53 }
 0xd54   :  { %3397 = vmatprep.subr.mxu0 %v8805_v35  ;;  %3468 = vmatprep.subr.mxu1 %v8808_v26 }
 0xd55   :  { %3398 = vmatpush1.msra.mxu0 %v8811_v16  ;;  %3469 = vmatpush1.msra.mxu1 %v8814_v42 }
 0xd56   :  { %3399 = vmatprep.subr.mxu0 %v8817_v0  ;;  %3470 = vmatprep.subr.mxu1 %v8820_v7 }
 0xd57   :  { %3400 = vmatpush1.msra.mxu0 %v8823_v30  ;;  %3471 = vmatpush1.msra.mxu1 %v8826_v31 }
 0xd58   :  { %3401 = vmatprep.subr.mxu0 %v8829_v32  ;;  %3472 = vmatprep.subr.mxu1 %v8832_v33 }
 0xd59   :  { %3402 = vmatpush1.msra.mxu0 %v8835_v34  ;;  %3473 = vmatpush1.msra.mxu1 %v8838_v36 }
 0xd5a   :  { %3403 = vmatprep.subr.mxu0 %v8841_v37  ;;  %3474 = vmatprep.subr.mxu1 %v8844_v39 }
 0xd5b   :  { %3404 = vmatpush1.msra.mxu0 %v8847_v6  ;;  %3475 = vmatpush1.msra.mxu1 %v8850_v47 }
 0xd5c   :  { %3405 = vmatprep.subr.mxu0 %v8853_v48  ;;  %3476 = vmatprep.subr.mxu1 %v8856_v49 }
 0xd5d   :  { %3406 = vmatpush1.msra.mxu0 %v8859_v50  ;;  %3477 = vmatpush1.msra.mxu1 %v8862_v51 }
 0xd5e   :  { %3407 = vmatprep.subr.mxu0 %v8865_v1  ;;  %3478 = vmatprep.subr.mxu1 %v8868_v3 }
 0xd5f   :  { %3408 = vmatpush1.msra.mxu0 %v8871_v40  ;;  %3479 = vmatpush1.msra.mxu1 %v10910_v23 }
 0xd60   :  { %3409 = vmatprep.subr.mxu0 %v10911_v2  ;;  %3480 = vmatprep.subr.mxu1 %v10912_v63  ;;  %v10938_v63 = vld [vmem:[#allocation31_spill] sm:$0xff] }
 0xd61   :  { %3410 = vmatpush1.msra.mxu0 %v10913_v19  ;;  %3481 = vmatpush1.msra.mxu1 %v10914_v54 }
 0xd62   :  { %3411 = vmatprep.subr.mxu0 %v10915_v20  ;;  %3482 = vmatprep.subr.mxu1 %v10916_v60 }
 0xd63   :  { %3412 = vmatpush1.msra.mxu0 %v10917_v59  ;;  %3483 = vmatpush1.msra.mxu1 %v10918_v14  ;;  %v10929_v14 = vld [vmem:[#allocation33_spill] sm:$0xff] }
 0xd64   :  { %3413 = vmatprep.subr.mxu0 %v10919_v12  ;;  %3484 = vmatprep.subr.mxu1 %v10920_v18  ;;  %v10930_v12 = vmov 0.0   ;;  %v10931_v18 = vld [vmem:[#allocation71_spill] sm:$0xff] }
 0xd65   :  { %3414 = vmatpush1.msra.mxu0 %v10921_v11  ;;  %3485 = vmatpush1.msra.mxu1 %v10922_v45  ;;  %v10932_v45 = vld [vmem:[#allocation36_spill] sm:$0xff] }
 0xd66   :  { %3415 = vmatprep.subr.mxu0 %v10923_v15  ;;  %3486 = vmatprep.subr.mxu1 %v10924_v29  ;;  %v10933_v15 = vld [vmem:[#allocation38_spill] sm:$0xff]  ;;  %v10934_v29 = vld [vmem:[#allocation57_spill] sm:$0xff] }
 0xd67   :  { %3416 = vmatpush1.msra.mxu0 %v10925_v43  ;;  %3487 = vmatpush1.msra.mxu1 %v10926_v46  ;;  %v10935_v43 = vld [vmem:[#allocation75_spill] sm:$0xff] }
 0xd68   :  { %3417 = vmatprep.subr.mxu0 %v10927_v44  ;;  %3488 = vmatprep.subr.mxu1 %v10928_v17  ;;  %v2196_v11 = vadd.f32 %v10935_v43, %v10934_v29  ;;  %v10936_v44 = vld [vmem:[#allocation76_spill] sm:$0xff]  ;;  %v2311_v43 = vadd.f32 %v10938_v63, %v8491_v58 }
 0xd69   :  { %3418 = vmatpush1.msra.mxu0 %v10929_v14  ;;  %3451 = vmatprep.mubr.f32.mxu0 %v10930_v12  ;;  %v2198_v59 = vadd.f32 %v10936_v44, %v8474_v38 }
 0xd6a   :  { %3489 = vmatpush1.msra.mxu1 %v10931_v18  ;;  %3522 = vmatprep.mubr.f32.mxu1 %v10930_v12  ;;  %v10937_v12 = vld [vmem:[#allocation78_spill] sm:$0xff] }
 0xd6b   :  { %3558 = vmatprep.subr.mxu0 %v10932_v45  ;;  %3629 = vmatprep.subr.mxu1 %v10933_v15  ;;  %v2309_v45 = vadd.f32 %v10937_v12, %v8487_v55 }
 0xe0a   :  { %v3282_v46 = vpop.f32.mrf.mxu0  ;;  %v3353_v18 = vpop.f32.mrf.mxu1 }
 0xe0b   :  { %v3283_v17 = vadd.f32 %v3282_v46, %v2196_v11  ;;  %v3354_v19 = vadd.f32 %v3353_v18, %v2309_v45 }
 0xe0c   :  { %v3284_v60 = vpop.f32.mrf.mxu0  ;;  %v3355_v15 = vpop.f32.mrf.mxu1 }
 0xe0d   :  { %v5947_v14 = vmul.f32 -1.442695, %v3283_v17  ;;  %v3285_v20 = vadd.f32 %v3284_v60, %v2198_v59  ;;  %v5949_v29 = vmul.f32 -1.442695, %v3354_v19  ;;  %v3356_v2 = vadd.f32 %v3355_v15, %v2311_v43 }
 0xe0f   :  { %6370 = vpow2.f32 %v5947_v14  ;;  %v5948_v54 = vmul.f32 -1.442695, %v3285_v20 }
 0xe11   :  { %6372 = vpow2.f32 %v5948_v54 }
 0xe12   :  { %6374 = vpow2.f32 %v5949_v29 }
 0xe13   :  { %6376 = vtanh.f32 %v3356_v2 }
 0xe1c   :  { %v6371_v23 = vpop.eup %6370 }
 0xe1d   :  { %v3367_v44 = vadd.f32 1.0, %v6371_v23 }
 0xe1e   :  { %v6373_v11 = vpop.eup %6372 }
 0xe1f   :  { %6378 = vrcp.f32 %v3367_v44  ;;  %v3368_v17 = vadd.f32 1.0, %v6373_v11  ;;  %v6375_v54 = vpop.eup %6374 }
 0xe20   :  { %v6377_v20 = vpop.eup %6376  ;;  %v3369_v12 = vadd.f32 1.0, %v6375_v54 }
 0xe21   :  { %6380 = vrcp.f32 %v3368_v17 }
 0xe22   :  { %6382 = vrcp.f32 %v3369_v12 }
 0xe2c   :  { %v6379_v60 = vpop.eup %6378 }
 0xe2d   :  { %v3378_v59 = vmul.f32 %v6379_v60, %v6377_v20 }
 0xe2e   :  { %v6381_v14 = vpop.eup %6380 }
 0xe2f   :  { %v3377_v18 = vmul.f32 %v6381_v14, %v8950_v28  ;;  %v6383_v23 = vpop.eup %6382 }
 0xe31   :  { %v9032_v46 = vadd.f32 %v3378_v59, %v3377_v18 }
 0xe33   :  { %6384 = vtanh.f32 %v9032_v46 }
 0xe40   :  { %v6385_v63 = vpop.eup %6384 }
 0xe41   :  { %v9035_v19 = vmul.f32 %v6385_v63, %v6383_v23 }
 0xe43   :  { %3452 = vmatmul.mubr.f32.vlgmr.msra.gmra.mxu0 %v9035_v19  ;;  %3523 = vmatmul.mubr.f32.vlgmr.msra.gmra.mxu1 %v9035_v19 }
 0xe44   :  { %3559 = vmatpush1.msra.mxu0 %v8665_v61  ;;  %3630 = vmatpush1.msra.mxu1 %v8668_v21  ;;  %v10939_v61 = vld [vmem:[#allocation60_spill] sm:$0xff]  ;;  %v10940_v21 = vld [vmem:[#allocation62_spill] sm:$0xff] }
 0xe45   :  { %3560 = vmatprep.subr.mxu0 %v8671_v27  ;;  %3631 = vmatprep.subr.mxu1 %v8674_v56  ;;  %v10941_v27 = vld [vmem:[#allocation63_spill] sm:$0xff]  ;;  %v10942_v56 = vld [vmem:[#allocation65_spill] sm:$0xff] }
 0xe46   :  { %3561 = vmatpush1.msra.mxu0 %v8677_v57  ;;  %3632 = vmatpush1.msra.mxu1 %v8680_v22  ;;  %v10943_v57 = vld [vmem:[#allocation64_spill] sm:$0xff]  ;;  %v10944_v22 = vld [vmem:[#allocation66_spill] sm:$0xff] }
 0xe47   :  { %3562 = vmatprep.subr.mxu0 %v8683_v25  ;;  %3633 = vmatprep.subr.mxu1 %v8686_v52  ;;  %v10945_v25 = vld [vmem:[#allocation30_spill] sm:$0xff]  ;;  %v10946_v52 = vld [vmem:[#allocation55_spill] sm:$0xff] }
 0xe48   :  { %3563 = vmatpush1.msra.mxu0 %v8689_v8  ;;  %3634 = vmatpush1.msra.mxu1 %v8692_v24  ;;  %v10947_v8 = vld [vmem:[#allocation67_spill] sm:$0xff]  ;;  %v10948_v24 = vld [vmem:[#allocation50_spill] sm:$0xff] }
 0xe49   :  { %3564 = vmatprep.subr.mxu0 %v8781_v41  ;;  %3635 = vmatprep.subr.mxu1 %v8784_v9  ;;  %v10949_v41 = vld [vmem:[#allocation59_spill] sm:$0xff]  ;;  %v10950_v9 = vld [vmem:[#allocation37_spill] sm:$0xff] }
 0xe4a   :  { %3565 = vmatpush1.msra.mxu0 %v8787_v10  ;;  %3636 = vmatpush1.msra.mxu1 %v8790_v5  ;;  %v10951_v10 = vld [vmem:[#allocation39_spill] sm:$0xff]  ;;  %v10952_v5 = vld [vmem:[#allocation40_spill] sm:$0xff] }
 0xe4b   :  { %3566 = vmatprep.subr.mxu0 %v8793_v62  ;;  %3637 = vmatprep.subr.mxu1 %v8796_v13  ;;  %v10953_v62 = vld [vmem:[#allocation42_spill] sm:$0xff]  ;;  %v10954_v13 = vld [vmem:[#allocation69_spill] sm:$0xff] }
 0xe4c   :  { %3567 = vmatpush1.msra.mxu0 %v8799_v4  ;;  %3638 = vmatpush1.msra.mxu1 %v8802_v53  ;;  %v10955_v4 = vld [vmem:[#allocation68_spill] sm:$0xff]  ;;  %v10956_v53 = vld [vmem:[#allocation70_spill] sm:$0xff] }
 0xe4d   :  { %3568 = vmatprep.subr.mxu0 %v8805_v35  ;;  %3639 = vmatprep.subr.mxu1 %v8808_v26  ;;  %v10957_v35 = vld [vmem:[#allocation32_spill] sm:$0xff]  ;;  %v10958_v26 = vld [vmem:[#allocation33_spill] sm:$0xff] }
 0xe4e   :  { %3569 = vmatpush1.msra.mxu0 %v8811_v16  ;;  %3640 = vmatpush1.msra.mxu1 %v8814_v42  ;;  %v10959_v16 = vld [vmem:[#allocation71_spill] sm:$0xff]  ;;  %v10960_v42 = vmov 0.0  }
 0xe4f   :  { %3570 = vmatprep.subr.mxu0 %v8817_v0  ;;  %3641 = vmatprep.subr.mxu1 %v8820_v7  ;;  %v3862_v0 = vld [vmem:[#allocation9 + $0x3e8] sm:$0xff]  ;;  %v3864_v7 = vld [vmem:[#allocation9 + $0x3f8] sm:$0xff] }
 0xe50   :  { %3571 = vmatpush1.msra.mxu0 %v8823_v30  ;;  %3642 = vmatpush1.msra.mxu1 %v8826_v31  ;;  %v10961_v30 = vld [vmem:[#allocation57_spill] sm:$0xff]  ;;  %v10962_v31 = vld [vmem:[#allocation83_spill] sm:$0xff] }
 0xe51   :  { %3572 = vmatprep.subr.mxu0 %v8829_v32  ;;  %3643 = vmatprep.subr.mxu1 %v8832_v33  ;;  %v2202_v32 = vadd.f32 %v10962_v31, %v10961_v30  ;;  %v3837_v31 = vld [vmem:[#allocation9 + $0x320] sm:$0xff] }
 0xe52   :  { %3573 = vmatpush1.msra.mxu0 %v8835_v34  ;;  %3644 = vmatpush1.msra.mxu1 %v8838_v36  ;;  %v10963_v34 = vld [vmem:[#allocation29_spill] sm:$0xff] }
 0xe53   :  { %3574 = vmatprep.subr.mxu0 %v8841_v37  ;;  %3645 = vmatprep.subr.mxu1 %v8844_v39  ;;  %v2204_v36 = vadd.f32 %v10963_v34, %v8474_v38  ;;  %v3836_v34 = vld [vmem:[#allocation9 + $0x318] sm:$0xff] }
 0xe54   :  { %3575 = vmatpush1.msra.mxu0 %v8847_v6  ;;  %3646 = vmatpush1.msra.mxu1 %v8850_v47 }
 0xe55   :  { %3576 = vmatprep.subr.mxu0 %v8853_v48  ;;  %3647 = vmatprep.subr.mxu1 %v8856_v49 }
 0xe56   :  { %3577 = vmatpush1.msra.mxu0 %v8859_v50  ;;  %3648 = vmatpush1.msra.mxu1 %v8862_v51  ;;  %v10964_v50 = vld [vmem:[#allocation49_spill] sm:$0xff] }
 0xe57   :  { %3578 = vmatprep.subr.mxu0 %v8865_v1  ;;  %3649 = vmatprep.subr.mxu1 %v8868_v3  ;;  %v2315_v51 = vadd.f32 %v10964_v50, %v8487_v55  ;;  %v3828_v50 = vld [vmem:[#allocation9 + $0x2d8] sm:$0xff] }
 0xe58   :  { %3579 = vmatpush1.msra.mxu0 %v8871_v40  ;;  %3650 = vmatpush1.msra.mxu1 %v10939_v61  ;;  %v10965_v40 = vld [vmem:[#allocation80_spill] sm:$0xff]  ;;  %v3861_v61 = vld [vmem:[#allocation9 + $0x3e0] sm:$0xff] }
 0xe59   :  { %3580 = vmatprep.subr.mxu0 %v10940_v21  ;;  %3651 = vmatprep.subr.mxu1 %v10941_v27  ;;  %v2317_v28 = vadd.f32 %v10965_v40, %v8491_v58  ;;  %v3863_v21 = vld [vmem:[#allocation9 + $0x3f0] sm:$0xff]  ;;  %v3858_v27 = vld [vmem:[#allocation9 + $0x3c8] sm:$0xff]  ;;  %v3824_v40 = vld [vmem:[#allocation9 + $0x2b8] sm:$0xff] }
 0xe5a   :  { %3581 = vmatpush1.msra.mxu0 %v10942_v56  ;;  %3652 = vmatpush1.msra.mxu1 %v10943_v57  ;;  %v3860_v56 = vld [vmem:[#allocation9 + $0x3d8] sm:$0xff]  ;;  %v3857_v57 = vld [vmem:[#allocation9 + $0x3c0] sm:$0xff] }
 0xe5b   :  { %3582 = vmatprep.subr.mxu0 %v10944_v22  ;;  %3653 = vmatprep.subr.mxu1 %v10945_v25  ;;  %v3854_v22 = vld [vmem:[#allocation9 + $0x3a8] sm:$0xff]  ;;  %v3856_v25 = vld [vmem:[#allocation9 + $0x3b8] sm:$0xff] }
 0xe5c   :  { %3583 = vmatpush1.msra.mxu0 %v10946_v52  ;;  %3654 = vmatpush1.msra.mxu1 %v10947_v8  ;;  %v3853_v52 = vld [vmem:[#allocation9 + $0x3a0] sm:$0xff]  ;;  %v3855_v8 = vld [vmem:[#allocation9 + $0x3b0] sm:$0xff] }
 0xe5d   :  { %3584 = vmatprep.subr.mxu0 %v10948_v24  ;;  %3655 = vmatprep.subr.mxu1 %v10949_v41  ;;  %v3850_v24 = vld [vmem:[#allocation9 + $0x388] sm:$0xff]  ;;  %v3852_v41 = vld [vmem:[#allocation9 + $0x398] sm:$0xff] }
 0xe5e   :  { %3585 = vmatpush1.msra.mxu0 %v10950_v9  ;;  %3656 = vmatpush1.msra.mxu1 %v10951_v10  ;;  %v3849_v9 = vld [vmem:[#allocation9 + $0x380] sm:$0xff]  ;;  %v3851_v10 = vld [vmem:[#allocation9 + $0x390] sm:$0xff] }
 0xe5f   :  { %3586 = vmatprep.subr.mxu0 %v10952_v5  ;;  %3657 = vmatprep.subr.mxu1 %v10953_v62  ;;  %v3846_v5 = vld [vmem:[#allocation9 + $0x368] sm:$0xff]  ;;  %v3848_v62 = vld [vmem:[#allocation9 + $0x378] sm:$0xff] }
 0xe60   :  { %3587 = vmatpush1.msra.mxu0 %v10954_v13  ;;  %3658 = vmatpush1.msra.mxu1 %v10955_v4  ;;  %v3845_v13 = vld [vmem:[#allocation9 + $0x360] sm:$0xff]  ;;  %v3847_v4 = vld [vmem:[#allocation9 + $0x370] sm:$0xff] }
 0xe61   :  { %3588 = vmatprep.subr.mxu0 %v10956_v53  ;;  %3659 = vmatprep.subr.mxu1 %v10957_v35  ;;  %v3842_v53 = vld [vmem:[#allocation9 + $0x348] sm:$0xff]  ;;  %v3844_v35 = vld [vmem:[#allocation9 + $0x358] sm:$0xff] }
 0xe62   :  { %3589 = vmatpush1.msra.mxu0 %v10958_v26  ;;  %3660 = vmatpush1.msra.mxu1 %v10959_v16  ;;  %v3841_v26 = vld [vmem:[#allocation9 + $0x340] sm:$0xff]  ;;  %v3843_v16 = vld [vmem:[#allocation9 + $0x350] sm:$0xff] }
 0xe63   :  { %3622 = vmatprep.mubr.f32.mxu0 %v10960_v42  ;;  %3693 = vmatprep.mubr.f32.mxu1 %v10960_v42 }
 0xe64   :  { %3886 = vmatprep.subr.mxu0 %v3862_v0  ;;  %3999 = vmatprep.subr.mxu1 %v3864_v7  ;;  %v3838_v0 = vld [vmem:[#allocation9 + $0x328] sm:$0xff]  ;;  %v3840_v7 = vld [vmem:[#allocation9 + $0x338] sm:$0xff] }
 0xf03   :  { %v3453_v33 = vpop.f32.mrf.mxu0  ;;  %v3524_v49 = vpop.f32.mrf.mxu1 }
 0xf04   :  { %v3454_v37 = vadd.f32 %v3453_v33, %v2202_v32  ;;  %v3525_v1 = vadd.f32 %v3524_v49, %v2315_v51  ;;  %v3839_v32 = vld [vmem:[#allocation9 + $0x330] sm:$0xff]  ;;  %v3834_v33 = vld [vmem:[#allocation9 + $0x308] sm:$0xff]  ;;  %v3825_v51 = vld [vmem:[#allocation9 + $0x2c0] sm:$0xff] }
 0xf05   :  { %v3455_v39 = vpop.f32.mrf.mxu0  ;;  %v3526_v3 = vpop.f32.mrf.mxu1  ;;  %v3826_v49 = vld [vmem:[#allocation9 + $0x2c8] sm:$0xff] }
 0xf06   :  { %v5950_v6 = vmul.f32 -1.442695, %v3454_v37  ;;  %v3456_v47 = vadd.f32 %v3455_v39, %v2204_v36  ;;  %v5952_v2 = vmul.f32 -1.442695, %v3525_v1  ;;  %v3527_v45 = vadd.f32 %v3526_v3, %v2317_v28  ;;  %v3833_v36 = vld [vmem:[#allocation9 + $0x300] sm:$0xff]  ;;  %v3835_v37 = vld [vmem:[#allocation9 + $0x310] sm:$0xff] }
 0xf07   :  { %v3830_v39 = vld [vmem:[#allocation9 + $0x2e8] sm:$0xff]  ;;  %v3827_v1 = vld [vmem:[#allocation9 + $0x2d0] sm:$0xff]  ;;  %v3821_v28 = vld [vmem:[#allocation9 + $0x2a0] sm:$0xff] }
 0xf08   :  { %6386 = vpow2.f32 %v5950_v6  ;;  %v5951_v48 = vmul.f32 -1.442695, %v3456_v47  ;;  %v3832_v6 = vld [vmem:[#allocation9 + $0x2f8] sm:$0xff]  ;;  %v3829_v47 = vld [vmem:[#allocation9 + $0x2e0] sm:$0xff]  ;;  %v3822_v3 = vld [vmem:[#allocation9 + $0x2a8] sm:$0xff] }
 0xf0a   :  { %6388 = vpow2.f32 %v5951_v48  ;;  %v3831_v48 = vld [vmem:[#allocation9 + $0x2f0] sm:$0xff] }
 0xf0b   :  { %6390 = vpow2.f32 %v5952_v2  ;;  %v3823_v2 = vld [vmem:[#allocation9 + $0x2b0] sm:$0xff] }
 0xf15   :  { %v6387_v29 = vpop.eup %6386 }
 0xf16   :  { %v3538_v15 = vadd.f32 1.0, %v6387_v29  ;;  %v3818_v29 = vld [vmem:[#allocation9 + $0x288] sm:$0xff] }
 0xf17   :  { %v6389_v43 = vpop.eup %6388 }
 0xf18   :  { %6392 = vrcp.f32 %v3538_v15  ;;  %v3539_v44 = vadd.f32 1.0, %v6389_v43  ;;  %v6391_v11 = vpop.eup %6390  ;;  %v3817_v15 = vld [vmem:[#allocation9 + $0x280] sm:$0xff]  ;;  %v3819_v43 = vld [vmem:[#allocation9 + $0x290] sm:$0xff] }
 0xf19   :  { %6394 = vtanh.f32 %v3527_v45  ;;  %v3540_v60 = vadd.f32 1.0, %v6391_v11  ;;  %v3820_v45 = vld [vmem:[#allocation9 + $0x298] sm:$0xff] }
 0xf1a   :  { %6396 = vrcp.f32 %v3539_v44  ;;  %v3814_v44 = vld [vmem:[#allocation9 + $0x268] sm:$0xff]  ;;  %v3816_v11 = vld [vmem:[#allocation9 + $0x278] sm:$0xff] }
 0xf1b   :  { %6398 = vrcp.f32 %v3540_v60  ;;  %v3812_v60 = vld [vmem:[#allocation9 + $0x258] sm:$0xff] }
 0xf25   :  { %v6393_v17 = vpop.eup %6392 }
 0xf26   :  { %v6395_v54 = vpop.eup %6394 }
 0xf27   :  { %v6397_v20 = vpop.eup %6396  ;;  %v3549_v14 = vmul.f32 %v6395_v54, %v6393_v17  ;;  %v3813_v17 = vld [vmem:[#allocation9 + $0x260] sm:$0xff]  ;;  %v3815_v54 = vld [vmem:[#allocation9 + $0x270] sm:$0xff] }
 0xf28   :  { %v3548_v59 = vmul.f32 %v6397_v20, %v9032_v46  ;;  %v6399_v18 = vpop.eup %6398  ;;  %v3859_v46 = vld [vmem:[#allocation9 + $0x3d0] sm:$0xff]  ;;  %v3810_v20 = vld [vmem:[#allocation9 + $0x248] sm:$0xff] }
 0xf2a   :  { %v9112_v12 = vadd.f32 %v3549_v14, %v3548_v59  ;;  %v3809_v59 = vld [vmem:[#allocation9 + $0x240] sm:$0xff]  ;;  %v3811_v14 = vld [vmem:[#allocation9 + $0x250] sm:$0xff] }
 0xf2c   :  { %6400 = vtanh.f32 %v9112_v12 }
 0xf39   :  { %v6401_v23 = vpop.eup %6400 }
 0xf3a   :  { %v9115_v63 = vmul.f32 %v6401_v23, %v6399_v18  ;;  %v3806_v18 = vld [vmem:[#allocation9 + $0x228] sm:$0xff]  ;;  %v3808_v23 = vld [vmem:[#allocation9 + $0x238] sm:$0xff] }
 0xf3c   :  { %3623 = vmatmul.mubr.f32.vlgmr.msra.gmra.mxu0 %v9115_v63  ;;  %3694 = vmatmul.mubr.f32.vlgmr.msra.gmra.mxu1 %v9115_v63 }
 0xf3d   :  { %3887 = vmatpush1.msra.mxu0 %v3861_v61  ;;  %4000 = vmatpush1.msra.mxu1 %v3863_v21  ;;  %v3805_v61 = vld [vmem:[#allocation9 + $0x220] sm:$0xff]  ;;  %v3807_v21 = vld [vmem:[#allocation9 + $0x230] sm:$0xff] }
 0xf3e   :  { %3888 = vmatprep.subr.mxu0 %v3858_v27  ;;  %4001 = vmatprep.subr.mxu1 %v3860_v56  ;;  %v3802_v27 = vld [vmem:[#allocation9 + $0x208] sm:$0xff]  ;;  %v3804_v56 = vld [vmem:[#allocation9 + $0x218] sm:$0xff] }
 0xf3f   :  { %3889 = vmatpush1.msra.mxu0 %v3857_v57  ;;  %4002 = vmatpush1.msra.mxu1 %v3859_v46  ;;  %v3801_v57 = vld [vmem:[#allocation9 + $0x200] sm:$0xff]  ;;  %v3803_v46 = vld [vmem:[#allocation9 + $0x210] sm:$0xff] }
 0xf40   :  { %3890 = vmatprep.subr.mxu0 %v3854_v22  ;;  %4003 = vmatprep.subr.mxu1 %v3856_v25  ;;  %v10966_v22 = vld [vmem:[#allocation85_spill] sm:$0xff]  ;;  %v10967_v25 = vld [vmem:[#allocation34_spill] sm:$0xff] }
 0xf41   :  { %3891 = vmatpush1.msra.mxu0 %v3853_v52  ;;  %4004 = vmatpush1.msra.mxu1 %v3855_v8  ;;  %v10968_v52 = vld [vmem:[#allocation35_spill] sm:$0xff]  ;;  %v10969_v8 = vld [vmem:[#allocation61_spill] sm:$0xff] }
 0xf42   :  { %3892 = vmatprep.subr.mxu0 %v3850_v24  ;;  %4005 = vmatprep.subr.mxu1 %v3852_v41  ;;  %v10970_v24 = vld [vmem:[#allocation73_spill] sm:$0xff]  ;;  %v9149_v41 = vld [vmem:[#allocation10 + $0x5e8] sm:$0xff] }
 0xf43   :  { %3893 = vmatpush1.msra.mxu0 %v3849_v9  ;;  %4006 = vmatpush1.msra.mxu1 %v3851_v10  ;;  %10971 = vst [vmem:[#allocation72_spill] sm:$0xff] %v9149_v41  ;;  %v9151_v9 = vld [vmem:[#allocation10 + $0x5f8] sm:$0xff]  ;;  %v9157_v10 = vld [vmem:[#allocation10 + $0x5f0] sm:$0xff] }
 0xf44   :  { %3894 = vmatprep.subr.mxu0 %v3846_v5  ;;  %4007 = vmatprep.subr.mxu1 %v3848_v62  ;;  %10972 = vst [vmem:[#allocation74_spill] sm:$0xff] %v9151_v9  ;;  %v9163_v5 = vld [vmem:[#allocation10 + $0x5d8] sm:$0xff]  ;;  %v9167_v62 = vld [vmem:[#allocation10 + $0x5c0] sm:$0xff] }
 0xf45   :  { %3895 = vmatpush1.msra.mxu0 %v3845_v13  ;;  %4008 = vmatpush1.msra.mxu1 %v3847_v4  ;;  %v9169_v13 = vld [vmem:[#allocation10 + $0x5d0] sm:$0xff]  ;;  %v9173_v4 = vld [vmem:[#allocation10 + $0x5a8] sm:$0xff] }
 0xf46   :  { %3896 = vmatprep.subr.mxu0 %v3842_v53  ;;  %4009 = vmatprep.subr.mxu1 %v3844_v35  ;;  %v9175_v53 = vld [vmem:[#allocation10 + $0x5b8] sm:$0xff]  ;;  %v9179_v35 = vld [vmem:[#allocation10 + $0x5a0] sm:$0xff] }
 0xf47   :  { %3897 = vmatpush1.msra.mxu0 %v3841_v26  ;;  %4010 = vmatpush1.msra.mxu1 %v3843_v16  ;;  %v9181_v26 = vld [vmem:[#allocation10 + $0x5b0] sm:$0xff]  ;;  %v9185_v16 = vld [vmem:[#allocation10 + $0x588] sm:$0xff] }
 0xf48   :  { %3898 = vmatprep.subr.mxu0 %v3838_v0  ;;  %4011 = vmatprep.subr.mxu1 %v3840_v7  ;;  %v9187_v0 = vld [vmem:[#allocation10 + $0x598] sm:$0xff]  ;;  %v9191_v7 = vld [vmem:[#allocation10 + $0x580] sm:$0xff] }
 0xf49   :  { %3899 = vmatpush1.msra.mxu0 %v3837_v31  ;;  %4012 = vmatpush1.msra.mxu1 %v3839_v32  ;;  %v9193_v31 = vld [vmem:[#allocation10 + $0x590] sm:$0xff]  ;;  %v9197_v32 = vld [vmem:[#allocation10 + $0x568] sm:$0xff] }
 0xf4a   :  { %3900 = vmatprep.subr.mxu0 %v3834_v33  ;;  %4013 = vmatprep.subr.mxu1 %v3836_v34  ;;  %v9199_v33 = vld [vmem:[#allocation10 + $0x578] sm:$0xff]  ;;  %v9203_v34 = vld [vmem:[#allocation10 + $0x560] sm:$0xff] }
 0xf4b   :  { %3901 = vmatpush1.msra.mxu0 %v3833_v36  ;;  %4014 = vmatpush1.msra.mxu1 %v3835_v37  ;;  %v9205_v36 = vld [vmem:[#allocation10 + $0x570] sm:$0xff]  ;;  %v9209_v37 = vld [vmem:[#allocation10 + $0x548] sm:$0xff] }
 0xf4c   :  { %3902 = vmatprep.subr.mxu0 %v3830_v39  ;;  %4015 = vmatprep.subr.mxu1 %v3832_v6  ;;  %v9211_v39 = vld [vmem:[#allocation10 + $0x558] sm:$0xff]  ;;  %v9215_v6 = vld [vmem:[#allocation10 + $0x540] sm:$0xff] }
 0xf4d   :  { %3903 = vmatpush1.msra.mxu0 %v3829_v47  ;;  %4016 = vmatpush1.msra.mxu1 %v3831_v48  ;;  %v9217_v47 = vld [vmem:[#allocation10 + $0x550] sm:$0xff]  ;;  %v9221_v48 = vld [vmem:[#allocation10 + $0x528] sm:$0xff] }
 0xf4e   :  { %3904 = vmatprep.subr.mxu0 %v3826_v49  ;;  %4017 = vmatprep.subr.mxu1 %v3828_v50  ;;  %v9223_v49 = vld [vmem:[#allocation10 + $0x538] sm:$0xff]  ;;  %v9227_v50 = vld [vmem:[#allocation10 + $0x520] sm:$0xff] }
 0xf4f   :  { %3905 = vmatpush1.msra.mxu0 %v3825_v51  ;;  %4018 = vmatpush1.msra.mxu1 %v3827_v1  ;;  %v9229_v51 = vld [vmem:[#allocation10 + $0x530] sm:$0xff]  ;;  %v9233_v1 = vld [vmem:[#allocation10 + $0x508] sm:$0xff] }
 0xf50   :  { %3906 = vmatprep.subr.mxu0 %v3822_v3  ;;  %4019 = vmatprep.subr.mxu1 %v3824_v40  ;;  %v9235_v3 = vld [vmem:[#allocation10 + $0x518] sm:$0xff]  ;;  %v9239_v40 = vld [vmem:[#allocation10 + $0x500] sm:$0xff] }
 0xf51   :  { %3907 = vmatpush1.msra.mxu0 %v3821_v28  ;;  %4020 = vmatpush1.msra.mxu1 %v3823_v2  ;;  %v9241_v28 = vld [vmem:[#allocation10 + $0x510] sm:$0xff]  ;;  %v9245_v2 = vld [vmem:[#allocation10 + $0x4e8] sm:$0xff] }
 0xf52   :  { %3908 = vmatprep.subr.mxu0 %v3818_v29  ;;  %4021 = vmatprep.subr.mxu1 %v3820_v45  ;;  %v9247_v29 = vld [vmem:[#allocation10 + $0x4f8] sm:$0xff]  ;;  %v9251_v45 = vld [vmem:[#allocation10 + $0x4e0] sm:$0xff] }
 0xf53   :  { %3909 = vmatpush1.msra.mxu0 %v3817_v15  ;;  %4022 = vmatpush1.msra.mxu1 %v3819_v43  ;;  %v9253_v15 = vld [vmem:[#allocation10 + $0x4f0] sm:$0xff]  ;;  %v9257_v43 = vld [vmem:[#allocation10 + $0x4c8] sm:$0xff] }
 0xf54   :  { %3910 = vmatprep.subr.mxu0 %v3814_v44  ;;  %4023 = vmatprep.subr.mxu1 %v3816_v11  ;;  %v9259_v44 = vld [vmem:[#allocation10 + $0x4d8] sm:$0xff]  ;;  %v9263_v11 = vld [vmem:[#allocation10 + $0x4c0] sm:$0xff] }
 0xf55   :  { %3911 = vmatpush1.msra.mxu0 %v3813_v17  ;;  %4024 = vmatpush1.msra.mxu1 %v3815_v54  ;;  %v9265_v17 = vld [vmem:[#allocation10 + $0x4d0] sm:$0xff]  ;;  %v9269_v54 = vld [vmem:[#allocation10 + $0x4a8] sm:$0xff] }
 0xf56   :  { %3912 = vmatprep.subr.mxu0 %v3810_v20  ;;  %4025 = vmatprep.subr.mxu1 %v3812_v60  ;;  %v9271_v20 = vld [vmem:[#allocation10 + $0x4b8] sm:$0xff]  ;;  %v9275_v60 = vld [vmem:[#allocation10 + $0x4a0] sm:$0xff] }
 0xf57   :  { %3913 = vmatpush1.msra.mxu0 %v3809_v59  ;;  %4026 = vmatpush1.msra.mxu1 %v3811_v14  ;;  %10973 = vst [vmem:[#allocation56_spill] sm:$0xff] %v9275_v60  ;;  %v9277_v59 = vld [vmem:[#allocation10 + $0x4b0] sm:$0xff]  ;;  %v9281_v14 = vld [vmem:[#allocation10 + $0x488] sm:$0xff] }
 0xf58   :  { %3914 = vmatprep.subr.mxu0 %v3806_v18  ;;  %4027 = vmatprep.subr.mxu1 %v3808_v23  ;;  %10974 = vst [vmem:[#allocation58_spill] sm:$0xff] %v9277_v59  ;;  %10975 = vst [vmem:[#allocation41_spill] sm:$0xff] %v9281_v14  ;;  %v9283_v18 = vld [vmem:[#allocation10 + $0x498] sm:$0xff]  ;;  %v9287_v23 = vld [vmem:[#allocation10 + $0x480] sm:$0xff] }
 0xf59   :  { %3915 = vmatpush1.msra.mxu0 %v3805_v61  ;;  %4028 = vmatpush1.msra.mxu1 %v3807_v21  ;;  %10976 = vst [vmem:[#allocation43_spill] sm:$0xff] %v9283_v18  ;;  %10977 = vst [vmem:[#allocation44_spill] sm:$0xff] %v9287_v23  ;;  %v9289_v61 = vld [vmem:[#allocation10 + $0x490] sm:$0xff]  ;;  %v9293_v21 = vld [vmem:[#allocation10 + $0x468] sm:$0xff] }
 0xf5a   :  { %3916 = vmatprep.subr.mxu0 %v3802_v27  ;;  %4029 = vmatprep.subr.mxu1 %v3804_v56  ;;  %10978 = vst [vmem:[#allocation46_spill] sm:$0xff] %v9289_v61  ;;  %10979 = vst [vmem:[#allocation45_spill] sm:$0xff] %v9293_v21  ;;  %v9295_v27 = vld [vmem:[#allocation10 + $0x478] sm:$0xff]  ;;  %v9299_v56 = vld [vmem:[#allocation10 + $0x460] sm:$0xff] }
 0xf5b   :  { %3917 = vmatpush1.msra.mxu0 %v3801_v57  ;;  %3950 = vmatprep.mubr.f32.mxu0 %v10960_v42  ;;  %10980 = vst [vmem:[#allocation47_spill] sm:$0xff] %v9295_v27  ;;  %10981 = vst [vmem:[#allocation48_spill] sm:$0xff] %v9299_v56  ;;  %v9301_v57 = vld [vmem:[#allocation10 + $0x470] sm:$0xff] }
 0xf5c   :  { %4030 = vmatpush1.msra.mxu1 %v3803_v46  ;;  %4063 = vmatprep.mubr.f32.mxu1 %v10960_v42  ;;  %10982 = vst [vmem:[#allocation77_spill] sm:$0xff] %v9301_v57  ;;  %v9305_v46 = vld [vmem:[#allocation10 + $0x448] sm:$0xff] }
 0xf5d   :  { %3951 = vmatmul.mubr.f32.vlgmr.msra.gmra.mxu0 %v10966_v22  ;;  %4064 = vmatmul.mubr.f32.vlgmr.msra.gmra.mxu1 %v10966_v22  ;;  %10983 = vst [vmem:[#allocation36_spill] sm:$0xff] %v9305_v46  ;;  %v9307_v22 = vld [vmem:[#allocation10 + $0x458] sm:$0xff] }
 0xf5e   :  { %3956 = vmatprep.mubr.f32.mxu0 %v10960_v42  ;;  %4069 = vmatprep.mubr.f32.mxu1 %v10960_v42  ;;  %10984 = vst [vmem:[#allocation38_spill] sm:$0xff] %v9307_v22 }
 0xf5f   :  { %4148 = vmatprep.subr.mxu0 %v9149_v41  ;;  %4219 = vmatprep.subr.mxu1 %v9151_v9 }
 0xf60   :  { %4220 = vmatpush1.msra.mxu1 %v9157_v10 }
 0xf61   :  { %3957 = vmatmul.mubr.f32.gmra.mxu0 %v10967_v25  ;;  %4070 = vmatmul.mubr.f32.gmra.mxu1 %v10967_v25  ;;  %v9311_v25 = vld [vmem:[#allocation10 + $0x440] sm:$0xff] }
 0xf62   :  { %3962 = vmatprep.mubr.f32.mxu0 %v10960_v42  ;;  %4075 = vmatprep.mubr.f32.mxu1 %v10960_v42  ;;  %10985 = vst [vmem:[#allocation75_spill] sm:$0xff] %v9311_v25 }
 0xf63   :  { %4221 = vmatprep.subr.mxu1 %v9163_v5 }
 0xf64   :  { %4222 = vmatpush1.msra.mxu1 %v9169_v13 }
 0xf65   :  { %3963 = vmatmul.mubr.f32.gmra.mxu0 %v10968_v52  ;;  %4076 = vmatmul.mubr.f32.gmra.mxu1 %v10968_v52  ;;  %v9313_v52 = vld [vmem:[#allocation10 + $0x450] sm:$0xff] }
 0xf66   :  { %3968 = vmatprep.mubr.f32.mxu0 %v10960_v42  ;;  %4081 = vmatprep.mubr.f32.mxu1 %v10960_v42  ;;  %10986 = vst [vmem:[#allocation76_spill] sm:$0xff] %v9313_v52 }
 0xf67   :  { %4223 = vmatprep.subr.mxu1 %v9175_v53 }
 0xf68   :  { %4224 = vmatpush1.msra.mxu1 %v9181_v26 }
 0xf69   :  { %3969 = vmatmul.mubr.f32.gmra.mxu0 %v10969_v8  ;;  %4082 = vmatmul.mubr.f32.gmra.mxu1 %v10969_v8  ;;  %v9317_v8 = vld [vmem:[#allocation10 + $0x428] sm:$0xff] }
 0xf6a   :  { %3974 = vmatprep.mubr.f32.mxu0 %v10960_v42  ;;  %4087 = vmatprep.mubr.f32.mxu1 %v10960_v42  ;;  %10987 = vst [vmem:[#allocation78_spill] sm:$0xff] %v9317_v8 }
 0xf6b   :  { %4225 = vmatprep.subr.mxu1 %v9187_v0 }
 0xf6c   :  { %4226 = vmatpush1.msra.mxu1 %v9193_v31 }
 0xf6d   :  { %3975 = vmatmul.mubr.f32.gmra.mxu0 %v10970_v24  ;;  %4088 = vmatmul.mubr.f32.gmra.mxu1 %v10970_v24  ;;  %v9319_v24 = vld [vmem:[#allocation10 + $0x438] sm:$0xff] }
 0xf6e   :  { %3980 = vmatprep.mubr.f32.mxu0 %v10960_v42  ;;  %4093 = vmatprep.mubr.f32.mxu1 %v10960_v42  ;;  %10988 = vst [vmem:[#allocation31_spill] sm:$0xff] %v9319_v24 }
 0xf6f   :  { %4227 = vmatprep.subr.mxu1 %v9199_v33 }
 0xf70   :  { %4228 = vmatpush1.msra.mxu1 %v9205_v36 }
 0xf71   :  { %3981 = vmatmul.mubr.f32.gmra.mxu0 %v9035_v19  ;;  %4094 = vmatmul.mubr.f32.gmra.mxu1 %v9035_v19  ;;  %v9155_v19 = vld [vmem:[#allocation10 + $0x5e0] sm:$0xff] }
 0xf72   :  { %3986 = vmatprep.mubr.f32.mxu0 %v10960_v42  ;;  %4099 = vmatprep.mubr.f32.mxu1 %v10960_v42 }
 0xf73   :  { %4149 = vmatpush1.msra.mxu0 %v9155_v19  ;;  %4229 = vmatprep.subr.mxu1 %v9211_v39 }
 0xf74   :  { %4230 = vmatpush1.msra.mxu1 %v9217_v47 }
 0xf75   :  { %3987 = vmatmul.mubr.f32.gmra.mxu0 %v9115_v63  ;;  %4100 = vmatmul.mubr.f32.gmra.mxu1 %v9115_v63  ;;  %v9161_v63 = vld [vmem:[#allocation10 + $0x5c8] sm:$0xff] }
 0xf76   :  { %3992 = vmatprep.mubr.f32.mxu0 %v10960_v42  ;;  %4105 = vmatprep.mubr.f32.mxu1 %v10960_v42 }
 0xf77   :  { %4150 = vmatprep.subr.mxu0 %v9161_v63  ;;  %4231 = vmatprep.subr.mxu1 %v9223_v49 }
 0xf78   :  { %4151 = vmatpush1.msra.mxu0 %v9167_v62  ;;  %4232 = vmatpush1.msra.mxu1 %v9229_v51 }
 0xf79   :  { %4152 = vmatprep.subr.mxu0 %v9173_v4  ;;  %4233 = vmatprep.subr.mxu1 %v9235_v3 }
 0xf7a   :  { %4153 = vmatpush1.msra.mxu0 %v9179_v35  ;;  %4234 = vmatpush1.msra.mxu1 %v9241_v28 }
 0xf7b   :  { %4154 = vmatprep.subr.mxu0 %v9185_v16  ;;  %4235 = vmatprep.subr.mxu1 %v9247_v29 }
 0xf7c   :  { %4155 = vmatpush1.msra.mxu0 %v9191_v7  ;;  %4236 = vmatpush1.msra.mxu1 %v9253_v15 }
 0xf7d   :  { %4156 = vmatprep.subr.mxu0 %v9197_v32  ;;  %4237 = vmatprep.subr.mxu1 %v9259_v44 }
 0xf7e   :  { %4157 = vmatpush1.msra.mxu0 %v9203_v34  ;;  %4238 = vmatpush1.msra.mxu1 %v9265_v17 }
 0xf7f   :  { %4158 = vmatprep.subr.mxu0 %v9209_v37  ;;  %4239 = vmatprep.subr.mxu1 %v9271_v20 }
 0xf80   :  { %4159 = vmatpush1.msra.mxu0 %v9215_v6  ;;  %4240 = vmatpush1.msra.mxu1 %v9277_v59 }
 0xf81   :  { %4160 = vmatprep.subr.mxu0 %v9221_v48  ;;  %4241 = vmatprep.subr.mxu1 %v9283_v18 }
 0xf82   :  { %4161 = vmatpush1.msra.mxu0 %v9227_v50  ;;  %4242 = vmatpush1.msra.mxu1 %v9289_v61 }
 0xf83   :  { %4162 = vmatprep.subr.mxu0 %v9233_v1  ;;  %4243 = vmatprep.subr.mxu1 %v9295_v27 }
 0xf84   :  { %4163 = vmatpush1.msra.mxu0 %v9239_v40  ;;  %4244 = vmatpush1.msra.mxu1 %v9301_v57  ;;  %v9323_v57 = vld [vmem:[#allocation10 + $0x420] sm:$0xff] }
 0xf85   :  { %4164 = vmatprep.subr.mxu0 %v9245_v2  ;;  %4245 = vmatprep.subr.mxu1 %v9307_v22  ;;  %10989 = vst [vmem:[#allocation60_spill] sm:$0xff] %v9323_v57  ;;  %v9327_v22 = vld [vmem:[#allocation10 + $0x408] sm:$0xff] }
 0xf86   :  { %4165 = vmatpush1.msra.mxu0 %v9251_v45  ;;  %4246 = vmatpush1.msra.mxu1 %v9313_v52  ;;  %10991 = vst [vmem:[#allocation63_spill] sm:$0xff] %v9327_v22  ;;  %v9333_v52 = vld [vmem:[#allocation10 + $0x400] sm:$0xff] }
 0xf87   :  { %4166 = vmatprep.subr.mxu0 %v9257_v43  ;;  %4247 = vmatprep.subr.mxu1 %v9319_v24  ;;  %10993 = vst [vmem:[#allocation64_spill] sm:$0xff] %v9333_v52 }
 0xf88   :  { %4167 = vmatpush1.msra.mxu0 %v9263_v11 }
 0xf89   :  { %4168 = vmatprep.subr.mxu0 %v9269_v54 }
 0xf8a   :  { %4169 = vmatpush1.msra.mxu0 %v9275_v60 }
 0xf8b   :  { %4170 = vmatprep.subr.mxu0 %v9281_v14  ;;  %v10998_v14 = vld [vmem:[#allocation84_spill] sm:$0xff] }
 0xf8c   :  { %4171 = vmatpush1.msra.mxu0 %v9287_v23 }
 0xf8d   :  { %4172 = vmatprep.subr.mxu0 %v9293_v21 }
 0xf8e   :  { %4173 = vmatpush1.msra.mxu0 %v9299_v56  ;;  %v9335_v56 = vld [vmem:[#allocation10 + $0x410] sm:$0xff] }
 0xf8f   :  { %4174 = vmatprep.subr.mxu0 %v9305_v46  ;;  %v9325_v46 = vld [vmem:[#allocation10 + $0x430] sm:$0xff]  ;;  %10994 = vst [vmem:[#allocation66_spill] sm:$0xff] %v9335_v56 }
 0xf90   :  { %4175 = vmatpush1.msra.mxu0 %v9311_v25  ;;  %10990 = vst [vmem:[#allocation62_spill] sm:$0xff] %v9325_v46  ;;  %4248 = vmatpush1.msra.mxu1 %v9325_v46  ;;  %v9331_v25 = vld [vmem:[#allocation10 + $0x418] sm:$0xff]  ;;  %v10995_v46 = vld [vmem:[#allocation79_spill] sm:$0xff] }
 0xf91   :  { %4176 = vmatprep.subr.mxu0 %v9317_v8  ;;  %10992 = vst [vmem:[#allocation65_spill] sm:$0xff] %v9331_v25  ;;  %4249 = vmatprep.subr.mxu1 %v9331_v25  ;;  %v10996_v8 = vld [vmem:[#allocation81_spill] sm:$0xff] }
 0xf92   :  { %4177 = vmatpush1.msra.mxu0 %v9323_v57  ;;  %4250 = vmatpush1.msra.mxu1 %v9335_v56  ;;  %v2208_v57 = vadd.f32 %v10995_v46, %v10961_v30  ;;  %v2210_v27 = vadd.f32 %v10996_v8, %v8474_v38  ;;  %v10997_v56 = vld [vmem:[#allocation82_spill] sm:$0xff]  ;;  %v2323_v30 = vadd.f32 %v10998_v14, %v8491_v58  ;;  %v11001_v14 = vld [vmem:[#allocation41_spill] sm:$0xff] }
 0xf93   :  { %4178 = vmatprep.subr.mxu0 %v9327_v22  ;;  %4390 = vmatprep.subr.mxu1 %v9151_v9  ;;  %v11004_v8 = vld [vmem:[#allocation46_spill] sm:$0xff] }
 0xf94   :  { %4179 = vmatpush1.msra.mxu0 %v9333_v52 }
 0xf95   :  { %4319 = vmatprep.subr.mxu0 %v9149_v41  ;;  %v2321_v41 = vadd.f32 %v10997_v56, %v8487_v55 }
 0xffc   :  { %v3624_v24 = vpop.f32.mrf.mxu0  ;;  %v3695_v52 = vpop.f32.mrf.mxu1 }
 0xffd   :  { %v3625_v21 = vadd.f32 %v3624_v24, %v2208_v57  ;;  %v3696_v18 = vadd.f32 %v3695_v52, %v2321_v41  ;;  %v11003_v52 = vld [vmem:[#allocation44_spill] sm:$0xff]  ;;  %v11005_v24 = vld [vmem:[#allocation45_spill] sm:$0xff] }
 0xffe   :  { %v3626_v61 = vpop.f32.mrf.mxu0  ;;  %v3697_v9 = vpop.f32.mrf.mxu1 }
 0xfff   :  { %v5953_v22 = vmul.f32 -1.442695, %v3625_v21  ;;  %v3627_v23 = vadd.f32 %v3626_v61, %v2210_v27  ;;  %v5955_v46 = vmul.f32 -1.442695, %v3696_v18  ;;  %v3698_v59 = vadd.f32 %v3697_v9, %v2323_v30  ;;  %v11002_v18 = vld [vmem:[#allocation43_spill] sm:$0xff] }
0x1000   :  { %v11006_v30 = vld [vmem:[#allocation47_spill] sm:$0xff] }
0x1001   :  { %6402 = vpow2.f32 %v5953_v22  ;;  %v5954_v25 = vmul.f32 -1.442695, %v3627_v23 }
0x1003   :  { %6404 = vpow2.f32 %v5954_v25 }
0x1004   :  { %6406 = vpow2.f32 %v5955_v46  ;;  %v11007_v46 = vld [vmem:[#allocation48_spill] sm:$0xff] }
0x1005   :  { %6408 = vtanh.f32 %v3698_v59  ;;  %v11000_v59 = vld [vmem:[#allocation58_spill] sm:$0xff] }
0x100e   :  { %v6403_v60 = vpop.eup %6402 }
0x100f   :  { %v3709_v38 = vadd.f32 1.0, %v6403_v60 }
0x1010   :  { %v6405_v57 = vpop.eup %6404 }
0x1011   :  { %6410 = vrcp.f32 %v3709_v38  ;;  %v3710_v61 = vadd.f32 1.0, %v6405_v57  ;;  %v6407_v23 = vpop.eup %6406  ;;  %v11008_v38 = vld [vmem:[#allocation77_spill] sm:$0xff]  ;;  %v11009_v57 = vld [vmem:[#allocation36_spill] sm:$0xff] }
0x1012   :  { %v6409_v21 = vpop.eup %6408  ;;  %v3711_v41 = vadd.f32 1.0, %v6407_v23  ;;  %v11011_v23 = vld [vmem:[#allocation75_spill] sm:$0xff] }
0x1013   :  { %6412 = vrcp.f32 %v3710_v61  ;;  %v11010_v61 = vld [vmem:[#allocation38_spill] sm:$0xff] }
0x1014   :  { %6414 = vrcp.f32 %v3711_v41  ;;  %v11016_v41 = vld [vmem:[#allocation62_spill] sm:$0xff] }
0x101e   :  { %v6411_v27 = vpop.eup %6410 }
0x101f   :  { %v3720_v22 = vmul.f32 %v6411_v27, %v6409_v21  ;;  %v11012_v21 = vld [vmem:[#allocation76_spill] sm:$0xff]  ;;  %v11013_v27 = vld [vmem:[#allocation78_spill] sm:$0xff] }
0x1020   :  { %v6413_v55 = vpop.eup %6412 }
0x1021   :  { %v3719_v56 = vmul.f32 %v6413_v55, %v9112_v12  ;;  %v6415_v58 = vpop.eup %6414  ;;  %v10999_v12 = vld [vmem:[#allocation56_spill] sm:$0xff] }
0x1022   :  { %v11015_v55 = vld [vmem:[#allocation60_spill] sm:$0xff] }
0x1023   :  { %v3721_v25 = vadd.f32 %v3720_v22, %v3719_v56  ;;  %v11014_v22 = vld [vmem:[#allocation31_spill] sm:$0xff] }
0x1024   :  { %v11017_v56 = vld [vmem:[#allocation63_spill] sm:$0xff] }
0x1025   :  { %6416 = vtanh.f32 %v3721_v25  ;;  %v11018_v25 = vld [vmem:[#allocation65_spill] sm:$0xff] }
0x1032   :  { %v6417_v9 = vpop.eup %6416 }
0x1033   :  { %v3723_v60 = vmul.f32 %v6417_v9, %v6415_v58  ;;  %v11019_v58 = vld [vmem:[#allocation64_spill] sm:$0xff]  ;;  %v11020_v9 = vld [vmem:[#allocation66_spill] sm:$0xff] }
0x1035   :  { %3993 = vmatmul.mubr.f32.gmra.mxu0 %v3723_v60  ;;  %4106 = vmatmul.mubr.f32.gmra.mxu1 %v3723_v60  ;;  %v11021_v60 = vld [vmem:[#allocation72_spill] sm:$0xff] }
0x1036   :  { %4212 = vmatprep.mubr.f32.mxu0 %v10960_v42  ;;  %4283 = vmatprep.mubr.f32.mxu1 %v10960_v42 }
0x1039   :  { %4213 = vmatmul.mubr.f32.vlgmr.msra.gmra.mxu0 %v10960_v42  ;;  %4284 = vmatmul.mubr.f32.vlgmr.msra.gmra.mxu1 %v10960_v42 }
0x103a   :  { %4320 = vmatpush1.msra.mxu0 %v9155_v19  ;;  %4391 = vmatpush1.msra.mxu1 %v9157_v10 }
0x103b   :  { %4321 = vmatprep.subr.mxu0 %v9161_v63  ;;  %4392 = vmatprep.subr.mxu1 %v9163_v5 }
0x103c   :  { %4322 = vmatpush1.msra.mxu0 %v9167_v62  ;;  %4393 = vmatpush1.msra.mxu1 %v9169_v13 }
0x103d   :  { %4323 = vmatprep.subr.mxu0 %v9173_v4  ;;  %4394 = vmatprep.subr.mxu1 %v9175_v53 }
0x103e   :  { %4324 = vmatpush1.msra.mxu0 %v9179_v35  ;;  %4395 = vmatpush1.msra.mxu1 %v9181_v26 }
0x103f   :  { %4325 = vmatprep.subr.mxu0 %v9185_v16  ;;  %4396 = vmatprep.subr.mxu1 %v9187_v0 }
0x1040   :  { %4326 = vmatpush1.msra.mxu0 %v9191_v7  ;;  %4397 = vmatpush1.msra.mxu1 %v9193_v31 }
0x1041   :  { %4327 = vmatprep.subr.mxu0 %v9197_v32  ;;  %4398 = vmatprep.subr.mxu1 %v9199_v33 }
0x1042   :  { %4328 = vmatpush1.msra.mxu0 %v9203_v34  ;;  %4399 = vmatpush1.msra.mxu1 %v9205_v36 }
0x1043   :  { %4329 = vmatprep.subr.mxu0 %v9209_v37  ;;  %4400 = vmatprep.subr.mxu1 %v9211_v39 }
0x1044   :  { %4330 = vmatpush1.msra.mxu0 %v9215_v6  ;;  %4401 = vmatpush1.msra.mxu1 %v9217_v47 }
0x1045   :  { %4331 = vmatprep.subr.mxu0 %v9221_v48  ;;  %4402 = vmatprep.subr.mxu1 %v9223_v49 }
0x1046   :  { %4332 = vmatpush1.msra.mxu0 %v9227_v50  ;;  %4403 = vmatpush1.msra.mxu1 %v9229_v51 }
0x1047   :  { %4333 = vmatprep.subr.mxu0 %v9233_v1  ;;  %4404 = vmatprep.subr.mxu1 %v9235_v3 }
0x1048   :  { %4334 = vmatpush1.msra.mxu0 %v9239_v40  ;;  %4405 = vmatpush1.msra.mxu1 %v9241_v28 }
0x1049   :  { %4335 = vmatprep.subr.mxu0 %v9245_v2  ;;  %4406 = vmatprep.subr.mxu1 %v9247_v29 }
0x104a   :  { %4336 = vmatpush1.msra.mxu0 %v9251_v45  ;;  %4407 = vmatpush1.msra.mxu1 %v9253_v15 }
0x104b   :  { %4337 = vmatprep.subr.mxu0 %v9257_v43  ;;  %4408 = vmatprep.subr.mxu1 %v9259_v44 }
0x104c   :  { %4338 = vmatpush1.msra.mxu0 %v9263_v11  ;;  %4409 = vmatpush1.msra.mxu1 %v9265_v17 }
0x104d   :  { %4339 = vmatprep.subr.mxu0 %v9269_v54  ;;  %4410 = vmatprep.subr.mxu1 %v9271_v20 }
0x104e   :  { %4340 = vmatpush1.msra.mxu0 %v10999_v12  ;;  %4411 = vmatpush1.msra.mxu1 %v11000_v59 }
0x104f   :  { %4341 = vmatprep.subr.mxu0 %v11001_v14  ;;  %4412 = vmatprep.subr.mxu1 %v11002_v18 }
0x1050   :  { %4342 = vmatpush1.msra.mxu0 %v11003_v52  ;;  %4413 = vmatpush1.msra.mxu1 %v11004_v8 }
0x1051   :  { %4343 = vmatprep.subr.mxu0 %v11005_v24  ;;  %4414 = vmatprep.subr.mxu1 %v11006_v30 }
0x1052   :  { %4344 = vmatpush1.msra.mxu0 %v11007_v46  ;;  %4415 = vmatpush1.msra.mxu1 %v11008_v38 }
0x1053   :  { %4345 = vmatprep.subr.mxu0 %v11009_v57  ;;  %4416 = vmatprep.subr.mxu1 %v11010_v61 }
0x1054   :  { %4346 = vmatpush1.msra.mxu0 %v11011_v23  ;;  %4417 = vmatpush1.msra.mxu1 %v11012_v21  ;;  %v4065_v21 = vpop.f32.mrf.mxu1 }
0x1055   :  { %4347 = vmatprep.subr.mxu0 %v11013_v27  ;;  %4418 = vmatprep.subr.mxu1 %v11014_v22  ;;  %v11022_v27 = vld [vmem:[#allocation74_spill] sm:$0xff]  ;;  %v3952_v22 = vpop.f32.mrf.mxu0 }
0x1056   :  { %4348 = vmatpush1.msra.mxu0 %v11015_v55  ;;  %4419 = vmatpush1.msra.mxu1 %v11016_v41 }
0x1057   :  { %4349 = vmatprep.subr.mxu0 %v11017_v56  ;;  %4420 = vmatprep.subr.mxu1 %v11018_v25  ;;  %v3954_v55 = vpop.f32.mrf.mxu0  ;;  %v4067_v56 = vpop.f32.mrf.mxu1 }
0x1058   :  { %4350 = vmatpush1.msra.mxu0 %v11019_v58  ;;  %4383 = vmatprep.mubr.f32.mxu0 %v10960_v42 }
0x1059   :  { %4421 = vmatpush1.msra.mxu1 %v11020_v9  ;;  %4454 = vmatprep.mubr.f32.mxu1 %v10960_v42  ;;  %v9422_v41 = vpop.f32.mrf.mxu0  ;;  %v9426_v25 = vpop.f32.mrf.mxu1 }
0x105a   :  { %4490 = vmatprep.subr.mxu0 %v11021_v60  ;;  %4561 = vmatprep.subr.mxu1 %v11022_v27  ;;  %11023 = vst [vmem:[#allocation30_spill] sm:$0xff] %v9422_v41  ;;  %11025 = vst [vmem:[#allocation67_spill] sm:$0xff] %v9426_v25 }
0x105b   :  { %v9424_v23 = vpop.f32.mrf.mxu0  ;;  %v9430_v61 = vpop.f32.mrf.mxu1 }
0x105c   :  { %11024 = vst [vmem:[#allocation55_spill] sm:$0xff] %v9424_v23  ;;  %11027 = vst [vmem:[#allocation59_spill] sm:$0xff] %v9430_v61 }
0x105d   :  { %v9428_v58 = vpop.f32.mrf.mxu0  ;;  %v9434_v42 = vpop.f32.mrf.mxu1 }
0x105e   :  { %11026 = vst [vmem:[#allocation50_spill] sm:$0xff] %v9428_v58  ;;  %11029 = vst [vmem:[#allocation39_spill] sm:$0xff] %v9434_v42 }
0x105f   :  { %v9432_v9 = vpop.f32.mrf.mxu0  ;;  %v9438_v27 = vpop.f32.mrf.mxu1 }
0x1060   :  { %11028 = vst [vmem:[#allocation37_spill] sm:$0xff] %v9432_v9  ;;  %11031 = vst [vmem:[#allocation42_spill] sm:$0xff] %v9438_v27 }
0x1061   :  { %v9436_v60 = vpop.f32.mrf.mxu0  ;;  %v9442_v41 = vpop.f32.mrf.mxu1 }
0x1062   :  { %11030 = vst [vmem:[#allocation40_spill] sm:$0xff] %v9436_v60  ;;  %11033 = vst [vmem:[#allocation68_spill] sm:$0xff] %v9442_v41  ;;  %v3791_v41 = vld [vmem:[#allocation12 + $0x8] sm:$0xf] }
0x1063   :  { %v9440_v57 = vpop.f32.mrf.mxu0  ;;  %v9446_v23 = vpop.f32.mrf.mxu1 }
0x1064   :  { %11032 = vst [vmem:[#allocation69_spill] sm:$0xff] %v9440_v57  ;;  %11035 = vst [vmem:[#allocation32_spill] sm:$0xff] %v9446_v23  ;;  %v11045_v23 = vld [vmem:[#allocation51_spill] sm:$0xff] }
0x1065   :  { %v9444_v38 = vpop.f32.mrf.mxu0  ;;  %v9450_v58 = vpop.f32.mrf.mxu1  ;;  %v9467_v46 = vrot.slane %v3791_v41, %v11045_v23 }
0x1066   :  { %11034 = vst [vmem:[#allocation70_spill] sm:$0xff] %v9444_v38  ;;  %11037 = vst [vmem:[#allocation71_spill] sm:$0xff] %v9450_v58 }
0x1067   :  { %v9448_v25 = vpop.f32.mrf.mxu0  ;;  %v9454_v9 = vpop.f32.mrf.mxu1  ;;  %11046 = vst [vmem:[#allocation35_spill] sm:$0xff] %v9467_v46 }
0x1068   :  { %11036 = vst [vmem:[#allocation33_spill] sm:$0xff] %v9448_v25  ;;  %11039 = vst [vmem:[#allocation83_spill] sm:$0xff] %v9454_v9 }
0x1069   :  { %v9452_v61 = vpop.f32.mrf.mxu0  ;;  %v9458_v60 = vpop.f32.mrf.mxu1 }
0x106a   :  { %11038 = vst [vmem:[#allocation57_spill] sm:$0xff] %v9452_v61  ;;  %11041 = vst [vmem:[#allocation49_spill] sm:$0xff] %v9458_v60  ;;  %v11049_v61 = vld [vmem:[#allocation53_spill] sm:$0xff]  ;;  %v3953_v60 = vadd.f32 %v3952_v22, %v9467_v46 }
0x106b   :  { %v9456_v42 = vpop.f32.mrf.mxu0  ;;  %v9462_v57 = vpop.f32.mrf.mxu1  ;;  %v9474_v9 = vrot.slane %v3791_v41, %v11049_v61 }
0x106c   :  { %11040 = vst [vmem:[#allocation29_spill] sm:$0xff] %v9456_v42  ;;  %11043 = vst [vmem:[#allocation85_spill] sm:$0xff] %v9462_v57 }
0x106d   :  { %v9460_v27 = vpop.f32.mrf.mxu0  ;;  %v9469_v25 = vpop.f32.mrf.mxu1  ;;  %v3955_v30 = vadd.f32 %v3954_v55, %v9474_v9 }
0x106e   :  { %11042 = vst [vmem:[#allocation80_spill] sm:$0xff] %v9460_v27  ;;  %11047 = vst [vmem:[#allocation61_spill] sm:$0xff] %v9469_v25 }
0x106f   :  { %v9464_v38 = vpop.f32.mrf.mxu0  ;;  %v9479_v27 = vpop.f32.mrf.mxu1 }
0x1070   :  { %11044 = vst [vmem:[#allocation34_spill] sm:$0xff] %v9464_v38  ;;  %11051 = vst [vmem:[#allocation81_spill] sm:$0xff] %v9479_v27  ;;  %v11055_v27 = vld [vmem:[#allocation54_spill] sm:$0xff] }
0x1071   :  { %v9491_v46 = vrot.slane %v3791_v41, %v11055_v27 }
0x10f5   :  { %v9471_v58 = vpop.f32.mrf.mxu0  ;;  %v9482_v38 = vpop.f32.mrf.mxu1 }
0x10f6   :  { %11048 = vst [vmem:[#allocation73_spill] sm:$0xff] %v9471_v58  ;;  %11052 = vst [vmem:[#allocation82_spill] sm:$0xff] %v9482_v38  ;;  %v11054_v58 = vld [vmem:[#allocation52_spill] sm:$0xff] }
0x10f7   :  { %v9476_v42 = vpop.f32.mrf.mxu0  ;;  %v9484_v52 = vpop.f32.mrf.mxu1  ;;  %v9487_v18 = vrot.slane %v3791_v41, %v11054_v58 }
0x10f8   :  { %11050 = vst [vmem:[#allocation79_spill] sm:$0xff] %v9476_v42  ;;  %11053 = vst [vmem:[#allocation84_spill] sm:$0xff] %v9484_v52 }
0x10f9   :  { %v4214_v57 = vpop.f32.mrf.mxu0  ;;  %v4285_v22 = vpop.f32.mrf.mxu1  ;;  %v4066_v42 = vadd.f32 %v4065_v21, %v9487_v18 }
0x10fa   :  { %v4215_v23 = vadd.f32 %v4214_v57, %v3953_v60  ;;  %v4068_v57 = vadd.f32 %v4067_v56, %v9491_v46 }
0x10fb   :  { %v4216_v24 = vpop.f32.mrf.mxu0  ;;  %v4286_v55 = vadd.f32 %v4285_v22, %v4066_v42  ;;  %v4287_v38 = vpop.f32.mrf.mxu1 }
0x10fc   :  { %v5956_v8 = vmul.f32 -1.442695, %v4215_v23  ;;  %v4217_v25 = vadd.f32 %v4216_v24, %v3955_v30  ;;  %v4288_v30 = vadd.f32 %v4287_v38, %v4068_v57  ;;  %v11057_v57 = vld [vmem:[#allocation44_spill] sm:$0xff] }
0x10fd   :  { %v5958_v60 = vmul.f32 -1.442695, %v4286_v55 }
0x10fe   :  { %6418 = vpow2.f32 %v5956_v8  ;;  %v5957_v61 = vmul.f32 -1.442695, %v4217_v25 }
0x1100   :  { %6420 = vpow2.f32 %v5957_v61 }
0x1101   :  { %6422 = vpow2.f32 %v5958_v60  ;;  %v11058_v60 = vld [vmem:[#allocation46_spill] sm:$0xff] }
0x110b   :  { %v6419_v24 = vpop.eup %6418 }
0x110c   :  { %v4299_v23 = vadd.f32 1.0, %v6419_v24  ;;  %v11059_v24 = vld [vmem:[#allocation45_spill] sm:$0xff] }
0x110d   :  { %v6421_v8 = vpop.eup %6420 }
0x110e   :  { %6424 = vrcp.f32 %v4299_v23  ;;  %v4300_v25 = vadd.f32 1.0, %v6421_v8  ;;  %v6423_v58 = vpop.eup %6422  ;;  %v11061_v23 = vld [vmem:[#allocation48_spill] sm:$0xff]  ;;  %v11062_v8 = vld [vmem:[#allocation77_spill] sm:$0xff] }
0x110f   :  { %6426 = vtanh.f32 %v4288_v30  ;;  %v4301_v27 = vadd.f32 1.0, %v6423_v58  ;;  %v11060_v30 = vld [vmem:[#allocation47_spill] sm:$0xff]  ;;  %v11064_v58 = vld [vmem:[#allocation38_spill] sm:$0xff] }
0x1110   :  { %6428 = vrcp.f32 %v4300_v25  ;;  %v11063_v25 = vld [vmem:[#allocation36_spill] sm:$0xff] }
0x1111   :  { %6430 = vrcp.f32 %v4301_v27  ;;  %v11067_v27 = vld [vmem:[#allocation78_spill] sm:$0xff] }
0x111b   :  { %v6425_v61 = vpop.eup %6424 }
0x111c   :  { %v6427_v21 = vpop.eup %6426 }
0x111d   :  { %v6429_v52 = vpop.eup %6428  ;;  %v4310_v42 = vmul.f32 %v6427_v21, %v6425_v61  ;;  %v11065_v61 = vld [vmem:[#allocation75_spill] sm:$0xff]  ;;  %v11066_v21 = vld [vmem:[#allocation76_spill] sm:$0xff] }
0x111e   :  { %v4309_v41 = vmul.f32 0.0, %v6429_v52  ;;  %v6431_v38 = vpop.eup %6430  ;;  %v11056_v52 = vld [vmem:[#allocation43_spill] sm:$0xff] }
0x1120   :  { %v9494_v22 = vadd.f32 %v4310_v42, %v4309_v41  ;;  %v11068_v41 = vld [vmem:[#allocation31_spill] sm:$0xff]  ;;  %v11069_v42 = vld [vmem:[#allocation60_spill] sm:$0xff] }
0x1122   :  { %6432 = vtanh.f32 %v9494_v22 }
0x112f   :  { %v6433_v56 = vpop.eup %6432 }
0x1130   :  { %v4313_v55 = vmul.f32 %v6433_v56, %v6431_v38  ;;  %v11070_v38 = vld [vmem:[#allocation62_spill] sm:$0xff]  ;;  %v11071_v56 = vld [vmem:[#allocation63_spill] sm:$0xff] }
0x1132   :  { %4384 = vmatmul.mubr.f32.vlgmr.msra.gmra.mxu0 %v4313_v55  ;;  %5521 = vst.msk [vmem:[#allocation18] sm:$0xff] %vm5520_vm1, %v4313_v55  ;;  %4455 = vmatmul.mubr.f32.vlgmr.msra.gmra.mxu1 %v4313_v55  ;;  %v11072_v55 = vld [vmem:[#allocation65_spill] sm:$0xff] }
0x1133   :  { %4491 = vmatpush1.msra.mxu0 %v9155_v19  ;;  %4562 = vmatpush1.msra.mxu1 %v9157_v10 }
0x1134   :  { %4492 = vmatprep.subr.mxu0 %v9161_v63  ;;  %4563 = vmatprep.subr.mxu1 %v9163_v5 }
0x1135   :  { %4493 = vmatpush1.msra.mxu0 %v9167_v62  ;;  %4564 = vmatpush1.msra.mxu1 %v9169_v13 }
0x1136   :  { %4494 = vmatprep.subr.mxu0 %v9173_v4  ;;  %4565 = vmatprep.subr.mxu1 %v9175_v53 }
0x1137   :  { %4495 = vmatpush1.msra.mxu0 %v9179_v35  ;;  %4566 = vmatpush1.msra.mxu1 %v9181_v26 }
0x1138   :  { %4496 = vmatprep.subr.mxu0 %v9185_v16  ;;  %4567 = vmatprep.subr.mxu1 %v9187_v0 }
0x1139   :  { %4497 = vmatpush1.msra.mxu0 %v9191_v7  ;;  %4568 = vmatpush1.msra.mxu1 %v9193_v31 }
0x113a   :  { %4498 = vmatprep.subr.mxu0 %v9197_v32  ;;  %4569 = vmatprep.subr.mxu1 %v9199_v33 }
0x113b   :  { %4499 = vmatpush1.msra.mxu0 %v9203_v34  ;;  %4570 = vmatpush1.msra.mxu1 %v9205_v36 }
0x113c   :  { %4500 = vmatprep.subr.mxu0 %v9209_v37  ;;  %4571 = vmatprep.subr.mxu1 %v9211_v39 }
0x113d   :  { %4501 = vmatpush1.msra.mxu0 %v9215_v6  ;;  %4572 = vmatpush1.msra.mxu1 %v9217_v47 }
0x113e   :  { %4502 = vmatprep.subr.mxu0 %v9221_v48  ;;  %4573 = vmatprep.subr.mxu1 %v9223_v49 }
0x113f   :  { %4503 = vmatpush1.msra.mxu0 %v9227_v50  ;;  %4574 = vmatpush1.msra.mxu1 %v9229_v51 }
0x1140   :  { %4504 = vmatprep.subr.mxu0 %v9233_v1  ;;  %4575 = vmatprep.subr.mxu1 %v9235_v3 }
0x1141   :  { %4505 = vmatpush1.msra.mxu0 %v9239_v40  ;;  %4576 = vmatpush1.msra.mxu1 %v9241_v28 }
0x1142   :  { %4506 = vmatprep.subr.mxu0 %v9245_v2  ;;  %4577 = vmatprep.subr.mxu1 %v9247_v29 }
0x1143   :  { %4507 = vmatpush1.msra.mxu0 %v9251_v45  ;;  %4578 = vmatpush1.msra.mxu1 %v9253_v15 }
0x1144   :  { %4508 = vmatprep.subr.mxu0 %v9257_v43  ;;  %4579 = vmatprep.subr.mxu1 %v9259_v44 }
0x1145   :  { %4509 = vmatpush1.msra.mxu0 %v9263_v11  ;;  %4580 = vmatpush1.msra.mxu1 %v9265_v17 }
0x1146   :  { %4510 = vmatprep.subr.mxu0 %v9269_v54  ;;  %4581 = vmatprep.subr.mxu1 %v9271_v20 }
0x1147   :  { %4511 = vmatpush1.msra.mxu0 %v10999_v12  ;;  %4582 = vmatpush1.msra.mxu1 %v11000_v59 }
0x1148   :  { %4512 = vmatprep.subr.mxu0 %v11001_v14  ;;  %4583 = vmatprep.subr.mxu1 %v11056_v52  ;;  %v11082_v52 = vld [vmem:[#allocation59_spill] sm:$0xff] }
0x1149   :  { %4513 = vmatpush1.msra.mxu0 %v11057_v57  ;;  %4584 = vmatpush1.msra.mxu1 %v11058_v60 }
0x114a   :  { %4514 = vmatprep.subr.mxu0 %v11059_v24  ;;  %4585 = vmatprep.subr.mxu1 %v11060_v30 }
0x114b   :  { %4515 = vmatpush1.msra.mxu0 %v11061_v23  ;;  %4586 = vmatpush1.msra.mxu1 %v11062_v8  ;;  %v11073_v8 = vld [vmem:[#allocation64_spill] sm:$0xff] }
0x114c   :  { %4516 = vmatprep.subr.mxu0 %v11063_v25  ;;  %4587 = vmatprep.subr.mxu1 %v11064_v58  ;;  %v11074_v25 = vmov 0.0   ;;  %v11075_v58 = vld [vmem:[#allocation66_spill] sm:$0xff] }
0x114d   :  { %4517 = vmatpush1.msra.mxu0 %v11065_v61  ;;  %4588 = vmatpush1.msra.mxu1 %v11066_v21  ;;  %v11076_v21 = vld [vmem:[#allocation72_spill] sm:$0xff] }
0x114e   :  { %4518 = vmatprep.subr.mxu0 %v11067_v27  ;;  %4589 = vmatprep.subr.mxu1 %v11068_v41  ;;  %v11077_v27 = vld [vmem:[#allocation74_spill] sm:$0xff]  ;;  %v11078_v41 = vld [vmem:[#allocation35_spill] sm:$0xff] }
0x114f   :  { %4519 = vmatpush1.msra.mxu0 %v11069_v42  ;;  %4590 = vmatpush1.msra.mxu1 %v11070_v38  ;;  %v11079_v42 = vld [vmem:[#allocation30_spill] sm:$0xff] }
0x1150   :  { %4520 = vmatprep.subr.mxu0 %v11071_v56  ;;  %4591 = vmatprep.subr.mxu1 %v11072_v55  ;;  %v3959_v61 = vadd.f32 %v11079_v42, %v11078_v41  ;;  %v11080_v56 = vld [vmem:[#allocation55_spill] sm:$0xff]  ;;  %v4074_v42 = vadd.f32 %v11082_v52, %v9491_v46 }
0x1151   :  { %4521 = vmatpush1.msra.mxu0 %v11073_v8  ;;  %4554 = vmatprep.mubr.f32.mxu0 %v11074_v25  ;;  %v3961_v23 = vadd.f32 %v11080_v56, %v9474_v9 }
0x1152   :  { %4592 = vmatpush1.msra.mxu1 %v11075_v58  ;;  %4625 = vmatprep.mubr.f32.mxu1 %v11074_v25  ;;  %v11081_v25 = vld [vmem:[#allocation67_spill] sm:$0xff] }
0x1153   :  { %4661 = vmatprep.subr.mxu0 %v11076_v21  ;;  %4732 = vmatprep.subr.mxu1 %v11077_v27  ;;  %v4072_v21 = vadd.f32 %v11081_v25, %v9487_v18 }
0x11f2   :  { %v4385_v38 = vpop.f32.mrf.mxu0  ;;  %v4456_v58 = vpop.f32.mrf.mxu1 }
0x11f3   :  { %v4386_v55 = vadd.f32 %v4385_v38, %v3959_v61  ;;  %v4457_v57 = vadd.f32 %v4456_v58, %v4072_v21 }
0x11f4   :  { %v4387_v30 = vpop.f32.mrf.mxu0  ;;  %v4458_v27 = vpop.f32.mrf.mxu1 }
0x11f5   :  { %v5959_v8 = vmul.f32 -1.442695, %v4386_v55  ;;  %v4388_v24 = vadd.f32 %v4387_v30, %v3961_v23  ;;  %v5961_v41 = vmul.f32 -1.442695, %v4457_v57  ;;  %v4459_v14 = vadd.f32 %v4458_v27, %v4074_v42  ;;  %v11105_v55 = vld [vmem:[#allocation72_spill] sm:$0xff]  ;;  %v11106_v42 = vld [vmem:[#allocation74_spill] sm:$0xff] }
0x11f6   :  { %v11103_v27 = vmov 0.0  }
0x11f7   :  { %6434 = vpow2.f32 %v5959_v8  ;;  %v5960_v60 = vmul.f32 -1.442695, %v4388_v24 }
0x11f9   :  { %6436 = vpow2.f32 %v5960_v60 }
0x11fa   :  { %6438 = vpow2.f32 %v5961_v41  ;;  %v11104_v41 = vld [vmem:[#allocation66_spill] sm:$0xff] }
0x11fb   :  { %6440 = vtanh.f32 %v4459_v14  ;;  %v11101_v14 = vld [vmem:[#allocation65_spill] sm:$0xff] }
0x1204   :  { %v6435_v59 = vpop.eup %6434 }
0x1205   :  { %v4470_v56 = vadd.f32 1.0, %v6435_v59 }
0x1206   :  { %v6437_v61 = vpop.eup %6436 }
0x1207   :  { %6442 = vrcp.f32 %v4470_v56  ;;  %v4471_v30 = vadd.f32 1.0, %v6437_v61  ;;  %v6439_v60 = vpop.eup %6438  ;;  %v11107_v56 = vld [vmem:[#allocation35_spill] sm:$0xff]  ;;  %v11108_v61 = vld [vmem:[#allocation50_spill] sm:$0xff] }
0x1208   :  { %v6441_v24 = vpop.eup %6440  ;;  %v4472_v58 = vadd.f32 1.0, %v6439_v60 }
0x1209   :  { %6444 = vrcp.f32 %v4471_v30  ;;  %v3965_v30 = vadd.f32 %v11108_v61, %v11107_v56 }
0x120a   :  { %6446 = vrcp.f32 %v4472_v58 }
0x1214   :  { %v6443_v23 = vpop.eup %6442 }
0x1215   :  { %v4481_v8 = vmul.f32 %v6443_v23, %v6441_v24  ;;  %v11109_v24 = vld [vmem:[#allocation37_spill] sm:$0xff] }
0x1216   :  { %v6445_v25 = vpop.eup %6444  ;;  %v3967_v23 = vadd.f32 %v11109_v24, %v9474_v9 }
0x1217   :  { %v4480_v21 = vmul.f32 %v6445_v25, %v9494_v22  ;;  %v6447_v59 = vpop.eup %6446  ;;  %v11102_v22 = vld [vmem:[#allocation64_spill] sm:$0xff] }
0x1219   :  { %v9573_v38 = vadd.f32 %v4481_v8, %v4480_v21 }
0x121b   :  { %6448 = vtanh.f32 %v9573_v38 }
0x1228   :  { %v6449_v52 = vpop.eup %6448 }
0x1229   :  { %v4484_v57 = vmul.f32 %v6449_v52, %v6447_v59 }
0x122b   :  { %4555 = vmatmul.mubr.f32.vlgmr.msra.gmra.mxu0 %v4484_v57  ;;  %5522 = vst.msk [vmem:[#allocation18 + $0x8] sm:$0xff] %vm5520_vm1, %v4484_v57  ;;  %4626 = vmatmul.mubr.f32.vlgmr.msra.gmra.mxu1 %v4484_v57  ;;  %v11110_v57 = vld [vmem:[#allocation39_spill] sm:$0xff] }
0x122c   :  { %4662 = vmatpush1.msra.mxu0 %v9155_v19  ;;  %4733 = vmatpush1.msra.mxu1 %v9157_v10  ;;  %v11083_v19 = vld [vmem:[#allocation58_spill] sm:$0xff]  ;;  %v11084_v10 = vld [vmem:[#allocation41_spill] sm:$0xff] }
0x122d   :  { %4663 = vmatprep.subr.mxu0 %v9161_v63  ;;  %4734 = vmatprep.subr.mxu1 %v9163_v5  ;;  %v11085_v63 = vld [vmem:[#allocation43_spill] sm:$0xff]  ;;  %v11086_v5 = vld [vmem:[#allocation44_spill] sm:$0xff] }
0x122e   :  { %4664 = vmatpush1.msra.mxu0 %v9167_v62  ;;  %4735 = vmatpush1.msra.mxu1 %v9169_v13  ;;  %v11087_v62 = vld [vmem:[#allocation46_spill] sm:$0xff]  ;;  %v11088_v13 = vld [vmem:[#allocation45_spill] sm:$0xff] }
0x122f   :  { %4665 = vmatprep.subr.mxu0 %v9173_v4  ;;  %4736 = vmatprep.subr.mxu1 %v9175_v53  ;;  %v11089_v4 = vld [vmem:[#allocation47_spill] sm:$0xff]  ;;  %v11090_v53 = vld [vmem:[#allocation48_spill] sm:$0xff] }
0x1230   :  { %4666 = vmatpush1.msra.mxu0 %v9179_v35  ;;  %4737 = vmatpush1.msra.mxu1 %v9181_v26  ;;  %v11091_v35 = vld [vmem:[#allocation77_spill] sm:$0xff]  ;;  %v11092_v26 = vld [vmem:[#allocation36_spill] sm:$0xff] }
0x1231   :  { %4667 = vmatprep.subr.mxu0 %v9185_v16  ;;  %4738 = vmatprep.subr.mxu1 %v9187_v0  ;;  %v11093_v16 = vld [vmem:[#allocation38_spill] sm:$0xff]  ;;  %v11094_v0 = vld [vmem:[#allocation75_spill] sm:$0xff] }
0x1232   :  { %4668 = vmatpush1.msra.mxu0 %v9191_v7  ;;  %4739 = vmatpush1.msra.mxu1 %v9193_v31  ;;  %v11095_v7 = vld [vmem:[#allocation76_spill] sm:$0xff]  ;;  %v11096_v31 = vld [vmem:[#allocation78_spill] sm:$0xff] }
0x1233   :  { %4669 = vmatprep.subr.mxu0 %v9197_v32  ;;  %4740 = vmatprep.subr.mxu1 %v9199_v33  ;;  %v11097_v32 = vld [vmem:[#allocation31_spill] sm:$0xff]  ;;  %v11098_v33 = vld [vmem:[#allocation60_spill] sm:$0xff] }
0x1234   :  { %4670 = vmatpush1.msra.mxu0 %v9203_v34  ;;  %4741 = vmatpush1.msra.mxu1 %v9205_v36  ;;  %v11099_v34 = vld [vmem:[#allocation62_spill] sm:$0xff]  ;;  %v11100_v36 = vld [vmem:[#allocation63_spill] sm:$0xff] }
0x1235   :  { %4671 = vmatprep.subr.mxu0 %v9209_v37  ;;  %4742 = vmatprep.subr.mxu1 %v9211_v39 }
0x1236   :  { %4672 = vmatpush1.msra.mxu0 %v9215_v6  ;;  %4743 = vmatpush1.msra.mxu1 %v9217_v47 }
0x1237   :  { %4673 = vmatprep.subr.mxu0 %v9221_v48  ;;  %4744 = vmatprep.subr.mxu1 %v9223_v49 }
0x1238   :  { %4674 = vmatpush1.msra.mxu0 %v9227_v50  ;;  %4745 = vmatpush1.msra.mxu1 %v9229_v51 }
0x1239   :  { %4675 = vmatprep.subr.mxu0 %v9233_v1  ;;  %4746 = vmatprep.subr.mxu1 %v9235_v3 }
0x123a   :  { %4676 = vmatpush1.msra.mxu0 %v9239_v40  ;;  %4747 = vmatpush1.msra.mxu1 %v9241_v28 }
0x123b   :  { %4677 = vmatprep.subr.mxu0 %v9245_v2  ;;  %4748 = vmatprep.subr.mxu1 %v9247_v29 }
0x123c   :  { %4678 = vmatpush1.msra.mxu0 %v9251_v45  ;;  %4749 = vmatpush1.msra.mxu1 %v9253_v15 }
0x123d   :  { %4679 = vmatprep.subr.mxu0 %v9257_v43  ;;  %4750 = vmatprep.subr.mxu1 %v9259_v44 }
0x123e   :  { %4680 = vmatpush1.msra.mxu0 %v9263_v11  ;;  %4751 = vmatpush1.msra.mxu1 %v9265_v17 }
0x123f   :  { %4681 = vmatprep.subr.mxu0 %v9269_v54  ;;  %4752 = vmatprep.subr.mxu1 %v9271_v20 }
0x1240   :  { %4682 = vmatpush1.msra.mxu0 %v10999_v12  ;;  %4753 = vmatpush1.msra.mxu1 %v11083_v19 }
0x1241   :  { %4683 = vmatprep.subr.mxu0 %v11084_v10  ;;  %4754 = vmatprep.subr.mxu1 %v11085_v63 }
0x1242   :  { %4684 = vmatpush1.msra.mxu0 %v11086_v5  ;;  %4755 = vmatpush1.msra.mxu1 %v11087_v62 }
0x1243   :  { %4685 = vmatprep.subr.mxu0 %v11088_v13  ;;  %4756 = vmatprep.subr.mxu1 %v11089_v4 }
0x1244   :  { %4686 = vmatpush1.msra.mxu0 %v11090_v53  ;;  %4757 = vmatpush1.msra.mxu1 %v11091_v35 }
0x1245   :  { %4687 = vmatprep.subr.mxu0 %v11092_v26  ;;  %4758 = vmatprep.subr.mxu1 %v11093_v16 }
0x1246   :  { %4688 = vmatpush1.msra.mxu0 %v11094_v0  ;;  %4759 = vmatpush1.msra.mxu1 %v11095_v7 }
0x1247   :  { %4689 = vmatprep.subr.mxu0 %v11096_v31  ;;  %4760 = vmatprep.subr.mxu1 %v11097_v32 }
0x1248   :  { %4690 = vmatpush1.msra.mxu0 %v11098_v33  ;;  %4761 = vmatpush1.msra.mxu1 %v11099_v34 }
0x1249   :  { %4691 = vmatprep.subr.mxu0 %v11100_v36  ;;  %4762 = vmatprep.subr.mxu1 %v11101_v14 }
0x124a   :  { %4692 = vmatpush1.msra.mxu0 %v11102_v22  ;;  %4725 = vmatprep.mubr.f32.mxu0 %v11103_v27 }
0x124b   :  { %4763 = vmatpush1.msra.mxu1 %v11104_v41  ;;  %4796 = vmatprep.mubr.f32.mxu1 %v11103_v27  ;;  %v11111_v27 = vld [vmem:[#allocation42_spill] sm:$0xff] }
0x124c   :  { %4832 = vmatprep.subr.mxu0 %v11105_v55  ;;  %4903 = vmatprep.subr.mxu1 %v11106_v42  ;;  %v4078_v55 = vadd.f32 %v11110_v57, %v9487_v18  ;;  %v4080_v61 = vadd.f32 %v11111_v27, %v9491_v46 }
0x12eb   :  { %v4556_v60 = vpop.f32.mrf.mxu0  ;;  %v4627_v52 = vpop.f32.mrf.mxu1 }
0x12ec   :  { %v4557_v8 = vadd.f32 %v4556_v60, %v3965_v30  ;;  %v4628_v41 = vadd.f32 %v4627_v52, %v4078_v55  ;;  %v9665_v55 = vld [vmem:[#allocation10 + $0x5d8] sm:$0xff] }
0x12ed   :  { %v4558_v25 = vpop.f32.mrf.mxu0  ;;  %v4629_v42 = vpop.f32.mrf.mxu1 }
0x12ee   :  { %v5962_v58 = vmul.f32 -1.442695, %v4557_v8  ;;  %v4559_v21 = vadd.f32 %v4558_v25, %v3967_v23  ;;  %v5964_v56 = vmul.f32 -1.442695, %v4628_v41  ;;  %v4630_v22 = vadd.f32 %v4629_v42, %v4080_v61  ;;  %v9668_v42 = vld [vmem:[#allocation10 + $0x5c0] sm:$0xff]  ;;  %v9671_v61 = vld [vmem:[#allocation10 + $0x5d0] sm:$0xff] }
0x12f0   :  { %6450 = vpow2.f32 %v5962_v58  ;;  %v5963_v59 = vmul.f32 -1.442695, %v4559_v21 }
0x12f2   :  { %6452 = vpow2.f32 %v5963_v59 }
0x12f3   :  { %6454 = vpow2.f32 %v5964_v56  ;;  %v9659_v56 = vld [vmem:[#allocation10 + $0x5f0] sm:$0xff] }
0x12f4   :  { %6456 = vtanh.f32 %v4630_v22  ;;  %v9656_v22 = vld [vmem:[#allocation10 + $0x5e0] sm:$0xff] }
0x12fd   :  { %v6451_v14 = vpop.eup %6450 }
0x12fe   :  { %v4641_v24 = vadd.f32 1.0, %v6451_v14 }
0x12ff   :  { %v6453_v30 = vpop.eup %6452 }
0x1300   :  { %6458 = vrcp.f32 %v4641_v24  ;;  %v4642_v60 = vadd.f32 1.0, %v6453_v30  ;;  %v6455_v23 = vpop.eup %6454  ;;  %v9674_v24 = vld [vmem:[#allocation10 + $0x5a8] sm:$0xff]  ;;  %v9677_v30 = vld [vmem:[#allocation10 + $0x5b8] sm:$0xff] }
0x1301   :  { %v6457_v8 = vpop.eup %6456  ;;  %v4643_v59 = vadd.f32 1.0, %v6455_v23  ;;  %v9683_v23 = vld [vmem:[#allocation10 + $0x5b0] sm:$0xff] }
0x1302   :  { %6460 = vrcp.f32 %v4642_v60  ;;  %v9680_v60 = vld [vmem:[#allocation10 + $0x5a0] sm:$0xff] }
0x1303   :  { %6462 = vrcp.f32 %v4643_v59  ;;  %v9698_v59 = vld [vmem:[#allocation10 + $0x568] sm:$0xff] }
0x130d   :  { %v6459_v25 = vpop.eup %6458 }
0x130e   :  { %v4652_v58 = vmul.f32 %v6459_v25, %v6457_v8  ;;  %v9686_v8 = vld [vmem:[#allocation10 + $0x588] sm:$0xff]  ;;  %v9689_v25 = vld [vmem:[#allocation10 + $0x598] sm:$0xff] }
0x130f   :  { %v6461_v21 = vpop.eup %6460 }
0x1310   :  { %v4651_v52 = vmul.f32 %v6461_v21, %v9573_v38  ;;  %v6463_v14 = vpop.eup %6462  ;;  %v9662_v38 = vld [vmem:[#allocation10 + $0x5c8] sm:$0xff]  ;;  %v9695_v21 = vld [vmem:[#allocation10 + $0x590] sm:$0xff] }
0x1312   :  { %v9652_v57 = vadd.f32 %v4652_v58, %v4651_v52  ;;  %v9692_v58 = vld [vmem:[#allocation10 + $0x580] sm:$0xff]  ;;  %v9701_v52 = vld [vmem:[#allocation10 + $0x578] sm:$0xff] }
0x1314   :  { %6464 = vtanh.f32 %v9652_v57 }
0x1321   :  { %v6465_v27 = vpop.eup %6464 }
0x1322   :  { %v4655_v41 = vmul.f32 %v6465_v27, %v6463_v14  ;;  %v9704_v14 = vld [vmem:[#allocation10 + $0x560] sm:$0xff]  ;;  %v9707_v27 = vld [vmem:[#allocation10 + $0x570] sm:$0xff] }
0x1324   :  { %4726 = vmatmul.mubr.f32.vlgmr.msra.gmra.mxu0 %v4655_v41  ;;  %5523 = vst.msk [vmem:[#allocation18 + $0x10] sm:$0xff] %vm5520_vm1, %v4655_v41  ;;  %4797 = vmatmul.mubr.f32.vlgmr.msra.gmra.mxu1 %v4655_v41  ;;  %v9796_v41 = vld [vmem:[#allocation10 + $0x558] sm:$0xff] }
0x1325   :  { %4833 = vmatpush1.msra.mxu0 %v9656_v22  ;;  %4904 = vmatpush1.msra.mxu1 %v9659_v56 }
0x1326   :  { %4834 = vmatprep.subr.mxu0 %v9662_v38  ;;  %4905 = vmatprep.subr.mxu1 %v9665_v55 }
0x1327   :  { %4835 = vmatpush1.msra.mxu0 %v9668_v42  ;;  %4906 = vmatpush1.msra.mxu1 %v9671_v61 }
0x1328   :  { %4836 = vmatprep.subr.mxu0 %v9674_v24  ;;  %4907 = vmatprep.subr.mxu1 %v9677_v30 }
0x1329   :  { %4837 = vmatpush1.msra.mxu0 %v9680_v60  ;;  %4908 = vmatpush1.msra.mxu1 %v9683_v23 }
0x132a   :  { %4838 = vmatprep.subr.mxu0 %v9686_v8  ;;  %4909 = vmatprep.subr.mxu1 %v9689_v25 }
0x132b   :  { %4839 = vmatpush1.msra.mxu0 %v9692_v58  ;;  %4910 = vmatpush1.msra.mxu1 %v9695_v21 }
0x132c   :  { %4840 = vmatprep.subr.mxu0 %v9698_v59  ;;  %4911 = vmatprep.subr.mxu1 %v9701_v52 }
0x132d   :  { %4841 = vmatpush1.msra.mxu0 %v9704_v14  ;;  %4912 = vmatpush1.msra.mxu1 %v9707_v27 }
0x132e   :  { %4842 = vmatprep.subr.mxu0 %v9209_v37  ;;  %4913 = vmatprep.subr.mxu1 %v9211_v39  ;;  %v11112_v37 = vld [vmem:[#allocation65_spill] sm:$0xff]  ;;  %v11113_v39 = vld [vmem:[#allocation64_spill] sm:$0xff] }
0x132f   :  { %4843 = vmatpush1.msra.mxu0 %v9215_v6  ;;  %4914 = vmatpush1.msra.mxu1 %v9217_v47  ;;  %v11114_v6 = vmov 0.0   ;;  %v11115_v47 = vld [vmem:[#allocation66_spill] sm:$0xff] }
0x1330   :  { %4844 = vmatprep.subr.mxu0 %v9221_v48  ;;  %4915 = vmatprep.subr.mxu1 %v9223_v49  ;;  %v9756_v48 = vld [vmem:[#allocation10 + $0x5e8] sm:$0xff]  ;;  %v9759_v49 = vld [vmem:[#allocation10 + $0x5f8] sm:$0xff] }
0x1331   :  { %4845 = vmatpush1.msra.mxu0 %v9227_v50  ;;  %4916 = vmatpush1.msra.mxu1 %v9229_v51  ;;  %11116 = vst [vmem:[#allocation56_spill] sm:$0xff] %v9756_v48  ;;  %11117 = vst [vmem:[#allocation51_spill] sm:$0xff] %v9759_v49  ;;  %v11118_v50 = vld [vmem:[#allocation35_spill] sm:$0xff]  ;;  %v11119_v51 = vld [vmem:[#allocation40_spill] sm:$0xff] }
0x1332   :  { %4846 = vmatprep.subr.mxu0 %v9233_v1  ;;  %4917 = vmatprep.subr.mxu1 %v9235_v3  ;;  %v3971_v1 = vadd.f32 %v11119_v51, %v11118_v50  ;;  %v9808_v51 = vld [vmem:[#allocation10 + $0x538] sm:$0xff] }
0x1333   :  { %4847 = vmatpush1.msra.mxu0 %v9239_v40  ;;  %4918 = vmatpush1.msra.mxu1 %v9241_v28  ;;  %v11120_v40 = vld [vmem:[#allocation69_spill] sm:$0xff] }
0x1334   :  { %4848 = vmatprep.subr.mxu0 %v9245_v2  ;;  %4919 = vmatprep.subr.mxu1 %v9247_v29  ;;  %v3973_v28 = vadd.f32 %v11120_v40, %v9474_v9  ;;  %v9817_v40 = vld [vmem:[#allocation10 + $0x508] sm:$0xff] }
0x1335   :  { %4849 = vmatpush1.msra.mxu0 %v9251_v45  ;;  %4920 = vmatpush1.msra.mxu1 %v9253_v15 }
0x1336   :  { %4850 = vmatprep.subr.mxu0 %v9257_v43  ;;  %4921 = vmatprep.subr.mxu1 %v9259_v44 }
0x1337   :  { %4851 = vmatpush1.msra.mxu0 %v9263_v11  ;;  %4922 = vmatpush1.msra.mxu1 %v9265_v17  ;;  %v11121_v11 = vld [vmem:[#allocation68_spill] sm:$0xff] }
0x1338   :  { %4852 = vmatprep.subr.mxu0 %v9269_v54  ;;  %4923 = vmatprep.subr.mxu1 %v9271_v20  ;;  %v4084_v17 = vadd.f32 %v11121_v11, %v9487_v18  ;;  %v9841_v11 = vld [vmem:[#allocation10 + $0x4c8] sm:$0xff] }
0x1339   :  { %4853 = vmatpush1.msra.mxu0 %v10999_v12  ;;  %4924 = vmatpush1.msra.mxu1 %v11083_v19  ;;  %v11122_v12 = vld [vmem:[#allocation32_spill] sm:$0xff] }
0x133a   :  { %4854 = vmatprep.subr.mxu0 %v11084_v10  ;;  %4925 = vmatprep.subr.mxu1 %v11085_v63  ;;  %v4086_v19 = vadd.f32 %v11122_v12, %v9491_v46  ;;  %v9853_v12 = vld [vmem:[#allocation10 + $0x4a8] sm:$0xff] }
0x133b   :  { %4855 = vmatpush1.msra.mxu0 %v11086_v5  ;;  %4926 = vmatpush1.msra.mxu1 %v11087_v62 }
0x133c   :  { %4856 = vmatprep.subr.mxu0 %v11088_v13  ;;  %4927 = vmatprep.subr.mxu1 %v11089_v4 }
0x133d   :  { %4857 = vmatpush1.msra.mxu0 %v11090_v53  ;;  %4928 = vmatpush1.msra.mxu1 %v11091_v35 }
0x133e   :  { %4858 = vmatprep.subr.mxu0 %v11092_v26  ;;  %4929 = vmatprep.subr.mxu1 %v11093_v16 }
0x133f   :  { %4859 = vmatpush1.msra.mxu0 %v11094_v0  ;;  %4930 = vmatpush1.msra.mxu1 %v11095_v7 }
0x1340   :  { %4860 = vmatprep.subr.mxu0 %v11096_v31  ;;  %4931 = vmatprep.subr.mxu1 %v11097_v32 }
0x1341   :  { %4861 = vmatpush1.msra.mxu0 %v11098_v33  ;;  %4932 = vmatpush1.msra.mxu1 %v11099_v34 }
0x1342   :  { %4862 = vmatprep.subr.mxu0 %v11100_v36  ;;  %4933 = vmatprep.subr.mxu1 %v11112_v37  ;;  %v9799_v37 = vld [vmem:[#allocation10 + $0x540] sm:$0xff] }
0x1343   :  { %4863 = vmatpush1.msra.mxu0 %v11113_v39  ;;  %4896 = vmatprep.mubr.f32.mxu0 %v11114_v6  ;;  %v9802_v39 = vld [vmem:[#allocation10 + $0x550] sm:$0xff] }
0x1344   :  { %4934 = vmatpush1.msra.mxu1 %v11115_v47  ;;  %4967 = vmatprep.mubr.f32.mxu1 %v11114_v6  ;;  %v9805_v47 = vld [vmem:[#allocation10 + $0x528] sm:$0xff] }
0x1345   :  { %5003 = vmatprep.subr.mxu0 %v9756_v48  ;;  %5074 = vmatprep.subr.mxu1 %v9759_v49 }
0x13e4   :  { %v4727_v3 = vpop.f32.mrf.mxu0  ;;  %v4798_v44 = vpop.f32.mrf.mxu1 }
0x13e5   :  { %v4728_v2 = vadd.f32 %v4727_v3, %v3971_v1  ;;  %v4799_v54 = vadd.f32 %v4798_v44, %v4084_v17  ;;  %v9811_v1 = vld [vmem:[#allocation10 + $0x520] sm:$0xff]  ;;  %v9814_v3 = vld [vmem:[#allocation10 + $0x530] sm:$0xff]  ;;  %v9844_v17 = vld [vmem:[#allocation10 + $0x4d8] sm:$0xff] }
0x13e6   :  { %v4729_v29 = vpop.f32.mrf.mxu0  ;;  %v4800_v20 = vpop.f32.mrf.mxu1  ;;  %v9838_v44 = vld [vmem:[#allocation10 + $0x4f0] sm:$0xff] }
0x13e7   :  { %v5965_v45 = vmul.f32 -1.442695, %v4728_v2  ;;  %v4730_v15 = vadd.f32 %v4729_v29, %v3973_v28  ;;  %v5967_v10 = vmul.f32 -1.442695, %v4799_v54  ;;  %v4801_v63 = vadd.f32 %v4800_v20, %v4086_v19  ;;  %v9820_v28 = vld [vmem:[#allocation10 + $0x518] sm:$0xff]  ;;  %v9823_v2 = vld [vmem:[#allocation10 + $0x500] sm:$0xff] }
0x13e8   :  { %v9826_v29 = vld [vmem:[#allocation10 + $0x510] sm:$0xff]  ;;  %v9847_v54 = vld [vmem:[#allocation10 + $0x4c0] sm:$0xff]  ;;  %v9856_v19 = vld [vmem:[#allocation10 + $0x4b8] sm:$0xff] }
0x13e9   :  { %6466 = vpow2.f32 %v5965_v45  ;;  %v5966_v43 = vmul.f32 -1.442695, %v4730_v15  ;;  %v9829_v45 = vld [vmem:[#allocation10 + $0x4e8] sm:$0xff]  ;;  %v9832_v15 = vld [vmem:[#allocation10 + $0x4f8] sm:$0xff]  ;;  %v9850_v20 = vld [vmem:[#allocation10 + $0x4d0] sm:$0xff] }
0x13eb   :  { %6468 = vpow2.f32 %v5966_v43  ;;  %v9835_v43 = vld [vmem:[#allocation10 + $0x4e0] sm:$0xff] }
0x13ec   :  { %6470 = vpow2.f32 %v5967_v10  ;;  %v9859_v10 = vld [vmem:[#allocation10 + $0x4a0] sm:$0xff] }
0x13ed   :  { %6472 = vtanh.f32 %v4801_v63  ;;  %v9862_v63 = vld [vmem:[#allocation10 + $0x4b0] sm:$0xff] }
0x13ee   :  { %11123 = vst [vmem:[#allocation53_spill] sm:$0xff] %v9862_v63 }
0x13f6   :  { %v6467_v5 = vpop.eup %6466 }
0x13f7   :  { %v4812_v62 = vadd.f32 1.0, %v6467_v5  ;;  %v9865_v5 = vld [vmem:[#allocation10 + $0x488] sm:$0xff] }
0x13f8   :  { %v6469_v13 = vpop.eup %6468  ;;  %11124 = vst [vmem:[#allocation52_spill] sm:$0xff] %v9865_v5 }
0x13f9   :  { %6474 = vrcp.f32 %v4812_v62  ;;  %v4813_v4 = vadd.f32 1.0, %v6469_v13  ;;  %v6471_v53 = vpop.eup %6470  ;;  %v9868_v62 = vld [vmem:[#allocation10 + $0x498] sm:$0xff]  ;;  %v9871_v13 = vld [vmem:[#allocation10 + $0x480] sm:$0xff] }
0x13fa   :  { %v6473_v35 = vpop.eup %6472  ;;  %v4814_v7 = vadd.f32 1.0, %v6471_v53  ;;  %11125 = vst [vmem:[#allocation54_spill] sm:$0xff] %v9868_v62  ;;  %11126 = vst [vmem:[#allocation30_spill] sm:$0xff] %v9871_v13  ;;  %v9877_v53 = vld [vmem:[#allocation10 + $0x468] sm:$0xff] }
0x13fb   :  { %6476 = vrcp.f32 %v4813_v4  ;;  %v9874_v4 = vld [vmem:[#allocation10 + $0x490] sm:$0xff]  ;;  %11128 = vst [vmem:[#allocation67_spill] sm:$0xff] %v9877_v53 }
0x13fc   :  { %6478 = vrcp.f32 %v4814_v7  ;;  %11127 = vst [vmem:[#allocation55_spill] sm:$0xff] %v9874_v4  ;;  %v9892_v7 = vld [vmem:[#allocation10 + $0x458] sm:$0xff] }
0x13fd   :  { %11133 = vst [vmem:[#allocation44_spill] sm:$0xff] %v9892_v7 }
0x1406   :  { %v6475_v26 = vpop.eup %6474 }
0x1407   :  { %v4823_v16 = vmul.f32 %v6475_v26, %v6473_v35  ;;  %v9880_v35 = vld [vmem:[#allocation10 + $0x478] sm:$0xff]  ;;  %v9883_v26 = vld [vmem:[#allocation10 + $0x460] sm:$0xff] }
0x1408   :  { %v6477_v0 = vpop.eup %6476  ;;  %11129 = vst [vmem:[#allocation59_spill] sm:$0xff] %v9880_v35  ;;  %11130 = vst [vmem:[#allocation58_spill] sm:$0xff] %v9883_v26 }
0x1409   :  { %v4822_v31 = vmul.f32 %v6477_v0, %v9652_v57  ;;  %v6479_v33 = vpop.eup %6478  ;;  %v9793_v57 = vld [vmem:[#allocation10 + $0x548] sm:$0xff] }
0x140a   :  { %v9889_v0 = vld [vmem:[#allocation10 + $0x448] sm:$0xff] }
0x140b   :  { %v9771_v32 = vadd.f32 %v4823_v16, %v4822_v31  ;;  %v9886_v16 = vld [vmem:[#allocation10 + $0x470] sm:$0xff]  ;;  %11132 = vst [vmem:[#allocation43_spill] sm:$0xff] %v9889_v0  ;;  %v9895_v31 = vld [vmem:[#allocation10 + $0x440] sm:$0xff] }
0x140c   :  { %11131 = vst [vmem:[#allocation41_spill] sm:$0xff] %v9886_v16  ;;  %11134 = vst [vmem:[#allocation46_spill] sm:$0xff] %v9895_v31 }
0x140d   :  { %6480 = vtanh.f32 %v9771_v32 }
0x141a   :  { %v6481_v34 = vpop.eup %6480 }
0x141b   :  { %v4826_v36 = vmul.f32 %v6481_v34, %v6479_v33  ;;  %v9898_v33 = vld [vmem:[#allocation10 + $0x450] sm:$0xff]  ;;  %v9901_v34 = vld [vmem:[#allocation10 + $0x428] sm:$0xff] }
0x141c   :  { %11135 = vst [vmem:[#allocation45_spill] sm:$0xff] %v9898_v33  ;;  %11136 = vst [vmem:[#allocation47_spill] sm:$0xff] %v9901_v34 }
0x141d   :  { %4897 = vmatmul.mubr.f32.vlgmr.msra.gmra.mxu0 %v4826_v36  ;;  %5524 = vst.msk [vmem:[#allocation18 + $0x18] sm:$0xff] %vm5520_vm1, %v4826_v36  ;;  %4968 = vmatmul.mubr.f32.vlgmr.msra.gmra.mxu1 %v4826_v36  ;;  %v9904_v36 = vld [vmem:[#allocation10 + $0x438] sm:$0xff] }
0x141e   :  { %5004 = vmatpush1.msra.mxu0 %v9656_v22  ;;  %5075 = vmatpush1.msra.mxu1 %v9659_v56  ;;  %11137 = vst [vmem:[#allocation48_spill] sm:$0xff] %v9904_v36 }
0x141f   :  { %5005 = vmatprep.subr.mxu0 %v9662_v38  ;;  %5076 = vmatprep.subr.mxu1 %v9665_v55 }
0x1420   :  { %5006 = vmatpush1.msra.mxu0 %v9668_v42  ;;  %5077 = vmatpush1.msra.mxu1 %v9671_v61 }
0x1421   :  { %5007 = vmatprep.subr.mxu0 %v9674_v24  ;;  %5078 = vmatprep.subr.mxu1 %v9677_v30 }
0x1422   :  { %5008 = vmatpush1.msra.mxu0 %v9680_v60  ;;  %5079 = vmatpush1.msra.mxu1 %v9683_v23 }
0x1423   :  { %5009 = vmatprep.subr.mxu0 %v9686_v8  ;;  %5080 = vmatprep.subr.mxu1 %v9689_v25 }
0x1424   :  { %5010 = vmatpush1.msra.mxu0 %v9692_v58  ;;  %5081 = vmatpush1.msra.mxu1 %v9695_v21 }
0x1425   :  { %5011 = vmatprep.subr.mxu0 %v9698_v59  ;;  %5082 = vmatprep.subr.mxu1 %v9701_v52 }
0x1426   :  { %5012 = vmatpush1.msra.mxu0 %v9704_v14  ;;  %5083 = vmatpush1.msra.mxu1 %v9707_v27 }
0x1427   :  { %5013 = vmatprep.subr.mxu0 %v9793_v57  ;;  %5084 = vmatprep.subr.mxu1 %v9796_v41 }
0x1428   :  { %5014 = vmatpush1.msra.mxu0 %v9799_v37  ;;  %5085 = vmatpush1.msra.mxu1 %v9802_v39 }
0x1429   :  { %5015 = vmatprep.subr.mxu0 %v9805_v47  ;;  %5086 = vmatprep.subr.mxu1 %v9808_v51 }
0x142a   :  { %5016 = vmatpush1.msra.mxu0 %v9811_v1  ;;  %5087 = vmatpush1.msra.mxu1 %v9814_v3 }
0x142b   :  { %5017 = vmatprep.subr.mxu0 %v9817_v40  ;;  %5088 = vmatprep.subr.mxu1 %v9820_v28 }
0x142c   :  { %5018 = vmatpush1.msra.mxu0 %v9823_v2  ;;  %5089 = vmatpush1.msra.mxu1 %v9826_v29 }
0x142d   :  { %5019 = vmatprep.subr.mxu0 %v9829_v45  ;;  %5090 = vmatprep.subr.mxu1 %v9832_v15 }
0x142e   :  { %5020 = vmatpush1.msra.mxu0 %v9835_v43  ;;  %5091 = vmatpush1.msra.mxu1 %v9838_v44 }
0x142f   :  { %5021 = vmatprep.subr.mxu0 %v9841_v11  ;;  %5092 = vmatprep.subr.mxu1 %v9844_v17 }
0x1430   :  { %5022 = vmatpush1.msra.mxu0 %v9847_v54  ;;  %5093 = vmatpush1.msra.mxu1 %v9850_v20 }
0x1431   :  { %5023 = vmatprep.subr.mxu0 %v9853_v12  ;;  %5094 = vmatprep.subr.mxu1 %v9856_v19 }
0x1432   :  { %5024 = vmatpush1.msra.mxu0 %v9859_v10  ;;  %5095 = vmatpush1.msra.mxu1 %v9862_v63 }
0x1433   :  { %5025 = vmatprep.subr.mxu0 %v9865_v5  ;;  %5096 = vmatprep.subr.mxu1 %v9868_v62  ;;  %v11147_v62 = vld [vmem:[#allocation83_spill] sm:$0xff] }
0x1434   :  { %5026 = vmatpush1.msra.mxu0 %v9871_v13  ;;  %5097 = vmatpush1.msra.mxu1 %v9874_v4 }
0x1435   :  { %5027 = vmatprep.subr.mxu0 %v9877_v53  ;;  %5098 = vmatprep.subr.mxu1 %v9880_v35 }
0x1436   :  { %5028 = vmatpush1.msra.mxu0 %v9883_v26  ;;  %5099 = vmatpush1.msra.mxu1 %v9886_v16 }
0x1437   :  { %5029 = vmatprep.subr.mxu0 %v9889_v0  ;;  %5100 = vmatprep.subr.mxu1 %v9892_v7  ;;  %v9907_v0 = vld [vmem:[#allocation10 + $0x420] sm:$0xff]  ;;  %v9910_v7 = vld [vmem:[#allocation10 + $0x430] sm:$0xff] }
0x1438   :  { %5030 = vmatpush1.msra.mxu0 %v9895_v31  ;;  %5101 = vmatpush1.msra.mxu1 %v9898_v33  ;;  %11138 = vst [vmem:[#allocation77_spill] sm:$0xff] %v9907_v0  ;;  %11139 = vst [vmem:[#allocation36_spill] sm:$0xff] %v9910_v7  ;;  %v9913_v31 = vld [vmem:[#allocation10 + $0x408] sm:$0xff]  ;;  %v9916_v33 = vld [vmem:[#allocation10 + $0x418] sm:$0xff] }
0x1439   :  { %5031 = vmatprep.subr.mxu0 %v9901_v34  ;;  %5102 = vmatprep.subr.mxu1 %v9904_v36  ;;  %11140 = vst [vmem:[#allocation38_spill] sm:$0xff] %v9913_v31  ;;  %11141 = vst [vmem:[#allocation75_spill] sm:$0xff] %v9916_v33  ;;  %v9919_v34 = vld [vmem:[#allocation10 + $0x400] sm:$0xff]  ;;  %v9923_v36 = vld [vmem:[#allocation10 + $0x410] sm:$0xff] }
0x143a   :  { %5032 = vmatpush1.msra.mxu0 %v9907_v0  ;;  %5103 = vmatpush1.msra.mxu1 %v9910_v7  ;;  %11142 = vst [vmem:[#allocation76_spill] sm:$0xff] %v9919_v34  ;;  %11143 = vst [vmem:[#allocation78_spill] sm:$0xff] %v9923_v36  ;;  %v11145_v0 = vld [vmem:[#allocation33_spill] sm:$0xff] }
0x143b   :  { %5033 = vmatprep.subr.mxu0 %v9913_v31  ;;  %5104 = vmatprep.subr.mxu1 %v9916_v33  ;;  %v11144_v31 = vld [vmem:[#allocation70_spill] sm:$0xff]  ;;  %v3979_v16 = vadd.f32 %v11145_v0, %v9474_v9 }
0x143c   :  { %5034 = vmatpush1.msra.mxu0 %v9919_v34  ;;  %5067 = vmatprep.mubr.f32.mxu0 %v11114_v6  ;;  %v3977_v7 = vadd.f32 %v11144_v31, %v11118_v50  ;;  %v4092_v31 = vadd.f32 %v11147_v62, %v9491_v46  ;;  %v11150_v62 = vld [vmem:[#allocation54_spill] sm:$0xff] }
0x143d   :  { %5105 = vmatpush1.msra.mxu1 %v9923_v36  ;;  %5138 = vmatprep.mubr.f32.mxu1 %v11114_v6  ;;  %v11146_v6 = vld [vmem:[#allocation71_spill] sm:$0xff] }
0x143e   :  { %5174 = vmatprep.subr.mxu0 %v9756_v48  ;;  %5245 = vmatprep.subr.mxu1 %v9759_v49  ;;  %v4090_v48 = vadd.f32 %v11146_v6, %v9487_v18 }
0x14dd   :  { %v4898_v33 = vpop.f32.mrf.mxu0  ;;  %v4969_v36 = vpop.f32.mrf.mxu1 }
0x14de   :  { %v4899_v34 = vadd.f32 %v4898_v33, %v3977_v7  ;;  %v4970_v13 = vadd.f32 %v4969_v36, %v4090_v48  ;;  %v11152_v36 = vld [vmem:[#allocation55_spill] sm:$0xff] }
0x14df   :  { %v4900_v26 = vpop.f32.mrf.mxu0  ;;  %v4971_v49 = vpop.f32.mrf.mxu1 }
0x14e0   :  { %v5968_v35 = vmul.f32 -1.442695, %v4899_v34  ;;  %v4901_v53 = vadd.f32 %v4900_v26, %v3979_v16  ;;  %v5970_v50 = vmul.f32 -1.442695, %v4970_v13  ;;  %v4972_v5 = vadd.f32 %v4971_v49, %v4092_v31  ;;  %v11151_v13 = vld [vmem:[#allocation30_spill] sm:$0xff]  ;;  %v11153_v31 = vld [vmem:[#allocation67_spill] sm:$0xff] }
0x14e2   :  { %6482 = vpow2.f32 %v5968_v35  ;;  %v5969_v4 = vmul.f32 -1.442695, %v4901_v53 }
0x14e4   :  { %6484 = vpow2.f32 %v5969_v4 }
0x14e5   :  { %6486 = vpow2.f32 %v5970_v50 }
0x14e6   :  { %6488 = vtanh.f32 %v4972_v5  ;;  %v11149_v5 = vld [vmem:[#allocation52_spill] sm:$0xff] }
0x14ef   :  { %v6483_v63 = vpop.eup %6482 }
0x14f0   :  { %v4983_v0 = vadd.f32 1.0, %v6483_v63 }
0x14f1   :  { %v6485_v7 = vpop.eup %6484 }
0x14f2   :  { %6490 = vrcp.f32 %v4983_v0  ;;  %v4984_v35 = vadd.f32 1.0, %v6485_v7  ;;  %v6487_v4 = vpop.eup %6486  ;;  %v11154_v0 = vld [vmem:[#allocation59_spill] sm:$0xff]  ;;  %v11155_v7 = vld [vmem:[#allocation58_spill] sm:$0xff] }
0x14f3   :  { %v6489_v53 = vpop.eup %6488  ;;  %v4985_v48 = vadd.f32 1.0, %v6487_v4  ;;  %v11157_v4 = vld [vmem:[#allocation43_spill] sm:$0xff] }
0x14f4   :  { %6492 = vrcp.f32 %v4984_v35  ;;  %v11156_v35 = vld [vmem:[#allocation41_spill] sm:$0xff] }
0x14f5   :  { %6494 = vrcp.f32 %v4985_v48  ;;  %v11162_v48 = vld [vmem:[#allocation48_spill] sm:$0xff] }
0x14ff   :  { %v6491_v26 = vpop.eup %6490 }
0x1500   :  { %v4994_v16 = vmul.f32 %v6491_v26, %v6489_v53  ;;  %v11158_v53 = vld [vmem:[#allocation44_spill] sm:$0xff]  ;;  %v11159_v26 = vld [vmem:[#allocation46_spill] sm:$0xff] }
0x1501   :  { %v6493_v6 = vpop.eup %6492 }
0x1502   :  { %v4993_v33 = vmul.f32 %v6493_v6, %v9771_v32  ;;  %v6495_v49 = vpop.eup %6494  ;;  %v11148_v32 = vld [vmem:[#allocation53_spill] sm:$0xff]  ;;  %v11161_v6 = vld [vmem:[#allocation47_spill] sm:$0xff] }
0x1504   :  { %v9938_v34 = vadd.f32 %v4994_v16, %v4993_v33  ;;  %v11160_v16 = vld [vmem:[#allocation45_spill] sm:$0xff] }
0x1505   :  { %v11163_v33 = vld [vmem:[#allocation77_spill] sm:$0xff] }
0x1506   :  { %6496 = vtanh.f32 %v9938_v34 }
0x1513   :  { %v6497_v50 = vpop.eup %6496 }
0x1514   :  { %v4997_v63 = vmul.f32 %v6497_v50, %v6495_v49  ;;  %v11164_v49 = vld [vmem:[#allocation36_spill] sm:$0xff]  ;;  %v11165_v50 = vld [vmem:[#allocation38_spill] sm:$0xff] }
0x1516   :  { %5068 = vmatmul.mubr.f32.vlgmr.msra.gmra.mxu0 %v4997_v63  ;;  %5525 = vst.msk [vmem:[#allocation18 + $0x20] sm:$0xff] %vm5520_vm1, %v4997_v63  ;;  %5139 = vmatmul.mubr.f32.vlgmr.msra.gmra.mxu1 %v4997_v63  ;;  %v11166_v63 = vld [vmem:[#allocation75_spill] sm:$0xff] }
0x1517   :  { %5175 = vmatpush1.msra.mxu0 %v9656_v22  ;;  %5246 = vmatpush1.msra.mxu1 %v9659_v56 }
0x1518   :  { %5176 = vmatprep.subr.mxu0 %v9662_v38  ;;  %5247 = vmatprep.subr.mxu1 %v9665_v55 }
0x1519   :  { %5177 = vmatpush1.msra.mxu0 %v9668_v42  ;;  %5248 = vmatpush1.msra.mxu1 %v9671_v61 }
0x151a   :  { %5178 = vmatprep.subr.mxu0 %v9674_v24  ;;  %5249 = vmatprep.subr.mxu1 %v9677_v30 }
0x151b   :  { %5179 = vmatpush1.msra.mxu0 %v9680_v60  ;;  %5250 = vmatpush1.msra.mxu1 %v9683_v23 }
0x151c   :  { %5180 = vmatprep.subr.mxu0 %v9686_v8  ;;  %5251 = vmatprep.subr.mxu1 %v9689_v25 }
0x151d   :  { %5181 = vmatpush1.msra.mxu0 %v9692_v58  ;;  %5252 = vmatpush1.msra.mxu1 %v9695_v21 }
0x151e   :  { %5182 = vmatprep.subr.mxu0 %v9698_v59  ;;  %5253 = vmatprep.subr.mxu1 %v9701_v52 }
0x151f   :  { %5183 = vmatpush1.msra.mxu0 %v9704_v14  ;;  %5254 = vmatpush1.msra.mxu1 %v9707_v27 }
0x1520   :  { %5184 = vmatprep.subr.mxu0 %v9793_v57  ;;  %5255 = vmatprep.subr.mxu1 %v9796_v41 }
0x1521   :  { %5185 = vmatpush1.msra.mxu0 %v9799_v37  ;;  %5256 = vmatpush1.msra.mxu1 %v9802_v39 }
0x1522   :  { %5186 = vmatprep.subr.mxu0 %v9805_v47  ;;  %5257 = vmatprep.subr.mxu1 %v9808_v51 }
0x1523   :  { %5187 = vmatpush1.msra.mxu0 %v9811_v1  ;;  %5258 = vmatpush1.msra.mxu1 %v9814_v3 }
0x1524   :  { %5188 = vmatprep.subr.mxu0 %v9817_v40  ;;  %5259 = vmatprep.subr.mxu1 %v9820_v28 }
0x1525   :  { %5189 = vmatpush1.msra.mxu0 %v9823_v2  ;;  %5260 = vmatpush1.msra.mxu1 %v9826_v29 }
0x1526   :  { %5190 = vmatprep.subr.mxu0 %v9829_v45  ;;  %5261 = vmatprep.subr.mxu1 %v9832_v15 }
0x1527   :  { %5191 = vmatpush1.msra.mxu0 %v9835_v43  ;;  %5262 = vmatpush1.msra.mxu1 %v9838_v44 }
0x1528   :  { %5192 = vmatprep.subr.mxu0 %v9841_v11  ;;  %5263 = vmatprep.subr.mxu1 %v9844_v17 }
0x1529   :  { %5193 = vmatpush1.msra.mxu0 %v9847_v54  ;;  %5264 = vmatpush1.msra.mxu1 %v9850_v20 }
0x152a   :  { %5194 = vmatprep.subr.mxu0 %v9853_v12  ;;  %5265 = vmatprep.subr.mxu1 %v9856_v19 }
0x152b   :  { %5195 = vmatpush1.msra.mxu0 %v9859_v10  ;;  %5266 = vmatpush1.msra.mxu1 %v11148_v32 }
0x152c   :  { %5196 = vmatprep.subr.mxu0 %v11149_v5  ;;  %5267 = vmatprep.subr.mxu1 %v11150_v62  ;;  %v11176_v62 = vld [vmem:[#allocation85_spill] sm:$0xff] }
0x152d   :  { %5197 = vmatpush1.msra.mxu0 %v11151_v13  ;;  %5268 = vmatpush1.msra.mxu1 %v11152_v36 }
0x152e   :  { %5198 = vmatprep.subr.mxu0 %v11153_v31  ;;  %5269 = vmatprep.subr.mxu1 %v11154_v0 }
0x152f   :  { %5199 = vmatpush1.msra.mxu0 %v11155_v7  ;;  %5270 = vmatpush1.msra.mxu1 %v11156_v35  ;;  %v11167_v35 = vld [vmem:[#allocation76_spill] sm:$0xff] }
0x1530   :  { %5200 = vmatprep.subr.mxu0 %v11157_v4  ;;  %5271 = vmatprep.subr.mxu1 %v11158_v53  ;;  %v11168_v4 = vmov 0.0   ;;  %v11169_v53 = vld [vmem:[#allocation78_spill] sm:$0xff] }
0x1531   :  { %5201 = vmatpush1.msra.mxu0 %v11159_v26  ;;  %5272 = vmatpush1.msra.mxu1 %v11160_v16  ;;  %v11170_v16 = vld [vmem:[#allocation56_spill] sm:$0xff] }
0x1532   :  { %5202 = vmatprep.subr.mxu0 %v11161_v6  ;;  %5273 = vmatprep.subr.mxu1 %v11162_v48  ;;  %v11171_v6 = vld [vmem:[#allocation51_spill] sm:$0xff] }
0x1533   :  { %5203 = vmatpush1.msra.mxu0 %v11163_v33  ;;  %5274 = vmatpush1.msra.mxu1 %v11164_v49  ;;  %v11172_v48 = vld [vmem:[#allocation35_spill] sm:$0xff]  ;;  %v11173_v33 = vld [vmem:[#allocation57_spill] sm:$0xff] }
0x1534   :  { %5204 = vmatprep.subr.mxu0 %v11165_v50  ;;  %5275 = vmatprep.subr.mxu1 %v11166_v63  ;;  %v3983_v26 = vadd.f32 %v11173_v33, %v11172_v48  ;;  %v11174_v50 = vld [vmem:[#allocation29_spill] sm:$0xff]  ;;  %v4098_v33 = vadd.f32 %v11176_v62, %v9491_v46 }
0x1535   :  { %5205 = vmatpush1.msra.mxu0 %v11167_v35  ;;  %5238 = vmatprep.mubr.f32.mxu0 %v11168_v4  ;;  %v3985_v7 = vadd.f32 %v11174_v50, %v9474_v9 }
0x1536   :  { %5276 = vmatpush1.msra.mxu1 %v11169_v53  ;;  %5309 = vmatprep.mubr.f32.mxu1 %v11168_v4  ;;  %v11175_v4 = vld [vmem:[#allocation49_spill] sm:$0xff] }
0x1537   :  { %5345 = vmatprep.subr.mxu0 %v11170_v16  ;;  %5416 = vmatprep.subr.mxu1 %v11171_v6  ;;  %v4096_v16 = vadd.f32 %v11175_v4, %v9487_v18 }
0x15d6   :  { %v5069_v49 = vpop.f32.mrf.mxu0  ;;  %v5140_v53 = vpop.f32.mrf.mxu1 }
0x15d7   :  { %v5070_v63 = vadd.f32 %v5069_v49, %v3983_v26  ;;  %v5141_v13 = vadd.f32 %v5140_v53, %v4096_v16 }
0x15d8   :  { %v5071_v0 = vpop.f32.mrf.mxu0  ;;  %v5142_v6 = vpop.f32.mrf.mxu1 }
0x15d9   :  { %v5971_v35 = vmul.f32 -1.442695, %v5070_v63  ;;  %v5072_v31 = vadd.f32 %v5071_v0, %v3985_v7  ;;  %v5973_v48 = vmul.f32 -1.442695, %v5141_v13  ;;  %v5143_v5 = vadd.f32 %v5142_v6, %v4098_v33 }
0x15db   :  { %6498 = vpow2.f32 %v5971_v35  ;;  %v5972_v36 = vmul.f32 -1.442695, %v5072_v31 }
0x15dd   :  { %6500 = vpow2.f32 %v5972_v36 }
0x15de   :  { %6502 = vpow2.f32 %v5973_v48 }
0x15df   :  { %6504 = vtanh.f32 %v5143_v5 }
0x15e8   :  { %v6499_v32 = vpop.eup %6498 }
0x15e9   :  { %v5154_v50 = vadd.f32 1.0, %v6499_v32 }
0x15ea   :  { %v6501_v26 = vpop.eup %6500 }
0x15eb   :  { %6506 = vrcp.f32 %v5154_v50  ;;  %v5155_v0 = vadd.f32 1.0, %v6501_v26  ;;  %v6503_v36 = vpop.eup %6502 }
0x15ec   :  { %v6505_v31 = vpop.eup %6504  ;;  %v5156_v53 = vadd.f32 1.0, %v6503_v36 }
0x15ed   :  { %6508 = vrcp.f32 %v5155_v0 }
0x15ee   :  { %6510 = vrcp.f32 %v5156_v53 }
0x15f8   :  { %v6507_v7 = vpop.eup %6506 }
0x15f9   :  { %v5165_v35 = vmul.f32 %v6507_v7, %v6505_v31 }
0x15fa   :  { %v6509_v4 = vpop.eup %6508 }
0x15fb   :  { %v5164_v49 = vmul.f32 %v6509_v4, %v9938_v34  ;;  %v6511_v32 = vpop.eup %6510 }
0x15fd   :  { %v10017_v63 = vadd.f32 %v5165_v35, %v5164_v49 }
0x15ff   :  { %6512 = vtanh.f32 %v10017_v63 }
0x160c   :  { %v6513_v62 = vpop.eup %6512 }
0x160d   :  { %v5168_v13 = vmul.f32 %v6513_v62, %v6511_v32  ;;  %v5544_v32 = vld [vmem:[#allocation13 + $0x78] sm:$0xff]  ;;  %v5543_v62 = vld [vmem:[#allocation13 + $0x70] sm:$0xff] }
0x160f   :  { %5239 = vmatmul.mubr.f32.vlgmr.msra.gmra.mxu0 %v5168_v13  ;;  %5526 = vst.msk [vmem:[#allocation18 + $0x28] sm:$0xff] %vm5520_vm1, %v5168_v13  ;;  %5310 = vmatmul.mubr.f32.vlgmr.msra.gmra.mxu1 %v5168_v13  ;;  %v5541_v13 = vld [vmem:[#allocation13 + $0x60] sm:$0xff] }
0x1610   :  { %5346 = vmatpush1.msra.mxu0 %v9656_v22  ;;  %5417 = vmatpush1.msra.mxu1 %v9659_v56  ;;  %v11177_v22 = vld [vmem:[#allocation53_spill] sm:$0xff]  ;;  %v11178_v56 = vld [vmem:[#allocation52_spill] sm:$0xff] }
0x1611   :  { %5347 = vmatprep.subr.mxu0 %v9662_v38  ;;  %5418 = vmatprep.subr.mxu1 %v9665_v55  ;;  %v11179_v38 = vld [vmem:[#allocation54_spill] sm:$0xff] }
0x1612   :  { %5348 = vmatpush1.msra.mxu0 %v9668_v42  ;;  %5419 = vmatpush1.msra.mxu1 %v9671_v61  ;;  %v11180_v55 = vld [vmem:[#allocation30_spill] sm:$0xff]  ;;  %v11181_v42 = vld [vmem:[#allocation55_spill] sm:$0xff] }
0x1613   :  { %5349 = vmatprep.subr.mxu0 %v9674_v24  ;;  %5420 = vmatprep.subr.mxu1 %v9677_v30  ;;  %v11182_v61 = vld [vmem:[#allocation67_spill] sm:$0xff]  ;;  %v11184_v30 = vld [vmem:[#allocation58_spill] sm:$0xff] }
0x1614   :  { %5350 = vmatpush1.msra.mxu0 %v9680_v60  ;;  %5421 = vmatpush1.msra.mxu1 %v9683_v23  ;;  %v11183_v24 = vld [vmem:[#allocation59_spill] sm:$0xff]  ;;  %v11185_v60 = vld [vmem:[#allocation41_spill] sm:$0xff] }
0x1615   :  { %5351 = vmatprep.subr.mxu0 %v9686_v8  ;;  %5422 = vmatprep.subr.mxu1 %v9689_v25  ;;  %v11186_v23 = vld [vmem:[#allocation43_spill] sm:$0xff]  ;;  %v11187_v8 = vld [vmem:[#allocation44_spill] sm:$0xff]  ;;  %v11188_v25 = vld [vmem:[#allocation46_spill] sm:$0xff] }
0x1616   :  { %5352 = vmatpush1.msra.mxu0 %v9692_v58  ;;  %5423 = vmatpush1.msra.mxu1 %v9695_v21  ;;  %v11189_v58 = vld [vmem:[#allocation45_spill] sm:$0xff]  ;;  %v11190_v21 = vld [vmem:[#allocation47_spill] sm:$0xff] }
0x1617   :  { %5353 = vmatprep.subr.mxu0 %v9698_v59  ;;  %5424 = vmatprep.subr.mxu1 %v9701_v52  ;;  %v11191_v59 = vld [vmem:[#allocation48_spill] sm:$0xff]  ;;  %v11192_v52 = vld [vmem:[#allocation77_spill] sm:$0xff] }
0x1618   :  { %5354 = vmatpush1.msra.mxu0 %v9704_v14  ;;  %5425 = vmatpush1.msra.mxu1 %v9707_v27  ;;  %v11193_v14 = vld [vmem:[#allocation36_spill] sm:$0xff]  ;;  %v11194_v27 = vld [vmem:[#allocation38_spill] sm:$0xff] }
0x1619   :  { %5355 = vmatprep.subr.mxu0 %v9793_v57  ;;  %5426 = vmatprep.subr.mxu1 %v9796_v41  ;;  %v11195_v57 = vld [vmem:[#allocation75_spill] sm:$0xff]  ;;  %v11196_v41 = vld [vmem:[#allocation76_spill] sm:$0xff] }
0x161a   :  { %5356 = vmatpush1.msra.mxu0 %v9799_v37  ;;  %5427 = vmatpush1.msra.mxu1 %v9802_v39  ;;  %v11197_v37 = vmov 0.0   ;;  %v11198_v39 = vld [vmem:[#allocation78_spill] sm:$0xff] }
0x161b   :  { %5357 = vmatprep.subr.mxu0 %v9805_v47  ;;  %5428 = vmatprep.subr.mxu1 %v9808_v51  ;;  %v11199_v47 = vld [vmem:[#allocation35_spill] sm:$0xff]  ;;  %v11200_v51 = vld [vmem:[#allocation80_spill] sm:$0xff] }
0x161c   :  { %5358 = vmatpush1.msra.mxu0 %v9811_v1  ;;  %5429 = vmatpush1.msra.mxu1 %v9814_v3  ;;  %v3989_v1 = vadd.f32 %v11200_v51, %v11199_v47  ;;  %v5645_v51 = vld [vmem:[#allocation15 + $0x30] sm:$0xff] }
0x161d   :  { %5359 = vmatprep.subr.mxu0 %v9817_v40  ;;  %5430 = vmatprep.subr.mxu1 %v9820_v28  ;;  %v11201_v40 = vld [vmem:[#allocation34_spill] sm:$0xff] }
0x161e   :  { %5360 = vmatpush1.msra.mxu0 %v9823_v2  ;;  %5431 = vmatpush1.msra.mxu1 %v9826_v29  ;;  %v3991_v28 = vadd.f32 %v11201_v40, %v9474_v9 }
0x161f   :  { %5361 = vmatprep.subr.mxu0 %v9829_v45  ;;  %5432 = vmatprep.subr.mxu1 %v9832_v15 }
0x1620   :  { %5362 = vmatpush1.msra.mxu0 %v9835_v43  ;;  %5433 = vmatpush1.msra.mxu1 %v9838_v44 }
0x1621   :  { %5363 = vmatprep.subr.mxu0 %v9841_v11  ;;  %5434 = vmatprep.subr.mxu1 %v9844_v17  ;;  %v11202_v11 = vld [vmem:[#allocation61_spill] sm:$0xff] }
0x1622   :  { %5364 = vmatpush1.msra.mxu0 %v9847_v54  ;;  %5435 = vmatpush1.msra.mxu1 %v9850_v20  ;;  %v4102_v17 = vadd.f32 %v11202_v11, %v9487_v18 }
0x1623   :  { %5365 = vmatprep.subr.mxu0 %v9853_v12  ;;  %5436 = vmatprep.subr.mxu1 %v9856_v19  ;;  %v11203_v12 = vld [vmem:[#allocation81_spill] sm:$0xff] }
0x1624   :  { %5366 = vmatpush1.msra.mxu0 %v9859_v10  ;;  %5437 = vmatpush1.msra.mxu1 %v11177_v22  ;;  %v4104_v19 = vadd.f32 %v11203_v12, %v9491_v46  ;;  %v5540_v22 = vld [vmem:[#allocation13 + $0x58] sm:$0xff] }
0x1625   :  { %5367 = vmatprep.subr.mxu0 %v11178_v56  ;;  %5438 = vmatprep.subr.mxu1 %v11179_v38  ;;  %v5539_v56 = vld [vmem:[#allocation13 + $0x50] sm:$0xff]  ;;  %v5538_v38 = vld [vmem:[#allocation13 + $0x48] sm:$0xff] }
0x1626   :  { %5368 = vmatpush1.msra.mxu0 %v11180_v55  ;;  %5439 = vmatpush1.msra.mxu1 %v11181_v42  ;;  %v5537_v55 = vld [vmem:[#allocation13 + $0x40] sm:$0xff]  ;;  %v5536_v42 = vld [vmem:[#allocation13 + $0x38] sm:$0xff] }
0x1627   :  { %5369 = vmatprep.subr.mxu0 %v11182_v61  ;;  %5440 = vmatprep.subr.mxu1 %v11183_v24  ;;  %v5535_v61 = vld [vmem:[#allocation13 + $0x30] sm:$0xff]  ;;  %v5534_v24 = vld [vmem:[#allocation13 + $0x28] sm:$0xff] }
0x1628   :  { %5370 = vmatpush1.msra.mxu0 %v11184_v30  ;;  %5441 = vmatpush1.msra.mxu1 %v11185_v60  ;;  %v5533_v30 = vld [vmem:[#allocation13 + $0x20] sm:$0xff]  ;;  %v5532_v60 = vld [vmem:[#allocation13 + $0x18] sm:$0xff] }
0x1629   :  { %5371 = vmatprep.subr.mxu0 %v11186_v23  ;;  %5442 = vmatprep.subr.mxu1 %v11187_v8  ;;  %v5531_v23 = vld [vmem:[#allocation13 + $0x10] sm:$0xff]  ;;  %v5530_v8 = vld [vmem:[#allocation13 + $0x8] sm:$0xff] }
0x162a   :  { %5372 = vmatpush1.msra.mxu0 %v11188_v25  ;;  %5443 = vmatpush1.msra.mxu1 %v11189_v58  ;;  %v5529_v25 = vld [vmem:[#allocation13] sm:$0xff]  ;;  %v5654_v58 = vld [vmem:[#allocation15 + $0x78] sm:$0xff] }
0x162b   :  { %5373 = vmatprep.subr.mxu0 %v11190_v21  ;;  %5444 = vmatprep.subr.mxu1 %v11191_v59  ;;  %v5653_v21 = vld [vmem:[#allocation15 + $0x70] sm:$0xff]  ;;  %v5652_v59 = vld [vmem:[#allocation15 + $0x68] sm:$0xff] }
0x162c   :  { %5374 = vmatpush1.msra.mxu0 %v11192_v52  ;;  %5445 = vmatpush1.msra.mxu1 %v11193_v14  ;;  %v5651_v52 = vld [vmem:[#allocation15 + $0x60] sm:$0xff]  ;;  %v5650_v14 = vld [vmem:[#allocation15 + $0x58] sm:$0xff] }
0x162d   :  { %5375 = vmatprep.subr.mxu0 %v11194_v27  ;;  %5446 = vmatprep.subr.mxu1 %v11195_v57  ;;  %v5649_v27 = vld [vmem:[#allocation15 + $0x50] sm:$0xff]  ;;  %v5648_v57 = vld [vmem:[#allocation15 + $0x48] sm:$0xff] }
0x162e   :  { %5376 = vmatpush1.msra.mxu0 %v11196_v41  ;;  %5409 = vmatprep.mubr.f32.mxu0 %v11197_v37  ;;  %v5647_v41 = vld [vmem:[#allocation15 + $0x40] sm:$0xff] }
0x162f   :  { %5447 = vmatpush1.msra.mxu1 %v11198_v39  ;;  %5480 = vmatprep.mubr.f32.mxu1 %v11197_v37  ;;  %v5646_v39 = vld [vmem:[#allocation15 + $0x38] sm:$0xff] }
0x1630   :  { %6038 = vmatprep.subr.mxu0 %v11197_v37  ;;  %6073 = vmatprep.subr.mxu1 %v11197_v37 }
0x16cf   :  { %v5240_v3 = vpop.f32.mrf.mxu0  ;;  %v5311_v44 = vpop.f32.mrf.mxu1 }
0x16d0   :  { %v5241_v2 = vadd.f32 %v5240_v3, %v3989_v1  ;;  %v5312_v54 = vadd.f32 %v5311_v44, %v4102_v17  ;;  %v5644_v1 = vld [vmem:[#allocation15 + $0x28] sm:$0xff]  ;;  %v11204_v3 = vld [vmem:[#allocation73_spill] sm:$0xff] }
0x16d1   :  { %v5242_v29 = vpop.f32.mrf.mxu0  ;;  %v5313_v20 = vpop.f32.mrf.mxu1  ;;  %v3995_v40 = vadd.f32 %v11204_v3, %v11199_v47  ;;  %v5750_v3 = vld [vmem:[#allocation16] sm:$0xff] }
0x16d2   :  { %v5974_v45 = vmul.f32 -1.442695, %v5241_v2  ;;  %v5243_v15 = vadd.f32 %v5242_v29, %v3991_v28  ;;  %v5976_v10 = vmul.f32 -1.442695, %v5312_v54  ;;  %v5314_v5 = vadd.f32 %v5313_v20, %v4104_v19  ;;  %v11205_v2 = vld [vmem:[#allocation79_spill] sm:$0xff]  ;;  %v11206_v54 = vld [vmem:[#allocation82_spill] sm:$0xff] }
0x16d3   :  { %v3997_v29 = vadd.f32 %v11205_v2, %v9474_v9  ;;  %v4108_v20 = vadd.f32 %v11206_v54, %v9487_v18  ;;  %v5984_v2 = vld [vmem:[%s10206_s11] ss:$0 sm:$0xff] }
0x16d4   :  { %6514 = vpow2.f32 %v5974_v45  ;;  %v5975_v43 = vmul.f32 -1.442695, %v5243_v15 }
0x16d6   :  { %6516 = vpow2.f32 %v5975_v43 }
0x16d7   :  { %6518 = vpow2.f32 %v5976_v10  ;;  %v11207_v10 = vld [vmem:[#allocation84_spill] sm:$0xff] }
0x16d8   :  { %v4110_v47 = vadd.f32 %v11207_v10, %v9491_v46 }
0x16e1   :  { %v6515_v34 = vpop.eup %6514 }
0x16e2   :  { %v5325_v48 = vadd.f32 1.0, %v6515_v34 }
0x16e3   :  { %v6517_v16 = vpop.eup %6516 }
0x16e4   :  { %6520 = vrcp.f32 %v5325_v48  ;;  %v5326_v6 = vadd.f32 1.0, %v6517_v16  ;;  %v6519_v33 = vpop.eup %6518 }
0x16e5   :  { %6522 = vtanh.f32 %v5314_v5  ;;  %v5327_v36 = vadd.f32 1.0, %v6519_v33 }
0x16e6   :  { %6524 = vrcp.f32 %v5326_v6 }
0x16e7   :  { %6526 = vrcp.f32 %v5327_v36 }
0x16f1   :  { %v6521_v50 = vpop.eup %6520 }
0x16f2   :  { %v6523_v26 = vpop.eup %6522 }
0x16f3   :  { %v6525_v0 = vpop.eup %6524  ;;  %v5336_v7 = vmul.f32 %v6523_v26, %v6521_v50 }
0x16f4   :  { %v5335_v31 = vmul.f32 %v6525_v0, %v10017_v63  ;;  %v6527_v4 = vpop.eup %6526  ;;  %v5542_v63 = vld [vmem:[#allocation13 + $0x68] sm:$0xff] }
0x16f6   :  { %v10096_v35 = vadd.f32 %v5336_v7, %v5335_v31 }
0x16f8   :  { %6528 = vtanh.f32 %v10096_v35 }
0x1705   :  { %v6529_v53 = vpop.eup %6528 }
0x1706   :  { %v5339_v49 = vmul.f32 %v6529_v53, %v6527_v4 }
0x1708   :  { %5410 = vmatmul.mubr.f32.vlgmr.msra.gmra.mxu0 %v5339_v49  ;;  %5527 = vst.msk [vmem:[#allocation18 + $0x30] sm:$0xff] %vm5520_vm1, %v5339_v49  ;;  %5481 = vmatmul.mubr.f32.vlgmr.msra.gmra.mxu1 %v5339_v49  ;;  %v5643_v49 = vld [vmem:[#allocation15 + $0x20] sm:$0xff] }
0x1709   :  { %6039 = vmatpush3.msra.mxu0 %v5544_v32  ;;  %6070 = vmatprep.mubr.msk.f32.mxu0 %vm6987_vm2, %v11197_v37  ;;  %v5642_v32 = vld [vmem:[#allocation15 + $0x18] sm:$0xff] }
0x170a   :  { %6040 = vmatprep.subr.mxu0 %v11197_v37  ;;  %6105 = vmatprep.mubr.msk.f32.mxu1 %vm6987_vm2, %v11197_v37 }
0x170b   :  { %6041 = vmatpush3.msra.mxu0 %v5543_v62  ;;  %6074 = vmatpush3.msra.mxu1 %v5654_v58  ;;  %v5640_v62 = vld [vmem:[#allocation15 + $0x8] sm:$0xff]  ;;  %v5981_v58 = vld [vmem:[%s10202_s7] ss:$0 sm:$0xff] }
0x170c   :  { %6042 = vmatprep.subr.mxu0 %v11197_v37  ;;  %6075 = vmatprep.subr.mxu1 %v11197_v37 }
0x170d   :  { %6043 = vmatpush3.msra.mxu0 %v5542_v63  ;;  %6076 = vmatpush3.msra.mxu1 %v5653_v21  ;;  %v5639_v63 = vld [vmem:[#allocation15] sm:$0xff] }
0x170e   :  { %6044 = vmatprep.subr.mxu0 %v11197_v37  ;;  %6077 = vmatprep.subr.mxu1 %v11197_v37 }
0x170f   :  { %6045 = vmatpush3.msra.mxu0 %v5541_v13  ;;  %6078 = vmatpush3.msra.mxu1 %v5652_v59  ;;  %v5765_v13 = vld [vmem:[#allocation16 + $0x78] sm:$0xff]  ;;  %v5982_v59 = vld [vmem:[%s10203_s8] ss:$0 sm:$0xff] }
0x1710   :  { %6046 = vmatprep.subr.mxu0 %v11197_v37  ;;  %6079 = vmatprep.subr.mxu1 %v11197_v37 }
0x1711   :  { %6047 = vmatpush3.msra.mxu0 %v5540_v22  ;;  %6080 = vmatpush3.msra.mxu1 %v5651_v52  ;;  %v5764_v22 = vld [vmem:[#allocation16 + $0x70] sm:$0xff] }
0x1712   :  { %6048 = vmatprep.subr.mxu0 %v11197_v37  ;;  %6081 = vmatprep.subr.mxu1 %v11197_v37 }
0x1713   :  { %6049 = vmatpush3.msra.mxu0 %v5539_v56  ;;  %6082 = vmatpush3.msra.mxu1 %v5650_v14  ;;  %v5763_v56 = vld [vmem:[#allocation16 + $0x68] sm:$0xff] }
0x1714   :  { %6050 = vmatprep.subr.mxu0 %v11197_v37  ;;  %6083 = vmatprep.subr.mxu1 %v11197_v37 }
0x1715   :  { %6051 = vmatpush3.msra.mxu0 %v5538_v38  ;;  %6084 = vmatpush3.msra.mxu1 %v5649_v27  ;;  %v5762_v38 = vld [vmem:[#allocation16 + $0x60] sm:$0xff] }
0x1716   :  { %6052 = vmatprep.subr.mxu0 %v11197_v37  ;;  %6085 = vmatprep.subr.mxu1 %v11197_v37 }
0x1717   :  { %6053 = vmatpush3.msra.mxu0 %v5537_v55  ;;  %6086 = vmatpush3.msra.mxu1 %v5648_v57  ;;  %v5761_v55 = vld [vmem:[#allocation16 + $0x58] sm:$0xff] }
0x1718   :  { %6054 = vmatprep.subr.mxu0 %v11197_v37  ;;  %6087 = vmatprep.subr.mxu1 %v11197_v37 }
0x1719   :  { %6055 = vmatpush3.msra.mxu0 %v5536_v42  ;;  %6088 = vmatpush3.msra.mxu1 %v5647_v41  ;;  %v5760_v42 = vld [vmem:[#allocation16 + $0x50] sm:$0xff]  ;;  %v5754_v41 = vld [vmem:[#allocation16 + $0x20] sm:$0xff] }
0x171a   :  { %6056 = vmatprep.subr.mxu0 %v11197_v37  ;;  %6089 = vmatprep.subr.mxu1 %v11197_v37 }
0x171b   :  { %6057 = vmatpush3.msra.mxu0 %v5535_v61  ;;  %6090 = vmatpush3.msra.mxu1 %v5646_v39  ;;  %v5759_v61 = vld [vmem:[#allocation16 + $0x48] sm:$0xff]  ;;  %v5753_v39 = vld [vmem:[#allocation16 + $0x18] sm:$0xff] }
0x171c   :  { %6058 = vmatprep.subr.mxu0 %v11197_v37  ;;  %6091 = vmatprep.subr.mxu1 %v11197_v37 }
0x171d   :  { %6059 = vmatpush3.msra.mxu0 %v5534_v24  ;;  %6092 = vmatpush3.msra.mxu1 %v5645_v51  ;;  %v5758_v24 = vld [vmem:[#allocation16 + $0x40] sm:$0xff]  ;;  %v5752_v51 = vld [vmem:[#allocation16 + $0x10] sm:$0xff] }
0x171e   :  { %6060 = vmatprep.subr.mxu0 %v11197_v37  ;;  %6093 = vmatprep.subr.mxu1 %v11197_v37 }
0x171f   :  { %6061 = vmatpush3.msra.mxu0 %v5533_v30  ;;  %6094 = vmatpush3.msra.mxu1 %v5644_v1  ;;  %v5757_v30 = vld [vmem:[#allocation16 + $0x38] sm:$0xff]  ;;  %v5751_v1 = vld [vmem:[#allocation16 + $0x8] sm:$0xff] }
0x1720   :  { %6062 = vmatprep.subr.mxu0 %v11197_v37  ;;  %6095 = vmatprep.subr.mxu1 %v11197_v37 }
0x1721   :  { %6063 = vmatpush3.msra.mxu0 %v5532_v60  ;;  %6096 = vmatpush3.msra.mxu1 %v5643_v49  ;;  %v5756_v60 = vld [vmem:[#allocation16 + $0x30] sm:$0xff] }
0x1722   :  { %6064 = vmatprep.subr.mxu0 %v11197_v37  ;;  %6097 = vmatprep.subr.mxu1 %v11197_v37 }
0x1723   :  { %6065 = vmatpush3.msra.mxu0 %v5531_v23  ;;  %6098 = vmatpush3.msra.mxu1 %v5642_v32  ;;  %v5755_v23 = vld [vmem:[#allocation16 + $0x28] sm:$0xff] }
0x1724   :  { %6066 = vmatprep.subr.mxu0 %v11197_v37  ;;  %6099 = vmatprep.subr.mxu1 %v11197_v37 }
0x1725   :  { %6067 = vmatpush3.msra.mxu0 %v5530_v8  ;;  %v5980_v8 = vld [vmem:[%s10201_s6] ss:$0 sm:$0xff] }
0x1726   :  { %6068 = vmatprep.subr.mxu0 %v11197_v37 }
0x1727   :  { %6069 = vmatpush3.msra.mxu0 %v5529_v25 }
0x1728   :  { %6108 = vmatprep.subr.mxu0 %v11197_v37 }
0x17c8   :  { %v5411_v28 = vpop.f32.mrf.mxu0  ;;  %v5482_v17 = vpop.f32.mrf.mxu1 }
0x17c9   :  { %v5412_v45 = vadd.f32 %v5411_v28, %v3995_v40  ;;  %v5483_v12 = vadd.f32 %v5482_v17, %v4108_v20  ;;  %v5983_v40 = vld [vmem:[%s10205_s10] ss:$0 sm:$0xff]  ;;  %s5849_s10 = sshll.u32 %s6989_s24, 4  ;;  %s5850_s10 = int_to_ptr.vmem [resolvable:$true] %s5849_s10 }
0x17ca   :  { %v5413_v15 = vpop.f32.mrf.mxu0  ;;  %v5484_v19 = vpop.f32.mrf.mxu1 }
0x17cb   :  { %v5977_v43 = vmul.f32 -1.442695, %v5412_v45  ;;  %v5414_v44 = vadd.f32 %v5413_v15, %v3997_v29  ;;  %v5979_v34 = vmul.f32 -1.442695, %v5483_v12  ;;  %v5485_v5 = vadd.f32 %v5484_v19, %v4110_v47  ;;  %v5985_v45 = vld [vmem:[%s10207_s12] ss:$0 sm:$0xff] }
0x17cd   :  { %6530 = vpow2.f32 %v5977_v43  ;;  %v5978_v11 = vmul.f32 -1.442695, %v5414_v44 }
0x17cf   :  { %6532 = vpow2.f32 %v5978_v11 }
0x17d0   :  { %6534 = vpow2.f32 %v5979_v34 }
0x17d1   :  { %6536 = vtanh.f32 %v5485_v5 }
0x17da   :  { %v6531_v48 = vpop.eup %6530 }
0x17db   :  { %v5496_v9 = vadd.f32 1.0, %v6531_v48 }
0x17dc   :  { %v6533_v16 = vpop.eup %6532 }
0x17dd   :  { %6538 = vrcp.f32 %v5496_v9  ;;  %v5497_v6 = vadd.f32 1.0, %v6533_v16  ;;  %v6535_v33 = vpop.eup %6534 }
0x17de   :  { %v6537_v50 = vpop.eup %6536  ;;  %v5498_v36 = vadd.f32 1.0, %v6535_v33 }
0x17df   :  { %6540 = vrcp.f32 %v5497_v6 }
0x17e0   :  { %6542 = vrcp.f32 %v5498_v36 }
0x17ea   :  { %v6539_v26 = vpop.eup %6538 }
0x17eb   :  { %v5507_v0 = vmul.f32 %v6539_v26, %v6537_v50 }
0x17ec   :  { %v6541_v18 = vpop.eup %6540 }
0x17ed   :  { %v5506_v31 = vmul.f32 %v6541_v18, %v10096_v35  ;;  %v6543_v46 = vpop.eup %6542  ;;  %v5641_v35 = vld [vmem:[#allocation15 + $0x10] sm:$0xff] }
0x17ee   :  { %6100 = vmatpush3.msra.mxu1 %v5641_v35 }
0x17ef   :  { %v5508_v7 = vadd.f32 %v5507_v0, %v5506_v31  ;;  %6101 = vmatprep.subr.mxu1 %v11197_v37 }
0x17f0   :  { %6102 = vmatpush3.msra.mxu1 %v5640_v62 }
0x17f1   :  { %6544 = vtanh.f32 %v5508_v7  ;;  %6103 = vmatprep.subr.mxu1 %v11197_v37 }
0x17f2   :  { %6104 = vmatpush3.msra.mxu1 %v5639_v63 }
0x17fe   :  { %v6545_v4 = vpop.eup %6544 }
0x17ff   :  { %v5510_v53 = vmul.f32 %v6545_v4, %v6543_v46 }
0x1801   :  { %5528 = vst.msk [vmem:[#allocation18 + $0x38] sm:$0xff] %vm5520_vm1, %v5510_v53  ;;  %6071 = vmatmul.mubr.f32.vlgmr.msra.gmra.mxu0 %v5510_v53 }
0x1802   :  { %6140 = vmatprep.mubr.msk.f32.mxu0 %vm6987_vm2, %v11197_v37  ;;  %6109 = vmatpush3.msra.mxu0 %v5765_v13 }
0x1803   :  { %6110 = vmatprep.subr.mxu0 %v11197_v37 }
0x1804   :  { %6111 = vmatpush3.msra.mxu0 %v5764_v22 }
0x1805   :  { %6112 = vmatprep.subr.mxu0 %v11197_v37 }
0x1806   :  { %6113 = vmatpush3.msra.mxu0 %v5763_v56 }
0x1807   :  { %6114 = vmatprep.subr.mxu0 %v11197_v37 }
0x1808   :  { %6115 = vmatpush3.msra.mxu0 %v5762_v38 }
0x1809   :  { %6116 = vmatprep.subr.mxu0 %v11197_v37 }
0x180a   :  { %6117 = vmatpush3.msra.mxu0 %v5761_v55 }
0x180b   :  { %6118 = vmatprep.subr.mxu0 %v11197_v37 }
0x180c   :  { %6119 = vmatpush3.msra.mxu0 %v5760_v42 }
0x180d   :  { %6120 = vmatprep.subr.mxu0 %v11197_v37 }
0x180e   :  { %6121 = vmatpush3.msra.mxu0 %v5759_v61 }
0x180f   :  { %6122 = vmatprep.subr.mxu0 %v11197_v37 }
0x1810   :  { %6123 = vmatpush3.msra.mxu0 %v5758_v24 }
0x1811   :  { %6124 = vmatprep.subr.mxu0 %v11197_v37 }
0x1812   :  { %6125 = vmatpush3.msra.mxu0 %v5757_v30 }
0x1813   :  { %6126 = vmatprep.subr.mxu0 %v11197_v37 }
0x1814   :  { %6127 = vmatpush3.msra.mxu0 %v5756_v60 }
0x1815   :  { %6128 = vmatprep.subr.mxu0 %v11197_v37 }
0x1816   :  { %6129 = vmatpush3.msra.mxu0 %v5755_v23 }
0x1817   :  { %6130 = vmatprep.subr.mxu0 %v11197_v37 }
0x1818   :  { %6131 = vmatpush3.msra.mxu0 %v5754_v41 }
0x1819   :  { %6132 = vmatprep.subr.mxu0 %v11197_v37 }
0x181a   :  { %6133 = vmatpush3.msra.mxu0 %v5753_v39 }
0x181b   :  { %6134 = vmatprep.subr.mxu0 %v11197_v37 }
0x181c   :  { %6135 = vmatpush3.msra.mxu0 %v5752_v51 }
0x181d   :  { %6136 = vmatprep.subr.mxu0 %v11197_v37 }
0x181e   :  { %6137 = vmatpush3.msra.mxu0 %v5751_v1 }
0x181f   :  { %6138 = vmatprep.subr.mxu0 %v11197_v37 }
0x1820   :  { %6139 = vmatpush3.msra.mxu0 %v5750_v3 }
0x18c1   :  { %v5618_v25 = vpop.f32.mrf.mxu0 }
0x18c2   :  { %v5619_v21 = vadd.f32 %v5980_v8, %v5618_v25 }
0x18c3   :  { %v6072_v52 = vpop.f32.mrf.mxu0 }
0x18c4   :  { %v5629_v14 = vmul.f32 %v5981_v58, %v5619_v21 }
0x18c6   :  { %v5637_v27 = vadd.f32 %v5982_v59, %v5629_v14 }
0x18c8   :  { %v5638_v57 = vmax.f32 %v5637_v27, 0.0 }
0x18ca   :  { %6106 = vmatmul.mubr.f32.vlgmr.msra.gmra.mxu1 %v5638_v57 }
0x198a   :  { %v5728_v28 = vpop.f32.mrf.mxu1 }
0x198b   :  { %v5729_v29 = vadd.f32 %v5983_v40, %v5728_v28 }
0x198c   :  { %v6107_v15 = vpop.f32.mrf.mxu1 }
0x198d   :  { %v5739_v43 = vmul.f32 %v5984_v2, %v5729_v29 }
0x198f   :  { %v5747_v44 = vadd.f32 %v5985_v45, %v5739_v43 }
0x1991   :  { %v5748_v11 = vmax.f32 %v5747_v44, 0.0 }
0x1993   :  { %5749 = vst [vmem:[#allocation19] sm:$0xff] %v5748_v11  ;;  %6141 = vmatmul.mubr.f32.vlgmr.msra.gmra.mxu0 %v5748_v11 }
0x1994   :  { %6909 = shalt.err (!%p6906_p2)
}
0x1995   :  { %5865 = dma.vmem_to_hbm [thread:$0]  %s5863_s21, 128, %s10211_s16, [#allocation20]  }
0x1996   :  { %s6918_s2 = scalar_lea.vmem %s5850_s10, 1024  ;;  %p6923_p4 = scmp.lt.s32.totalorder %s5850_s10, %s5850_s10 }
0x1997   :  { %p6919_p3 = scmp.ne.s32.totalorder %s5850_s10, %s6918_s2  ;;  %p6924_p5 = scmp.lt.s32.totalorder %s6918_s2, %s6918_s2 }
0x1999   :  { %p6925_p6 = por %p6924_p5, %p6923_p4 }
0x199b   :  { %p6926_p7 = pnand %p6925_p6, %p6919_p3 }
0x199d   :  { %6929 = shalt.err (!%p6926_p7)
}
0x199e   :  { %5855 = dma.vmem_to_hbm [thread:$0]  %s5850_s10, 1024, %s10210_s15, [#allocation6], %s6978_s29, %s6978_s29, %s6979_s0  }
0x199f   :  { %v5986_v37 = vld [vmem:[%s10209_s14] ss:$0 sm:$0xff]  ;;  %s6990_s26 = smov [#allocation21]  }
0x19a0   :  { %s5872_s16 = sshll.u32 %s6990_s26, 4  ;;  %s5873_s16 = int_to_ptr.vmem [resolvable:$true] %s5872_s16 }
0x19a1   :  { %s6938_s9 = scalar_lea.vmem %s5873_s16, 128  ;;  %p6943_p9 = scmp.lt.s32.totalorder %s5873_s16, %s5873_s16 }
0x19a2   :  { %p6939_p8 = scmp.ne.s32.totalorder %s5873_s16, %s6938_s9  ;;  %p6944_p10 = scmp.lt.s32.totalorder %s6938_s9, %s6938_s9 }
0x19a4   :  { %p6945_p11 = por %p6944_p10, %p6943_p9 }
0x19a6   :  { %p6946_p12 = pnand %p6945_p11, %p6939_p8 }
0x1a53   :  { %v5839_v17 = vpop.f32.mrf.mxu0 }
0x1a54   :  { %v5840_v54 = vadd.f32 %v5986_v37, %v5839_v17 }
0x1a55   :  { %v6142_v20 = vpop.f32.mrf.mxu0 }
0x1a56   :  { %5843 = vst [vmem:[#allocation21] sm:$0xff] %v5840_v54 }
0x1a57   :  { %6949 = shalt.err (!%p6946_p12)
}
0x1a58   :  { %5875 = dma.vmem_to_hbm [thread:$0]  %s5873_s16, 128, %s10212_s17, [#allocation20]  }
0x1a59   :  { %6968 = dma.done.wait [#allocation6], 1024  }
0x1a5a   :  { %6969 = vsyncadd [#allocation6], 4294966272 }
0x1a5b   :  { %6970 = dma.done.wait [#allocation20], 256  }
0x1a5c   :  { %6971 = vsyncadd [#allocation20], 4294967040 }
0x1a5d   :  { %5885 = vsyncpa [#allocation5], 1 }
0x1a5e   :  { %5886 = vsyncpa [#allocation8], 1 }
0x1a5f   :  { %5887 = vsyncpa [#allocation11], 1 }
0x1a60   :  { %5888 = vsyncpa [#allocation14], 1 }
0x1a61   :  { %5889 = vsyncpa [#allocation17], 1 }
0x1a62   :  { %5890 = vsyncpa [#allocation6], 1 }
0x1a63   :  { %5891 = vsyncpa [#allocation20], 1 }

</bundles_post_ra>
